<compile_context>
chip_gen: v7x
topology: tpu7x:2x2x1
jax: 0.10.0
libtpu: 0.0.40
codegen_flags: <defaults>
</compile_context>

<pallas_src>
import functools
import itertools

import jax
import jax.numpy as jnp
import numpy as np
from jax.experimental import pallas as pl
from jax.experimental.pallas import tpu as pltpu

EPS = 1e-5
LANES = 128


def _round_up(x, m):
    return (x + m - 1) // m * m


# ---------------------------------------------------------------------------
# In-kernel helpers
# ---------------------------------------------------------------------------
def _conv_taps(src_ref, w_ref, *, guard, m_mid, wp2, cp):
    """f32 accumulator (m_mid, cp) = sum over 3x3 taps of shifted rows @ W[tap].

    src_ref holds zero-padded images flattened row-major (pad columns kept),
    each image with `guard` zero rows on both sides, so tap (kh, kw) is the
    pure row shift d = (kh-1)*wp2 + (kw-1).  Accumulation is a local value
    (dot-add chain), so the pipelined output ref is written exactly once by
    the caller and the stats epilogue reuses this value without a reload.
    """
    acc = None
    for t, (kh, kw) in enumerate(itertools.product(range(3), range(3))):
        d = (kh - 1) * wp2 + (kw - 1)                      # flat-row shift
        xs = src_ref[pl.ds(guard + d, m_mid), :]           # static start/size
        wt = w_ref[pl.ds(t * cp, cp), :]
        contrib = jnp.dot(xs, wt, preferred_element_type=jnp.float32)
        acc = contrib if acc is None else acc + contrib
    return acc


def _write_conv_out(y_ref, acc, *, guard, m_mid, cp):
    """Single write of the conv result; outer guard rows are zeroed so that
    downstream kernels can safely mask them (garbage must stay finite)."""
    z = jnp.zeros((guard, cp), y_ref.dtype)
    y_ref[pl.ds(0, guard), :] = z
    y_ref[pl.ds(guard, m_mid), :] = acc.astype(y_ref.dtype)
    y_ref[pl.ds(guard + m_mid, guard), :] = z


def _write_stats(acc, mask_mid, stats_ref):
    """Per-channel sum / sum-of-squares over valid rows, straight from the
    local f32 accumulator (no output reload, no zero-pad concat)."""
    yv = acc * mask_mid                                    # mask zeroes pad/garbage rows
    stats_ref[0:1, :] = jnp.sum(yv, axis=0, keepdims=True)
    stats_ref[1:2, :] = jnp.sum(yv * yv, axis=0, keepdims=True)


# ---------------------------------------------------------------------------
# Kernels
# ---------------------------------------------------------------------------
def _conv_stats_kernel(x_ref, w_ref, mask_ref, y_ref, stats_ref,
                       *, guard, m_mid, wp2, cp):
    """K1: y1 = conv1(x) (9 shifted MXU matmuls) + per-group BN1 partial stats."""
    acc = _conv_taps(x_ref, w_ref, guard=guard, m_mid=m_mid, wp2=wp2, cp=cp)
    _write_stats(acc, mask_ref[pl.ds(guard, m_mid), :], stats_ref)
    _write_conv_out(y_ref, acc, guard=guard, m_mid=m_mid, cp=cp)


def _bn_relu_conv_stats_kernel(y1_ref, ss1_ref, mask_ref, w2_ref,
                               y2_ref, stats_ref, act_ref,
                               *, guard, m_mid, wp2, cp):
    """K2: a = relu(bn1(y1)) staged in VMEM (never hits HBM); y2 = conv2(a) + stats."""
    scale = ss1_ref[0:1, :]                                # (1, Cp), hoisted
    shift = ss1_ref[1:2, :]
    mask = mask_ref[...]                                   # (Mg, 1)
    a = jnp.maximum(y1_ref[...].astype(jnp.float32) * scale + shift, 0.0) * mask
    # Mask already zeroes guard + spatial-pad rows, so conv2's shifted reads of
    # the staged activation see correct zero padding.
    act_ref[...] = a.astype(jnp.bfloat16)
    acc = _conv_taps(act_ref, w2_ref, guard=guard, m_mid=m_mid, wp2=wp2, cp=cp)
    _write_stats(acc, mask[guard:guard + m_mid, :], stats_ref)
    _write_conv_out(y2_ref, acc, guard=guard, m_mid=m_mid, cp=cp)


def _bn_add_relu_kernel(y2_ref, ss2_ref, res_ref, out_ref):
    """K3: out = relu(bn2(y2) + residual); residual read straight from x_flat (bf16)."""
    scale = ss2_ref[0:1, :]
    shift = ss2_ref[1:2, :]
    out = (y2_ref[...].astype(jnp.float32) * scale + shift
           + res_ref[...].astype(jnp.float32))
    out_ref[...] = jnp.maximum(out, 0.0)


# ---------------------------------------------------------------------------
# Layout / glue (cheap, O(activation) once at block entry/exit)
# ---------------------------------------------------------------------------
def _nchw_to_padded_flat(x, cp, wp2, guard, dtype):
    """(N,C,H,W) -> (N, 2*guard + (H+2)*wp2, cp): channels-last (lane-dense,
    zero channel pad), zero spatial pad, flattened row-major including the pad
    columns, plus `guard` zero rows on each side (shift halo)."""
    n, c, h, w = x.shape
    x = jnp.transpose(x, (0, 2, 3, 1))                     # NHWC (once, at entry)
    x = jnp.pad(x, ((0, 0), (1, 1), (1, wp2 - w - 1), (0, cp - c)))
    x = x.reshape(n, (h + 2) * wp2, cp)
    x = jnp.pad(x, ((0, 0), (guard, guard), (0, 0)))
    return x.astype(dtype)


def _weights_to_flat(w, cp, cop, dtype):
    """(Co, Ci, 3, 3) -> (9*cp, cop); row block t = kh*3+kw holds W[kh,kw] as (Ci, Co)."""
    co, ci, kh, kw = w.shape
    wt = jnp.transpose(w, (2, 3, 1, 0))                    # (kh, kw, Ci, Co)
    wt = jnp.pad(wt, ((0, 0), (0, 0), (0, cp - ci), (0, cop - co)))
    return wt.reshape(kh * kw * cp, cop).astype(dtype)


def _valid_row_mask(h, w, wp2, guard, group):
    """(group * mtot, 1) f32: 1 on valid pixel rows, 0 on guard / pad rows."""
    m = jnp.zeros((h + 2, wp2), jnp.float32).at[1:h + 1, 1:w + 1].set(1.0)
    m = m.reshape((h + 2) * wp2, 1)
    m = jnp.pad(m, ((guard, guard), (0, 0)))
    return jnp.tile(m, (group, 1))


def _stats_to_scale_shift(stats, gamma, beta, count, cop):
    """Reduce per-group (sum, sumsq) partials -> per-channel BN scale/shift (8, Cp)."""
    s1 = jnp.sum(stats[:, 0, :], axis=0)
    s2 = jnp.sum(stats[:, 1, :], axis=0)
    mean = s1 / count
    var = jnp.maximum(s2 / count - mean * mean, 0.0)       # biased var (training BN)
    g = jnp.pad(gamma, (0, cop - gamma.shape[0]))
    b = jnp.pad(beta, (0, cop - beta.shape[0]))
    scale = g * jax.lax.rsqrt(var + EPS)
    shift = b - mean * scale
    return jnp.zeros((8, cop), jnp.float32).at[0].set(scale).at[1].set(shift)


def _pick_group_size(n, mtot, cp):
    """Images per grid step: largest divisor of n that keeps >=2 grid steps
    (both v7x TensorCores busy) and a modest per-step VMEM footprint."""
    budget = 20 * 1024 * 1024           # generous headroom inside 64 MiB (v7x)
    best = 1
    for g in range(1, n + 1):
        if n % g:
            continue
        if n >= 2 and n // g < 2:
            continue
        # rough per-step bytes: double-buffered bf16 in + bf16 out + bf16 act
        # scratch + f32 output of K3 (worst kernel).
        per_step = g * mtot * cp * (2 * 2 + 2 * 2 + 2 + 2 * 4)
        if per_step <= budget:
            best = g
    return best


# ---------------------------------------------------------------------------
# Forward
# ---------------------------------------------------------------------------
def residual_block_forward(x_nchw, params):
    """ResidualBlock forward, training-mode BN.  Conv inputs/weights and the
    y1/y2 intermediates are bf16 (f32 MXU accumulation, f32 BN/epilogue).
    Conv biases are dropped: a per-channel constant before training-mode BN is
    cancelled exactly by the mean subtraction."""
    w1, _b1, g1, be1, w2, _b2, g2, be2 = params
    n, c, h, w = x_nchw.shape
    cout = w1.shape[0]
    assert w1.shape[2:] == (3, 3) and w2.shape[2:] == (3, 3)
    assert cout == c and w2.shape[0] == cout, "residual add requires Cin == Cout"

    cp = _round_up(c, LANES)          # lane-dense channel tile (multiple of 128)
    wp2 = w + 2                       # padded width (pad columns kept in the layout)
    mp = (h + 2) * wp2                # flat rows per padded image
    guard = _round_up(wp2 + 1, 16)    # halo for the flat-row shifts
    assert guard >= wp2 + 1, "guard must cover the largest tap shift"
    mtot = mp + 2 * guard             # rows per image incl. guard halo
    count = float(n * h * w)

    group = _pick_group_size(n, mtot, cp)   # images stacked per grid step
    ng = n // group
    mg = group * mtot                       # rows per block
    m_mid = mg - 2 * guard                  # rows actually computed by the taps

    x_flat = _nchw_to_padded_flat(x_nchw, cp, wp2, guard, jnp.bfloat16)
    x_grp = x_flat.reshape(ng, mg, cp)      # conv1 input AND K3's bf16 residual
    w1f = _weights_to_flat(w1, cp, cp, jnp.bfloat16)
    w2f = _weights_to_flat(w2, cp, cp, jnp.bfloat16)
    mask = _valid_row_mask(h, w, wp2, guard, group)

    cparams = pltpu.CompilerParams(
        dimension_semantics=("parallel",),               # v7x: 2 TCs split groups
        vmem_limit_bytes=48 * 1024 * 1024,               # <= v7x-safe bound
    )

    img_spec = pl.BlockSpec((None, mg, cp), lambda i: (i, 0, 0))
    st_spec = pl.BlockSpec((None, 2, cp), lambda i: (i, 0, 0))
    w_spec = pl.BlockSpec((9 * cp, cp), lambda i: (0, 0))      # loop-invariant
    mask_spec = pl.BlockSpec((mg, 1), lambda i: (0, 0))        # loop-invariant
    ss_spec = pl.BlockSpec((8, cp), lambda i: (0, 0))          # loop-invariant

    kern_kw = dict(guard=guard, m_mid=m_mid, wp2=wp2, cp=cp)

    # --- K1: conv1 + BN1 partial statistics (y1 stored bf16) ----------------
    y1, stats1 = pl.pallas_call(
        functools.partial(_conv_stats_kernel, **kern_kw),
        grid=(ng,),
        in_specs=[img_spec, w_spec, mask_spec],
        out_specs=(img_spec, st_spec),
        out_shape=(jax.ShapeDtypeStruct((ng, mg, cp), jnp.bfloat16),
                   jax.ShapeDtypeStruct((ng, 2, cp), jnp.float32)),
        compiler_params=cparams,
    )(x_grp, w1f, mask)

    ss1 = _stats_to_scale_shift(stats1, g1, be1, count, cp)

    # --- K2: bn1-apply + relu + conv2 + BN2 partial statistics (fused) ------
    y2, stats2 = pl.pallas_call(
        functools.partial(_bn_relu_conv_stats_kernel, **kern_kw),
        grid=(ng,),
        in_specs=[img_spec, ss_spec, mask_spec, w_spec],
        out_specs=(img_spec, st_spec),
        out_shape=(jax.ShapeDtypeStruct((ng, mg, cp), jnp.bfloat16),
                   jax.ShapeDtypeStruct((ng, 2, cp), jnp.float32)),
        scratch_shapes=[pltpu.VMEM((mg, cp), jnp.bfloat16)],
        compiler_params=cparams,
    )(y1, ss1, mask, w2f)

    ss2 = _stats_to_scale_shift(stats2, g2, be2, count, cp)

    # --- K3: bn2-apply + residual add + relu (residual = bf16 x_grp) --------
    out_grp = pl.pallas_call(
        _bn_add_relu_kernel,
        grid=(ng,),
        in_specs=[img_spec, ss_spec, img_spec],
        out_specs=img_spec,
        out_shape=jax.ShapeDtypeStruct((ng, mg, cp), jnp.float32),
        compiler_params=cparams,
    )(y2, ss2, x_grp)

    out = out_grp.reshape(n, mtot, cp)[:, guard:guard + mp, :]
    out = out.reshape(n, h + 2, wp2, cp)[:, 1:h + 1, 1:w + 1, :c]
    return jnp.transpose(out, (0, 3, 1, 2))                # back to NCHW


# ---------------------------------------------------------------------------
# Pure-JAX reference: same semantics as the PyTorch ResidualBlock in training
# mode (bf16 conv inputs, f32 accumulation, f32 BN / residual / relu).  Conv
# biases are applied here; they cancel under training-mode BN, so the kernel
# legitimately drops them.
# ---------------------------------------------------------------------------
def reference_forward(x, params):
    w1, b1, g1, be1, w2, b2, g2, be2 = params

    def conv(inp, wt, b):
        y = jax.lax.conv_general_dilated(
            inp.astype(jnp.bfloat16), wt.astype(jnp.bfloat16),
            window_strides=(1, 1), padding=((1, 1), (1, 1)),
            dimension_numbers=("NCHW", "OIHW", "NCHW"),
            preferred_element_type=jnp.float32)
        return y + b[None, :, None, None]

    def bn(y, g, be):
        mean = y.mean(axis=(0, 2, 3), keepdims=True)
        var = ((y - mean) ** 2).mean(axis=(0, 2, 3), keepdims=True)
        return (y - mean) / jnp.sqrt(var + EPS) * g[None, :, None, None] \
            + be[None, :, None, None]

    a1 = jnp.maximum(bn(conv(x, w1, b1), g1, be1), 0.0)
    out = bn(conv(a1, w2, b2), g2, be2) + x
    return jnp.maximum(out, 0.0)


# ---------------------------------------------------------------------------
if __name__ == "__main__":
    N, C, H, W = 2, 4, 16, 16
    Cout = C

    key = jax.random.PRNGKey(0)
    ks = jax.random.split(key, 9)
    x = jax.random.normal(ks[0], (N, C, H, W), dtype=jnp.float32)
    w1 = 0.1 * jax.random.normal(ks[1], (Cout, C, 3, 3), dtype=jnp.float32)
    b1 = 0.1 * jax.random.normal(ks[2], (Cout,), dtype=jnp.float32)
    g1 = 1.0 + 0.1 * jax.random.normal(ks[3], (Cout,), dtype=jnp.float32)
    be1 = 0.1 * jax.random.normal(ks[4], (Cout,), dtype=jnp.float32)
    w2 = 0.1 * jax.random.normal(ks[5], (Cout, Cout, 3, 3), dtype=jnp.float32)
    b2 = 0.1 * jax.random.normal(ks[6], (Cout,), dtype=jnp.float32)
    g2 = 1.0 + 0.1 * jax.random.normal(ks[7], (Cout,), dtype=jnp.float32)
    be2 = 0.1 * jax.random.normal(ks[8], (Cout,), dtype=jnp.float32)
    params = (w1, b1, g1, be1, w2, b2, g2, be2)

    fwd = jax.jit(residual_block_forward)
    out = jax.block_until_ready(fwd(x, params))

    ref = jax.block_until_ready(jax.jit(reference_forward)(x, params))
    # Tolerance covers bf16 rounding: both pipelines compute the BN statistics,
    # residual and relu in f32, but the kernel (per the perf review) stores the
    # y1 / y2 intermediates and the residual in bf16, so it deviates slightly
    # more from the all-f32-intermediate reference than the previous version.
    np.testing.assert_allclose(np.asarray(out), np.asarray(ref), rtol=3e-2, atol=3e-2)

    print("KERNEL_OK")
</pallas_src>

<mosaic_0001>
module attributes {stable_mosaic.version = 11 : i64} {
  func.func @_conv_stats_kernel(%arg0: i32, %arg1: memref<1x388x128xbf16, #tpu.memory_space<vmem>>, %arg2: memref<1152x128xbf16, #tpu.memory_space<vmem>>, %arg3: memref<388x1xf32, #tpu.memory_space<vmem>>, %arg4: memref<1x388x128xbf16, #tpu.memory_space<vmem>>, %arg5: memref<1x2x128xf32, #tpu.memory_space<vmem>>) attributes {dimension_semantics = [#tpu.dimension_semantics<parallel>], iteration_bounds = array<i64: 2>, scalar_prefetch = 0 : i64, scratch_operands = 0 : i64, tpu.core_type = #tpu.core_type<tc>, window_params = [{transform_indices = @transform_0, window_bounds = array<i64: 1, 388, 128>}, {pipeline_mode = #tpu.pipeline_mode<synchronous>, transform_indices = @transform_1, window_bounds = array<i64: 1152, 128>}, {pipeline_mode = #tpu.pipeline_mode<synchronous>, transform_indices = @transform_2, window_bounds = array<i64: 388, 1>}, {transform_indices = @transform_3, window_bounds = array<i64: 1, 388, 128>}, {transform_indices = @transform_4, window_bounds = array<i64: 1, 2, 128>}]} {
    %c0 = arith.constant 0 : index
    %c13 = arith.constant 13 : index
    %c0_0 = arith.constant 0 : index
    %0 = vector.load %arg1[%c0, %c13, %c0_0] : memref<1x388x128xbf16, #tpu.memory_space<vmem>>, vector<1x324x128xbf16>
    %1 = vector.shape_cast %0 : vector<1x324x128xbf16> to vector<324x128xbf16>
    %c0_1 = arith.constant 0 : index
    %c0_2 = arith.constant 0 : index
    %2 = vector.load %arg2[%c0_1, %c0_2] : memref<1152x128xbf16, #tpu.memory_space<vmem>>, vector<128x128xbf16>
    %cst = arith.constant dense<0.000000e+00> : vector<324x128xf32>
    %3 = tpu.matmul %1, %2, %cst {dimension_numbers = #tpu.dot_dimension_numbers<[1], [0], [0], [1], [0, 0, 1, 1], [], []>} : vector<324x128xbf16>, vector<128x128xbf16>, vector<324x128xf32> -> vector<324x128xf32>
    %c0_3 = arith.constant 0 : index
    %c14 = arith.constant 14 : index
    %c0_4 = arith.constant 0 : index
    %4 = vector.load %arg1[%c0_3, %c14, %c0_4] : memref<1x388x128xbf16, #tpu.memory_space<vmem>>, vector<1x324x128xbf16>
    %5 = vector.shape_cast %4 : vector<1x324x128xbf16> to vector<324x128xbf16>
    %c128 = arith.constant 128 : index
    %c0_5 = arith.constant 0 : index
    %6 = vector.load %arg2[%c128, %c0_5] : memref<1152x128xbf16, #tpu.memory_space<vmem>>, vector<128x128xbf16>
    %cst_6 = arith.constant dense<0.000000e+00> : vector<324x128xf32>
    %7 = tpu.matmul %5, %6, %cst_6 {dimension_numbers = #tpu.dot_dimension_numbers<[1], [0], [0], [1], [0, 0, 1, 1], [], []>} : vector<324x128xbf16>, vector<128x128xbf16>, vector<324x128xf32> -> vector<324x128xf32>
    %8 = arith.addf %3, %7 : vector<324x128xf32>
    %c0_7 = arith.constant 0 : index
    %c15 = arith.constant 15 : index
    %c0_8 = arith.constant 0 : index
    %9 = vector.load %arg1[%c0_7, %c15, %c0_8] : memref<1x388x128xbf16, #tpu.memory_space<vmem>>, vector<1x324x128xbf16>
    %10 = vector.shape_cast %9 : vector<1x324x128xbf16> to vector<324x128xbf16>
    %c256 = arith.constant 256 : index
    %c0_9 = arith.constant 0 : index
    %11 = vector.load %arg2[%c256, %c0_9] : memref<1152x128xbf16, #tpu.memory_space<vmem>>, vector<128x128xbf16>
    %cst_10 = arith.constant dense<0.000000e+00> : vector<324x128xf32>
    %12 = tpu.matmul %10, %11, %cst_10 {dimension_numbers = #tpu.dot_dimension_numbers<[1], [0], [0], [1], [0, 0, 1, 1], [], []>} : vector<324x128xbf16>, vector<128x128xbf16>, vector<324x128xf32> -> vector<324x128xf32>
    %13 = arith.addf %8, %12 : vector<324x128xf32>
    %c0_11 = arith.constant 0 : index
    %c31 = arith.constant 31 : index
    %c0_12 = arith.constant 0 : index
    %14 = vector.load %arg1[%c0_11, %c31, %c0_12] : memref<1x388x128xbf16, #tpu.memory_space<vmem>>, vector<1x324x128xbf16>
    %15 = vector.shape_cast %14 : vector<1x324x128xbf16> to vector<324x128xbf16>
    %c384 = arith.constant 384 : index
    %c0_13 = arith.constant 0 : index
    %16 = vector.load %arg2[%c384, %c0_13] : memref<1152x128xbf16, #tpu.memory_space<vmem>>, vector<128x128xbf16>
    %cst_14 = arith.constant dense<0.000000e+00> : vector<324x128xf32>
    %17 = tpu.matmul %15, %16, %cst_14 {dimension_numbers = #tpu.dot_dimension_numbers<[1], [0], [0], [1], [0, 0, 1, 1], [], []>} : vector<324x128xbf16>, vector<128x128xbf16>, vector<324x128xf32> -> vector<324x128xf32>
    %18 = arith.addf %13, %17 : vector<324x128xf32>
    %c0_15 = arith.constant 0 : index
    %c32 = arith.constant 32 : index
    %c0_16 = arith.constant 0 : index
    %19 = vector.load %arg1[%c0_15, %c32, %c0_16] : memref<1x388x128xbf16, #tpu.memory_space<vmem>>, vector<1x324x128xbf16>
    %20 = vector.shape_cast %19 : vector<1x324x128xbf16> to vector<324x128xbf16>
    %c512 = arith.constant 512 : index
    %c0_17 = arith.constant 0 : index
    %21 = vector.load %arg2[%c512, %c0_17] : memref<1152x128xbf16, #tpu.memory_space<vmem>>, vector<128x128xbf16>
    %cst_18 = arith.constant dense<0.000000e+00> : vector<324x128xf32>
    %22 = tpu.matmul %20, %21, %cst_18 {dimension_numbers = #tpu.dot_dimension_numbers<[1], [0], [0], [1], [0, 0, 1, 1], [], []>} : vector<324x128xbf16>, vector<128x128xbf16>, vector<324x128xf32> -> vector<324x128xf32>
    %23 = arith.addf %18, %22 : vector<324x128xf32>
    %c0_19 = arith.constant 0 : index
    %c33 = arith.constant 33 : index
    %c0_20 = arith.constant 0 : index
    %24 = vector.load %arg1[%c0_19, %c33, %c0_20] : memref<1x388x128xbf16, #tpu.memory_space<vmem>>, vector<1x324x128xbf16>
    %25 = vector.shape_cast %24 : vector<1x324x128xbf16> to vector<324x128xbf16>
    %c640 = arith.constant 640 : index
    %c0_21 = arith.constant 0 : index
    %26 = vector.load %arg2[%c640, %c0_21] : memref<1152x128xbf16, #tpu.memory_space<vmem>>, vector<128x128xbf16>
    %cst_22 = arith.constant dense<0.000000e+00> : vector<324x128xf32>
    %27 = tpu.matmul %25, %26, %cst_22 {dimension_numbers = #tpu.dot_dimension_numbers<[1], [0], [0], [1], [0, 0, 1, 1], [], []>} : vector<324x128xbf16>, vector<128x128xbf16>, vector<324x128xf32> -> vector<324x128xf32>
    %28 = arith.addf %23, %27 : vector<324x128xf32>
    %c0_23 = arith.constant 0 : index
    %c49 = arith.constant 49 : index
    %c0_24 = arith.constant 0 : index
    %29 = vector.load %arg1[%c0_23, %c49, %c0_24] : memref<1x388x128xbf16, #tpu.memory_space<vmem>>, vector<1x324x128xbf16>
    %30 = vector.shape_cast %29 : vector<1x324x128xbf16> to vector<324x128xbf16>
    %c768 = arith.constant 768 : index
    %c0_25 = arith.constant 0 : index
    %31 = vector.load %arg2[%c768, %c0_25] : memref<1152x128xbf16, #tpu.memory_space<vmem>>, vector<128x128xbf16>
    %cst_26 = arith.constant dense<0.000000e+00> : vector<324x128xf32>
    %32 = tpu.matmul %30, %31, %cst_26 {dimension_numbers = #tpu.dot_dimension_numbers<[1], [0], [0], [1], [0, 0, 1, 1], [], []>} : vector<324x128xbf16>, vector<128x128xbf16>, vector<324x128xf32> -> vector<324x128xf32>
    %33 = arith.addf %28, %32 : vector<324x128xf32>
    %c0_27 = arith.constant 0 : index
    %c50 = arith.constant 50 : index
    %c0_28 = arith.constant 0 : index
    %34 = vector.load %arg1[%c0_27, %c50, %c0_28] : memref<1x388x128xbf16, #tpu.memory_space<vmem>>, vector<1x324x128xbf16>
    %35 = vector.shape_cast %34 : vector<1x324x128xbf16> to vector<324x128xbf16>
    %c896 = arith.constant 896 : index
    %c0_29 = arith.constant 0 : index
    %36 = vector.load %arg2[%c896, %c0_29] : memref<1152x128xbf16, #tpu.memory_space<vmem>>, vector<128x128xbf16>
    %cst_30 = arith.constant dense<0.000000e+00> : vector<324x128xf32>
    %37 = tpu.matmul %35, %36, %cst_30 {dimension_numbers = #tpu.dot_dimension_numbers<[1], [0], [0], [1], [0, 0, 1, 1], [], []>} : vector<324x128xbf16>, vector<128x128xbf16>, vector<324x128xf32> -> vector<324x128xf32>
    %38 = arith.addf %33, %37 : vector<324x128xf32>
    %c0_31 = arith.constant 0 : index
    %c51 = arith.constant 51 : index
    %c0_32 = arith.constant 0 : index
    %39 = vector.load %arg1[%c0_31, %c51, %c0_32] : memref<1x388x128xbf16, #tpu.memory_space<vmem>>, vector<1x324x128xbf16>
    %40 = vector.shape_cast %39 : vector<1x324x128xbf16> to vector<324x128xbf16>
    %c1024 = arith.constant 1024 : index
    %c0_33 = arith.constant 0 : index
    %41 = vector.load %arg2[%c1024, %c0_33] : memref<1152x128xbf16, #tpu.memory_space<vmem>>, vector<128x128xbf16>
    %cst_34 = arith.constant dense<0.000000e+00> : vector<324x128xf32>
    %42 = tpu.matmul %40, %41, %cst_34 {dimension_numbers = #tpu.dot_dimension_numbers<[1], [0], [0], [1], [0, 0, 1, 1], [], []>} : vector<324x128xbf16>, vector<128x128xbf16>, vector<324x128xf32> -> vector<324x128xf32>
    %43 = arith.addf %38, %42 : vector<324x128xf32>
    %c32_35 = arith.constant 32 : index
    %c0_36 = arith.constant 0 : index
    %44 = vector.load %arg3[%c32_35, %c0_36] : memref<388x1xf32, #tpu.memory_space<vmem>>, vector<324x1xf32>
    %45 = vector.broadcast %44 : vector<324x1xf32> to vector<324x128xf32>
    %46 = arith.mulf %43, %45 : vector<324x128xf32>
    %cst_37 = arith.constant dense<0.000000e+00> : vector<128xf32>
    %47 = vector.multi_reduction <add>, %46, %cst_37 [0] : vector<324x128xf32> to vector<128xf32>
    %48 = vector.shape_cast %47 : vector<128xf32> to vector<1x128xf32>
    %c0_38 = arith.constant 0 : index
    %c0_39 = arith.constant 0 : index
    %c0_40 = arith.constant 0 : index
    %49 = vector.load %arg5[%c0_38, %c0_39, %c0_40] : memref<1x2x128xf32, #tpu.memory_space<vmem>>, vector<1x1x128xf32>
    %50 = vector.shape_cast %49 : vector<1x1x128xf32> to vector<1x128xf32>
    %51 = vector.shape_cast %48 : vector<1x128xf32> to vector<1x1x128xf32>
    tpu.vector_store %arg5[%c0_38, %c0_39, %c0_40], %51 {strides = array<i32>} : memref<1x2x128xf32, #tpu.memory_space<vmem>>, vector<1x1x128xf32>,
    %52 = arith.mulf %46, %46 : vector<324x128xf32>
    %cst_41 = arith.constant dense<0.000000e+00> : vector<128xf32>
    %53 = vector.multi_reduction <add>, %52, %cst_41 [0] : vector<324x128xf32> to vector<128xf32>
    %54 = vector.shape_cast %53 : vector<128xf32> to vector<1x128xf32>
    %c0_42 = arith.constant 0 : index
    %c1 = arith.constant 1 : index
    %c0_43 = arith.constant 0 : index
    %55 = vector.load %arg5[%c0_42, %c1, %c0_43] : memref<1x2x128xf32, #tpu.memory_space<vmem>>, vector<1x1x128xf32>
    %56 = vector.shape_cast %55 : vector<1x1x128xf32> to vector<1x128xf32>
    %57 = vector.shape_cast %54 : vector<1x128xf32> to vector<1x1x128xf32>
    tpu.vector_store %arg5[%c0_42, %c1, %c0_43], %57 {strides = array<i32>} : memref<1x2x128xf32, #tpu.memory_space<vmem>>, vector<1x1x128xf32>,
    %cst_44 = arith.constant 0.000000e+00 : bf16
    %58 = vector.broadcast %cst_44 : bf16 to vector<32x128xbf16>
    %c0_45 = arith.constant 0 : index
    %c0_46 = arith.constant 0 : index
    %c0_47 = arith.constant 0 : index
    %59 = vector.load %arg4[%c0_45, %c0_46, %c0_47] : memref<1x388x128xbf16, #tpu.memory_space<vmem>>, vector<1x32x128xbf16>
    %60 = vector.shape_cast %59 : vector<1x32x128xbf16> to vector<32x128xbf16>
    %61 = vector.shape_cast %58 : vector<32x128xbf16> to vector<1x32x128xbf16>
    tpu.vector_store %arg4[%c0_45, %c0_46, %c0_47], %61 {strides = array<i32>} : memref<1x388x128xbf16, #tpu.memory_space<vmem>>, vector<1x32x128xbf16>,
    %62 = arith.truncf %43 : vector<324x128xf32> to vector<324x128xbf16>
    %c0_48 = arith.constant 0 : index
    %c32_49 = arith.constant 32 : index
    %c0_50 = arith.constant 0 : index
    %63 = vector.load %arg4[%c0_48, %c32_49, %c0_50] : memref<1x388x128xbf16, #tpu.memory_space<vmem>>, vector<1x324x128xbf16>
    %64 = vector.shape_cast %63 : vector<1x324x128xbf16> to vector<324x128xbf16>
    %65 = vector.shape_cast %62 : vector<324x128xbf16> to vector<1x324x128xbf16>
    tpu.vector_store %arg4[%c0_48, %c32_49, %c0_50], %65 {strides = array<i32>} : memref<1x388x128xbf16, #tpu.memory_space<vmem>>, vector<1x324x128xbf16>,
    %c0_51 = arith.constant 0 : index
    %c356 = arith.constant 356 : index
    %c0_52 = arith.constant 0 : index
    %66 = vector.load %arg4[%c0_51, %c356, %c0_52] : memref<1x388x128xbf16, #tpu.memory_space<vmem>>, vector<1x32x128xbf16>
    %67 = vector.shape_cast %66 : vector<1x32x128xbf16> to vector<32x128xbf16>
    %68 = vector.shape_cast %58 : vector<32x128xbf16> to vector<1x32x128xbf16>
    tpu.vector_store %arg4[%c0_51, %c356, %c0_52], %68 {strides = array<i32>} : memref<1x388x128xbf16, #tpu.memory_space<vmem>>, vector<1x32x128xbf16>,
    return
  }
  func.func @transform_0(%arg0: i32) -> (i32, i32, i32) {
    %c0_i32 = arith.constant 0 : i32
    %c0_i32_0 = arith.constant 0 : i32
    %c0_i32_1 = arith.constant 0 : i32
    return %arg0, %c0_i32, %c0_i32_0 : i32, i32, i32
  }
  func.func @transform_1(%arg0: i32) -> (i32, i32) {
    %c0_i32 = arith.constant 0 : i32
    %c0_i32_0 = arith.constant 0 : i32
    %c0_i32_1 = arith.constant 0 : i32
    return %c0_i32, %c0_i32_0 : i32, i32
  }
  func.func @transform_2(%arg0: i32) -> (i32, i32) {
    %c0_i32 = arith.constant 0 : i32
    %c0_i32_0 = arith.constant 0 : i32
    %c0_i32_1 = arith.constant 0 : i32
    return %c0_i32, %c0_i32_0 : i32, i32
  }
  func.func @transform_3(%arg0: i32) -> (i32, i32, i32) {
    %c0_i32 = arith.constant 0 : i32
    %c0_i32_0 = arith.constant 0 : i32
    %c0_i32_1 = arith.constant 0 : i32
    return %arg0, %c0_i32, %c0_i32_0 : i32, i32, i32
  }
  func.func @transform_4(%arg0: i32) -> (i32, i32, i32) {
    %c0_i32 = arith.constant 0 : i32
    %c0_i32_0 = arith.constant 0 : i32
    %c0_i32_1 = arith.constant 0 : i32
    return %arg0, %c0_i32, %c0_i32_0 : i32, i32, i32
  }
}

module attributes {stable_mosaic.version = 11 : i64} {
  func.func @_bn_relu_conv_stats_kernel(%arg0: i32, %arg1: memref<1x388x128xbf16, #tpu.memory_space<vmem>>, %arg2: memref<8x128xf32, #tpu.memory_space<vmem>>, %arg3: memref<388x1xf32, #tpu.memory_space<vmem>>, %arg4: memref<1152x128xbf16, #tpu.memory_space<vmem>>, %arg5: memref<1x388x128xbf16, #tpu.memory_space<vmem>>, %arg6: memref<1x2x128xf32, #tpu.memory_space<vmem>>, %arg7: memref<388x128xbf16, #tpu.memory_space<vmem>>) attributes {dimension_semantics = [#tpu.dimension_semantics<parallel>], iteration_bounds = array<i64: 2>, scalar_prefetch = 0 : i64, scratch_operands = 1 : i64, tpu.core_type = #tpu.core_type<tc>, window_params = [{transform_indices = @transform_0, window_bounds = array<i64: 1, 388, 128>}, {pipeline_mode = #tpu.pipeline_mode<synchronous>, transform_indices = @transform_1, window_bounds = array<i64: 8, 128>}, {pipeline_mode = #tpu.pipeline_mode<synchronous>, transform_indices = @transform_2, window_bounds = array<i64: 388, 1>}, {pipeline_mode = #tpu.pipeline_mode<synchronous>, transform_indices = @transform_3, window_bounds = array<i64: 1152, 128>}, {transform_indices = @transform_4, window_bounds = array<i64: 1, 388, 128>}, {transform_indices = @transform_5, window_bounds = array<i64: 1, 2, 128>}]} {
    %c0 = arith.constant 0 : index
    %c0_0 = arith.constant 0 : index
    %0 = vector.load %arg2[%c0, %c0_0] : memref<8x128xf32, #tpu.memory_space<vmem>>, vector<1x128xf32>
    %c1 = arith.constant 1 : index
    %c0_1 = arith.constant 0 : index
    %1 = vector.load %arg2[%c1, %c0_1] : memref<8x128xf32, #tpu.memory_space<vmem>>, vector<1x128xf32>
    %c0_2 = arith.constant 0 : index
    %c0_3 = arith.constant 0 : index
    %2 = vector.load %arg3[%c0_2, %c0_3] : memref<388x1xf32, #tpu.memory_space<vmem>>, vector<388x1xf32>
    %c0_4 = arith.constant 0 : index
    %c0_5 = arith.constant 0 : index
    %c0_6 = arith.constant 0 : index
    %3 = vector.load %arg1[%c0_4, %c0_5, %c0_6] : memref<1x388x128xbf16, #tpu.memory_space<vmem>>, vector<1x388x128xbf16>
    %4 = vector.shape_cast %3 : vector<1x388x128xbf16> to vector<388x128xbf16>
    %5 = arith.extf %4 : vector<388x128xbf16> to vector<388x128xf32>
    %6 = vector.broadcast %0 : vector<1x128xf32> to vector<388x128xf32>
    %7 = arith.mulf %5, %6 : vector<388x128xf32>
    %8 = vector.broadcast %1 : vector<1x128xf32> to vector<388x128xf32>
    %9 = arith.addf %7, %8 : vector<388x128xf32>
    %cst = arith.constant 0.000000e+00 : f32
    %10 = vector.broadcast %cst : f32 to vector<388x128xf32>
    %11 = arith.maximumf %9, %10 : vector<388x128xf32>
    %12 = vector.broadcast %2 : vector<388x1xf32> to vector<388x128xf32>
    %13 = arith.mulf %11, %12 : vector<388x128xf32>
    %14 = arith.truncf %13 : vector<388x128xf32> to vector<388x128xbf16>
    %c0_7 = arith.constant 0 : index
    %c0_8 = arith.constant 0 : index
    %15 = vector.load %arg7[%c0_7, %c0_8] : memref<388x128xbf16, #tpu.memory_space<vmem>>, vector<388x128xbf16>
    tpu.vector_store %arg7[%c0_7, %c0_8], %14 {strides = array<i32>} : memref<388x128xbf16, #tpu.memory_space<vmem>>, vector<388x128xbf16>,
    %c13 = arith.constant 13 : index
    %c0_9 = arith.constant 0 : index
    %16 = vector.load %arg7[%c13, %c0_9] : memref<388x128xbf16, #tpu.memory_space<vmem>>, vector<324x128xbf16>
    %c0_10 = arith.constant 0 : index
    %c0_11 = arith.constant 0 : index
    %17 = vector.load %arg4[%c0_10, %c0_11] : memref<1152x128xbf16, #tpu.memory_space<vmem>>, vector<128x128xbf16>
    %cst_12 = arith.constant dense<0.000000e+00> : vector<324x128xf32>
    %18 = tpu.matmul %16, %17, %cst_12 {dimension_numbers = #tpu.dot_dimension_numbers<[1], [0], [0], [1], [0, 0, 1, 1], [], []>} : vector<324x128xbf16>, vector<128x128xbf16>, vector<324x128xf32> -> vector<324x128xf32>
    %c14 = arith.constant 14 : index
    %c0_13 = arith.constant 0 : index
    %19 = vector.load %arg7[%c14, %c0_13] : memref<388x128xbf16, #tpu.memory_space<vmem>>, vector<324x128xbf16>
    %c128 = arith.constant 128 : index
    %c0_14 = arith.constant 0 : index
    %20 = vector.load %arg4[%c128, %c0_14] : memref<1152x128xbf16, #tpu.memory_space<vmem>>, vector<128x128xbf16>
    %cst_15 = arith.constant dense<0.000000e+00> : vector<324x128xf32>
    %21 = tpu.matmul %19, %20, %cst_15 {dimension_numbers = #tpu.dot_dimension_numbers<[1], [0], [0], [1], [0, 0, 1, 1], [], []>} : vector<324x128xbf16>, vector<128x128xbf16>, vector<324x128xf32> -> vector<324x128xf32>
    %22 = arith.addf %18, %21 : vector<324x128xf32>
    %c15 = arith.constant 15 : index
    %c0_16 = arith.constant 0 : index
    %23 = vector.load %arg7[%c15, %c0_16] : memref<388x128xbf16, #tpu.memory_space<vmem>>, vector<324x128xbf16>
    %c256 = arith.constant 256 : index
    %c0_17 = arith.constant 0 : index
    %24 = vector.load %arg4[%c256, %c0_17] : memref<1152x128xbf16, #tpu.memory_space<vmem>>, vector<128x128xbf16>
    %cst_18 = arith.constant dense<0.000000e+00> : vector<324x128xf32>
    %25 = tpu.matmul %23, %24, %cst_18 {dimension_numbers = #tpu.dot_dimension_numbers<[1], [0], [0], [1], [0, 0, 1, 1], [], []>} : vector<324x128xbf16>, vector<128x128xbf16>, vector<324x128xf32> -> vector<324x128xf32>
    %26 = arith.addf %22, %25 : vector<324x128xf32>
    %c31 = arith.constant 31 : index
    %c0_19 = arith.constant 0 : index
    %27 = vector.load %arg7[%c31, %c0_19] : memref<388x128xbf16, #tpu.memory_space<vmem>>, vector<324x128xbf16>
    %c384 = arith.constant 384 : index
    %c0_20 = arith.constant 0 : index
    %28 = vector.load %arg4[%c384, %c0_20] : memref<1152x128xbf16, #tpu.memory_space<vmem>>, vector<128x128xbf16>
    %cst_21 = arith.constant dense<0.000000e+00> : vector<324x128xf32>
    %29 = tpu.matmul %27, %28, %cst_21 {dimension_numbers = #tpu.dot_dimension_numbers<[1], [0], [0], [1], [0, 0, 1, 1], [], []>} : vector<324x128xbf16>, vector<128x128xbf16>, vector<324x128xf32> -> vector<324x128xf32>
    %30 = arith.addf %26, %29 : vector<324x128xf32>
    %c32 = arith.constant 32 : index
    %c0_22 = arith.constant 0 : index
    %31 = vector.load %arg7[%c32, %c0_22] : memref<388x128xbf16, #tpu.memory_space<vmem>>, vector<324x128xbf16>
    %c512 = arith.constant 512 : index
    %c0_23 = arith.constant 0 : index
    %32 = vector.load %arg4[%c512, %c0_23] : memref<1152x128xbf16, #tpu.memory_space<vmem>>, vector<128x128xbf16>
    %cst_24 = arith.constant dense<0.000000e+00> : vector<324x128xf32>
    %33 = tpu.matmul %31, %32, %cst_24 {dimension_numbers = #tpu.dot_dimension_numbers<[1], [0], [0], [1], [0, 0, 1, 1], [], []>} : vector<324x128xbf16>, vector<128x128xbf16>, vector<324x128xf32> -> vector<324x128xf32>
    %34 = arith.addf %30, %33 : vector<324x128xf32>
    %c33 = arith.constant 33 : index
    %c0_25 = arith.constant 0 : index
    %35 = vector.load %arg7[%c33, %c0_25] : memref<388x128xbf16, #tpu.memory_space<vmem>>, vector<324x128xbf16>
    %c640 = arith.constant 640 : index
    %c0_26 = arith.constant 0 : index
    %36 = vector.load %arg4[%c640, %c0_26] : memref<1152x128xbf16, #tpu.memory_space<vmem>>, vector<128x128xbf16>
    %cst_27 = arith.constant dense<0.000000e+00> : vector<324x128xf32>
    %37 = tpu.matmul %35, %36, %cst_27 {dimension_numbers = #tpu.dot_dimension_numbers<[1], [0], [0], [1], [0, 0, 1, 1], [], []>} : vector<324x128xbf16>, vector<128x128xbf16>, vector<324x128xf32> -> vector<324x128xf32>
    %38 = arith.addf %34, %37 : vector<324x128xf32>
    %c49 = arith.constant 49 : index
    %c0_28 = arith.constant 0 : index
    %39 = vector.load %arg7[%c49, %c0_28] : memref<388x128xbf16, #tpu.memory_space<vmem>>, vector<324x128xbf16>
    %c768 = arith.constant 768 : index
    %c0_29 = arith.constant 0 : index
    %40 = vector.load %arg4[%c768, %c0_29] : memref<1152x128xbf16, #tpu.memory_space<vmem>>, vector<128x128xbf16>
    %cst_30 = arith.constant dense<0.000000e+00> : vector<324x128xf32>
    %41 = tpu.matmul %39, %40, %cst_30 {dimension_numbers = #tpu.dot_dimension_numbers<[1], [0], [0], [1], [0, 0, 1, 1], [], []>} : vector<324x128xbf16>, vector<128x128xbf16>, vector<324x128xf32> -> vector<324x128xf32>
    %42 = arith.addf %38, %41 : vector<324x128xf32>
    %c50 = arith.constant 50 : index
    %c0_31 = arith.constant 0 : index
    %43 = vector.load %arg7[%c50, %c0_31] : memref<388x128xbf16, #tpu.memory_space<vmem>>, vector<324x128xbf16>
    %c896 = arith.constant 896 : index
    %c0_32 = arith.constant 0 : index
    %44 = vector.load %arg4[%c896, %c0_32] : memref<1152x128xbf16, #tpu.memory_space<vmem>>, vector<128x128xbf16>
    %cst_33 = arith.constant dense<0.000000e+00> : vector<324x128xf32>
    %45 = tpu.matmul %43, %44, %cst_33 {dimension_numbers = #tpu.dot_dimension_numbers<[1], [0], [0], [1], [0, 0, 1, 1], [], []>} : vector<324x128xbf16>, vector<128x128xbf16>, vector<324x128xf32> -> vector<324x128xf32>
    %46 = arith.addf %42, %45 : vector<324x128xf32>
    %c51 = arith.constant 51 : index
    %c0_34 = arith.constant 0 : index
    %47 = vector.load %arg7[%c51, %c0_34] : memref<388x128xbf16, #tpu.memory_space<vmem>>, vector<324x128xbf16>
    %c1024 = arith.constant 1024 : index
    %c0_35 = arith.constant 0 : index
    %48 = vector.load %arg4[%c1024, %c0_35] : memref<1152x128xbf16, #tpu.memory_space<vmem>>, vector<128x128xbf16>
    %cst_36 = arith.constant dense<0.000000e+00> : vector<324x128xf32>
    %49 = tpu.matmul %47, %48, %cst_36 {dimension_numbers = #tpu.dot_dimension_numbers<[1], [0], [0], [1], [0, 0, 1, 1], [], []>} : vector<324x128xbf16>, vector<128x128xbf16>, vector<324x128xf32> -> vector<324x128xf32>
    %50 = arith.addf %46, %49 : vector<324x128xf32>
    %51 = vector.extract_strided_slice %2 {offsets = [32, 0], sizes = [324, 1], strides = [1, 1]} : vector<388x1xf32> to vector<324x1xf32>
    %52 = vector.broadcast %51 : vector<324x1xf32> to vector<324x128xf32>
    %53 = arith.mulf %50, %52 : vector<324x128xf32>
    %cst_37 = arith.constant dense<0.000000e+00> : vector<128xf32>
    %54 = vector.multi_reduction <add>, %53, %cst_37 [0] : vector<324x128xf32> to vector<128xf32>
    %55 = vector.shape_cast %54 : vector<128xf32> to vector<1x128xf32>
    %c0_38 = arith.constant 0 : index
    %c0_39 = arith.constant 0 : index
    %c0_40 = arith.constant 0 : index
    %56 = vector.load %arg6[%c0_38, %c0_39, %c0_40] : memref<1x2x128xf32, #tpu.memory_space<vmem>>, vector<1x1x128xf32>
    %57 = vector.shape_cast %56 : vector<1x1x128xf32> to vector<1x128xf32>
    %58 = vector.shape_cast %55 : vector<1x128xf32> to vector<1x1x128xf32>
    tpu.vector_store %arg6[%c0_38, %c0_39, %c0_40], %58 {strides = array<i32>} : memref<1x2x128xf32, #tpu.memory_space<vmem>>, vector<1x1x128xf32>,
    %59 = arith.mulf %53, %53 : vector<324x128xf32>
    %cst_41 = arith.constant dense<0.000000e+00> : vector<128xf32>
    %60 = vector.multi_reduction <add>, %59, %cst_41 [0] : vector<324x128xf32> to vector<128xf32>
    %61 = vector.shape_cast %60 : vector<128xf32> to vector<1x128xf32>
    %c0_42 = arith.constant 0 : index
    %c1_43 = arith.constant 1 : index
    %c0_44 = arith.constant 0 : index
    %62 = vector.load %arg6[%c0_42, %c1_43, %c0_44] : memref<1x2x128xf32, #tpu.memory_space<vmem>>, vector<1x1x128xf32>
    %63 = vector.shape_cast %62 : vector<1x1x128xf32> to vector<1x128xf32>
    %64 = vector.shape_cast %61 : vector<1x128xf32> to vector<1x1x128xf32>
    tpu.vector_store %arg6[%c0_42, %c1_43, %c0_44], %64 {strides = array<i32>} : memref<1x2x128xf32, #tpu.memory_space<vmem>>, vector<1x1x128xf32>,
    %cst_45 = arith.constant 0.000000e+00 : bf16
    %65 = vector.broadcast %cst_45 : bf16 to vector<32x128xbf16>
    %c0_46 = arith.constant 0 : index
    %c0_47 = arith.constant 0 : index
    %c0_48 = arith.constant 0 : index
    %66 = vector.load %arg5[%c0_46, %c0_47, %c0_48] : memref<1x388x128xbf16, #tpu.memory_space<vmem>>, vector<1x32x128xbf16>
    %67 = vector.shape_cast %66 : vector<1x32x128xbf16> to vector<32x128xbf16>
    %68 = vector.shape_cast %65 : vector<32x128xbf16> to vector<1x32x128xbf16>
    tpu.vector_store %arg5[%c0_46, %c0_47, %c0_48], %68 {strides = array<i32>} : memref<1x388x128xbf16, #tpu.memory_space<vmem>>, vector<1x32x128xbf16>,
    %69 = arith.truncf %50 : vector<324x128xf32> to vector<324x128xbf16>
    %c0_49 = arith.constant 0 : index
    %c32_50 = arith.constant 32 : index
    %c0_51 = arith.constant 0 : index
    %70 = vector.load %arg5[%c0_49, %c32_50, %c0_51] : memref<1x388x128xbf16, #tpu.memory_space<vmem>>, vector<1x324x128xbf16>
    %71 = vector.shape_cast %70 : vector<1x324x128xbf16> to vector<324x128xbf16>
    %72 = vector.shape_cast %69 : vector<324x128xbf16> to vector<1x324x128xbf16>
    tpu.vector_store %arg5[%c0_49, %c32_50, %c0_51], %72 {strides = array<i32>} : memref<1x388x128xbf16, #tpu.memory_space<vmem>>, vector<1x324x128xbf16>,
    %c0_52 = arith.constant 0 : index
    %c356 = arith.constant 356 : index
    %c0_53 = arith.constant 0 : index
    %73 = vector.load %arg5[%c0_52, %c356, %c0_53] : memref<1x388x128xbf16, #tpu.memory_space<vmem>>, vector<1x32x128xbf16>
    %74 = vector.shape_cast %73 : vector<1x32x128xbf16> to vector<32x128xbf16>
    %75 = vector.shape_cast %65 : vector<32x128xbf16> to vector<1x32x128xbf16>
    tpu.vector_store %arg5[%c0_52, %c356, %c0_53], %75 {strides = array<i32>} : memref<1x388x128xbf16, #tpu.memory_space<vmem>>, vector<1x32x128xbf16>,
    return
  }
  func.func @transform_0(%arg0: i32) -> (i32, i32, i32) {
    %c0_i32 = arith.constant 0 : i32
    %c0_i32_0 = arith.constant 0 : i32
    %c0_i32_1 = arith.constant 0 : i32
    return %arg0, %c0_i32, %c0_i32_0 : i32, i32, i32
  }
  func.func @transform_1(%arg0: i32) -> (i32, i32) {
    %c0_i32 = arith.constant 0 : i32
    %c0_i32_0 = arith.constant 0 : i32
    %c0_i32_1 = arith.constant 0 : i32
    return %c0_i32, %c0_i32_0 : i32, i32
  }
  func.func @transform_2(%arg0: i32) -> (i32, i32) {
    %c0_i32 = arith.constant 0 : i32
    %c0_i32_0 = arith.constant 0 : i32
    %c0_i32_1 = arith.constant 0 : i32
    return %c0_i32, %c0_i32_0 : i32, i32
  }
  func.func @transform_3(%arg0: i32) -> (i32, i32) {
    %c0_i32 = arith.constant 0 : i32
    %c0_i32_0 = arith.constant 0 : i32
    %c0_i32_1 = arith.constant 0 : i32
    return %c0_i32, %c0_i32_0 : i32, i32
  }
  func.func @transform_4(%arg0: i32) -> (i32, i32, i32) {
    %c0_i32 = arith.constant 0 : i32
    %c0_i32_0 = arith.constant 0 : i32
    %c0_i32_1 = arith.constant 0 : i32
    return %arg0, %c0_i32, %c0_i32_0 : i32, i32, i32
  }
  func.func @transform_5(%arg0: i32) -> (i32, i32, i32) {
    %c0_i32 = arith.constant 0 : i32
    %c0_i32_0 = arith.constant 0 : i32
    %c0_i32_1 = arith.constant 0 : i32
    return %arg0, %c0_i32, %c0_i32_0 : i32, i32, i32
  }
}

module attributes {stable_mosaic.version = 11 : i64} {
  func.func @_bn_add_relu_kernel(%arg0: i32, %arg1: memref<1x388x128xbf16, #tpu.memory_space<vmem>>, %arg2: memref<8x128xf32, #tpu.memory_space<vmem>>, %arg3: memref<1x388x128xbf16, #tpu.memory_space<vmem>>, %arg4: memref<1x388x128xf32, #tpu.memory_space<vmem>>) attributes {dimension_semantics = [#tpu.dimension_semantics<parallel>], iteration_bounds = array<i64: 2>, scalar_prefetch = 0 : i64, scratch_operands = 0 : i64, tpu.core_type = #tpu.core_type<tc>, window_params = [{transform_indices = @transform_0, window_bounds = array<i64: 1, 388, 128>}, {pipeline_mode = #tpu.pipeline_mode<synchronous>, transform_indices = @transform_1, window_bounds = array<i64: 8, 128>}, {transform_indices = @transform_2, window_bounds = array<i64: 1, 388, 128>}, {transform_indices = @transform_3, window_bounds = array<i64: 1, 388, 128>}]} {
    %c0 = arith.constant 0 : index
    %c0_0 = arith.constant 0 : index
    %0 = vector.load %arg2[%c0, %c0_0] : memref<8x128xf32, #tpu.memory_space<vmem>>, vector<1x128xf32>
    %c1 = arith.constant 1 : index
    %c0_1 = arith.constant 0 : index
    %1 = vector.load %arg2[%c1, %c0_1] : memref<8x128xf32, #tpu.memory_space<vmem>>, vector<1x128xf32>
    %c0_2 = arith.constant 0 : index
    %c0_3 = arith.constant 0 : index
    %c0_4 = arith.constant 0 : index
    %2 = vector.load %arg1[%c0_2, %c0_3, %c0_4] : memref<1x388x128xbf16, #tpu.memory_space<vmem>>, vector<1x388x128xbf16>
    %3 = vector.shape_cast %2 : vector<1x388x128xbf16> to vector<388x128xbf16>
    %4 = arith.extf %3 : vector<388x128xbf16> to vector<388x128xf32>
    %5 = vector.broadcast %0 : vector<1x128xf32> to vector<388x128xf32>
    %6 = arith.mulf %4, %5 : vector<388x128xf32>
    %7 = vector.broadcast %1 : vector<1x128xf32> to vector<388x128xf32>
    %8 = arith.addf %6, %7 : vector<388x128xf32>
    %c0_5 = arith.constant 0 : index
    %c0_6 = arith.constant 0 : index
    %c0_7 = arith.constant 0 : index
    %9 = vector.load %arg3[%c0_5, %c0_6, %c0_7] : memref<1x388x128xbf16, #tpu.memory_space<vmem>>, vector<1x388x128xbf16>
    %10 = vector.shape_cast %9 : vector<1x388x128xbf16> to vector<388x128xbf16>
    %11 = arith.extf %10 : vector<388x128xbf16> to vector<388x128xf32>
    %12 = arith.addf %8, %11 : vector<388x128xf32>
    %cst = arith.constant 0.000000e+00 : f32
    %13 = vector.broadcast %cst : f32 to vector<388x128xf32>
    %14 = arith.maximumf %12, %13 : vector<388x128xf32>
    %c0_8 = arith.constant 0 : index
    %c0_9 = arith.constant 0 : index
    %c0_10 = arith.constant 0 : index
    %15 = vector.load %arg4[%c0_8, %c0_9, %c0_10] : memref<1x388x128xf32, #tpu.memory_space<vmem>>, vector<1x388x128xf32>
    %16 = vector.shape_cast %15 : vector<1x388x128xf32> to vector<388x128xf32>
    %17 = vector.shape_cast %14 : vector<388x128xf32> to vector<1x388x128xf32>
    tpu.vector_store %arg4[%c0_8, %c0_9, %c0_10], %17 {strides = array<i32>} : memref<1x388x128xf32, #tpu.memory_space<vmem>>, vector<1x388x128xf32>,
    return
  }
  func.func @transform_0(%arg0: i32) -> (i32, i32, i32) {
    %c0_i32 = arith.constant 0 : i32
    %c0_i32_0 = arith.constant 0 : i32
    %c0_i32_1 = arith.constant 0 : i32
    return %arg0, %c0_i32, %c0_i32_0 : i32, i32, i32
  }
  func.func @transform_1(%arg0: i32) -> (i32, i32) {
    %c0_i32 = arith.constant 0 : i32
    %c0_i32_0 = arith.constant 0 : i32
    %c0_i32_1 = arith.constant 0 : i32
    return %c0_i32, %c0_i32_0 : i32, i32
  }
  func.func @transform_2(%arg0: i32) -> (i32, i32, i32) {
    %c0_i32 = arith.constant 0 : i32
    %c0_i32_0 = arith.constant 0 : i32
    %c0_i32_1 = arith.constant 0 : i32
    return %arg0, %c0_i32, %c0_i32_0 : i32, i32, i32
  }
  func.func @transform_3(%arg0: i32) -> (i32, i32, i32) {
    %c0_i32 = arith.constant 0 : i32
    %c0_i32_0 = arith.constant 0 : i32
    %c0_i32_1 = arith.constant 0 : i32
    return %arg0, %c0_i32, %c0_i32_0 : i32, i32, i32
  }
}

</mosaic_0001>

<bundles_post_ra>
// kernel: residual_block_forward.5
= control target key start
LH: loop header
LB: loop body
LE: loop exit
PB: predicated region body
PF: predicated region fallthrough
CT: control target
= control target key end

     0   :  { %s997_s12 = smov 0   ;;  %s1234_s0 = inlined_call_operand.vmem [shape: bf16[2,388,128], index: 0, kind: input, shape index: {}]   ;;  %s1235_s1 = inlined_call_operand.vmem [shape: f32[8,128], index: 1, kind: input, shape index: {}]   ;;  %s1236_s2 = inlined_call_operand.vmem [shape: bf16[2,388,128], index: 2, kind: input, shape index: {}]   ;;  %s1237_s3 = inlined_call_operand.vmem [shape: f32[2,388,128], index: 3, kind: output, shape index: {}]  }
   0x1 LB: > { %s709_s13 = sadd.s32 4294967295, %s975_s12   ;;  %p713_p0 = scmp.ge.s32.totalorder %s975_s12, 1  ;;  %s975_s12 = sphi %s997_s12, %s13_s12  }
   0x2   : > { %p147_p1 = scmp.lt.s32.totalorder %s975_s12, 3 }
   0x4   : > { %p148_p2 = pnand %p713_p0, %p147_p1 }
   0x5   : > { %p176_p3 = scmp.lt.s32.totalorder (!%p148_p2), %s709_s13, 1  ;;  %v1021_v0 = vld [vmem:[%s1235_s1] ss:$0 sm:$0xff] (!%p148_p2)  ;;  %v1032_v11 = vld [vmem:[%s1235_s1 + $0x1] ss:$0 sm:$0xff] (!%p148_p2) }
   0x6   : > { %151 = sbr.rel (%p148_p2) target bundleno = 98 (0x62), region = 32 }
   0xd   : > { %s1239_s13 = smov (!%p176_p3, %s709_s13), 1 }
   0xe   : > { %s959_s14 = smul.u32 196, %s1239_s13 }
   0xf   : > { %s960_s25 = smul.u32 392, %s1239_s13 }
  0x10   : > { %s1011_s17 = scalar_lea.vmem %s1234_s0, %s959_s14  ;;  %s1016_s20 = scalar_lea.vmem %s1236_s2, %s959_s14 }
  0x11   : > { %v722_v1 = vld [vmem:[%s1011_s17] sm:$0xff]   ;;  %v913_v3 = vld [vmem:[%s1011_s17 + $0x8] sm:$0xff]   ;;  %v914_v9 = vld [vmem:[%s1011_s17 + $0x10] sm:$0xff]   ;;  %s1052_s28 = scalar_lea.vmem %s1237_s3, %s960_s25 }
  0x12   : > { %v818_v2 = vld [vmem:[%s1016_s20] sm:$0xff]   ;;  %v723_v4 = vunpack.c.l.bf16 %v722_v1  ;;  %v724_v6 = vunpack.c.h.bf16 %v722_v1  ;;  %v936_v8 = vld [vmem:[%s1016_s20 + $0x8] sm:$0xff]   ;;  %v937_v10 = vld [vmem:[%s1016_s20 + $0x10] sm:$0xff]   ;;  %v727_v12 = vunpack.c.l.bf16 %v913_v3  ;;  %v728_v14 = vunpack.c.h.bf16 %v913_v3 }
  0x13   : > { %v819_v5 = vunpack.c.l.bf16 %v818_v2  ;;  %v820_v7 = vunpack.c.h.bf16 %v818_v2  ;;  %v823_v13 = vunpack.c.l.bf16 %v936_v8  ;;  %v824_v15 = vunpack.c.h.bf16 %v936_v8  ;;  %v915_v16 = vld [vmem:[%s1011_s17 + $0x18] sm:$0xff]   ;;  %v916_v42 = vld [vmem:[%s1011_s17 + $0x20] sm:$0xff]   ;;  %v917_v52 = vld [vmem:[%s1011_s17 + $0x28] sm:$0xff]  }
  0x14   : > { %v295_v17 = vmul.f32 %v723_v4, %v1021_v0  ;;  %v296_v18 = vmul.f32 %v724_v6, %v1021_v0  ;;  %v731_v19 = vunpack.c.l.bf16 %v914_v9  ;;  %v827_v20 = vunpack.c.l.bf16 %v937_v10  ;;  %v938_v21 = vld [vmem:[%s1016_s20 + $0x18] sm:$0xff]   ;;  %v939_v47 = vld [vmem:[%s1016_s20 + $0x20] sm:$0xff]   ;;  %v940_v57 = vld [vmem:[%s1016_s20 + $0x28] sm:$0xff]  }
  0x15   : > { %v297_v22 = vmul.f32 %v727_v12, %v1021_v0  ;;  %v298_v23 = vmul.f32 %v728_v14, %v1021_v0  ;;  %v732_v24 = vunpack.c.h.bf16 %v914_v9  ;;  %v828_v25 = vunpack.c.h.bf16 %v937_v10  ;;  %v918_v62 = vld [vmem:[%s1011_s17 + $0x30] sm:$0xff]   ;;  %v919_v14 = vld [vmem:[%s1011_s17 + $0x38] sm:$0xff]  }
  0x16   : > { %v348_v26 = vadd.f32 %v1032_v11, %v295_v17  ;;  %v349_v27 = vadd.f32 %v1032_v11, %v296_v18  ;;  %v299_v28 = vmul.f32 %v731_v19, %v1021_v0  ;;  %v735_v29 = vunpack.c.l.bf16 %v915_v16  ;;  %v941_v4 = vld [vmem:[%s1016_s20 + $0x30] sm:$0xff]  }
  0x17   : > { %v350_v30 = vadd.f32 %v1032_v11, %v297_v22  ;;  %v351_v31 = vadd.f32 %v1032_v11, %v298_v23  ;;  %v300_v32 = vmul.f32 %v732_v24, %v1021_v0  ;;  %v831_v33 = vunpack.c.l.bf16 %v938_v21  ;;  %v942_v23 = vld [vmem:[%s1016_s20 + $0x38] sm:$0xff]  }
  0x18   : > { %v495_v34 = vadd.f32 %v819_v5, %v348_v26  ;;  %v496_v35 = vadd.f32 %v820_v7, %v349_v27  ;;  %v352_v36 = vadd.f32 %v1032_v11, %v299_v28  ;;  %v301_v37 = vmul.f32 %v735_v29, %v1021_v0 }
  0x19   : > { %v497_v38 = vadd.f32 %v823_v13, %v350_v30  ;;  %v498_v39 = vadd.f32 %v824_v15, %v351_v31  ;;  %v353_v40 = vadd.f32 %v1032_v11, %v300_v32  ;;  %v736_v41 = vunpack.c.h.bf16 %v915_v16  ;;  %v920_v32 = vld [vmem:[%s1011_s17 + $0x40] sm:$0xff]  }
  0x1a   : > { %v544_v43 = vmax.f32 %v495_v34, 0.0  ;;  %v545_v44 = vmax.f32 %v496_v35, 0.0  ;;  %v499_v45 = vadd.f32 %v827_v20, %v352_v36  ;;  %v354_v46 = vadd.f32 %v1032_v11, %v301_v37  ;;  %v943_v37 = vld [vmem:[%s1016_s20 + $0x40] sm:$0xff]  }
  0x1b   : > { %v546_v48 = vmax.f32 %v497_v38, 0.0  ;;  %v547_v49 = vmax.f32 %v498_v39, 0.0  ;;  %v500_v50 = vadd.f32 %v828_v25, %v353_v40  ;;  %v302_v51 = vmul.f32 %v736_v41, %v1021_v0 }
  0x1c   : > { %593 = vst [vmem:[%s1052_s28] sm:$0xff] %v544_v43  ;;  %594 = vst [vmem:[%s1052_s28 + $0x8] sm:$0xff] %v545_v44  ;;  %v548_v53 = vmax.f32 %v499_v45, 0.0  ;;  %v501_v54 = vadd.f32 %v831_v33, %v354_v46  ;;  %v832_v55 = vunpack.c.h.bf16 %v938_v21  ;;  %v739_v56 = vunpack.c.l.bf16 %v916_v42  ;;  %v921_v46 = vld [vmem:[%s1011_s17 + $0x48] sm:$0xff]  }
  0x1d   : > { %595 = vst [vmem:[%s1052_s28 + $0x10] sm:$0xff] %v546_v48  ;;  %596 = vst [vmem:[%s1052_s28 + $0x18] sm:$0xff] %v547_v49  ;;  %v549_v58 = vmax.f32 %v500_v50, 0.0  ;;  %v355_v59 = vadd.f32 %v1032_v11, %v302_v51  ;;  %v835_v60 = vunpack.c.l.bf16 %v939_v47  ;;  %v740_v61 = vunpack.c.h.bf16 %v916_v42 }
  0x1e   : > { %597 = vst [vmem:[%s1052_s28 + $0x20] sm:$0xff] %v548_v53  ;;  %v550_v63 = vmax.f32 %v501_v54, 0.0  ;;  %v303_v1 = vmul.f32 %v739_v56, %v1021_v0  ;;  %v836_v2 = vunpack.c.h.bf16 %v939_v47  ;;  %v743_v3 = vunpack.c.l.bf16 %v917_v52  ;;  %v944_v47 = vld [vmem:[%s1016_s20 + $0x48] sm:$0xff]   ;;  %v922_v56 = vld [vmem:[%s1011_s17 + $0x50] sm:$0xff]  }
  0x1f   : > { %598 = vst [vmem:[%s1052_s28 + $0x28] sm:$0xff] %v549_v58  ;;  %v502_v5 = vadd.f32 %v832_v55, %v355_v59  ;;  %v304_v6 = vmul.f32 %v740_v61, %v1021_v0  ;;  %v839_v7 = vunpack.c.l.bf16 %v940_v57  ;;  %v744_v8 = vunpack.c.h.bf16 %v917_v52  ;;  %v945_v61 = vld [vmem:[%s1016_s20 + $0x50] sm:$0xff]  }
  0x20   : > { %599 = vst [vmem:[%s1052_s28 + $0x30] sm:$0xff] %v550_v63  ;;  %v356_v9 = vadd.f32 %v1032_v11, %v303_v1  ;;  %v305_v10 = vmul.f32 %v743_v3, %v1021_v0  ;;  %v840_v12 = vunpack.c.h.bf16 %v940_v57  ;;  %v747_v13 = vunpack.c.l.bf16 %v918_v62 }
  0x21   : > { %v551_v15 = vmax.f32 %v502_v5, 0.0  ;;  %v357_v16 = vadd.f32 %v1032_v11, %v304_v6  ;;  %v306_v17 = vmul.f32 %v744_v8, %v1021_v0  ;;  %v843_v18 = vunpack.c.l.bf16 %v941_v4 }
  0x22   : > { %v503_v19 = vadd.f32 %v835_v60, %v356_v9  ;;  %v358_v20 = vadd.f32 %v1032_v11, %v305_v10  ;;  %v307_v21 = vmul.f32 %v747_v13, %v1021_v0  ;;  %v748_v22 = vunpack.c.h.bf16 %v918_v62 }
  0x23   : > { %600 = vst [vmem:[%s1052_s28 + $0x38] sm:$0xff] %v551_v15  ;;  %v504_v24 = vadd.f32 %v836_v2, %v357_v16  ;;  %v359_v25 = vadd.f32 %v1032_v11, %v306_v17  ;;  %v844_v26 = vunpack.c.h.bf16 %v941_v4  ;;  %v751_v27 = vunpack.c.l.bf16 %v919_v14  ;;  %v946_v17 = vld [vmem:[%s1016_s20 + $0x58] sm:$0xff]  }
  0x24   : > { %v552_v28 = vmax.f32 %v503_v19, 0.0  ;;  %v505_v29 = vadd.f32 %v839_v7, %v358_v20  ;;  %v360_v30 = vadd.f32 %v1032_v11, %v307_v21  ;;  %v308_v31 = vmul.f32 %v748_v22, %v1021_v0 }
  0x25   : > { %v553_v33 = vmax.f32 %v504_v24, 0.0  ;;  %v506_v34 = vadd.f32 %v840_v12, %v359_v25  ;;  %v309_v35 = vmul.f32 %v751_v27, %v1021_v0  ;;  %v847_v36 = vunpack.c.l.bf16 %v942_v23  ;;  %v923_v12 = vld [vmem:[%s1011_s17 + $0x58] sm:$0xff]  }
  0x26   : > { %601 = vst [vmem:[%s1052_s28 + $0x40] sm:$0xff] %v552_v28  ;;  %v554_v38 = vmax.f32 %v505_v29, 0.0  ;;  %v507_v39 = vadd.f32 %v843_v18, %v360_v30  ;;  %v361_v40 = vadd.f32 %v1032_v11, %v308_v31  ;;  %v752_v41 = vunpack.c.h.bf16 %v919_v14  ;;  %v947_v31 = vld [vmem:[%s1016_s20 + $0x60] sm:$0xff]  }
  0x27   : > { %602 = vst [vmem:[%s1052_s28 + $0x48] sm:$0xff] %v553_v33  ;;  %v555_v42 = vmax.f32 %v506_v34, 0.0  ;;  %v362_v43 = vadd.f32 %v1032_v11, %v309_v35  ;;  %v848_v44 = vunpack.c.h.bf16 %v942_v23  ;;  %v755_v45 = vunpack.c.l.bf16 %v920_v32 }
  0x28   : > { %603 = vst [vmem:[%s1052_s28 + $0x50] sm:$0xff] %v554_v38  ;;  %v556_v48 = vmax.f32 %v507_v39, 0.0  ;;  %v508_v49 = vadd.f32 %v844_v26, %v361_v40  ;;  %v310_v50 = vmul.f32 %v752_v41, %v1021_v0  ;;  %v851_v51 = vunpack.c.l.bf16 %v943_v37  ;;  %v924_v26 = vld [vmem:[%s1011_s17 + $0x60] sm:$0xff]   ;;  %v925_v40 = vld [vmem:[%s1011_s17 + $0x68] sm:$0xff]  }
  0x29   : > { %604 = vst [vmem:[%s1052_s28 + $0x58] sm:$0xff] %v555_v42  ;;  %v509_v52 = vadd.f32 %v847_v36, %v362_v43  ;;  %v311_v53 = vmul.f32 %v755_v45, %v1021_v0  ;;  %v756_v54 = vunpack.c.h.bf16 %v920_v32  ;;  %v852_v55 = vunpack.c.h.bf16 %v943_v37  ;;  %v948_v41 = vld [vmem:[%s1016_s20 + $0x68] sm:$0xff]  }
  0x2a   : > { %605 = vst [vmem:[%s1052_s28 + $0x60] sm:$0xff] %v556_v48  ;;  %v557_v57 = vmax.f32 %v508_v49, 0.0  ;;  %v363_v58 = vadd.f32 %v1032_v11, %v310_v50  ;;  %v759_v59 = vunpack.c.l.bf16 %v921_v46  ;;  %v855_v60 = vunpack.c.l.bf16 %v944_v47  ;;  %v926_v50 = vld [vmem:[%s1011_s17 + $0x70] sm:$0xff]  }
  0x2b   : > { %v558_v62 = vmax.f32 %v509_v52, 0.0  ;;  %v364_v63 = vadd.f32 %v1032_v11, %v311_v53  ;;  %v312_v1 = vmul.f32 %v756_v54, %v1021_v0  ;;  %v760_v2 = vunpack.c.h.bf16 %v921_v46 }
  0x2c   : > { %606 = vst [vmem:[%s1052_s28 + $0x68] sm:$0xff] %v557_v57  ;;  %v510_v3 = vadd.f32 %v848_v44, %v363_v58  ;;  %v313_v4 = vmul.f32 %v759_v59, %v1021_v0  ;;  %v856_v5 = vunpack.c.h.bf16 %v944_v47  ;;  %v763_v6 = vunpack.c.l.bf16 %v922_v56  ;;  %v949_v59 = vld [vmem:[%s1016_s20 + $0x70] sm:$0xff]  }
  0x2d   : > { %607 = vst [vmem:[%s1052_s28 + $0x70] sm:$0xff] %v558_v62  ;;  %v511_v7 = vadd.f32 %v851_v51, %v364_v63  ;;  %v365_v8 = vadd.f32 %v1032_v11, %v312_v1  ;;  %v314_v9 = vmul.f32 %v760_v2, %v1021_v0  ;;  %v859_v10 = vunpack.c.l.bf16 %v945_v61 }
  0x2e   : > { %v559_v13 = vmax.f32 %v510_v3, 0.0  ;;  %v366_v14 = vadd.f32 %v1032_v11, %v313_v4  ;;  %v315_v15 = vmul.f32 %v763_v6, %v1021_v0  ;;  %v764_v16 = vunpack.c.h.bf16 %v922_v56 }
  0x2f   : > { %v560_v18 = vmax.f32 %v511_v7, 0.0  ;;  %v512_v19 = vadd.f32 %v852_v55, %v365_v8  ;;  %v367_v20 = vadd.f32 %v1032_v11, %v314_v9  ;;  %v860_v21 = vunpack.c.h.bf16 %v945_v61 }
  0x30   : > { %608 = vst [vmem:[%s1052_s28 + $0x78] sm:$0xff] %v559_v13  ;;  %v513_v22 = vadd.f32 %v855_v60, %v366_v14  ;;  %v368_v23 = vadd.f32 %v1032_v11, %v315_v15  ;;  %v316_v24 = vmul.f32 %v764_v16, %v1021_v0  ;;  %v767_v25 = vunpack.c.l.bf16 %v923_v12 }
  0x31   : > { %609 = vst [vmem:[%s1052_s28 + $0x80] sm:$0xff] %v560_v18  ;;  %v561_v27 = vmax.f32 %v512_v19, 0.0  ;;  %v514_v28 = vadd.f32 %v856_v5, %v367_v20  ;;  %v863_v29 = vunpack.c.l.bf16 %v946_v17  ;;  %v768_v30 = vunpack.c.h.bf16 %v923_v12  ;;  %v927_v5 = vld [vmem:[%s1011_s17 + $0x78] sm:$0xff]   ;;  %v928_v20 = vld [vmem:[%s1011_s17 + $0x80] sm:$0xff]  }
  0x32   : > { %v562_v32 = vmax.f32 %v513_v22, 0.0  ;;  %v515_v33 = vadd.f32 %v859_v10, %v368_v23  ;;  %v369_v34 = vadd.f32 %v1032_v11, %v316_v24  ;;  %v317_v35 = vmul.f32 %v767_v25, %v1021_v0  ;;  %v950_v10 = vld [vmem:[%s1016_s20 + $0x78] sm:$0xff]   ;;  %v951_v25 = vld [vmem:[%s1016_s20 + $0x80] sm:$0xff]  }
  0x33   : > { %610 = vst [vmem:[%s1052_s28 + $0x88] sm:$0xff] %v561_v27  ;;  %v563_v36 = vmax.f32 %v514_v28, 0.0  ;;  %v318_v37 = vmul.f32 %v768_v30, %v1021_v0  ;;  %v864_v38 = vunpack.c.h.bf16 %v946_v17  ;;  %v771_v39 = vunpack.c.l.bf16 %v924_v26 }
  0x34   : > { %611 = vst [vmem:[%s1052_s28 + $0x90] sm:$0xff] %v562_v32  ;;  %v564_v42 = vmax.f32 %v515_v33, 0.0  ;;  %v516_v43 = vadd.f32 %v860_v21, %v369_v34  ;;  %v370_v44 = vadd.f32 %v1032_v11, %v317_v35  ;;  %v867_v45 = vunpack.c.l.bf16 %v947_v31  ;;  %v929_v34 = vld [vmem:[%s1011_s17 + $0x88] sm:$0xff]  }
  0x35   : > { %612 = vst [vmem:[%s1052_s28 + $0x98] sm:$0xff] %v563_v36  ;;  %v371_v46 = vadd.f32 %v1032_v11, %v318_v37  ;;  %v319_v47 = vmul.f32 %v771_v39, %v1021_v0  ;;  %v772_v48 = vunpack.c.h.bf16 %v924_v26  ;;  %v868_v49 = vunpack.c.h.bf16 %v947_v31  ;;  %v952_v35 = vld [vmem:[%s1016_s20 + $0x88] sm:$0xff]  }
  0x36   : > { %613 = vst [vmem:[%s1052_s28 + $0xa0] sm:$0xff] %v564_v42  ;;  %v565_v51 = vmax.f32 %v516_v43, 0.0  ;;  %v517_v52 = vadd.f32 %v863_v29, %v370_v44  ;;  %v775_v53 = vunpack.c.l.bf16 %v925_v40  ;;  %v871_v54 = vunpack.c.l.bf16 %v948_v41  ;;  %v930_v44 = vld [vmem:[%s1011_s17 + $0x90] sm:$0xff]  }
  0x37   : > { %v518_v55 = vadd.f32 %v864_v38, %v371_v46  ;;  %v372_v56 = vadd.f32 %v1032_v11, %v319_v47  ;;  %v320_v57 = vmul.f32 %v772_v48, %v1021_v0  ;;  %v776_v58 = vunpack.c.h.bf16 %v925_v40 }
  0x38   : > { %614 = vst [vmem:[%s1052_s28 + $0xa8] sm:$0xff] %v565_v51  ;;  %v566_v60 = vmax.f32 %v517_v52, 0.0  ;;  %v321_v61 = vmul.f32 %v775_v53, %v1021_v0  ;;  %v872_v62 = vunpack.c.h.bf16 %v948_v41  ;;  %v779_v63 = vunpack.c.l.bf16 %v926_v50  ;;  %v953_v53 = vld [vmem:[%s1016_s20 + $0x90] sm:$0xff]  }
  0x39   : > { %v567_v1 = vmax.f32 %v518_v55, 0.0  ;;  %v519_v2 = vadd.f32 %v867_v45, %v372_v56  ;;  %v373_v3 = vadd.f32 %v1032_v11, %v320_v57  ;;  %v322_v4 = vmul.f32 %v776_v58, %v1021_v0 }
  0x3a   : > { %615 = vst [vmem:[%s1052_s28 + $0xb0] sm:$0xff] %v566_v60  ;;  %v374_v6 = vadd.f32 %v1032_v11, %v321_v61  ;;  %v323_v7 = vmul.f32 %v779_v63, %v1021_v0  ;;  %v875_v8 = vunpack.c.l.bf16 %v949_v59  ;;  %v780_v9 = vunpack.c.h.bf16 %v926_v50 }
  0x3b   : > { %616 = vst [vmem:[%s1052_s28 + $0xb8] sm:$0xff] %v567_v1  ;;  %v568_v12 = vmax.f32 %v519_v2, 0.0  ;;  %v520_v13 = vadd.f32 %v868_v49, %v373_v3  ;;  %v375_v14 = vadd.f32 %v1032_v11, %v322_v4  ;;  %v876_v15 = vunpack.c.h.bf16 %v949_v59  ;;  %v954_v4 = vld [vmem:[%s1016_s20 + $0x98] sm:$0xff]  }
  0x3c   : > { %v521_v16 = vadd.f32 %v871_v54, %v374_v6  ;;  %v376_v17 = vadd.f32 %v1032_v11, %v323_v7  ;;  %v324_v18 = vmul.f32 %v780_v9, %v1021_v0  ;;  %v783_v19 = vunpack.c.l.bf16 %v927_v5 }
  0x3d   : > { %617 = vst [vmem:[%s1052_s28 + $0xc0] sm:$0xff] %v568_v12  ;;  %v569_v21 = vmax.f32 %v520_v13, 0.0  ;;  %v522_v22 = vadd.f32 %v872_v62, %v375_v14  ;;  %v879_v23 = vunpack.c.l.bf16 %v950_v10  ;;  %v784_v24 = vunpack.c.h.bf16 %v927_v5  ;;  %v931_v62 = vld [vmem:[%s1011_s17 + $0x98] sm:$0xff]   ;;  %v932_v14 = vld [vmem:[%s1011_s17 + $0xa0] sm:$0xff]  }
  0x3e   : > { %v570_v26 = vmax.f32 %v521_v16, 0.0  ;;  %v523_v27 = vadd.f32 %v875_v8, %v376_v17  ;;  %v377_v28 = vadd.f32 %v1032_v11, %v324_v18  ;;  %v325_v29 = vmul.f32 %v783_v19, %v1021_v0  ;;  %v955_v19 = vld [vmem:[%s1016_s20 + $0xa0] sm:$0xff]  }
  0x3f   : > { %618 = vst [vmem:[%s1052_s28 + $0xc8] sm:$0xff] %v569_v21  ;;  %v571_v30 = vmax.f32 %v522_v22, 0.0  ;;  %v326_v31 = vmul.f32 %v784_v24, %v1021_v0  ;;  %v880_v32 = vunpack.c.h.bf16 %v950_v10  ;;  %v787_v33 = vunpack.c.l.bf16 %v928_v20 }
  0x40   : > { %619 = vst [vmem:[%s1052_s28 + $0xd0] sm:$0xff] %v570_v26  ;;  %v572_v36 = vmax.f32 %v523_v27, 0.0  ;;  %v524_v37 = vadd.f32 %v876_v15, %v377_v28  ;;  %v378_v38 = vadd.f32 %v1032_v11, %v325_v29  ;;  %v883_v39 = vunpack.c.l.bf16 %v951_v25  ;;  %v933_v28 = vld [vmem:[%s1011_s17 + $0xa8] sm:$0xff]  }
  0x41   : > { %620 = vst [vmem:[%s1052_s28 + $0xd8] sm:$0xff] %v571_v30  ;;  %v379_v40 = vadd.f32 %v1032_v11, %v326_v31  ;;  %v327_v41 = vmul.f32 %v787_v33, %v1021_v0  ;;  %v788_v42 = vunpack.c.h.bf16 %v928_v20  ;;  %v884_v43 = vunpack.c.h.bf16 %v951_v25  ;;  %v956_v29 = vld [vmem:[%s1016_s20 + $0xa8] sm:$0xff]  }
  0x42   : > { %621 = vst [vmem:[%s1052_s28 + $0xe0] sm:$0xff] %v572_v36  ;;  %v573_v45 = vmax.f32 %v524_v37, 0.0  ;;  %v525_v46 = vadd.f32 %v879_v23, %v378_v38  ;;  %v791_v47 = vunpack.c.l.bf16 %v929_v34  ;;  %v887_v48 = vunpack.c.l.bf16 %v952_v35  ;;  %v934_v38 = vld [vmem:[%s1011_s17 + $0xb0] sm:$0xff]  }
  0x43   : > { %v526_v49 = vadd.f32 %v880_v32, %v379_v40  ;;  %v380_v50 = vadd.f32 %v1032_v11, %v327_v41  ;;  %v328_v51 = vmul.f32 %v788_v42, %v1021_v0  ;;  %v792_v52 = vunpack.c.h.bf16 %v929_v34 }
  0x44   : > { %622 = vst [vmem:[%s1052_s28 + $0xe8] sm:$0xff] %v573_v45  ;;  %v574_v54 = vmax.f32 %v525_v46, 0.0  ;;  %v329_v55 = vmul.f32 %v791_v47, %v1021_v0  ;;  %v888_v56 = vunpack.c.h.bf16 %v952_v35  ;;  %v795_v57 = vunpack.c.l.bf16 %v930_v44  ;;  %v957_v47 = vld [vmem:[%s1016_s20 + $0xb0] sm:$0xff]  }
  0x45   : > { %v575_v58 = vmax.f32 %v526_v49, 0.0  ;;  %v527_v59 = vadd.f32 %v883_v39, %v380_v50  ;;  %v381_v60 = vadd.f32 %v1032_v11, %v328_v51  ;;  %v330_v61 = vmul.f32 %v792_v52, %v1021_v0 }
  0x46   : > { %623 = vst [vmem:[%s1052_s28 + $0xf0] sm:$0xff] %v574_v54  ;;  %v382_v63 = vadd.f32 %v1032_v11, %v329_v55  ;;  %v331_v1 = vmul.f32 %v795_v57, %v1021_v0  ;;  %v891_v2 = vunpack.c.l.bf16 %v953_v53  ;;  %v796_v3 = vunpack.c.h.bf16 %v930_v44 }
  0x47   : > { %624 = vst [vmem:[%s1052_s28 + $0xf8] sm:$0xff] %v575_v58  ;;  %v576_v5 = vmax.f32 %v527_v59, 0.0  ;;  %v528_v6 = vadd.f32 %v884_v43, %v381_v60  ;;  %v383_v7 = vadd.f32 %v1032_v11, %v330_v61  ;;  %v892_v8 = vunpack.c.h.bf16 %v953_v53  ;;  %v958_v61 = vld [vmem:[%s1016_s20 + $0xb8] sm:$0xff]  }
  0x48   : > { %v529_v9 = vadd.f32 %v887_v48, %v382_v63  ;;  %v384_v10 = vadd.f32 %v1032_v11, %v331_v1  ;;  %v332_v12 = vmul.f32 %v796_v3, %v1021_v0  ;;  %v799_v13 = vunpack.c.l.bf16 %v931_v62 }
  0x49   : > { %625 = vst [vmem:[%s1052_s28 + $0x100] sm:$0xff] %v576_v5  ;;  %v577_v15 = vmax.f32 %v528_v6, 0.0  ;;  %v530_v16 = vadd.f32 %v888_v56, %v383_v7  ;;  %v895_v17 = vunpack.c.l.bf16 %v954_v4  ;;  %v800_v18 = vunpack.c.h.bf16 %v931_v62  ;;  %v935_v56 = vld [vmem:[%s1011_s17 + $0xb8] sm:$0xff]   ;;  %v241_v7 = vld [vmem:[%s1011_s17 + $0xc0] sm:$0x3] }
  0x4a   : > { %v578_v20 = vmax.f32 %v529_v9, 0.0  ;;  %v531_v21 = vadd.f32 %v891_v2, %v384_v10  ;;  %v385_v22 = vadd.f32 %v1032_v11, %v332_v12  ;;  %v333_v23 = vmul.f32 %v799_v13, %v1021_v0 }
  0x4b   : > { %626 = vst [vmem:[%s1052_s28 + $0x108] sm:$0xff] %v577_v15  ;;  %v579_v24 = vmax.f32 %v530_v16, 0.0  ;;  %v334_v25 = vmul.f32 %v800_v18, %v1021_v0  ;;  %v896_v26 = vunpack.c.h.bf16 %v954_v4  ;;  %v803_v27 = vunpack.c.l.bf16 %v932_v14 }
  0x4c   : > { %627 = vst [vmem:[%s1052_s28 + $0x110] sm:$0xff] %v578_v20  ;;  %v580_v30 = vmax.f32 %v531_v21, 0.0  ;;  %v532_v31 = vadd.f32 %v892_v8, %v385_v22  ;;  %v386_v32 = vadd.f32 %v1032_v11, %v333_v23  ;;  %v899_v33 = vunpack.c.l.bf16 %v955_v19 }
  0x4d   : > { %628 = vst [vmem:[%s1052_s28 + $0x118] sm:$0xff] %v579_v24  ;;  %v387_v34 = vadd.f32 %v1032_v11, %v334_v25  ;;  %v335_v35 = vmul.f32 %v803_v27, %v1021_v0  ;;  %v804_v36 = vunpack.c.h.bf16 %v932_v14  ;;  %v900_v37 = vunpack.c.h.bf16 %v955_v19 }
  0x4e   : > { %629 = vst [vmem:[%s1052_s28 + $0x120] sm:$0xff] %v580_v30  ;;  %v581_v39 = vmax.f32 %v532_v31, 0.0  ;;  %v533_v40 = vadd.f32 %v895_v17, %v386_v32  ;;  %v807_v41 = vunpack.c.l.bf16 %v933_v28  ;;  %v903_v42 = vunpack.c.l.bf16 %v956_v29  ;;  %v445_v17 = vld [vmem:[%s1016_s20 + $0xc0] sm:$0x3] }
  0x4f   : > { %v534_v43 = vadd.f32 %v896_v26, %v387_v34  ;;  %v388_v44 = vadd.f32 %v1032_v11, %v335_v35  ;;  %v336_v45 = vmul.f32 %v804_v36, %v1021_v0  ;;  %v808_v46 = vunpack.c.h.bf16 %v933_v28 }
  0x50   : > { %630 = vst [vmem:[%s1052_s28 + $0x128] sm:$0xff] %v581_v39  ;;  %v582_v48 = vmax.f32 %v533_v40, 0.0  ;;  %v337_v49 = vmul.f32 %v807_v41, %v1021_v0  ;;  %v904_v50 = vunpack.c.h.bf16 %v956_v29  ;;  %v811_v51 = vunpack.c.l.bf16 %v934_v38 }
  0x51   : > { %v583_v52 = vmax.f32 %v534_v43, 0.0  ;;  %v535_v53 = vadd.f32 %v899_v33, %v388_v44  ;;  %v389_v54 = vadd.f32 %v1032_v11, %v336_v45  ;;  %v338_v55 = vmul.f32 %v808_v46, %v1021_v0 }
  0x52   : > { %631 = vst [vmem:[%s1052_s28 + $0x130] sm:$0xff] %v582_v48  ;;  %v390_v57 = vadd.f32 %v1032_v11, %v337_v49  ;;  %v339_v58 = vmul.f32 %v811_v51, %v1021_v0  ;;  %v907_v59 = vunpack.c.l.bf16 %v957_v47  ;;  %v812_v60 = vunpack.c.h.bf16 %v934_v38 }
  0x53   : > { %632 = vst [vmem:[%s1052_s28 + $0x138] sm:$0xff] %v583_v52  ;;  %v584_v62 = vmax.f32 %v535_v53, 0.0  ;;  %v536_v63 = vadd.f32 %v900_v37, %v389_v54  ;;  %v391_v1 = vadd.f32 %v1032_v11, %v338_v55  ;;  %v908_v2 = vunpack.c.h.bf16 %v957_v47 }
  0x54   : > { %v537_v3 = vadd.f32 %v903_v42, %v390_v57  ;;  %v392_v4 = vadd.f32 %v1032_v11, %v339_v58  ;;  %v340_v5 = vmul.f32 %v812_v60, %v1021_v0  ;;  %v815_v6 = vunpack.c.l.bf16 %v935_v56 }
  0x55   : > { %633 = vst [vmem:[%s1052_s28 + $0x140] sm:$0xff] %v584_v62  ;;  %v585_v8 = vmax.f32 %v536_v63, 0.0  ;;  %v538_v9 = vadd.f32 %v904_v50, %v391_v1  ;;  %v911_v10 = vunpack.c.l.bf16 %v958_v61  ;;  %v816_v12 = vunpack.c.h.bf16 %v935_v56 }
  0x56   : > { %v586_v13 = vmax.f32 %v537_v3, 0.0  ;;  %v539_v14 = vadd.f32 %v907_v59, %v392_v4  ;;  %v393_v15 = vadd.f32 %v1032_v11, %v340_v5  ;;  %v341_v16 = vmul.f32 %v815_v6, %v1021_v0 }
  0x57   : > { %634 = vst [vmem:[%s1052_s28 + $0x148] sm:$0xff] %v585_v8  ;;  %v587_v18 = vmax.f32 %v538_v9, 0.0  ;;  %v342_v19 = vmul.f32 %v816_v12, %v1021_v0  ;;  %v912_v20 = vunpack.c.h.bf16 %v958_v61  ;;  %v290_v21 = vunpack.c.l.bf16 %v241_v7 }
  0x58   : > { %635 = vst [vmem:[%s1052_s28 + $0x150] sm:$0xff] %v586_v13  ;;  %v588_v22 = vmax.f32 %v539_v14, 0.0  ;;  %v540_v23 = vadd.f32 %v908_v2, %v393_v15  ;;  %v394_v24 = vadd.f32 %v1032_v11, %v341_v16  ;;  %v494_v27 = vunpack.c.l.bf16 %v445_v17 }
  0x59   : > { %636 = vst [vmem:[%s1052_s28 + $0x158] sm:$0xff] %v587_v18  ;;  %v395_v25 = vadd.f32 %v1032_v11, %v342_v19  ;;  %v343_v26 = vmul.f32 %v1021_v0, %v290_v21 }
  0x5a   : > { %637 = vst [vmem:[%s1052_s28 + $0x160] sm:$0xff] %v588_v22  ;;  %v589_v28 = vmax.f32 %v540_v23, 0.0  ;;  %v541_v29 = vadd.f32 %v911_v10, %v394_v24 }
  0x5b   : > { %v542_v30 = vadd.f32 %v912_v20, %v395_v25  ;;  %v396_v31 = vadd.f32 %v1032_v11, %v343_v26 }
  0x5c   : > { %638 = vst [vmem:[%s1052_s28 + $0x168] sm:$0xff] %v589_v28  ;;  %v590_v32 = vmax.f32 %v541_v29, 0.0 }
  0x5d   : > { %v591_v33 = vmax.f32 %v542_v30, 0.0  ;;  %v543_v34 = vadd.f32 %v494_v27, %v396_v31 }
  0x5e   : > { %639 = vst [vmem:[%s1052_s28 + $0x170] sm:$0xff] %v590_v32 }
  0x5f   : > { %640 = vst [vmem:[%s1052_s28 + $0x178] sm:$0xff] %v591_v33  ;;  %v592_v35 = vmax.f32 %v543_v34, 0.0 }
  0x61   : > { %641 = vst [vmem:[%s1052_s28 + $0x180] sm:$0xf] %v592_v35 }
  0x62 PF: > { %s13_s12 = sadd.s32 1, %s975_s12  }
  0x63   : > { %p10_p4 = scmp.ge.s32.totalorder %s13_s12, 4  }
  0x65   :  { %12 = sbr.rel (!%p10_p4) target bundleno = 1 (0x1), region = 65 }

// kernel: residual_block_forward.3
= control target key start
LH: loop header
LB: loop body
LE: loop exit
PB: predicated region body
PF: predicated region fallthrough
CT: control target
= control target key end

     0   :  { %s7668_s15 = smov 0   ;;  %s9666_s0 = inlined_call_operand.vmem [shape: bf16[2,388,128], index: 0, kind: input, shape index: {}]   ;;  %s9667_s1 = inlined_call_operand.vmem [shape: bf16[1152,128], index: 1, kind: input, shape index: {}]   ;;  %s9668_s2 = inlined_call_operand.vmem [shape: f32[388,1], index: 2, kind: input, shape index: {}]   ;;  %s9669_s3 = inlined_call_operand.vmem [shape: bf16[2,388,128], index: 3, kind: output, shape index: {0}]   ;;  %s9670_s4 = inlined_call_operand.vmem [shape: f32[2,2,128], index: 4, kind: output, shape index: {1}]  }
   0x1 LB: > { %s5251_s16 = sadd.s32 4294967295, %s7638_s15   ;;  %p5255_p0 = scmp.ge.s32.totalorder %s7638_s15, 1  ;;  %s7638_s15 = sphi %s7668_s15, %s15_s15  }
   0x2   : > { %p165_p1 = scmp.lt.s32.totalorder %s7638_s15, 3 }
   0x4   : > { %p166_p2 = pnand %p5255_p0, %p165_p1 }
   0x6   : > { %169 = sbr.rel (%p166_p2) target bundleno = 1033 (0x409), region = 32 }
   0xd   : > { %v7444_v0 = vld [vmem:[%s9667_s1 + $0x40] sm:$0xff]   ;;  %v9714_v1 = vmov 0.0   ;;  %v7446_v3 = vld [vmem:[%s9667_s1 + $0x48] sm:$0xff]   ;;  %vm7641_vm0 = vmmov 0   ;;  %p195_p3 = scmp.lt.s32.totalorder %s5251_s16, 1  ;;  %v7448_v5 = vld [vmem:[%s9667_s1 + $0x50] sm:$0xff]  }
   0xe   : > { %5885 = vmatprep.subr.bf16.mxu1 %v9714_v1  ;;  %6285 = vmatprep.subr.bf16.mxu0 %v9714_v1  ;;  %v7445_v2 = vld [vmem:[%s9667_s1 + $0x100] sm:$0xff]   ;;  %v7447_v4 = vld [vmem:[%s9667_s1 + $0x108] sm:$0xff]   ;;  %v7449_v6 = vld [vmem:[%s9667_s1 + $0x110] sm:$0xff]   ;;  %vm390_vm1 = vcmask 1044480   ;;  %vm2614_vm2 = vsmask.f32 7424 }
   0xf   : > { %5886 = vmatpush3.bf16.msra.mxu1 %v7444_v0  ;;  %5901 = vmatprep.mubr.msk.bf16.mxu1 %vm7641_vm0, %v9714_v1  ;;  %s9850_s16 = smov (!%p195_p3, %s5251_s16), 1  ;;  %v7450_v7 = vld [vmem:[%s9667_s1 + $0x58] sm:$0xff]   ;;  %v7452_v9 = vld [vmem:[%s9667_s1 + $0x60] sm:$0xff]   ;;  %v7454_v11 = vld [vmem:[%s9667_s1 + $0x68] sm:$0xff]   ;;  %vm704_vm3 = vsmask.f32 5376 }
  0x10   : > { %6286 = vmatpush3.bf16.msra.mxu0 %v7445_v2  ;;  %5887 = vmatprep.subr.bf16.mxu1 %v9714_v1  ;;  %v7451_v8 = vld [vmem:[%s9667_s1 + $0x118] sm:$0xff]   ;;  %s7430_s7 = smul.u32 196, %s9850_s16  ;;  %v7453_v10 = vld [vmem:[%s9667_s1 + $0x120] sm:$0xff]   ;;  %v7455_v12 = vld [vmem:[%s9667_s1 + $0x128] sm:$0xff]   ;;  %vm1182_vm4 = vsmask.f32 4352 }
  0x11   : > { %6287 = vmatprep.subr.bf16.mxu0 %v9714_v1  ;;  %6301 = vmatprep.mubr.msk.bf16.mxu0 %vm7641_vm0, %v9714_v1  ;;  %v7456_v17 = vld [vmem:[%s9667_s1 + $0x70] sm:$0xff]   ;;  %v7458_v22 = vld [vmem:[%s9667_s1 + $0x78] sm:$0xff]   ;;  %v7465_v36 = vld [vmem:[%s9667_s1 + $0x140] sm:$0xff]   ;;  %vm3749_vm5 = vcmask 1046528   ;;  %vm4121_vm6 = vsmask.f32 6400 }
  0x12   : > { %s7727_s14 = scalar_lea.vmem %s9666_s0, %s7430_s7  ;;  %v7457_v21 = vld [vmem:[%s9667_s1 + $0x130] sm:$0xff]   ;;  %v7459_v23 = vld [vmem:[%s9667_s1 + $0x138] sm:$0xff]   ;;  %v7469_v37 = vld [vmem:[%s9667_s1] sm:$0xff]   ;;  %s9186_s27 = scalar_lea.vmem %s9669_s3, %s7430_s7  ;;  %vm4851_vm7 = vcmask 1043456  }
  0x13   : > { %5888 = vmatpush3.bf16.msra.mxu1 %v7446_v3  ;;  %v211_v13 = vld [vmem:[%s7727_s14 + $0x8] sm:$0xf]  ;;  %v268_v14 = vld [vmem:[%s7727_s14 + $0x4] sm:$0x8]  ;;  %v1588_v15 = vld [vmem:[%s7727_s14 + $0x14] sm:$0xf] }
  0x14   : > { %6288 = vmatpush3.bf16.msra.mxu0 %v7447_v4  ;;  %5889 = vmatprep.subr.bf16.mxu1 %v9714_v1  ;;  %v1589_v16 = vld [vmem:[%s7727_s14 + $0x18] sm:$0xf]  ;;  %v7745_v18 = vcombine.low %v268_v14, %v211_v13  ;;  %v7461_v19 = vld [vmem:[%s7727_s14 + $0xc] sm:$0xff]   ;;  %v1590_v26 = vld [vmem:[%s7727_s14 + $0x1c] sm:$0xf] }
  0x15   : > { %6289 = vmatprep.subr.bf16.mxu0 %v9714_v1  ;;  %v7748_v20 = vcombine.low %v1588_v15, %v1589_v16  ;;  %v392_v25 = vrot.slane %v7461_v19, 3  ;;  %v1591_v27 = vld [vmem:[%s7727_s14 + $0x20] sm:$0xf]  ;;  %v1587_v28 = vld [vmem:[%s7727_s14 + $0x10] sm:$0xf]  ;;  %v7775_v34 = vld [vmem:[%s7727_s14 + $0x14] sm:$0xff]   ;;  %v7816_v48 = vcombine.low %v1589_v16, %v1590_v26 }
  0x16   : > { %v391_v24 = vrot.slane %v7745_v18, 3  ;;  %v7766_v29 = vcombine.low %v1590_v26, %v1591_v27  ;;  %v1592_v30 = vld [vmem:[%s7727_s14 + $0x24] sm:$0xf]  ;;  %v1593_v31 = vld [vmem:[%s7727_s14 + $0x28] sm:$0xf]  ;;  %v7772_v33 = vcombine.low %v1587_v28, %v1588_v15  ;;  %v394_v41 = vrot.slane %v7775_v34, 3 }
  0x17   : > { %5890 = vmatpush3.bf16.msra.mxu1 %v7448_v5  ;;  %v7777_v35 = vcombine.low %v1592_v30, %v1593_v31  ;;  %v1594_v38 = vld [vmem:[%s7727_s14 + $0x2c] sm:$0xf]  ;;  %v7789_v39 = vld [vmem:[%s7727_s14 + $0x30] sm:$0xf]  ;;  %v1596_v43 = vld [vmem:[%s7727_s14 + $0x34] sm:$0xf]  ;;  %v5337_v61 = vcombine.low %v1591_v27, %v1592_v30 }
  0x18   : > { %6290 = vmatpush3.bf16.msra.mxu0 %v7449_v6  ;;  %5891 = vmatprep.subr.bf16.mxu1 %v9714_v1  ;;  %v393_v32 = vsel %vm390_vm1, %v391_v24, %v392_v25  ;;  %v7792_v40 = vcombine.low %v1594_v38, %v7789_v39  ;;  %v7470_v42 = vld [vmem:[%s9667_s1 + $0x148] sm:$0xff]   ;;  %v7805_v44 = vld [vmem:[%s7727_s14 + $0x38] sm:$0xf]  ;;  %v395_v47 = vsel %vm390_vm1, %v392_v25, %v394_v41  ;;  %v7819_v49 = vld [vmem:[%s7727_s14 + $0x1c] sm:$0xff]   ;;  %v2618_v54 = vshll.u32 %v7772_v33, 16 }
  0x19   : > { %6291 = vmatprep.subr.bf16.mxu0 %v9714_v1  ;;  %v7478_v45 = vld [vmem:[%s9667_s1 + $0x8] sm:$0xff]   ;;  %v7812_v46 = vcombine.low %v1596_v43, %v7805_v44  ;;  %v7822_v50 = vld [vmem:[%s7727_s14 + $0x3c] sm:$0xf]  ;;  %v7825_v51 = vld [vmem:[%s7727_s14 + $0x40] sm:$0xf]  ;;  %v2623_v58 = vshll.u32 %v7816_v48, 16  ;;  %v5338_v5 = vcombine.low %v1593_v31, %v1594_v38  ;;  %v7893_v19 = vcombine.low %v7789_v39, %v1596_v43 }
  0x1a   : > { %v7474_v52 = vld [vmem:[%s9667_s1 + $0x150] sm:$0xff]   ;;  %v7832_v53 = vcombine.low %v7822_v50, %v7825_v51  ;;  %v7840_v56 = vld [vmem:[%s7727_s14 + $0x44] sm:$0xf]  ;;  %v7844_v57 = vld [vmem:[%s7727_s14 + $0x48] sm:$0xf]  ;;  %v396_v59 = vrot.slane %v7819_v49, 3 }
  0x1b   : > { %5892 = vmatpush3.bf16.msra.mxu1 %v7450_v7  ;;  %v7490_v55 = vld [vmem:[%s9667_s1 + $0x10] sm:$0xff]   ;;  %v7853_v60 = vcombine.low %v7840_v56, %v7844_v57  ;;  %v7482_v62 = vld [vmem:[%s9667_s1 + $0x158] sm:$0xff]   ;;  %v2616_v63 = vshrl.u32 %v7772_v33, 16  ;;  %v2620_v0 = vrot.slane %v2618_v54, 1  ;;  %v7863_v2 = vld [vmem:[%s7727_s14 + $0x4c] sm:$0xf] }
  0x1c   : > { %6292 = vmatpush3.bf16.msra.mxu0 %v7451_v8  ;;  %5893 = vmatprep.subr.bf16.mxu1 %v9714_v1  ;;  %v7866_v3 = vld [vmem:[%s7727_s14 + $0x50] sm:$0xf]  ;;  %v7869_v4 = vld [vmem:[%s7727_s14 + $0x24] sm:$0xff]   ;;  %v2631_v7 = vshll.u32 %v5337_v61, 16  ;;  %v2625_v8 = vrot.slane %v2623_v58, 1  ;;  %v7500_v14 = vld [vmem:[%s9667_s1 + $0x18] sm:$0xff]  }
  0x1d   : > { %6293 = vmatprep.subr.bf16.mxu0 %v9714_v1  ;;  %v7873_v6 = vcombine.low %v7863_v2, %v7866_v3  ;;  %v7883_v13 = vld [vmem:[%s7727_s14 + $0x54] sm:$0xf]  ;;  %v7889_v15 = vld [vmem:[%s7727_s14 + $0x58] sm:$0xf]  ;;  %v2635_v16 = vshrl.u32 %v5337_v61, 16  ;;  %v2643_v24 = vshrl.u32 %v5338_v5, 16  ;;  %v2621_v27 = vor.u32 %v2620_v0, %v2616_v63 }
  0x1e   : > { %v7907_v25 = vld [vmem:[%s7727_s14 + $0x5c] sm:$0xf]  ;;  %v7910_v26 = vld [vmem:[%s7727_s14 + $0x60] sm:$0xf]  ;;  %v2647_v30 = vshll.u32 %v7893_v19, 16  ;;  %v7937_v43 = vld [vmem:[%s7727_s14 + $0x2c] sm:$0xff]  }
  0x1f   : > { %5894 = vmatpush3.bf16.msra.mxu1 %v7452_v9  ;;  %v397_v9 = vsel %vm390_vm1, %v394_v41, %v396_v59  ;;  %v7915_v31 = vld [vmem:[%s7727_s14 + $0x64] sm:$0xf]  ;;  %v7928_v39 = vld [vmem:[%s7727_s14 + $0x70] sm:$0xf]  ;;  %v7952_v54 = vsel %vm2614_vm2, %v2621_v27, %v2625_v8  ;;  %v7503_v0 = vld [vmem:[%s9667_s1 + $0x178] sm:$0xff]   ;;  %v5344_v27 = vcombine.low %v7889_v15, %v7907_v25 }
  0x20   : > { %6294 = vmatpush3.bf16.msra.mxu0 %v7453_v10  ;;  %5895 = vmatprep.subr.bf16.mxu1 %v9714_v1  ;;  %v2627_v10 = vshrl.u32 %v7816_v48, 16 }
  0x21   : > { %6295 = vmatprep.subr.bf16.mxu0 %v9714_v1 }
  0x23   : > { %5896 = vmatpush3.bf16.msra.mxu1 %v7454_v11  ;;  %v7486_v11 = vld [vmem:[%s9667_s1 + $0x160] sm:$0xff]  }
  0x24   : > { %6296 = vmatpush3.bf16.msra.mxu0 %v7455_v12  ;;  %5897 = vmatprep.subr.bf16.mxu1 %v9714_v1  ;;  %v2639_v12 = vshll.u32 %v5338_v5, 16 }
  0x25   : > { %6297 = vmatprep.subr.bf16.mxu0 %v9714_v1 }
  0x26   : > { %v2641_v28 = vrot.slane %v2639_v12, 1 }
  0x27   : > { %5898 = vmatpush3.bf16.msra.mxu1 %v7456_v17  ;;  %v398_v17 = vrot.slane %v7869_v4, 3 }
  0x28   : > { %6298 = vmatpush3.bf16.msra.mxu0 %v7457_v21  ;;  %5899 = vmatprep.subr.bf16.mxu1 %v9714_v1  ;;  %v7897_v21 = vcombine.low %v7883_v13, %v7889_v15  ;;  %v7526_v15 = vld [vmem:[%s9667_s1 + $0x38] sm:$0xff]  }
  0x29   : > { %6299 = vmatprep.subr.bf16.mxu0 %v9714_v1 }
  0x2b   : > { %5900 = vmatpush3.bf16.msra.mxu1 %v7458_v22  ;;  %v2633_v22 = vrot.slane %v2631_v7, 1 }
  0x2c   : > { %6300 = vmatpush3.bf16.msra.mxu0 %v7459_v23  ;;  %5985 = vmatprep.subr.bf16.mxu1 %v9714_v1  ;;  %v7494_v23 = vld [vmem:[%s9667_s1 + $0x168] sm:$0xff]  }
  0x2d   : > { %6385 = vmatprep.subr.bf16.mxu0 %v9714_v1  ;;  %v2637_v38 = vor.u32 %v2635_v16, %v2633_v22 }
  0x2e   : > { %5902 = vmatmul.mubr.bf16.vlgmr.msra.gmra.mrb[0].mxu1 %v393_v32  ;;  %v7918_v32 = vld [vmem:[%s7727_s14 + $0x68] sm:$0xf] }
  0x2f   : > { %6302 = vmatmul.mubr.bf16.vlgmr.msra.gmra.mrb[0].mxu0 %v7772_v33  ;;  %5905 = vmatprep.mubr.msk.bf16.mxu1 %vm7641_vm0, %v9714_v1  ;;  %v7921_v33 = vld [vmem:[%s7727_s14 + $0x6c] sm:$0xf]  ;;  %v7932_v41 = vcombine.low %v7915_v31, %v7918_v32 }
  0x30   : > { %6386 = vmatpush3.bf16.msra.mxu0 %v7465_v36  ;;  %6305 = vmatprep.mubr.msk.bf16.mxu0 %vm7641_vm0, %v9714_v1  ;;  %v7925_v36 = vcombine.low %v7907_v25, %v7910_v26  ;;  %v8021_v25 = vcombine.low %v7910_v26, %v7915_v31 }
  0x31   : > { %5986 = vmatpush3.bf16.msra.mxu1 %v7469_v37  ;;  %6387 = vmatprep.subr.bf16.mxu0 %v9714_v1  ;;  %v2629_v37 = vor.u32 %v2627_v10, %v2625_v8  ;;  %v7517_v8 = vld [vmem:[%s9667_s1 + $0x28] sm:$0xff]  }
  0x32   : > { %5987 = vmatprep.subr.bf16.mxu1 %v9714_v1 }
  0x33   : > { %v7958_v58 = vsel %vm2614_vm2, %v2629_v37, %v2633_v22 }
  0x34   : > { %6388 = vmatpush3.bf16.msra.mxu0 %v7470_v42  ;;  %v399_v42 = vsel %vm390_vm1, %v396_v59, %v398_v17  ;;  %v2651_v59 = vshrl.u32 %v7893_v19, 16 }
  0x35   : > { %6389 = vmatprep.subr.bf16.mxu0 %v9714_v1  ;;  %5988 = vmatpush3.bf16.msra.mxu1 %v7478_v45  ;;  %v7941_v45 = vcombine.low %v7921_v33, %v7928_v39 }
  0x36   : > { %5906 = vmatmul.mubr.bf16.gmra.mrb[4].mxu1 %v395_v47  ;;  %5989 = vmatprep.subr.bf16.mxu1 %v9714_v1  ;;  %v2645_v47 = vor.u32 %v2643_v24, %v2641_v28  ;;  %v7521_v24 = vld [vmem:[%s9667_s1 + $0x30] sm:$0xff]  }
  0x37   : > { %6306 = vmatmul.mubr.bf16.gmra.mrb[4].mxu0 %v7816_v48  ;;  %5909 = vmatprep.mubr.msk.bf16.mxu1 %vm7641_vm0, %v9714_v1  ;;  %v7945_v48 = vcombine.low %v7805_v44, %v7822_v50  ;;  %v7961_v44 = vsel %vm2614_vm2, %v2637_v38, %v2641_v28  ;;  %v2649_v50 = vrot.slane %v2647_v30, 1 }
  0x38   : > { %6309 = vmatprep.mubr.msk.bf16.mxu0 %vm7641_vm0, %v9714_v1  ;;  %6390 = vmatpush3.bf16.msra.mxu0 %v7474_v52  ;;  %v7498_v52 = vld [vmem:[%s9667_s1 + $0x170] sm:$0xff]  }
  0x39   : > { %6391 = vmatprep.subr.bf16.mxu0 %v9714_v1  ;;  %5990 = vmatpush3.bf16.msra.mxu1 %v7490_v55  ;;  %v7512_v55 = vld [vmem:[%s9667_s1 + $0x20] sm:$0xff]   ;;  %v2655_v63 = vshll.u32 %v7945_v48, 16  ;;  %v2653_v7 = vor.u32 %v2651_v59, %v2649_v50 }
  0x3a   : > { %5991 = vmatprep.subr.bf16.mxu1 %v9714_v1 }
  0x3c   : > { %6392 = vmatpush3.bf16.msra.mxu0 %v7482_v62  ;;  %v7968_v62 = vsel %vm2614_vm2, %v2645_v47, %v2649_v50 }
  0x3d   : > { %6393 = vmatprep.subr.bf16.mxu0 %v9714_v1  ;;  %5992 = vmatpush3.bf16.msra.mxu1 %v7500_v14  ;;  %v2659_v14 = vshrl.u32 %v7945_v48, 16 }
  0x3e   : > { %5910 = vmatmul.mubr.bf16.gmra.mrb[8].mxu1 %v397_v9  ;;  %5993 = vmatprep.subr.bf16.mxu1 %v9714_v1  ;;  %v2657_v9 = vrot.slane %v2655_v63, 1 }
  0x3f   : > { %6310 = vmatmul.mubr.bf16.gmra.mrb[8].mxu0 %v5337_v61  ;;  %5913 = vmatprep.mubr.msk.bf16.mxu1 %vm7641_vm0, %v9714_v1  ;;  %v400_v61 = vrot.slane %v7937_v43, 3 }
  0x40   : > { %6313 = vmatprep.mubr.msk.bf16.mxu0 %vm7641_vm0, %v9714_v1  ;;  %6394 = vmatpush3.bf16.msra.mxu0 %v7486_v11  ;;  %v5341_v11 = vcombine.low %v7825_v51, %v7840_v56  ;;  %v7988_v12 = vsel %vm2614_vm2, %v2653_v7, %v2657_v9  ;;  %v5343_v51 = vcombine.low %v7866_v3, %v7883_v13  ;;  %v8012_v3 = vld [vmem:[%s7727_s14 + $0x3c] sm:$0xff]   ;;  %v2695_v7 = vshll.u32 %v8021_v25, 16 }
  0x41   : > { %6395 = vmatprep.subr.bf16.mxu0 %v9714_v1  ;;  %5994 = vmatpush3.bf16.msra.mxu1 %v7512_v55  ;;  %v401_v10 = vsel %vm390_vm1, %v398_v17, %v400_v61  ;;  %v2661_v17 = vor.u32 %v2659_v14, %v2657_v9  ;;  %v404_v26 = vrot.slane %v8012_v3, 3  ;;  %v8048_v14 = vld [vmem:[%s7727_s14 + $0x44] sm:$0xff]  }
  0x42   : > { %5995 = vmatprep.subr.bf16.mxu1 %v9714_v1  ;;  %v2663_v16 = vshll.u32 %v5341_v11, 16  ;;  %v2679_v30 = vshll.u32 %v5343_v51, 16  ;;  %v2683_v47 = vshrl.u32 %v5343_v51, 16  ;;  %v8040_v9 = vrot.slane %v2695_v7, 1 }
  0x44   : > { %6396 = vmatpush3.bf16.msra.mxu0 %v7494_v23  ;;  %v5342_v23 = vcombine.low %v7844_v57, %v7863_v2  ;;  %v2665_v56 = vrot.slane %v2663_v16, 1  ;;  %v2667_v57 = vshrl.u32 %v5341_v11, 16  ;;  %v406_v16 = vrot.slane %v8048_v14, 3 }
  0x45   : > { %6397 = vmatprep.subr.bf16.mxu0 %v9714_v1  ;;  %5996 = vmatpush3.bf16.msra.mxu1 %v7517_v8 }
  0x46   : > { %5914 = vmatmul.mubr.bf16.gmra.mrb[12].mxu1 %v399_v42  ;;  %5997 = vmatprep.subr.bf16.mxu1 %v9714_v1  ;;  %v2671_v2 = vshll.u32 %v5342_v23, 16  ;;  %v2675_v28 = vshrl.u32 %v5342_v23, 16  ;;  %v2669_v13 = vor.u32 %v2667_v57, %v2665_v56  ;;  %v2681_v42 = vrot.slane %v2679_v30, 1 }
  0x47   : > { %6314 = vmatmul.mubr.bf16.gmra.mrb[12].mxu0 %v5338_v5  ;;  %5917 = vmatprep.mubr.msk.bf16.mxu1 %vm7641_vm0, %v9714_v1  ;;  %v7977_v5 = vld [vmem:[%s7727_s14 + $0x34] sm:$0xff]  }
  0x48   : > { %6317 = vmatprep.mubr.msk.bf16.mxu0 %vm7641_vm0, %v9714_v1  ;;  %6398 = vmatpush3.bf16.msra.mxu0 %v7498_v52  ;;  %v402_v22 = vrot.slane %v7977_v5, 3  ;;  %v2673_v37 = vrot.slane %v2671_v2, 1  ;;  %v2687_v52 = vshll.u32 %v5344_v27, 16  ;;  %v2685_v59 = vor.u32 %v2683_v47, %v2681_v42  ;;  %v8075_v2 = vld [vmem:[%s7727_s14 + $0x5c] sm:$0xff]   ;;  %v7515_v47 = vld [vmem:[%s9667_s1 + $0x188] sm:$0xff]  }
  0x49   : > { %6399 = vmatprep.subr.bf16.mxu0 %v9714_v1  ;;  %5998 = vmatpush3.bf16.msra.mxu1 %v7521_v24 }
  0x4a   : > { %5999 = vmatprep.subr.bf16.mxu1 %v9714_v1  ;;  %v403_v38 = vsel %vm390_vm1, %v400_v61, %v402_v22  ;;  %v8024_v55 = vsel %vm2614_vm2, %v2669_v13, %v2673_v37  ;;  %v2677_v50 = vor.u32 %v2675_v28, %v2673_v37  ;;  %v2689_v63 = vrot.slane %v2687_v52, 1  ;;  %v8083_v28 = vld [vmem:[%s7727_s14 + $0x64] sm:$0xff]   ;;  %v8093_v13 = vld [vmem:[%s7727_s14 + $0x6c] sm:$0xff]   ;;  %v8110_v52 = vld [vmem:[%s7727_s14 + $0x74] sm:$0xff]  }
  0x4b   : > { %v2691_v61 = vshrl.u32 %v5344_v27, 16 }
  0x4c   : > { %6400 = vmatpush3.bf16.msra.mxu0 %v7503_v0  ;;  %v8027_v0 = vsel %vm2614_vm2, %v2677_v50, %v2681_v42  ;;  %v8036_v31 = vsel %vm2614_vm2, %v2685_v59, %v2689_v63  ;;  %v416_v42 = vrot.slane %v8093_v13, 3  ;;  %v418_v50 = vrot.slane %v8110_v52, 3  ;;  %v7525_v59 = vld [vmem:[%s9667_s1 + $0x198] sm:$0xff]  }
  0x4d   : > { %6485 = vmatprep.subr.bf16.mxu0 %v9714_v1  ;;  %6000 = vmatpush3.bf16.msra.mxu1 %v7526_v15  ;;  %v2693_v8 = vor.u32 %v2691_v61, %v2689_v63  ;;  %v7520_v15 = vld [vmem:[%s9667_s1 + $0x190] sm:$0xff]   ;;  %v8129_v61 = vld [vmem:[%s7727_s14 + $0x7c] sm:$0xff]  }
  0x4e   : > { %5918 = vmatmul.mubr.bf16.gmra.mrb[16].mxu1 %v401_v10  ;;  %6085 = vmatprep.subr.bf16.mxu1 %v9714_v1  ;;  %v419_v63 = vsel %vm390_vm1, %v416_v42, %v418_v50  ;;  %v420_v7 = vrot.slane %v8129_v61, 3 }
  0x4f   : > { %6318 = vmatmul.mubr.bf16.gmra.mrb[16].mxu0 %v7893_v19  ;;  %5921 = vmatprep.mubr.msk.bf16.mxu1 %vm7641_vm0, %v9714_v1  ;;  %v8009_v19 = vsel %vm2614_vm2, %v2661_v17, %v2665_v56  ;;  %v8044_v10 = vsel %vm2614_vm2, %v2693_v8, %v8040_v9  ;;  %v407_v17 = vsel %vm390_vm1, %v404_v26, %v406_v16  ;;  %v8057_v56 = vld [vmem:[%s7727_s14 + $0x4c] sm:$0xff]  }
  0x50   : > { %6321 = vmatprep.mubr.msk.bf16.mxu0 %vm7641_vm0, %v9714_v1  ;;  %v421_v8 = vsel %vm390_vm1, %v418_v50, %v420_v7 }
  0x56   : > { %5922 = vmatmul.mubr.bf16.gmra.mrb[20].mxu1 %v403_v38  ;;  %v7511_v38 = vld [vmem:[%s9667_s1 + $0x180] sm:$0xff]  }
  0x57   : > { %6322 = vmatmul.mubr.bf16.gmra.mrb[20].mxu0 %v7945_v48  ;;  %5925 = vmatprep.mubr.msk.bf16.mxu1 %vm7641_vm0, %v9714_v1  ;;  %v405_v48 = vsel %vm390_vm1, %v402_v22, %v404_v26  ;;  %v8065_v22 = vld [vmem:[%s7727_s14 + $0x54] sm:$0xff]   ;;  %v7532_v26 = vld [vmem:[%s9667_s1 + $0x1a8] sm:$0xff]  }
  0x58   : > { %6325 = vmatprep.mubr.msk.bf16.mxu0 %vm7641_vm0, %v9714_v1 }
  0x5e   : > { %5926 = vmatmul.mubr.bf16.gmra.mrb[24].mxu1 %v405_v48  ;;  %v8147_v48 = vld [vmem:[%s7727_s14 + $0x84] sm:$0xff]  }
  0x5f   : > { %6326 = vmatmul.mubr.bf16.gmra.mrb[24].mxu0 %v5341_v11  ;;  %5929 = vmatprep.mubr.msk.bf16.mxu1 %vm7641_vm0, %v9714_v1  ;;  %v408_v11 = vrot.slane %v8057_v56, 3 }
  0x60   : > { %6329 = vmatprep.mubr.msk.bf16.mxu0 %vm7641_vm0, %v9714_v1 }
  0x61   : > { %v409_v24 = vsel %vm390_vm1, %v406_v16, %v408_v11  ;;  %v422_v16 = vrot.slane %v8147_v48, 3 }
  0x66   : > { %5930 = vmatmul.mubr.bf16.gmra.mrb[28].mxu1 %v407_v17  ;;  %v7541_v17 = vld [vmem:[%s9667_s1 + $0x1b8] sm:$0xff]  }
  0x67   : > { %6330 = vmatmul.mubr.bf16.gmra.mrb[28].mxu0 %v5342_v23  ;;  %5933 = vmatprep.mubr.msk.bf16.mxu1 %vm7641_vm0, %v9714_v1  ;;  %v410_v23 = vrot.slane %v8065_v22, 3 }
  0x68   : > { %6333 = vmatprep.mubr.msk.bf16.mxu0 %vm7641_vm0, %v9714_v1 }
  0x69   : > { %v411_v57 = vsel %vm390_vm1, %v408_v11, %v410_v23  ;;  %v423_v11 = vsel %vm390_vm1, %v420_v7, %v422_v16 }
  0x6e   : > { %5934 = vmatmul.mubr.bf16.gmra.mrb[32].mxu1 %v409_v24  ;;  %v8165_v24 = vld [vmem:[%s7727_s14 + $0x8c] sm:$0xff]  }
  0x6f   : > { %6334 = vmatmul.mubr.bf16.gmra.mrb[32].mxu0 %v5343_v51  ;;  %5937 = vmatprep.mubr.msk.bf16.mxu1 %vm7641_vm0, %v9714_v1  ;;  %v412_v51 = vrot.slane %v8075_v2, 3 }
  0x70   : > { %6337 = vmatprep.mubr.msk.bf16.mxu0 %vm7641_vm0, %v9714_v1 }
  0x71   : > { %v413_v30 = vsel %vm390_vm1, %v410_v23, %v412_v51 }
  0x76   : > { %5938 = vmatmul.mubr.bf16.gmra.mrb[36].mxu1 %v411_v57  ;;  %v8176_v57 = vld [vmem:[%s7727_s14 + $0x94] sm:$0xff]  }
  0x77   : > { %6338 = vmatmul.mubr.bf16.gmra.mrb[36].mxu0 %v5344_v27  ;;  %5941 = vmatprep.mubr.msk.bf16.mxu1 %vm7641_vm0, %v9714_v1  ;;  %v414_v27 = vrot.slane %v8083_v28, 3 }
  0x78   : > { %6341 = vmatprep.mubr.msk.bf16.mxu0 %vm7641_vm0, %v9714_v1 }
  0x79   : > { %v415_v37 = vsel %vm390_vm1, %v412_v51, %v414_v27 }
  0x7e   : > { %5942 = vmatmul.mubr.bf16.gmra.mrb[40].mxu1 %v413_v30  ;;  %v8186_v30 = vld [vmem:[%s7727_s14 + $0x9c] sm:$0xff]  }
  0x7f   : > { %6342 = vmatmul.mubr.bf16.gmra.mrb[40].mxu0 %v8021_v25  ;;  %5945 = vmatprep.mubr.msk.bf16.mxu1 %vm7641_vm0, %v9714_v1 }
  0x80   : > { %6401 = vmatprep.mubr.msk.bf16.mxu0 %vm7641_vm0, %v9714_v1 }
  0x86   : > { %5946 = vmatmul.mubr.bf16.gmra.mrb[44].mxu1 %v415_v37  ;;  %v251_v37 = vld [vmem:[%s7727_s14 + $0xa8] sm:$0x1] }
  0x87   : > { %6402 = vmatmul.mubr.bf16.vlgmr.msra.gmra.mrb[0].mxu0 %v7952_v54  ;;  %5949 = vmatprep.mubr.msk.bf16.mxu1 %vm7641_vm0, %v9714_v1  ;;  %v417_v54 = vsel %vm390_vm1, %v414_v27, %v416_v42  ;;  %v250_v27 = vld [vmem:[%s7727_s14 + $0xa4] sm:$0xf] }
  0x88   : > { %6486 = vmatpush3.bf16.msra.mxu0 %v7511_v38  ;;  %6405 = vmatprep.mubr.msk.bf16.mxu0 %vm7641_vm0, %v9714_v1  ;;  %v8197_v42 = vcombine.low %v250_v27, %v251_v37 }
  0x89   : > { %6487 = vmatprep.subr.bf16.mxu0 %v9714_v1 }
  0x8c   : > { %6488 = vmatpush3.bf16.msra.mxu0 %v7515_v47  ;;  %v210_v47 = vld [vmem:[%s7727_s14 + $0x4] sm:$0xc] }
  0x8d   : > { %6489 = vmatprep.subr.bf16.mxu0 %v9714_v1 }
  0x8e   : > { %5950 = vmatmul.mubr.bf16.gmra.mrb[48].mxu1 %v417_v54  ;;  %v7605_v54 = vld [vmem:[%s7727_s14 + $0x8] sm:$0xf] }
  0x8f   : > { %6406 = vmatmul.mubr.bf16.gmra.mrb[4].mxu0 %v7958_v58  ;;  %5953 = vmatprep.mubr.msk.bf16.mxu1 %vm7641_vm0, %v9714_v1  ;;  %v7527_v58 = vld [vmem:[%s9667_s1 + $0x1a0] sm:$0xff]  }
  0x90   : > { %6409 = vmatprep.mubr.msk.bf16.mxu0 %vm7641_vm0, %v9714_v1  ;;  %6490 = vmatpush3.bf16.msra.mxu0 %v7520_v15  ;;  %v5288_v15 = vcombine.low %v210_v47, %v7605_v54  ;;  %v1614_v54 = vld [vmem:[%s7727_s14 + $0x7c] sm:$0xf] }
  0x91   : > { %6491 = vmatprep.subr.bf16.mxu0 %v9714_v1 }
  0x94   : > { %6492 = vmatpush3.bf16.msra.mxu0 %v7525_v59  ;;  %v709_v59 = vshll.u32 %v5288_v15, 16 }
  0x95   : > { %6493 = vmatprep.subr.bf16.mxu0 %v9714_v1 }
  0x96   : > { %5954 = vmatmul.mubr.bf16.gmra.mrb[52].mxu1 %v419_v63  ;;  %v8212_v63 = vld [vmem:[%s7727_s14 + $0xc] sm:$0xff]  }
  0x97   : > { %6410 = vmatmul.mubr.bf16.gmra.mrb[8].mxu0 %v7961_v44  ;;  %5957 = vmatprep.mubr.msk.bf16.mxu1 %vm7641_vm0, %v9714_v1  ;;  %v7536_v44 = vld [vmem:[%s9667_s1 + $0x1b0] sm:$0xff]   ;;  %v9704_v7 = vshll.u32 %v8212_v63, 16 }
  0x98   : > { %6413 = vmatprep.mubr.msk.bf16.mxu0 %vm7641_vm0, %v9714_v1  ;;  %6494 = vmatpush3.bf16.msra.mxu0 %v7527_v58  ;;  %v9709_v58 = vshrl.u32 %v8212_v63, 16 }
  0x99   : > { %6495 = vmatprep.subr.bf16.mxu0 %v9714_v1 }
  0x9c   : > { %6496 = vmatpush3.bf16.msra.mxu0 %v7532_v26  ;;  %v8218_v26 = vcombine.low %v7918_v32, %v7921_v33 }
  0x9d   : > { %6497 = vmatprep.subr.bf16.mxu0 %v9714_v1 }
  0x9e   : > { %5958 = vmatmul.mubr.bf16.gmra.mrb[56].mxu1 %v421_v8  ;;  %9756 = vst [vmem:[#allocation2_spill] sm:$0xff] %v8218_v26 }
  0x9f   : > { %6414 = vmatmul.mubr.bf16.gmra.mrb[12].mxu0 %v7968_v62  ;;  %5961 = vmatprep.mubr.msk.bf16.mxu1 %vm7641_vm0, %v9714_v1  ;;  %v424_v62 = vrot.slane %v8165_v24, 3 }
  0xa0   : > { %6417 = vmatprep.mubr.msk.bf16.mxu0 %vm7641_vm0, %v9714_v1  ;;  %6498 = vmatpush3.bf16.msra.mxu0 %v7536_v44  ;;  %v716_v44 = vrot.slane %v9709_v58, 2  ;;  %v8572_v58 = vld [vmem:[%s7727_s14 + $0x48] sm:$0xff]  }
  0xa1   : > { %6499 = vmatprep.subr.bf16.mxu0 %v9714_v1  ;;  %v425_v23 = vsel %vm390_vm1, %v422_v16, %v424_v62  ;;  %v719_v16 = vrot.slane %v9704_v7, 3  ;;  %v8543_v7 = vld [vmem:[%s7727_s14 + $0x40] sm:$0xff]  }
  0xa3   : > { %v720_v33 = vor.u32 %v719_v16, %v716_v44  ;;  %v7533_v44 = vld [vmem:[%s9667_s1 + $0x88] sm:$0xff]  }
  0xa4   : > { %6500 = vmatpush3.bf16.msra.mxu0 %v7541_v17  ;;  %v2699_v17 = vshrl.u32 %v8021_v25, 16 }
  0xa5   : > { %6585 = vmatprep.subr.bf16.mxu0 %v9714_v1 }
  0xa6   : > { %5962 = vmatmul.mubr.bf16.gmra.mrb[60].mxu1 %v423_v11  ;;  %v2703_v11 = vshll.u32 %v8218_v26, 16  ;;  %v2701_v25 = vor.u32 %v2699_v17, %v8040_v9  ;;  %v7529_v9 = vld [vmem:[%s9667_s1 + $0x80] sm:$0xff]  }
  0xa7   : > { %6418 = vmatmul.mubr.bf16.gmra.mrb[16].mxu0 %v7988_v12  ;;  %5965 = vmatprep.mubr.msk.bf16.mxu1 %vm7641_vm0, %v9714_v1  ;;  %v426_v12 = vrot.slane %v8176_v57, 3 }
  0xa8   : > { %6421 = vmatprep.mubr.msk.bf16.mxu0 %vm7641_vm0, %v9714_v1 }
  0xa9   : > { %v427_v51 = vsel %vm390_vm1, %v424_v62, %v426_v12  ;;  %v1612_v62 = vld [vmem:[%s7727_s14 + $0x74] sm:$0xf] }
  0xae   : > { %5966 = vmatmul.mubr.bf16.gmra.mrb[64].mxu1 %v425_v23  ;;  %v9699_v23 = vshrl.u32 %v7775_v34, 16 }
  0xaf   : > { %6422 = vmatmul.mubr.bf16.gmra.mrb[20].mxu0 %v8009_v19  ;;  %5969 = vmatprep.mubr.msk.bf16.mxu1 %vm7641_vm0, %v9714_v1  ;;  %v428_v19 = vrot.slane %v8186_v30, 3 }
  0xb0   : > { %6425 = vmatprep.mubr.msk.bf16.mxu0 %vm7641_vm0, %v9714_v1  ;;  %v725_v27 = vrot.slane %v9699_v23, 2  ;;  %v8514_v23 = vld [vmem:[%s7727_s14 + $0x38] sm:$0xff]  }
  0xb1   : > { %v429_v38 = vsel %vm390_vm1, %v426_v12, %v428_v19  ;;  %v9681_v12 = vshll.u32 %v7775_v34, 16 }
  0xb3   : > { %v728_v37 = vrot.slane %v9681_v12, 3  ;;  %v1626_v12 = vld [vmem:[%s7727_s14 + $0xac] sm:$0xf] }
  0xb6   : > { %5970 = vmatmul.mubr.bf16.gmra.mrb[68].mxu1 %v427_v51  ;;  %v2705_v51 = vrot.slane %v2703_v11, 1 }
  0xb7   : > { %6426 = vmatmul.mubr.bf16.gmra.mrb[24].mxu0 %v8024_v55  ;;  %5973 = vmatprep.mubr.msk.bf16.mxu1 %vm7641_vm0, %v9714_v1  ;;  %v430_v55 = vrot.slane %v8197_v42, 3 }
  0xb8   : > { %6429 = vmatprep.mubr.msk.bf16.mxu0 %vm7641_vm0, %v9714_v1 }
  0xb9   : > { %v431_v50 = vsel %vm390_vm1, %v428_v19, %v430_v55 }
  0xbe   : > { %5974 = vmatmul.mubr.bf16.gmra.mrb[72].mxu1 %v429_v38  ;;  %v2706_v38 = vsel %vm2614_vm2, %v2701_v25, %v2705_v51 }
  0xbf   : > { %6430 = vmatmul.mubr.bf16.gmra.mrb[28].mxu0 %v8027_v0  ;;  %5977 = vmatprep.mubr.msk.bf16.mxu1 %vm7641_vm0, %v9714_v1  ;;  %v706_v0 = vshrl.u32 %v5288_v15, 16  ;;  %v729_v15 = vor.u32 %v728_v37, %v725_v27  ;;  %v1616_v27 = vld [vmem:[%s7727_s14 + $0x84] sm:$0xf]  ;;  %v9676_v37 = vshrl.u32 %v7869_v4, 16 }
  0xc0   : > { %6433 = vmatprep.mubr.msk.bf16.mxu0 %vm7641_vm0, %v9714_v1 }
  0xc1   : > { %v708_v8 = vrot.slane %v706_v0, 2  ;;  %v9677_v0 = vshll.u32 %v7819_v49, 16  ;;  %v730_v16 = vsel %vm704_vm3, %v720_v33, %v729_v15 }
  0xc3   : > { %v737_v11 = vrot.slane %v9677_v0, 3  ;;  %v1623_v0 = vld [vmem:[%s7727_s14 + $0xa0] sm:$0xf] }
  0xc6   : > { %5978 = vmatmul.mubr.bf16.gmra.mrb[76].mxu1 %v431_v50  ;;  %v9678_v50 = vshrl.u32 %v7819_v49, 16 }
  0xc7   : > { %6434 = vmatmul.mubr.bf16.gmra.mrb[32].mxu0 %v8036_v31  ;;  %5981 = vmatprep.mubr.msk.bf16.mxu1 %vm7641_vm0, %v9714_v1  ;;  %v711_v31 = vrot.slane %v709_v59, 3 }
  0xc8   : > { %6437 = vmatprep.mubr.msk.bf16.mxu0 %vm7641_vm0, %v9714_v1  ;;  %v734_v17 = vrot.slane %v9678_v50, 2  ;;  %v1624_v50 = vld [vmem:[%s7727_s14 + $0xa4] sm:$0xf] }
  0xc9   : > { %v712_v32 = vor.u32 %v711_v31, %v708_v8 }
  0xcb   : > { %v721_v19 = vsel %vm704_vm3, %v712_v32, %v720_v33  ;;  %v738_v33 = vor.u32 %v737_v11, %v734_v17  ;;  %v7547_v11 = vld [vmem:[%s9667_s1 + $0xa0] sm:$0xff]  }
  0xce   : > { %5982 = vmatmul.mubr.bf16.gmra.mrb[80].mxu1 %v430_v55  ;;  %v2707_v55 = vshrl.u32 %v8218_v26, 16 }
  0xcf   : > { %6438 = vmatmul.mubr.bf16.gmra.mrb[36].mxu0 %v8044_v10  ;;  %6001 = vmatprep.mubr.msk.bf16.mxu1 %vm7641_vm0, %v9714_v1  ;;  %v8238_v10 = vcombine.low %v7928_v39, %v1612_v62  ;;  %v1613_v39 = vld [vmem:[%s7727_s14 + $0x78] sm:$0xf] }
  0xd0   : > { %6441 = vmatprep.mubr.msk.bf16.mxu0 %vm7641_vm0, %v9714_v1  ;;  %v2709_v59 = vor.u32 %v2707_v55, %v2705_v51  ;;  %v8259_v31 = vcombine.low %v1613_v39, %v1614_v54  ;;  %v7538_v51 = vld [vmem:[%s9667_s1 + $0x90] sm:$0xff]   ;;  %v7542_v39 = vld [vmem:[%s9667_s1 + $0x98] sm:$0xff]   ;;  %v739_v54 = vsel %vm704_vm3, %v729_v15, %v738_v33 }
  0xd1   : > { %9757 = vst [vmem:[#allocation3_spill] sm:$0xff] %v8238_v10  ;;  %v2711_v47 = vshll.u32 %v8238_v10, 16  ;;  %v2715_v32 = vshrl.u32 %v8238_v10, 16 }
  0xd2   : > { %9758 = vst [vmem:[#allocation4_spill] sm:$0xff] %v8259_v31  ;;  %v2719_v25 = vshll.u32 %v8259_v31, 16 }
  0xd3   : > { %v2713_v8 = vrot.slane %v2711_v47, 1 }
  0xd4   : > { %v2721_v47 = vrot.slane %v2719_v25, 1  ;;  %v9672_v25 = vshrl.u32 %v7937_v43, 16 }
  0xd5   : > { %v2714_v62 = vsel %vm2614_vm2, %v2709_v59, %v2713_v8  ;;  %v2717_v55 = vor.u32 %v2715_v32, %v2713_v8  ;;  %v743_v59 = vrot.slane %v9676_v37, 2  ;;  %v1618_v32 = vld [vmem:[%s7727_s14 + $0x8c] sm:$0xf] }
  0xd6   : > { %6002 = vmatmul.mubr.bf16.vlgmr.msra.gmra.mrb[0].mxu1 %v721_v19  ;;  %v1615_v19 = vld [vmem:[%s7727_s14 + $0x80] sm:$0xf] }
  0xd7   : > { %6442 = vmatmul.mubr.bf16.gmra.mrb[40].mxu0 %v2706_v38  ;;  %6005 = vmatprep.mubr.msk.bf16.mxu1 %vm7641_vm0, %v9714_v1  ;;  %v9675_v38 = vshll.u32 %v7869_v4, 16  ;;  %v2722_v8 = vsel %vm2614_vm2, %v2717_v55, %v2721_v47 }
  0xd8   : > { %6445 = vmatprep.mubr.msk.bf16.mxu0 %vm7641_vm0, %v9714_v1  ;;  %6086 = vmatpush3.bf16.msra.mxu1 %v7529_v9  ;;  %v8285_v9 = vcombine.low %v1615_v19, %v1616_v27 }
  0xd9   : > { %6087 = vmatprep.subr.bf16.mxu1 %v9714_v1 }
  0xda   : > { %9759 = vst [vmem:[#allocation5_spill] sm:$0xff] %v8285_v9  ;;  %v2727_v17 = vshll.u32 %v8285_v9, 16 }
  0xdc   : > { %6088 = vmatpush3.bf16.msra.mxu1 %v7533_v44  ;;  %v746_v44 = vrot.slane %v9675_v38, 3  ;;  %v2729_v27 = vrot.slane %v2727_v17, 1  ;;  %v7556_v17 = vld [vmem:[%s9667_s1 + $0xb0] sm:$0xff]  }
  0xdd   : > { %6089 = vmatprep.subr.bf16.mxu1 %v9714_v1 }
  0xde   : > { %6006 = vmatmul.mubr.bf16.gmra.mrb[4].mxu1 %v730_v16  ;;  %v2723_v16 = vshrl.u32 %v8259_v31, 16  ;;  %v747_v15 = vor.u32 %v746_v44, %v743_v59  ;;  %v752_v59 = vrot.slane %v9672_v25, 2 }
  0xdf   : > { %6446 = vmatmul.mubr.bf16.gmra.mrb[44].mxu0 %v2714_v62  ;;  %6009 = vmatprep.mubr.msk.bf16.mxu1 %vm7641_vm0, %v9714_v1  ;;  %v1617_v62 = vld [vmem:[%s7727_s14 + $0x88] sm:$0xf] }
  0xe0   : > { %6449 = vmatprep.mubr.msk.bf16.mxu0 %vm7641_vm0, %v9714_v1  ;;  %6090 = vmatpush3.bf16.msra.mxu1 %v7538_v51  ;;  %v9671_v51 = vshll.u32 %v7937_v43, 16  ;;  %v2725_v19 = vor.u32 %v2723_v16, %v2721_v47  ;;  %v8311_v55 = vcombine.low %v1617_v62, %v1618_v32  ;;  %v1620_v62 = vld [vmem:[%s7727_s14 + $0x94] sm:$0xf]  ;;  %v9674_v32 = vshrl.u32 %v7977_v5, 16 }
  0xe1   : > { %6091 = vmatprep.subr.bf16.mxu1 %v9714_v1 }
  0xe2   : > { %9760 = vst [vmem:[#allocation6_spill] sm:$0xff] %v8311_v55  ;;  %v755_v44 = vrot.slane %v9671_v51, 3  ;;  %v2730_v47 = vsel %vm2614_vm2, %v2725_v19, %v2729_v27  ;;  %v2735_v16 = vshll.u32 %v8311_v55, 16  ;;  %v9673_v19 = vshll.u32 %v7977_v5, 16 }
  0xe4   : > { %6092 = vmatpush3.bf16.msra.mxu1 %v7542_v39  ;;  %v7552_v39 = vld [vmem:[%s9667_s1 + $0xa8] sm:$0xff]   ;;  %v2737_v51 = vrot.slane %v2735_v16, 1 }
  0xe5   : > { %6093 = vmatprep.subr.bf16.mxu1 %v9714_v1 }
  0xe6   : > { %6010 = vmatmul.mubr.bf16.gmra.mrb[8].mxu1 %v739_v54  ;;  %v748_v54 = vsel %vm704_vm3, %v738_v33, %v747_v15  ;;  %v756_v33 = vor.u32 %v755_v44, %v752_v59  ;;  %v761_v44 = vrot.slane %v9674_v32, 2 }
  0xe7   : > { %6450 = vmatmul.mubr.bf16.gmra.mrb[48].mxu0 %v2722_v8  ;;  %6013 = vmatprep.mubr.msk.bf16.mxu1 %vm7641_vm0, %v9714_v1  ;;  %v2731_v8 = vshrl.u32 %v8285_v9, 16  ;;  %v9776_v9 = vshrl.u32 %v7977_v5, 16 }
  0xe8   : > { %6453 = vmatprep.mubr.msk.bf16.mxu0 %vm7641_vm0, %v9714_v1  ;;  %6094 = vmatpush3.bf16.msra.mxu1 %v7547_v11  ;;  %v1619_v11 = vld [vmem:[%s7727_s14 + $0x90] sm:$0xf]  ;;  %v757_v59 = vsel %vm704_vm3, %v747_v15, %v756_v33 }
  0xe9   : > { %6095 = vmatprep.subr.bf16.mxu1 %v9714_v1  ;;  %v8337_v25 = vcombine.low %v1619_v11, %v1620_v62  ;;  %v1622_v11 = vld [vmem:[%s7727_s14 + $0x9c] sm:$0xf]  ;;  %v9680_v62 = vshrl.u32 %v8012_v3, 16 }
  0xeb   : > { %9761 = vst [vmem:[#allocation7_spill] sm:$0xff] %v8337_v25  ;;  %v2743_v16 = vshll.u32 %v8337_v25, 16 }
  0xec   : > { %6096 = vmatpush3.bf16.msra.mxu1 %v7552_v39  ;;  %v2733_v39 = vor.u32 %v2731_v8, %v2729_v27  ;;  %v2739_v8 = vshrl.u32 %v8311_v55, 16 }
  0xed   : > { %6097 = vmatprep.subr.bf16.mxu1 %v9714_v1 }
  0xee   : > { %6014 = vmatmul.mubr.bf16.gmra.mrb[12].mxu1 %v748_v54  ;;  %v7561_v54 = vld [vmem:[%s9667_s1 + $0xb8] sm:$0xff]   ;;  %v2738_v27 = vsel %vm2614_vm2, %v2733_v39, %v2737_v51  ;;  %v9679_v39 = vshll.u32 %v8012_v3, 16 }
  0xef   : > { %6454 = vmatmul.mubr.bf16.gmra.mrb[52].mxu0 %v2730_v47  ;;  %6017 = vmatprep.mubr.msk.bf16.mxu1 %vm7641_vm0, %v9714_v1  ;;  %v764_v47 = vrot.slane %v9673_v19, 3  ;;  %v2745_v19 = vrot.slane %v2743_v16, 1 }
  0xf0   : > { %6457 = vmatprep.mubr.msk.bf16.mxu0 %vm7641_vm0, %v9714_v1  ;;  %6098 = vmatpush3.bf16.msra.mxu1 %v7556_v17  ;;  %v1621_v17 = vld [vmem:[%s7727_s14 + $0x98] sm:$0xf]  ;;  %v773_v38 = vrot.slane %v9679_v39, 3 }
  0xf1   : > { %6099 = vmatprep.subr.bf16.mxu1 %v9714_v1  ;;  %v765_v15 = vor.u32 %v764_v47, %v761_v44  ;;  %v8360_v32 = vcombine.low %v1621_v17, %v1622_v11  ;;  %v2747_v47 = vshrl.u32 %v8337_v25, 16  ;;  %v8378_v11 = vcombine.low %v1623_v0, %v1624_v50 }
  0xf2   : > { %v9686_v0 = vshrl.u32 %v8057_v56, 16 }
  0xf3   : > { %9762 = vst [vmem:[#allocation8_spill] sm:$0xff] %v8360_v32  ;;  %v2751_v37 = vshll.u32 %v8360_v32, 16  ;;  %v2749_v16 = vor.u32 %v2747_v47, %v2745_v19  ;;  %9763 = vst [vmem:[#allocation9_spill] sm:$0xff] %v8378_v11  ;;  %v2759_v39 = vshll.u32 %v8378_v11, 16 }
  0xf4   : > { %6100 = vmatpush3.bf16.msra.mxu1 %v7561_v54  ;;  %v2741_v54 = vor.u32 %v2739_v8, %v2737_v51  ;;  %v9682_v8 = vshll.u32 %v8048_v14, 16 }
  0xf5   : > { %6185 = vmatprep.subr.bf16.mxu1 %v9714_v1  ;;  %v2753_v17 = vrot.slane %v2751_v37, 1  ;;  %v9683_v37 = vshll.u32 %v8057_v56, 16 }
  0xf6   : > { %6018 = vmatmul.mubr.bf16.gmra.mrb[16].mxu1 %v757_v59  ;;  %v766_v59 = vsel %vm704_vm3, %v756_v33, %v765_v15  ;;  %v2746_v44 = vsel %vm2614_vm2, %v2741_v54, %v2745_v19  ;;  %v9689_v33 = vshrl.u32 %v8048_v14, 16 }
  0xf7   : > { %6458 = vmatmul.mubr.bf16.gmra.mrb[56].mxu0 %v2738_v27  ;;  %6021 = vmatprep.mubr.msk.bf16.mxu1 %vm7641_vm0, %v9714_v1  ;;  %v770_v27 = vrot.slane %v9680_v62, 2  ;;  %v1625_v62 = vld [vmem:[%s7727_s14 + $0xa8] sm:$0xf] }
  0xf8   : > { %6461 = vmatprep.mubr.msk.bf16.mxu0 %vm7641_vm0, %v9714_v1  ;;  %v8396_v47 = vcombine.low %v1625_v62, %v1626_v12  ;;  %v9685_v62 = vshrl.u32 %v8065_v22, 16 }
  0xf9   : > { %v774_v51 = vor.u32 %v773_v38, %v770_v27  ;;  %v2754_v38 = vsel %vm2614_vm2, %v2749_v16, %v2753_v17  ;;  %v2755_v27 = vshrl.u32 %v8360_v32, 16 }
  0xfa   : > { %9764 = vst [vmem:[#allocation10_spill] sm:$0xff] %v8396_v47 }
  0xfb   : > { %v775_v54 = vsel %vm704_vm3, %v765_v15, %v774_v51  ;;  %v2757_v19 = vor.u32 %v2755_v27, %v2753_v17  ;;  %v2761_v15 = vrot.slane %v2759_v39, 1  ;;  %v9684_v39 = vshll.u32 %v8065_v22, 16  ;;  %v7543_v27 = vld [vmem:[%s7727_s14 + $0xb0] ss:$0 sps:$4 sm:$0x77]  }
  0xfe   : > { %6022 = vmatmul.mubr.bf16.gmra.mrb[20].mxu1 %v766_v59  ;;  %v779_v59 = vrot.slane %v9689_v33, 2 }
  0xff   : > { %6462 = vmatmul.mubr.bf16.gmra.mrb[60].mxu0 %v2746_v44  ;;  %6025 = vmatprep.mubr.msk.bf16.mxu1 %vm7641_vm0, %v9714_v1  ;;  %v782_v44 = vrot.slane %v9682_v8, 3  ;;  %v2767_v8 = vshll.u32 %v8396_v47, 16 }
 0x100   : > { %6465 = vmatprep.mubr.msk.bf16.mxu0 %vm7641_vm0, %v9714_v1 }
 0x101   : > { %v783_v50 = vor.u32 %v782_v44, %v779_v59  ;;  %v791_v59 = vrot.slane %v9683_v37, 3  ;;  %v2762_v44 = vsel %vm2614_vm2, %v2757_v19, %v2761_v15  ;;  %v2769_v17 = vrot.slane %v2767_v8, 1 }
 0x102   : > { %v2775_v37 = vshll.u32 %v7543_v27, 16 }
 0x103   : > { %v784_v16 = vsel %vm704_vm3, %v774_v51, %v783_v50 }
 0x106   : > { %6026 = vmatmul.mubr.bf16.gmra.mrb[24].mxu1 %v775_v54  ;;  %v788_v54 = vrot.slane %v9686_v0, 2 }
 0x107   : > { %6466 = vmatmul.mubr.bf16.gmra.mrb[64].mxu0 %v2754_v38  ;;  %6029 = vmatprep.mubr.msk.bf16.mxu1 %vm7641_vm0, %v9714_v1  ;;  %v2763_v38 = vshrl.u32 %v8378_v11, 16 }
 0x108   : > { %6469 = vmatprep.mubr.msk.bf16.mxu0 %vm7641_vm0, %v9714_v1  ;;  %v792_v12 = vor.u32 %v791_v59, %v788_v54  ;;  %v800_v54 = vrot.slane %v9684_v39, 3  ;;  %v2777_v39 = vrot.slane %v2775_v37, 1 }
 0x109   : > { %v2765_v51 = vor.u32 %v2763_v38, %v2761_v15  ;;  %v9688_v15 = vshll.u32 %v8075_v2, 16 }
 0x10a   : > { %v793_v19 = vsel %vm704_vm3, %v783_v50, %v792_v12  ;;  %v9687_v50 = vshrl.u32 %v8075_v2, 16 }
 0x10b   : > { %v2770_v59 = vsel %vm2614_vm2, %v2765_v51, %v2769_v17  ;;  %v3092_v51 = vld [vmem:[%s7727_s14 + $0x18] sm:$0xf] }
 0x10e   : > { %6030 = vmatmul.mubr.bf16.gmra.mrb[28].mxu1 %v784_v16  ;;  %v797_v16 = vrot.slane %v9685_v62, 2  ;;  %v8428_v62 = vld [vmem:[%s7727_s14 + $0x1c] sm:$0xf] }
 0x10f   : > { %6470 = vmatmul.mubr.bf16.gmra.mrb[68].mxu0 %v2762_v44  ;;  %6033 = vmatprep.mubr.msk.bf16.mxu1 %vm7641_vm0, %v9714_v1  ;;  %v2771_v44 = vshrl.u32 %v8396_v47, 16  ;;  %v5373_v0 = vcombine.low %v3092_v51, %v8428_v62  ;;  %v9724_v47 = vshll.u32 %v8186_v30, 16 }
 0x110   : > { %6473 = vmatprep.mubr.msk.bf16.mxu0 %vm7641_vm0, %v9714_v1  ;;  %v801_v8 = vor.u32 %v800_v54, %v797_v16  ;;  %v809_v16 = vrot.slane %v9688_v15, 3 }
 0x111   : > { %v2773_v38 = vor.u32 %v2771_v44, %v2769_v17  ;;  %v2779_v17 = vshrl.u32 %v7543_v27, 16  ;;  %v9696_v44 = vshrl.u32 %v8083_v28, 16  ;;  %v3255_v15 = vshll.u32 %v5373_v0, 16 }
 0x113   : > { %v2778_v54 = vsel %vm2614_vm2, %v2773_v38, %v2777_v39  ;;  %v2781_v51 = vor.u32 %v2779_v17, %v2777_v39  ;;  %v9692_v39 = vshll.u32 %v8093_v13, 16 }
 0x116   : > { %6034 = vmatmul.mubr.bf16.gmra.mrb[32].mxu1 %v793_v19  ;;  %v802_v19 = vsel %vm704_vm3, %v792_v12, %v801_v8  ;;  %v9693_v12 = vshll.u32 %v8083_v28, 16 }
 0x117   : > { %6474 = vmatmul.mubr.bf16.gmra.mrb[72].mxu0 %v2770_v59  ;;  %6037 = vmatprep.mubr.msk.bf16.mxu1 %vm7641_vm0, %v9714_v1  ;;  %v806_v59 = vrot.slane %v9687_v50, 2  ;;  %v8444_v50 = vld [vmem:[%s7727_s14 + $0x20] sm:$0xff]  }
 0x118   : > { %6477 = vmatprep.mubr.msk.bf16.mxu0 %vm7641_vm0, %v9714_v1  ;;  %v818_v27 = vrot.slane %v9693_v12, 3 }
 0x119   : > { %v810_v37 = vor.u32 %v809_v16, %v806_v59  ;;  %v3253_v59 = vshrl.u32 %v5373_v0, 16  ;;  %v3257_v16 = vrot.slane %v3255_v15, 1  ;;  %v8461_v15 = vld [vmem:[%s7727_s14 + $0x28] sm:$0xff]  }
 0x11b   : > { %v811_v38 = vsel %vm704_vm3, %v801_v8, %v810_v37  ;;  %v9691_v8 = vshrl.u32 %v8093_v13, 16  ;;  %v3258_v17 = vor.u32 %v3257_v16, %v3253_v59  ;;  %v7546_v59 = vld [vmem:[%s9667_s1 + $0x1c0] sm:$0xff]   ;;  %v9695_v16 = vshrl.u32 %v8444_v50, 16 }
 0x11e   : > { %6038 = vmatmul.mubr.bf16.gmra.mrb[36].mxu1 %v802_v19  ;;  %v815_v19 = vrot.slane %v9696_v44, 2  ;;  %v7555_v44 = vld [vmem:[%s9667_s1 + $0x1d0] sm:$0xff]  }
 0x11f   : > { %6478 = vmatmul.mubr.bf16.gmra.mrb[76].mxu0 %v2778_v54  ;;  %6041 = vmatprep.mubr.msk.bf16.mxu1 %vm7641_vm0, %v9714_v1  ;;  %v9690_v54 = vshll.u32 %v8444_v50, 16 }
 0x120   : > { %6481 = vmatprep.mubr.msk.bf16.mxu0 %vm7641_vm0, %v9714_v1  ;;  %v819_v33 = vor.u32 %v818_v27, %v815_v19  ;;  %v827_v19 = vrot.slane %v9692_v39, 3  ;;  %v9697_v39 = vshll.u32 %v8110_v52, 16 }
 0x121   : > { %v3262_v0 = vrot.slane %v9690_v54, 1  ;;  %v9694_v54 = vshll.u32 %v8461_v15, 16 }
 0x123   : > { %v3263_v27 = vsel %vm2614_vm2, %v3258_v17, %v3262_v0  ;;  %v3266_v17 = vor.u32 %v9695_v16, %v3262_v0  ;;  %v3270_v12 = vrot.slane %v9694_v54, 1  ;;  %v9701_v54 = vshrl.u32 %v8461_v15, 16 }
 0x125   : > { %v3271_v0 = vsel %vm2614_vm2, %v3266_v17, %v3270_v12  ;;  %v9702_v17 = vshll.u32 %v8129_v61, 16 }
 0x126   : > { %6042 = vmatmul.mubr.bf16.gmra.mrb[40].mxu1 %v811_v38  ;;  %v820_v38 = vsel %vm704_vm3, %v810_v37, %v819_v33 }
 0x127   : > { %6482 = vmatmul.mubr.bf16.gmra.mrb[80].mxu0 %v2781_v51  ;;  %6045 = vmatprep.mubr.msk.bf16.mxu1 %vm7641_vm0, %v9714_v1  ;;  %v824_v51 = vrot.slane %v9691_v8, 2  ;;  %v9698_v8 = vshrl.u32 %v8110_v52, 16 }
 0x128   : > { %6501 = vmatprep.mubr.msk.bf16.mxu0 %vm7641_vm0, %v9714_v1 }
 0x129   : > { %v828_v37 = vor.u32 %v827_v19, %v824_v51  ;;  %v7550_v51 = vld [vmem:[%s9667_s1 + $0x1c8] sm:$0xff]  }
 0x12b   : > { %v829_v19 = vsel %vm704_vm3, %v819_v33, %v828_v37 }
 0x12e   : > { %6046 = vmatmul.mubr.bf16.gmra.mrb[44].mxu1 %v820_v38  ;;  %v8485_v38 = vld [vmem:[%s7727_s14 + $0x30] sm:$0xff]  }
 0x12f   : > { %6502 = vmatmul.mubr.bf16.vlgmr.msra.gmra.mrb[0].mxu0 %v3263_v27  ;;  %6049 = vmatprep.mubr.msk.bf16.mxu1 %vm7641_vm0, %v9714_v1  ;;  %v833_v27 = vrot.slane %v9698_v8, 2  ;;  %v9700_v16 = vshll.u32 %v8485_v38, 16 }
 0x130   : > { %6586 = vmatpush3.bf16.msra.mxu0 %v7546_v59  ;;  %6505 = vmatprep.mubr.msk.bf16.mxu0 %vm7641_vm0, %v9714_v1  ;;  %v836_v59 = vrot.slane %v9697_v39, 3  ;;  %v9703_v39 = vshrl.u32 %v8129_v61, 16 }
 0x131   : > { %6587 = vmatprep.subr.bf16.mxu0 %v9714_v1  ;;  %v3278_v8 = vrot.slane %v9700_v16, 1  ;;  %v9706_v16 = vshrl.u32 %v8485_v38, 16 }
 0x132   : > { %v837_v33 = vor.u32 %v836_v59, %v833_v27  ;;  %v842_v59 = vrot.slane %v9703_v39, 2 }
 0x134   : > { %6588 = vmatpush3.bf16.msra.mxu0 %v7550_v51  ;;  %v3274_v51 = vor.u32 %v9701_v54, %v3270_v12  ;;  %v838_v27 = vsel %vm704_vm3, %v828_v37, %v837_v33  ;;  %v845_v12 = vrot.slane %v9702_v17, 3  ;;  %v7564_v54 = vld [vmem:[%s9667_s1 + $0x1e0] sm:$0xff]   ;;  %v9708_v17 = vshrl.u32 %v8147_v48, 16 }
 0x135   : > { %6589 = vmatprep.subr.bf16.mxu0 %v9714_v1 }
 0x136   : > { %6050 = vmatmul.mubr.bf16.gmra.mrb[48].mxu1 %v829_v19  ;;  %v7560_v19 = vld [vmem:[%s9667_s1 + $0x1d8] sm:$0xff]   ;;  %v846_v37 = vor.u32 %v845_v12, %v842_v59  ;;  %v851_v12 = vrot.slane %v9708_v17, 2 }
 0x137   : > { %6506 = vmatmul.mubr.bf16.gmra.mrb[4].mxu0 %v3271_v0  ;;  %6053 = vmatprep.mubr.msk.bf16.mxu1 %vm7641_vm0, %v9714_v1  ;;  %v3279_v0 = vsel %vm2614_vm2, %v3274_v51, %v3278_v8  ;;  %v9707_v51 = vshll.u32 %v8147_v48, 16 }
 0x138   : > { %6509 = vmatprep.mubr.msk.bf16.mxu0 %vm7641_vm0, %v9714_v1  ;;  %6590 = vmatpush3.bf16.msra.mxu0 %v7555_v44  ;;  %v9705_v44 = vshll.u32 %v8514_v23, 16  ;;  %v847_v59 = vsel %vm704_vm3, %v837_v33, %v846_v37 }
 0x139   : > { %6591 = vmatprep.subr.bf16.mxu0 %v9714_v1 }
 0x13a   : > { %v3286_v39 = vrot.slane %v9705_v44, 1  ;;  %v9711_v44 = vshrl.u32 %v8514_v23, 16 }
 0x13c   : > { %6592 = vmatpush3.bf16.msra.mxu0 %v7560_v19  ;;  %v3282_v19 = vor.u32 %v9706_v16, %v3278_v8  ;;  %v854_v8 = vrot.slane %v9707_v51, 3  ;;  %v7573_v16 = vld [vmem:[%s9667_s1 + $0x1f0] sm:$0xff]   ;;  %v9712_v51 = vshrl.u32 %v8165_v24, 16 }
 0x13d   : > { %6593 = vmatprep.subr.bf16.mxu0 %v9714_v1 }
 0x13e   : > { %6054 = vmatmul.mubr.bf16.gmra.mrb[52].mxu1 %v838_v27  ;;  %v7569_v27 = vld [vmem:[%s9667_s1 + $0x1e8] sm:$0xff]   ;;  %v855_v33 = vor.u32 %v854_v8, %v851_v12  ;;  %v860_v8 = vrot.slane %v9712_v51, 2  ;;  %v9719_v51 = vshll.u32 %v8176_v57, 16 }
 0x13f   : > { %6510 = vmatmul.mubr.bf16.gmra.mrb[8].mxu0 %v3279_v0  ;;  %6057 = vmatprep.mubr.msk.bf16.mxu1 %vm7641_vm0, %v9714_v1  ;;  %v3287_v0 = vsel %vm2614_vm2, %v3282_v19, %v3286_v39  ;;  %v9713_v19 = vshll.u32 %v8165_v24, 16 }
 0x140   : > { %6513 = vmatprep.mubr.msk.bf16.mxu0 %vm7641_vm0, %v9714_v1  ;;  %6594 = vmatpush3.bf16.msra.mxu0 %v7564_v54  ;;  %v9710_v54 = vshll.u32 %v8543_v7, 16  ;;  %v856_v12 = vsel %vm704_vm3, %v846_v37, %v855_v33 }
 0x141   : > { %6595 = vmatprep.subr.bf16.mxu0 %v9714_v1 }
 0x142   : > { %v3294_v17 = vrot.slane %v9710_v54, 1  ;;  %v9717_v54 = vshrl.u32 %v8543_v7, 16 }
 0x144   : > { %6596 = vmatpush3.bf16.msra.mxu0 %v7569_v27  ;;  %v3290_v27 = vor.u32 %v9711_v44, %v3286_v39  ;;  %v863_v39 = vrot.slane %v9713_v19, 3  ;;  %v9720_v44 = vshrl.u32 %v8176_v57, 16  ;;  %v8598_v19 = vld [vmem:[%s7727_s14 + $0x50] sm:$0xff]  }
 0x145   : > { %6597 = vmatprep.subr.bf16.mxu0 %v9714_v1  ;;  %v9730_v11 = vshrl.u32 %v8598_v19, 16 }
 0x146   : > { %6058 = vmatmul.mubr.bf16.gmra.mrb[56].mxu1 %v847_v59  ;;  %v7578_v59 = vld [vmem:[%s9667_s1 + $0x1f8] sm:$0xff]   ;;  %v864_v37 = vor.u32 %v863_v39, %v860_v8  ;;  %v869_v8 = vrot.slane %v9720_v44, 2  ;;  %v872_v39 = vrot.slane %v9719_v51, 3 }
 0x147   : > { %6514 = vmatmul.mubr.bf16.gmra.mrb[12].mxu0 %v3287_v0  ;;  %6061 = vmatprep.mubr.msk.bf16.mxu1 %vm7641_vm0, %v9714_v1  ;;  %v3295_v0 = vsel %vm2614_vm2, %v3290_v27, %v3294_v17  ;;  %v3298_v27 = vor.u32 %v9717_v54, %v3294_v17  ;;  %v9722_v17 = vshll.u32 %v8598_v19, 16  ;;  %v8619_v44 = vld [vmem:[%s7727_s14 + $0x58] sm:$0xff]  }
 0x148   : > { %6517 = vmatprep.mubr.msk.bf16.mxu0 %vm7641_vm0, %v9714_v1  ;;  %6598 = vmatpush3.bf16.msra.mxu0 %v7573_v16  ;;  %v9716_v16 = vshll.u32 %v8572_v58, 16  ;;  %v873_v54 = vor.u32 %v872_v39, %v869_v8  ;;  %v881_v39 = vrot.slane %v9724_v47, 3 }
 0x149   : > { %6599 = vmatprep.subr.bf16.mxu0 %v9714_v1  ;;  %v3310_v51 = vrot.slane %v9722_v17, 1 }
 0x14c   : > { %6600 = vmatpush3.bf16.msra.mxu0 %v7578_v59  ;;  %v3302_v59 = vrot.slane %v9716_v16, 1  ;;  %v9765_v16 = vmov 0.0  }
 0x14d   : > { %6685 = vmatprep.subr.bf16.mxu0 %v9714_v1 }
 0x14e   : > { %6062 = vmatmul.mubr.bf16.gmra.mrb[60].mxu1 %v856_v12  ;;  %v865_v12 = vsel %vm704_vm3, %v855_v33, %v864_v37  ;;  %v9725_v33 = vshrl.u32 %v8186_v30, 16 }
 0x14f   : > { %6518 = vmatmul.mubr.bf16.gmra.mrb[16].mxu0 %v3295_v0  ;;  %6065 = vmatprep.mubr.msk.bf16.mxu1 %vm7641_vm0, %v9714_v1  ;;  %v3303_v0 = vsel %vm2614_vm2, %v3298_v27, %v3302_v59 }
 0x150   : > { %6521 = vmatprep.mubr.msk.bf16.mxu0 %vm7641_vm0, %v9714_v1  ;;  %v9723_v1 = vshrl.u32 %v8572_v58, 16  ;;  %v878_v8 = vrot.slane %v9725_v33, 2 }
 0x152   : > { %v3306_v27 = vor.u32 %v9723_v1, %v3302_v59  ;;  %v9728_v59 = vshll.u32 %v8619_v44, 16  ;;  %v882_v17 = vor.u32 %v881_v39, %v878_v8  ;;  %v888_v1 = vshll.u32 %v8197_v42, 16 }
 0x154   : > { %v3318_v47 = vrot.slane %v9728_v59, 1  ;;  %v890_v8 = vrot.slane %v888_v1, 3  ;;  %v9766_v59 = vshrl.u32 %v8212_v63, 16 }
 0x156   : > { %6066 = vmatmul.mubr.bf16.gmra.mrb[64].mxu1 %v865_v12  ;;  %v874_v12 = vsel %vm704_vm3, %v864_v37, %v873_v54  ;;  %v885_v37 = vshrl.u32 %v8197_v42, 16  ;;  %v9729_v42 = vshrl.u32 %v8619_v44, 16 }
 0x157   : > { %6522 = vmatmul.mubr.bf16.gmra.mrb[20].mxu0 %v3303_v0  ;;  %6069 = vmatprep.mubr.msk.bf16.mxu1 %vm7641_vm0, %v9765_v16  ;;  %v3311_v0 = vsel %vm2614_vm2, %v3306_v27, %v3310_v51  ;;  %v3314_v27 = vor.u32 %v9730_v11, %v3310_v51  ;;  %v9767_v11 = vshll.u32 %v8212_v63, 16 }
 0x158   : > { %6525 = vmatprep.mubr.msk.bf16.mxu0 %vm7641_vm0, %v9765_v16  ;;  %v887_v33 = vrot.slane %v885_v37, 2  ;;  %v8655_v37 = vld [vmem:[%s7727_s14 + $0x68] sm:$0xff]  }
 0x159   : > { %v3319_v39 = vsel %vm2614_vm2, %v3314_v27, %v3318_v47  ;;  %v9739_v55 = vshrl.u32 %v8655_v37, 16 }
 0x15a   : > { %v891_v51 = vor.u32 %v890_v8, %v887_v33  ;;  %v9733_v33 = vshll.u32 %v8655_v37, 16  ;;  %v1187_v8 = vshll.u32 %v7745_v18, 16 }
 0x15c   : > { %v892_v27 = vsel %vm704_vm3, %v882_v17, %v891_v51 }
 0x15e   : > { %6070 = vmatmul.mubr.bf16.gmra.mrb[68].mxu1 %v874_v12  ;;  %v8640_v12 = vld [vmem:[%s7727_s14 + $0x60] sm:$0xff]  }
 0x15f   : > { %6526 = vmatmul.mubr.bf16.gmra.mrb[24].mxu0 %v3311_v0  ;;  %6073 = vmatprep.mubr.msk.bf16.mxu1 %vm7641_vm0, %v9765_v16  ;;  %v883_v0 = vsel %vm704_vm3, %v873_v54, %v882_v17  ;;  %v9727_v32 = vshll.u32 %v8640_v12, 16  ;;  %v3322_v54 = vor.u32 %v9729_v42, %v3318_v47  ;;  %v1184_v47 = vshrl.u32 %v7745_v18, 16 }
 0x160   : > { %6529 = vmatprep.mubr.msk.bf16.mxu0 %vm7641_vm0, %v9765_v16  ;;  %v1191_v42 = vrot.slane %v9766_v59, 3  ;;  %v1192_v18 = vrot.slane %v9767_v11, 4  ;;  %v8690_v59 = vld [vmem:[%s7727_s14 + $0x78] sm:$0xff]  }
 0x161   : > { %v3326_v1 = vrot.slane %v9727_v32, 1  ;;  %v8672_v32 = vld [vmem:[%s7727_s14 + $0x70] sm:$0xff]  }
 0x166   : > { %6074 = vmatmul.mubr.bf16.gmra.mrb[72].mxu1 %v883_v0  ;;  %v3327_v0 = vsel %vm2614_vm2, %v3322_v54, %v3326_v1  ;;  %v3334_v54 = vrot.slane %v9733_v33, 1  ;;  %v1193_v33 = vor.u32 %v1192_v18, %v1191_v42  ;;  %v9769_v42 = vshll.u32 %v7775_v34, 16  ;;  %v7566_v18 = vld [vmem:[%s9667_s1 + $0xc0] sm:$0xff]  }
 0x167   : > { %6530 = vmatmul.mubr.bf16.gmra.mrb[28].mxu0 %v3319_v39  ;;  %6077 = vmatprep.mubr.msk.bf16.mxu1 %vm7641_vm0, %v9765_v16  ;;  %v9742_v39 = vshrl.u32 %v8640_v12, 16 }
 0x168   : > { %6533 = vmatprep.mubr.msk.bf16.mxu0 %vm7641_vm0, %v9765_v16  ;;  %v3338_v63 = vor.u32 %v9739_v55, %v3334_v54 }
 0x169   : > { %v3330_v17 = vor.u32 %v9742_v39, %v3326_v1  ;;  %v9735_v1 = vshll.u32 %v8672_v32, 16 }
 0x16b   : > { %v3335_v25 = vsel %vm2614_vm2, %v3330_v17, %v3334_v54  ;;  %v3342_v11 = vrot.slane %v9735_v1, 1  ;;  %v1196_v17 = vrot.slane %v9769_v42, 4  ;;  %v9734_v54 = vshll.u32 %v8690_v59, 16 }
 0x16c   : > { %v9770_v42 = vshrl.u32 %v7819_v49, 16 }
 0x16e   : > { %6078 = vmatmul.mubr.bf16.gmra.mrb[76].mxu1 %v892_v27  ;;  %v1186_v27 = vrot.slane %v1184_v47, 3 }
 0x16f   : > { %6534 = vmatmul.mubr.bf16.gmra.mrb[32].mxu0 %v3327_v0  ;;  %6081 = vmatprep.mubr.msk.bf16.mxu1 %vm7641_vm0, %v9765_v16  ;;  %v1189_v0 = vrot.slane %v1187_v8, 4 }
 0x170   : > { %6537 = vmatprep.mubr.msk.bf16.mxu0 %vm7641_vm0, %v9765_v16 }
 0x171   : > { %v1190_v47 = vor.u32 %v1189_v0, %v1186_v27  ;;  %v3343_v27 = vsel %vm2614_vm2, %v3338_v63, %v3342_v11  ;;  %v9736_v0 = vshrl.u32 %v8672_v32, 16  ;;  %v3350_v63 = vrot.slane %v9734_v54, 1 }
 0x176   : > { %6082 = vmatmul.mubr.bf16.gmra.mrb[80].mxu1 %v891_v51  ;;  %v9768_v51 = vshrl.u32 %v7775_v34, 16  ;;  %v3346_v34 = vor.u32 %v9736_v0, %v3342_v11  ;;  %v9771_v11 = vshll.u32 %v7819_v49, 16  ;;  %v7575_v0 = vld [vmem:[%s9667_s1 + $0xd0] sm:$0xff]  }
 0x177   : > { %6538 = vmatmul.mubr.bf16.gmra.mrb[36].mxu0 %v3335_v25  ;;  %6101 = vmatprep.mubr.msk.bf16.mxu1 %vm7641_vm0, %v9765_v16  ;;  %v1194_v25 = vsel %vm1182_vm4, %v1190_v47, %v1193_v33 }
 0x178   : > { %6541 = vmatprep.mubr.msk.bf16.mxu0 %vm7641_vm0, %v9765_v16  ;;  %v1195_v8 = vrot.slane %v9768_v51, 3  ;;  %v8712_v51 = vld [vmem:[%s7727_s14 + $0x80] sm:$0xff]   ;;  %v3351_v54 = vsel %vm2614_vm2, %v3346_v34, %v3350_v63 }
 0x179   : > { %v9737_v1 = vshll.u32 %v8712_v51, 16 }
 0x17a   : > { %v1197_v47 = vor.u32 %v1196_v17, %v1195_v8  ;;  %v1199_v17 = vrot.slane %v9770_v42, 3  ;;  %v9772_v42 = vshrl.u32 %v7869_v4, 16 }
 0x17b   : > { %v3358_v34 = vrot.slane %v9737_v1, 1  ;;  %v9740_v1 = vshrl.u32 %v8712_v51, 16 }
 0x17c   : > { %v1198_v8 = vsel %vm1182_vm4, %v1193_v33, %v1197_v47 }
 0x17e   : > { %6102 = vmatmul.mubr.bf16.vlgmr.msra.gmra.mrb[0].mxu1 %v1194_v25  ;;  %v7570_v25 = vld [vmem:[%s9667_s1 + $0xc8] sm:$0xff]  }
 0x17f   : > { %6542 = vmatmul.mubr.bf16.gmra.mrb[40].mxu0 %v3343_v27  ;;  %6105 = vmatprep.mubr.msk.bf16.mxu1 %vm7641_vm0, %v9765_v16  ;;  %v1200_v27 = vrot.slane %v9771_v11, 4 }
 0x180   : > { %6545 = vmatprep.mubr.msk.bf16.mxu0 %vm7641_vm0, %v9765_v16  ;;  %6186 = vmatpush3.bf16.msra.mxu1 %v7566_v18  ;;  %v9738_v18 = vshrl.u32 %v8690_v59, 16 }
 0x181   : > { %6187 = vmatprep.subr.bf16.mxu1 %v9765_v16  ;;  %v1201_v49 = vor.u32 %v1200_v27, %v1199_v17  ;;  %v1203_v17 = vrot.slane %v9772_v42, 3  ;;  %v8767_v42 = vld [vmem:[%s7727_s14 + $0x90] sm:$0xff]  }
 0x182   : > { %v3354_v33 = vor.u32 %v9738_v18, %v3350_v63  ;;  %v9773_v63 = vshll.u32 %v7869_v4, 16  ;;  %v7583_v18 = vld [vmem:[%s9667_s1 + $0xe0] sm:$0xff]   ;;  %v9744_v39 = vshll.u32 %v8767_v42, 16  ;;  %v3376_v10 = vshrl.u32 %v8767_v42, 16 }
 0x184   : > { %6188 = vmatpush3.bf16.msra.mxu1 %v7570_v25  ;;  %v8739_v25 = vld [vmem:[%s7727_s14 + $0x88] sm:$0xff]   ;;  %v1204_v11 = vrot.slane %v9773_v63, 4  ;;  %v3359_v27 = vsel %vm2614_vm2, %v3354_v33, %v3358_v34  ;;  %v3362_v33 = vor.u32 %v9740_v1, %v3358_v34  ;;  %v7607_v63 = vld [vmem:[%s7727_s14 + $0x10] sm:$0xf]  ;;  %v9775_v34 = vshll.u32 %v7937_v43, 16 }
 0x185   : > { %6189 = vmatprep.subr.bf16.mxu1 %v9765_v16 }
 0x186   : > { %6106 = vmatmul.mubr.bf16.gmra.mrb[4].mxu1 %v1198_v8  ;;  %v1202_v8 = vsel %vm1182_vm4, %v1197_v47, %v1201_v49  ;;  %v1586_v47 = vld [vmem:[%s7727_s14 + $0xc] sm:$0x8]  ;;  %v1205_v4 = vor.u32 %v1204_v11, %v1203_v17  ;;  %v1208_v1 = vrot.slane %v9775_v34, 4  ;;  %v3374_v34 = vrot.slane %v9744_v39, 1 }
 0x187   : > { %6546 = vmatmul.mubr.bf16.gmra.mrb[44].mxu0 %v3351_v54  ;;  %6109 = vmatprep.mubr.msk.bf16.mxu1 %vm7641_vm0, %v9765_v16  ;;  %v7579_v54 = vld [vmem:[%s9667_s1 + $0xd8] sm:$0xff]   ;;  %v5306_v17 = vcombine.low %v1586_v47, %v7607_v63  ;;  %v7587_v47 = vld [vmem:[%s9667_s1 + $0xf0] sm:$0xff]   ;;  %v9777_v39 = vshll.u32 %v7977_v5, 16 }
 0x188   : > { %6549 = vmatprep.mubr.msk.bf16.mxu0 %vm7641_vm0, %v9765_v16  ;;  %6190 = vmatpush3.bf16.msra.mxu1 %v7575_v0  ;;  %v9741_v0 = vshll.u32 %v8739_v25, 16  ;;  %v1206_v11 = vsel %vm1182_vm4, %v1201_v49, %v1205_v4  ;;  %v3378_v5 = vor.u32 %v3376_v10, %v3374_v34 }
 0x189   : > { %6191 = vmatprep.subr.bf16.mxu1 %v9765_v16  ;;  %v1750_v49 = vshrl.u32 %v5306_v17, 16  ;;  %v1753_v63 = vshll.u32 %v5306_v17, 16  ;;  %v8797_v17 = vld [vmem:[%s7727_s14 + $0x98] sm:$0xff]  }
 0x18a   : > { %v9750_v26 = vshll.u32 %v8797_v17, 16 }
 0x18c   : > { %6192 = vmatpush3.bf16.msra.mxu1 %v7579_v54  ;;  %v3366_v54 = vrot.slane %v9741_v0, 1 }
 0x18d   : > { %6193 = vmatprep.subr.bf16.mxu1 %v9765_v16 }
 0x18e   : > { %6110 = vmatmul.mubr.bf16.gmra.mrb[8].mxu1 %v1202_v8  ;;  %v7585_v8 = vld [vmem:[%s9667_s1 + $0xe8] sm:$0xff]   ;;  %v3367_v0 = vsel %vm2614_vm2, %v3362_v33, %v3366_v54 }
 0x18f   : > { %6550 = vmatmul.mubr.bf16.gmra.mrb[48].mxu0 %v3359_v27  ;;  %6113 = vmatprep.mubr.msk.bf16.mxu1 %vm7641_vm0, %v9765_v16  ;;  %v9774_v27 = vshrl.u32 %v7937_v43, 16  ;;  %v1758_v43 = vshrl.u32 %v7748_v20, 16 }
 0x190   : > { %6553 = vmatprep.mubr.msk.bf16.mxu0 %vm7641_vm0, %v9765_v16  ;;  %6194 = vmatpush3.bf16.msra.mxu1 %v7583_v18  ;;  %v9745_v18 = vshrl.u32 %v8739_v25, 16 }
 0x191   : > { %6195 = vmatprep.subr.bf16.mxu1 %v9765_v16  ;;  %v1207_v55 = vrot.slane %v9774_v27, 3  ;;  %v1761_v27 = vshll.u32 %v7748_v20, 16  ;;  %v1755_v20 = vrot.slane %v1753_v63, 4 }
 0x193   : > { %v1209_v33 = vor.u32 %v1208_v1, %v1207_v55  ;;  %v1752_v55 = vrot.slane %v1750_v49, 3  ;;  %v1760_v1 = vrot.slane %v1758_v43, 3  ;;  %v1763_v31 = vrot.slane %v1761_v27, 4 }
 0x194   : > { %6196 = vmatpush3.bf16.msra.mxu1 %v7585_v8  ;;  %v3370_v8 = vor.u32 %v9745_v18, %v3366_v54  ;;  %v1211_v54 = vrot.slane %v9776_v9, 3  ;;  %v1212_v18 = vrot.slane %v9777_v39, 4  ;;  %v3382_v9 = vrot.slane %v9750_v26, 1  ;;  %v8821_v39 = vld [vmem:[%s7727_s14 + $0xa0] sm:$0xff]  }
 0x195   : > { %6197 = vmatprep.subr.bf16.mxu1 %v9765_v16  ;;  %v1756_v49 = vor.u32 %v1755_v20, %v1752_v55  ;;  %v1764_v63 = vor.u32 %v1763_v31, %v1760_v1  ;;  %v1767_v27 = vshrl.u32 %v7766_v29, 16  ;;  %v9755_v31 = vshrl.u32 %v8797_v17, 16  ;;  %v8845_v20 = vld [vmem:[%s7727_s14 + $0xa8] sm:$0xff]  }
 0x196   : > { %6114 = vmatmul.mubr.bf16.gmra.mrb[12].mxu1 %v1206_v11  ;;  %v1210_v11 = vsel %vm1182_vm4, %v1205_v4, %v1209_v33  ;;  %v1213_v4 = vor.u32 %v1212_v18, %v1211_v54  ;;  %v1770_v54 = vshll.u32 %v7766_v29, 16  ;;  %v9749_v55 = vshll.u32 %v8821_v39, 16 }
 0x197   : > { %6554 = vmatmul.mubr.bf16.gmra.mrb[52].mxu0 %v3367_v0  ;;  %6117 = vmatprep.mubr.msk.bf16.mxu1 %vm7641_vm0, %v9765_v16  ;;  %v7590_v0 = vld [vmem:[%s9667_s1 + $0xf8] sm:$0xff]   ;;  %v8824_v43 = vsel %vm1182_vm4, %v1756_v49, %v1764_v63  ;;  %v1769_v1 = vrot.slane %v1767_v27, 3  ;;  %v1776_v49 = vshrl.u32 %v7777_v35, 16  ;;  %v9752_v26 = vshrl.u32 %v8821_v39, 16 }
 0x198   : > { %6557 = vmatprep.mubr.msk.bf16.mxu0 %vm7641_vm0, %v9765_v16  ;;  %6198 = vmatpush3.bf16.msra.mxu1 %v7587_v47  ;;  %v3375_v47 = vsel %vm2614_vm2, %v3370_v8, %v3374_v34  ;;  %v1214_v18 = vsel %vm1182_vm4, %v1209_v33, %v1213_v4  ;;  %v9778_v8 = vshrl.u32 %v8012_v3, 16  ;;  %v9779_v34 = vshll.u32 %v8012_v3, 16 }
 0x199   : > { %6199 = vmatprep.subr.bf16.mxu1 %v9765_v16  ;;  %v3386_v3 = vor.u32 %v9755_v31, %v3382_v9  ;;  %v3390_v29 = vrot.slane %v9749_v55, 1  ;;  %v9751_v27 = vshll.u32 %v8845_v20, 16 }
 0x19b   : > { %v3391_v55 = vsel %vm2614_vm2, %v3386_v3, %v3390_v29  ;;  %v8869_v3 = vld [vmem:[%s7727_s14 + $0xb0] sm:$0xff]  }
 0x19c   : > { %6200 = vmatpush3.bf16.msra.mxu1 %v7590_v0  ;;  %v1215_v0 = vrot.slane %v9778_v8, 3  ;;  %v1779_v8 = vshll.u32 %v7777_v35, 16 }
 0x19d   : > { %6785 = vmatprep.subr.bf16.mxu1 %v9765_v16 }
 0x19e   : > { %6118 = vmatmul.mubr.bf16.gmra.mrb[16].mxu1 %v1210_v11  ;;  %v1216_v11 = vrot.slane %v9779_v34, 4  ;;  %v9780_v34 = vshrl.u32 %v8048_v14, 16 }
 0x19f   : > { %6558 = vmatmul.mubr.bf16.gmra.mrb[56].mxu0 %v3375_v47  ;;  %6121 = vmatprep.mubr.msk.bf16.mxu1 %vm7641_vm0, %v9765_v16  ;;  %v3383_v47 = vsel %vm2614_vm2, %v3378_v5, %v3382_v9  ;;  %v1772_v5 = vrot.slane %v1770_v54, 4  ;;  %v9781_v9 = vshll.u32 %v8048_v14, 16  ;;  %v3394_v14 = vor.u32 %v9752_v26, %v3390_v29 }
 0x1a0   : > { %6561 = vmatprep.mubr.msk.bf16.mxu0 %vm7641_vm0, %v9765_v16  ;;  %v1217_v33 = vor.u32 %v1216_v11, %v1215_v0  ;;  %v1219_v11 = vrot.slane %v9780_v34, 3  ;;  %v9783_v29 = vshll.u32 %v8057_v56, 16  ;;  %v9753_v26 = vshrl.u32 %v8845_v20, 16 }
 0x1a2   : > { %v1218_v0 = vsel %vm1182_vm4, %v1213_v4, %v1217_v33  ;;  %v3398_v4 = vrot.slane %v9751_v27, 1 }
 0x1a4   : > { %v3399_v27 = vsel %vm2614_vm2, %v3394_v14, %v3398_v4  ;;  %v8893_v14 = vld [vmem:[%s7727_s14 + $0xb8] ss:$0 sps:$4 sm:$0x77]  }
 0x1a6   : > { %6122 = vmatmul.mubr.bf16.gmra.mrb[20].mxu1 %v1214_v18  ;;  %v1773_v18 = vor.u32 %v1772_v5, %v1769_v1  ;;  %v1778_v1 = vrot.slane %v1776_v49, 3  ;;  %v1785_v5 = vshrl.u32 %v7792_v40, 16  ;;  %v9754_v49 = vshll.u32 %v8869_v3, 16 }
 0x1a7   : > { %6562 = vmatmul.mubr.bf16.gmra.mrb[60].mxu0 %v3383_v47  ;;  %6125 = vmatprep.mubr.msk.bf16.mxu1 %vm7641_vm0, %v9765_v16  ;;  %v1220_v47 = vrot.slane %v9781_v9, 4 }
 0x1a8   : > { %6565 = vmatprep.mubr.msk.bf16.mxu0 %vm7641_vm0, %v9765_v16  ;;  %v8858_v54 = vsel %vm1182_vm4, %v1764_v63, %v1773_v18  ;;  %v1781_v63 = vrot.slane %v1779_v8, 4 }
 0x1a9   : > { %v1221_v35 = vor.u32 %v1220_v47, %v1219_v11  ;;  %v9782_v11 = vshrl.u32 %v8057_v56, 16  ;;  %v1224_v47 = vrot.slane %v9783_v29, 4  ;;  %v3402_v56 = vor.u32 %v9753_v26, %v3398_v4 }
 0x1ab   : > { %v1222_v34 = vsel %vm1182_vm4, %v1217_v33, %v1221_v35  ;;  %v1223_v9 = vrot.slane %v9782_v11, 3  ;;  %v3406_v33 = vrot.slane %v9754_v49, 1  ;;  %v3408_v49 = vshrl.u32 %v8869_v3, 16 }
 0x1ad   : > { %v3407_v26 = vsel %vm2614_vm2, %v3402_v56, %v3406_v33 }
 0x1ae   : > { %6126 = vmatmul.mubr.bf16.gmra.mrb[24].mxu1 %v1218_v0  ;;  %v1788_v0 = vshll.u32 %v7792_v40, 16  ;;  %v1225_v40 = vor.u32 %v1224_v47, %v1223_v9  ;;  %v9784_v9 = vshrl.u32 %v8065_v22, 16  ;;  %v9785_v47 = vshll.u32 %v8065_v22, 16 }
 0x1af   : > { %6566 = vmatmul.mubr.bf16.gmra.mrb[64].mxu0 %v3391_v55  ;;  %6129 = vmatprep.mubr.msk.bf16.mxu1 %vm7641_vm0, %v9765_v16  ;;  %v1782_v55 = vor.u32 %v1781_v63, %v1778_v1  ;;  %v1787_v1 = vrot.slane %v1785_v5, 3  ;;  %v1794_v63 = vshrl.u32 %v7812_v46, 16  ;;  %v3412_v5 = vshll.u32 %v8893_v14, 16 }
 0x1b0   : > { %6569 = vmatprep.mubr.msk.bf16.mxu0 %vm7641_vm0, %v9765_v16  ;;  %v1226_v11 = vsel %vm1182_vm4, %v1221_v35, %v1225_v40  ;;  %v1227_v29 = vrot.slane %v9784_v9, 3  ;;  %v1228_v4 = vrot.slane %v9785_v47, 4  ;;  %v3410_v22 = vor.u32 %v3408_v49, %v3406_v33 }
 0x1b1   : > { %v8882_v8 = vsel %vm1182_vm4, %v1773_v18, %v1782_v55  ;;  %v1790_v18 = vrot.slane %v1788_v0, 4  ;;  %v3414_v35 = vrot.slane %v3412_v5, 1  ;;  %v1796_v56 = vrot.slane %v1794_v63, 3  ;;  %v3729_v5 = vld [vmem:[%s7727_s14 + $0x18] sm:$0xe] }
 0x1b2   : > { %v9787_v9 = vshll.u32 %v8075_v2, 16  ;;  %v3416_v63 = vshrl.u32 %v8893_v14, 16 }
 0x1b3   : > { %v3415_v31 = vsel %vm2614_vm2, %v3410_v22, %v3414_v35 }
 0x1b4   : > { %v1232_v47 = vrot.slane %v9787_v9, 4  ;;  %v8939_v9 = vcombine.low %v3729_v5, %v8428_v62  ;;  %v1821_v5 = vshrl.u32 %v7873_v6, 16 }
 0x1b6   : > { %6130 = vmatmul.mubr.bf16.gmra.mrb[28].mxu1 %v1222_v34  ;;  %v1797_v34 = vshll.u32 %v7812_v46, 16  ;;  %v1229_v46 = vor.u32 %v1228_v4, %v1227_v29  ;;  %v1803_v29 = vshrl.u32 %v7832_v53, 16  ;;  %v1806_v4 = vshll.u32 %v7832_v53, 16 }
 0x1b7   : > { %6570 = vmatmul.mubr.bf16.gmra.mrb[68].mxu0 %v3399_v27  ;;  %6133 = vmatprep.mubr.msk.bf16.mxu1 %vm7641_vm0, %v9765_v16  ;;  %v1791_v27 = vor.u32 %v1790_v18, %v1787_v1 }
 0x1b8   : > { %6573 = vmatprep.mubr.msk.bf16.mxu0 %vm7641_vm0, %v9765_v16  ;;  %v1799_v1 = vrot.slane %v1797_v34, 4  ;;  %v1808_v34 = vrot.slane %v1806_v4, 4  ;;  %v9790_v4 = vshrl.u32 %v8093_v13, 16 }
 0x1b9   : > { %v8906_v0 = vsel %vm1182_vm4, %v1782_v55, %v1791_v27  ;;  %v1230_v55 = vsel %vm1182_vm4, %v1225_v40, %v1229_v46 }
 0x1ba   : > { %v1800_v18 = vor.u32 %v1799_v1, %v1796_v56  ;;  %v3418_v56 = vor.u32 %v3416_v63, %v3414_v35  ;;  %v3751_v35 = vrot.slane %v8444_v50, 1  ;;  %v1239_v63 = vrot.slane %v9790_v4, 3 }
 0x1bb   : > { %v1833_v4 = vshll.u32 %v7897_v21, 16 }
 0x1bc   : > { %v8923_v33 = vsel %vm1182_vm4, %v1791_v27, %v1800_v18  ;;  %v9788_v27 = vshrl.u32 %v8083_v28, 16 }
 0x1be   : > { %6134 = vmatmul.mubr.bf16.gmra.mrb[32].mxu1 %v1226_v11  ;;  %v9786_v11 = vshrl.u32 %v8075_v2, 16  ;;  %v1805_v2 = vrot.slane %v1803_v29, 3  ;;  %v1235_v1 = vrot.slane %v9788_v27, 3  ;;  %v7582_v27 = vld [vmem:[%s9667_s1 + $0x200] sm:$0xff]  }
 0x1bf   : > { %6574 = vmatmul.mubr.bf16.gmra.mrb[72].mxu0 %v3407_v26  ;;  %6137 = vmatprep.mubr.msk.bf16.mxu1 %vm7641_vm0, %v9765_v16 }
 0x1c0   : > { %6577 = vmatprep.mubr.msk.bf16.mxu0 %vm7641_vm0, %v9765_v16  ;;  %v1231_v26 = vrot.slane %v9786_v11, 3  ;;  %v1809_v53 = vor.u32 %v1808_v34, %v1805_v2  ;;  %v1812_v11 = vshrl.u32 %v7853_v60, 16  ;;  %v9791_v2 = vshll.u32 %v8093_v13, 16 }
 0x1c2   : > { %v1233_v40 = vor.u32 %v1232_v47, %v1231_v26  ;;  %v1815_v26 = vshll.u32 %v7853_v60, 16  ;;  %v8942_v47 = vsel %vm1182_vm4, %v1800_v18, %v1809_v53  ;;  %v1814_v60 = vrot.slane %v1812_v11, 3 }
 0x1c3   : > { %v1240_v34 = vrot.slane %v9791_v2, 4  ;;  %v7586_v2 = vld [vmem:[%s9667_s1 + $0x210] sm:$0xff]  }
 0x1c4   : > { %v1234_v22 = vsel %vm1182_vm4, %v1229_v46, %v1233_v40  ;;  %v1817_v29 = vrot.slane %v1815_v26, 4  ;;  %v9792_v26 = vshrl.u32 %v8110_v52, 16 }
 0x1c5   : > { %v1241_v13 = vor.u32 %v1240_v34, %v1239_v63 }
 0x1c6   : > { %6138 = vmatmul.mubr.bf16.gmra.mrb[36].mxu1 %v1230_v55  ;;  %v1818_v62 = vor.u32 %v1817_v29, %v1814_v60  ;;  %v9793_v60 = vshll.u32 %v8110_v52, 16 }
 0x1c7   : > { %6578 = vmatmul.mubr.bf16.gmra.mrb[76].mxu0 %v3415_v31  ;;  %6141 = vmatprep.mubr.msk.bf16.mxu1 %vm7641_vm0, %v9765_v16  ;;  %v9789_v31 = vshll.u32 %v8083_v28, 16  ;;  %v3750_v28 = vrot.slane %v8939_v9, 1 }
 0x1c8   : > { %6581 = vmatprep.mubr.msk.bf16.mxu0 %vm7641_vm0, %v9765_v16  ;;  %v1244_v29 = vrot.slane %v9793_v60, 4 }
 0x1c9   : > { %v1236_v55 = vrot.slane %v9789_v31, 4  ;;  %v1823_v31 = vrot.slane %v1821_v5, 3 }
 0x1cb   : > { %v1237_v46 = vor.u32 %v1236_v55, %v1235_v1  ;;  %v8962_v1 = vsel %vm1182_vm4, %v1809_v53, %v1818_v62 }
 0x1cd   : > { %v1238_v18 = vsel %vm1182_vm4, %v1233_v40, %v1237_v46  ;;  %v7584_v40 = vld [vmem:[%s9667_s1 + $0x208] sm:$0xff]   ;;  %v1242_v11 = vsel %vm1182_vm4, %v1237_v46, %v1241_v13  ;;  %v7589_v46 = vld [vmem:[%s9667_s1 + $0x218] sm:$0xff]  }
 0x1ce   : > { %6142 = vmatmul.mubr.bf16.gmra.mrb[40].mxu1 %v1234_v22  ;;  %v1824_v22 = vshll.u32 %v7873_v6, 16  ;;  %v3753_v6 = vrot.slane %v8461_v15, 1 }
 0x1cf   : > { %6582 = vmatmul.mubr.bf16.gmra.mrb[80].mxu0 %v3418_v56  ;;  %6145 = vmatprep.mubr.msk.bf16.mxu1 %vm7641_vm0, %v9765_v16  ;;  %v3752_v56 = vsel %vm3749_vm5, %v3750_v28, %v3751_v35  ;;  %v1243_v28 = vrot.slane %v9792_v26, 3 }
 0x1d0   : > { %6601 = vmatprep.mubr.msk.bf16.mxu0 %vm7641_vm0, %v9765_v16  ;;  %v1826_v55 = vrot.slane %v1824_v22, 4  ;;  %v3754_v63 = vsel %vm3749_vm5, %v3751_v35, %v3753_v6 }
 0x1d1   : > { %v1245_v52 = vor.u32 %v1244_v29, %v1243_v28  ;;  %v7591_v28 = vld [vmem:[%s9667_s1 + $0x220] sm:$0xff]  }
 0x1d2   : > { %v1827_v53 = vor.u32 %v1826_v55, %v1823_v31  ;;  %v1839_v55 = vshrl.u32 %v7925_v36, 16 }
 0x1d3   : > { %v1246_v22 = vsel %vm1182_vm4, %v1241_v13, %v1245_v52  ;;  %v7592_v13 = vld [vmem:[%s9667_s1 + $0x228] sm:$0xff]  }
 0x1d4   : > { %v8985_v34 = vsel %vm1182_vm4, %v1818_v62, %v1827_v53  ;;  %v1835_v62 = vrot.slane %v1833_v4, 4  ;;  %v9796_v4 = vshrl.u32 %v8147_v48, 16 }
 0x1d6   : > { %6146 = vmatmul.mubr.bf16.gmra.mrb[44].mxu1 %v1238_v18  ;;  %v1830_v18 = vshrl.u32 %v7897_v21, 16  ;;  %v3755_v21 = vrot.slane %v8485_v38, 1 }
 0x1d7   : > { %6602 = vmatmul.mubr.bf16.vlgmr.msra.gmra.mrb[0].mxu0 %v3752_v56  ;;  %6149 = vmatprep.mubr.msk.bf16.mxu1 %vm7641_vm0, %v9765_v16  ;;  %v9794_v56 = vshrl.u32 %v8129_v61, 16 }
 0x1d8   : > { %6686 = vmatpush3.bf16.msra.mxu0 %v7582_v27  ;;  %6605 = vmatprep.mubr.msk.bf16.mxu0 %vm7641_vm0, %v9765_v16  ;;  %v1832_v35 = vrot.slane %v1830_v18, 3  ;;  %v3756_v26 = vsel %vm3749_vm5, %v3753_v6, %v3755_v21  ;;  %v1841_v6 = vrot.slane %v1839_v55, 3  ;;  %v9798_v55 = vshrl.u32 %v8165_v24, 16 }
 0x1d9   : > { %6687 = vmatprep.subr.bf16.mxu0 %v9765_v16  ;;  %v1247_v27 = vrot.slane %v9794_v56, 3  ;;  %v7593_v56 = vld [vmem:[%s9667_s1 + $0x230] sm:$0xff]  }
 0x1da   : > { %v1836_v5 = vor.u32 %v1835_v62, %v1832_v35  ;;  %v1848_v35 = vshrl.u32 %v7932_v41, 16  ;;  %v1851_v62 = vshll.u32 %v7932_v41, 16  ;;  %v3759_v41 = vrot.slane %v8543_v7, 1 }
 0x1dc   : > { %6688 = vmatpush3.bf16.msra.mxu0 %v7584_v40  ;;  %v9795_v40 = vshll.u32 %v8129_v61, 16  ;;  %v9009_v60 = vsel %vm1182_vm4, %v1827_v53, %v1836_v5 }
 0x1dd   : > { %6689 = vmatprep.subr.bf16.mxu0 %v9765_v16 }
 0x1de   : > { %6150 = vmatmul.mubr.bf16.gmra.mrb[48].mxu1 %v1242_v11  ;;  %v1248_v31 = vrot.slane %v9795_v40, 4  ;;  %v1842_v11 = vshll.u32 %v7925_v36, 16  ;;  %v3757_v36 = vrot.slane %v8514_v23, 1 }
 0x1df   : > { %6606 = vmatmul.mubr.bf16.gmra.mrb[4].mxu0 %v3754_v63  ;;  %6153 = vmatprep.mubr.msk.bf16.mxu1 %vm7641_vm0, %v9765_v16  ;;  %v1251_v63 = vrot.slane %v9796_v4, 3 }
 0x1e0   : > { %6609 = vmatprep.mubr.msk.bf16.mxu0 %vm7641_vm0, %v9765_v16  ;;  %6690 = vmatpush3.bf16.msra.mxu0 %v7586_v2  ;;  %v1249_v61 = vor.u32 %v1248_v31, %v1247_v27  ;;  %v1844_v53 = vrot.slane %v1842_v11, 4  ;;  %v9797_v2 = vshll.u32 %v8147_v48, 16  ;;  %v1255_v11 = vrot.slane %v9798_v55, 3 }
 0x1e1   : > { %6691 = vmatprep.subr.bf16.mxu0 %v9765_v16 }
 0x1e2   : > { %v1845_v29 = vor.u32 %v1844_v53, %v1841_v6  ;;  %v1250_v18 = vsel %vm1182_vm4, %v1245_v52, %v1249_v61  ;;  %v7594_v52 = vld [vmem:[%s9667_s1 + $0x238] sm:$0xff]  }
 0x1e4   : > { %6692 = vmatpush3.bf16.msra.mxu0 %v7589_v46  ;;  %v1252_v46 = vrot.slane %v9797_v2, 4  ;;  %v9033_v27 = vsel %vm1182_vm4, %v1836_v5, %v1845_v29  ;;  %v1853_v5 = vrot.slane %v1851_v62, 4 }
 0x1e5   : > { %6693 = vmatprep.subr.bf16.mxu0 %v9765_v16 }
 0x1e6   : > { %6154 = vmatmul.mubr.bf16.gmra.mrb[52].mxu1 %v1246_v22  ;;  %v3758_v22 = vsel %vm3749_vm5, %v3755_v21, %v3757_v36  ;;  %v1253_v48 = vor.u32 %v1252_v46, %v1251_v63  ;;  %v1850_v21 = vrot.slane %v1848_v35, 3  ;;  %v9800_v63 = vshrl.u32 %v8176_v57, 16 }
 0x1e7   : > { %6610 = vmatmul.mubr.bf16.gmra.mrb[8].mxu0 %v3756_v26  ;;  %6157 = vmatprep.mubr.msk.bf16.mxu1 %vm7641_vm0, %v9765_v16  ;;  %v9799_v26 = vshll.u32 %v8165_v24, 16  ;;  %v1857_v24 = vshrl.u32 %v7941_v45, 16  ;;  %v9801_v46 = vshll.u32 %v8176_v57, 16  ;;  %v3763_v57 = vrot.slane %v8598_v19, 1 }
 0x1e8   : > { %6613 = vmatprep.mubr.msk.bf16.mxu0 %vm7641_vm0, %v9765_v16  ;;  %6694 = vmatpush3.bf16.msra.mxu0 %v7591_v28  ;;  %v1854_v40 = vor.u32 %v1853_v5, %v1850_v21  ;;  %v1254_v31 = vsel %vm1182_vm4, %v1249_v61, %v1253_v48  ;;  %v3761_v61 = vrot.slane %v8572_v58, 1  ;;  %v1259_v2 = vrot.slane %v9800_v63, 3 }
 0x1e9   : > { %6695 = vmatprep.subr.bf16.mxu0 %v9765_v16  ;;  %v1256_v28 = vrot.slane %v9799_v26, 4  ;;  %v1260_v35 = vrot.slane %v9801_v46, 4  ;;  %v9803_v5 = vshll.u32 %v8186_v30, 16 }
 0x1ea   : > { %v9052_v6 = vsel %vm1182_vm4, %v1845_v29, %v1854_v40  ;;  %v3762_v62 = vsel %vm3749_vm5, %v3759_v41, %v3761_v61 }
 0x1eb   : > { %v1257_v53 = vor.u32 %v1256_v28, %v1255_v11  ;;  %v3764_v11 = vsel %vm3749_vm5, %v3761_v61, %v3763_v57 }
 0x1ec   : > { %6696 = vmatpush3.bf16.msra.mxu0 %v7592_v13  ;;  %v3760_v13 = vsel %vm3749_vm5, %v3757_v36, %v3759_v41  ;;  %v1860_v36 = vshll.u32 %v7941_v45, 16  ;;  %v1261_v45 = vor.u32 %v1260_v35, %v1259_v2  ;;  %v3769_v2 = vrot.slane %v8655_v37, 1 }
 0x1ed   : > { %6697 = vmatprep.subr.bf16.mxu0 %v9765_v16  ;;  %v1258_v29 = vsel %vm1182_vm4, %v1253_v48, %v1257_v53  ;;  %v1162_v48 = vld [vmem:[%s7727_s14 + $0xa8] sm:$0x3]  ;;  %v3771_v35 = vrot.slane %v8672_v32, 1 }
 0x1ee   : > { %6158 = vmatmul.mubr.bf16.gmra.mrb[56].mxu1 %v1250_v18  ;;  %v1859_v18 = vrot.slane %v1857_v24, 3  ;;  %v1862_v4 = vrot.slane %v1860_v36, 4  ;;  %v1262_v41 = vsel %vm1182_vm4, %v1257_v53, %v1261_v45  ;;  %v3765_v53 = vrot.slane %v8619_v44, 1 }
 0x1ef   : > { %6614 = vmatmul.mubr.bf16.gmra.mrb[12].mxu0 %v3758_v22  ;;  %6161 = vmatprep.mubr.msk.bf16.mxu1 %vm7641_vm0, %v9765_v16 }
 0x1f0   : > { %6617 = vmatprep.mubr.msk.bf16.mxu0 %vm7641_vm0, %v9765_v16  ;;  %6698 = vmatpush3.bf16.msra.mxu0 %v7593_v56  ;;  %v9067_v22 = vor.u32 %v1862_v4, %v1859_v18  ;;  %v3766_v18 = vsel %vm3749_vm5, %v3763_v57, %v3765_v53  ;;  %v3767_v4 = vrot.slane %v8640_v12, 1  ;;  %v7609_v57 = vld [vmem:[%s9667_s1 + $0x100] sm:$0xff]  }
 0x1f1   : > { %6699 = vmatprep.subr.bf16.mxu0 %v9765_v16 }
 0x1f2   : > { %v9071_v56 = vsel %vm1182_vm4, %v1854_v40, %v9067_v22  ;;  %v1264_v40 = vrot.slane %v9803_v5, 4  ;;  %v3768_v63 = vsel %vm3749_vm5, %v3765_v53, %v3767_v4  ;;  %v3770_v46 = vsel %vm3749_vm5, %v3767_v4, %v3769_v2 }
 0x1f3   : > { %v3777_v5 = vrot.slane %v8739_v25, 1  ;;  %v7642_v53 = vmov 0  }
 0x1f4   : > { %6700 = vmatpush3.bf16.msra.mxu0 %v7594_v52  ;;  %v9802_v52 = vshrl.u32 %v8186_v30, 16  ;;  %7442 = vset.pattern.permute.xlu0 %v7642_v53  ;;  %4950 = vst [vmem:[%s9186_s27] sm:$0xf] %v7642_v53  ;;  %4951 = vst [vmem:[%s9186_s27 + $0x4] sm:$0xf] %v7642_v53 }
 0x1f5   : > { %4952 = vst [vmem:[%s9186_s27 + $0x8] sm:$0xf] %v7642_v53  ;;  %4953 = vst [vmem:[%s9186_s27 + $0xc] sm:$0xf] %v7642_v53  ;;  %7443 = vset.pattern.permute.xlu1 %v7642_v53 }
 0x1f6   : > { %6162 = vmatmul.mubr.bf16.gmra.mrb[60].mxu1 %v1254_v31  ;;  %v1263_v21 = vrot.slane %v9802_v52, 3  ;;  %v7608_v31 = vld [vmem:[%s7727_s14 + $0xa4] sm:$0xf]  ;;  %v7611_v52 = vld [vmem:[%s9667_s1 + $0x110] sm:$0xff]   ;;  %5160 = vst [vmem:[%s9186_s27 + $0xb0] sm:$0xc] %v7642_v53 }
 0x1f7   : > { %6618 = vmatmul.mubr.bf16.gmra.mrb[16].mxu0 %v3760_v13  ;;  %6165 = vmatprep.mubr.msk.bf16.mxu1 %vm7641_vm0, %v9765_v16  ;;  %v5297_v55 = vcombine.low %v7608_v31, %v1162_v48  ;;  %5161 = vst [vmem:[%s9186_s27 + $0xb4] sm:$0xf] %v7642_v53  ;;  %5162 = vst [vmem:[%s9186_s27 + $0xb8] sm:$0xf] %v7642_v53 }
 0x1f8   : > { %6621 = vmatprep.mubr.msk.bf16.mxu0 %vm7641_vm0, %v9765_v16  ;;  %v1265_v26 = vor.u32 %v1264_v40, %v1263_v21  ;;  %v7613_v40 = vld [vmem:[%s9667_s1 + $0x120] sm:$0xff]   ;;  %5163 = vst [vmem:[%s9186_s27 + $0xbc] sm:$0xf] %v7642_v53  ;;  %5164 = vst [vmem:[%s9186_s27 + $0xc0] sm:$0x3] %v7642_v53 }
 0x1f9   : > { %v1268_v28 = vshrl.u32 %v5297_v55, 16  ;;  %v1271_v13 = vshll.u32 %v5297_v55, 16  ;;  %v3779_v55 = vrot.slane %v8767_v42, 1 }
 0x1fa   : > { %v1266_v30 = vsel %vm1182_vm4, %v1261_v45, %v1265_v26  ;;  %v3773_v45 = vrot.slane %v8690_v59, 1 }
 0x1fb   : > { %v1270_v24 = vrot.slane %v1268_v28, 3  ;;  %v1273_v36 = vrot.slane %v1271_v13, 4  ;;  %v3781_v28 = vrot.slane %v8797_v17, 1 }
 0x1fc   : > { %v3774_v48 = vsel %vm3749_vm5, %v3771_v35, %v3773_v45 }
 0x1fd   : > { %v1274_v61 = vor.u32 %v1273_v36, %v1270_v24  ;;  %v3782_v13 = vsel %vm3749_vm5, %v3779_v55, %v3781_v28  ;;  %v4527_v36 = vld [vmem:[%s9668_s2 + $0x30] sm:$0xff] }
 0x1fe   : > { %6166 = vmatmul.mubr.bf16.gmra.mrb[64].mxu1 %v1258_v29  ;;  %4578 = vperm.xlu1 %7443, %v4527_v36  }
 0x1ff   : > { %6622 = vmatmul.mubr.bf16.gmra.mrb[20].mxu0 %v3762_v62  ;;  %6169 = vmatprep.mubr.msk.bf16.mxu1 %vm7641_vm0, %v9765_v16  ;;  %v1275_v29 = vsel %vm1182_vm4, %v1265_v26, %v1274_v61  ;;  %v3772_v62 = vsel %vm3749_vm5, %v3769_v2, %v3771_v35  ;;  %v3780_v26 = vsel %vm3749_vm5, %v3777_v5, %v3779_v55  ;;  %v3787_v2 = vrot.slane %v8869_v3, 1  ;;  %v4532_v35 = vld [vmem:[%s9668_s2 + $0x58] sm:$0xff] }
 0x200   : > { %6625 = vmatprep.mubr.msk.bf16.mxu0 %vm7641_vm0, %v9765_v16 }
 0x206   : > { %6170 = vmatmul.mubr.bf16.gmra.mrb[68].mxu1 %v1262_v41  ;;  %v3775_v41 = vrot.slane %v8712_v51, 1 }
 0x207   : > { %6626 = vmatmul.mubr.bf16.gmra.mrb[24].mxu0 %v3764_v11  ;;  %6173 = vmatprep.mubr.msk.bf16.mxu1 %vm7641_vm0, %v9765_v16  ;;  %v7615_v11 = vld [vmem:[%s9667_s1 + $0x130] sm:$0xff]  }
 0x208   : > { %6629 = vmatprep.mubr.msk.bf16.mxu0 %vm7641_vm0, %v9765_v16  ;;  %v3776_v21 = vsel %vm3749_vm5, %v3773_v45, %v3775_v41  ;;  %v3778_v31 = vsel %vm3749_vm5, %v3775_v41, %v3777_v5  ;;  %v3789_v45 = vrot.slane %v8893_v14, 1  ;;  %v4536_v14 = vld [vmem:[%s9668_s2 + $0x78] sm:$0xff]  ;;  %v4123_v41 = vshrl.u32 %v8939_v9, 16 }
 0x209   : > { %v7618_v5 = vld [vmem:[%s7727_s14 + $0x78] sm:$0xf] }
 0x20a   : > { %v4125_v55 = vrot.slane %v4123_v41, 1  ;;  %v4546_v41 = vld [vmem:[%s9668_s2 + $0xc8] sm:$0xff] }
 0x20e   : > { %6174 = vmatmul.mubr.bf16.gmra.mrb[72].mxu1 %v1266_v30  ;;  %v4526_v30 = vld [vmem:[%s9668_s2 + $0x28] sm:$0xff] }
 0x20f   : > { %6630 = vmatmul.mubr.bf16.gmra.mrb[28].mxu0 %v3766_v18  ;;  %6177 = vmatprep.mubr.msk.bf16.mxu1 %vm7641_vm0, %v9765_v16  ;;  %v4529_v18 = vld [vmem:[%s9668_s2 + $0x40] sm:$0xff] }
 0x210   : > { %6633 = vmatprep.mubr.msk.bf16.mxu0 %vm7641_vm0, %v9765_v16 }
 0x216   : > { %6178 = vmatmul.mubr.bf16.gmra.mrb[76].mxu1 %v1275_v29  ;;  %v4531_v29 = vld [vmem:[%s9668_s2 + $0x50] sm:$0xff] }
 0x217   : > { %6634 = vmatmul.mubr.bf16.gmra.mrb[32].mxu0 %v3768_v63  ;;  %6181 = vmatprep.mubr.msk.bf16.mxu1 %vm7641_vm0, %v9765_v16  ;;  %v4530_v63 = vld [vmem:[%s9668_s2 + $0x48] sm:$0xff] }
 0x218   : > { %6637 = vmatprep.mubr.msk.bf16.mxu0 %vm7641_vm0, %v9765_v16 }
 0x21e   : > { %6182 = vmatmul.mubr.bf16.gmra.mrb[80].mxu1 %v1274_v61  ;;  %v3785_v61 = vrot.slane %v8845_v20, 1 }
 0x21f   : > { %6638 = vmatmul.mubr.bf16.gmra.mrb[36].mxu0 %v3770_v46  ;;  %6201 = vmatprep.mubr.msk.bf16.mxu1 %vm7641_vm0, %v9765_v16 }
 0x220   : > { %6641 = vmatprep.mubr.msk.bf16.mxu0 %vm7641_vm0, %v9765_v16  ;;  %v3788_v46 = vsel %vm3749_vm5, %v3785_v61, %v3787_v2 }
 0x226   : > { %6202 = vmatmul.mubr.bf16.vlgmr.msra.gmra.mrb[0].mxu1 %v8824_v43  ;;  %v7610_v43 = vld [vmem:[%s9667_s1 + $0x108] sm:$0xff]  }
 0x227   : > { %6642 = vmatmul.mubr.bf16.gmra.mrb[40].mxu0 %v3772_v62  ;;  %6205 = vmatprep.mubr.msk.bf16.mxu1 %vm7641_vm0, %v9765_v16  ;;  %v4535_v62 = vld [vmem:[%s9668_s2 + $0x70] sm:$0xff] }
 0x228   : > { %6645 = vmatprep.mubr.msk.bf16.mxu0 %vm7641_vm0, %v9765_v16  ;;  %6793 = vmatpush3.bf16.msra.mxu1 %v7609_v57  ;;  %v4537_v57 = vld [vmem:[%s9668_s2 + $0x80] sm:$0xff] }
 0x229   : > { %6786 = vmatprep.subr.bf16.mxu1 %v9765_v16 }
 0x22c   : > { %6794 = vmatpush3.bf16.msra.mxu1 %v7610_v43  ;;  %v4539_v43 = vld [vmem:[%s9668_s2 + $0x90] sm:$0xff] }
 0x22d   : > { %6787 = vmatprep.subr.bf16.mxu1 %v9765_v16 }
 0x22e   : > { %6206 = vmatmul.mubr.bf16.gmra.mrb[4].mxu1 %v8858_v54  ;;  %v7612_v54 = vld [vmem:[%s9667_s1 + $0x118] sm:$0xff]  }
 0x22f   : > { %6646 = vmatmul.mubr.bf16.gmra.mrb[44].mxu0 %v3774_v48  ;;  %6209 = vmatprep.mubr.msk.bf16.mxu1 %vm7641_vm0, %v9765_v16  ;;  %v3790_v48 = vsel %vm3749_vm5, %v3787_v2, %v3789_v45 }
 0x230   : > { %6649 = vmatprep.mubr.msk.bf16.mxu0 %vm7641_vm0, %v9765_v16  ;;  %6795 = vmatpush3.bf16.msra.mxu1 %v7611_v52  ;;  %v4126_v52 = vshll.u32 %v8939_v9, 16  ;;  %v9805_v9 = vshll.u32 %v8444_v50, 16 }
 0x231   : > { %6788 = vmatprep.subr.bf16.mxu1 %v9765_v16 }
 0x234   : > { %6796 = vmatpush3.bf16.msra.mxu1 %v7612_v54  ;;  %v7617_v54 = vld [vmem:[%s7727_s14 + $0x74] sm:$0xf] }
 0x235   : > { %6789 = vmatprep.subr.bf16.mxu1 %v9765_v16 }
 0x236   : > { %6210 = vmatmul.mubr.bf16.gmra.mrb[8].mxu1 %v8882_v8  ;;  %v7614_v8 = vld [vmem:[%s9667_s1 + $0x128] sm:$0xff]  }
 0x237   : > { %6650 = vmatmul.mubr.bf16.gmra.mrb[48].mxu0 %v3776_v21  ;;  %6213 = vmatprep.mubr.msk.bf16.mxu1 %vm7641_vm0, %v9765_v16  ;;  %v4541_v21 = vld [vmem:[%s9668_s2 + $0xa0] sm:$0xff] }
 0x238   : > { %6653 = vmatprep.mubr.msk.bf16.mxu0 %vm7641_vm0, %v9765_v16  ;;  %6797 = vmatpush3.bf16.msra.mxu1 %v7613_v40  ;;  %v5319_v40 = vcombine.low %v7617_v54, %v7618_v5 }
 0x239   : > { %6790 = vmatprep.subr.bf16.mxu1 %v9765_v16 }
 0x23c   : > { %6798 = vmatpush3.bf16.msra.mxu1 %v7614_v8 }
 0x23d   : > { %6791 = vmatprep.subr.bf16.mxu1 %v9765_v16 }
 0x23e   : > { %6214 = vmatmul.mubr.bf16.gmra.mrb[12].mxu1 %v8906_v0  ;;  %v7616_v0 = vld [vmem:[%s9667_s1 + $0x138] sm:$0xff]  }
 0x23f   : > { %6654 = vmatmul.mubr.bf16.gmra.mrb[52].mxu0 %v3778_v31  ;;  %6217 = vmatprep.mubr.msk.bf16.mxu1 %vm7641_vm0, %v9765_v16  ;;  %v9804_v31 = vshrl.u32 %v8444_v50, 16  ;;  %v4543_v50 = vld [vmem:[%s9668_s2 + $0xb0] sm:$0xff] }
 0x240   : > { %6657 = vmatprep.mubr.msk.bf16.mxu0 %vm7641_vm0, %v9765_v16  ;;  %6799 = vmatpush3.bf16.msra.mxu1 %v7615_v11  ;;  %v4128_v11 = vrot.slane %v4126_v52, 2  ;;  %v4549_v52 = vld [vmem:[%s9668_s2 + $0xe0] sm:$0xff] }
 0x241   : > { %6792 = vmatprep.subr.bf16.mxu1 %v9765_v16  ;;  %v4130_v8 = vrot.slane %v9804_v31, 1 }
 0x244   : > { %6800 = vmatpush3.bf16.msra.mxu1 %v7616_v0  ;;  %v1866_v0 = vshrl.u32 %v5319_v40, 16 }
 0x246   : > { %6218 = vmatmul.mubr.bf16.gmra.mrb[16].mxu1 %v8923_v33  ;;  %v4525_v33 = vld [vmem:[%s9668_s2 + $0x20] sm:$0xff] }
 0x247   : > { %6658 = vmatmul.mubr.bf16.gmra.mrb[56].mxu0 %v3780_v26  ;;  %6221 = vmatprep.mubr.msk.bf16.mxu1 %vm7641_vm0, %v9765_v16  ;;  %v4131_v26 = vrot.slane %v9805_v9, 2 }
 0x248   : > { %6661 = vmatprep.mubr.msk.bf16.mxu0 %vm7641_vm0, %v9765_v16  ;;  %4568 = vperm.xlu0 %7442, %v4525_v33   ;;  %v4129_v33 = vor.u32 %v4128_v11, %v4125_v55  ;;  %v4548_v55 = vld [vmem:[%s9668_s2 + $0xd8] sm:$0xff] }
 0x24c   : > { %4573 = vperm.xlu0 %7442, %v4526_v30   ;;  %v7619_v30 = vld [vmem:[%s7727_s14 + $0x7c] sm:$0xf] }
 0x24e   : > { %6222 = vmatmul.mubr.bf16.gmra.mrb[20].mxu1 %v8942_v47  ;;  %v3783_v47 = vrot.slane %v8821_v39, 1 }
 0x24f   : > { %6662 = vmatmul.mubr.bf16.gmra.mrb[60].mxu0 %v3782_v13  ;;  %6225 = vmatprep.mubr.msk.bf16.mxu1 %vm7641_vm0, %v9765_v16  ;;  %v4540_v13 = vld [vmem:[%s9668_s2 + $0x98] sm:$0xff] }
 0x250   : > { %6665 = vmatprep.mubr.msk.bf16.mxu0 %vm7641_vm0, %v9765_v16  ;;  %v3784_v24 = vsel %vm3749_vm5, %v3781_v28, %v3783_v47  ;;  %4588 = vperm.xlu0 %7442, %v4529_v18   ;;  %v3786_v4 = vsel %vm3749_vm5, %v3783_v47, %v3785_v61  ;;  %v1869_v28 = vshll.u32 %v5319_v40, 16  ;;  %v1868_v47 = vrot.slane %v1866_v0, 3  ;;  %v4542_v18 = vld [vmem:[%s9668_s2 + $0xa8] sm:$0xff]  ;;  %v4545_v61 = vld [vmem:[%s9668_s2 + $0xc0] sm:$0xff] }
 0x252   : > { %v1871_v53 = vrot.slane %v1869_v28, 4  ;;  %v7623_v28 = vld [vmem:[%s7727_s14 + $0x8c] sm:$0xf] }
 0x254   : > { %4598 = vperm.xlu0 %7442, %v4531_v29  }
 0x256   : > { %6226 = vmatmul.mubr.bf16.gmra.mrb[24].mxu1 %v8962_v1  ;;  %v4528_v1 = vld [vmem:[%s9668_s2 + $0x38] sm:$0xff] }
 0x257   : > { %6666 = vmatmul.mubr.bf16.gmra.mrb[64].mxu0 %v3784_v24  ;;  %6229 = vmatprep.mubr.msk.bf16.mxu1 %vm7641_vm0, %v9765_v16  ;;  %v7620_v24 = vld [vmem:[%s7727_s14 + $0x80] sm:$0xf] }
 0x258   : > { %6669 = vmatprep.mubr.msk.bf16.mxu0 %vm7641_vm0, %v9765_v16  ;;  %4583 = vperm.xlu1 %7443, %v4528_v1   ;;  %v5320_v36 = vcombine.low %v7619_v30, %v7620_v24  ;;  %v9811_v24 = vshll.u32 %v8514_v23, 16 }
 0x25c   : > { %4593 = vperm.xlu1 %7443, %v4530_v63   ;;  %v9807_v63 = vshll.u32 %v8461_v15, 16 }
 0x25e   : > { %6230 = vmatmul.mubr.bf16.gmra.mrb[28].mxu1 %v8985_v34  ;;  %v4533_v34 = vld [vmem:[%s9668_s2 + $0x60] sm:$0xff]  ;;  %v4135_v2 = vrot.slane %v9807_v63, 2 }
 0x25f   : > { %6670 = vmatmul.mubr.bf16.gmra.mrb[68].mxu0 %v3786_v4  ;;  %6233 = vmatprep.mubr.msk.bf16.mxu1 %vm7641_vm0, %v9765_v16  ;;  %v9806_v4 = vshrl.u32 %v8461_v15, 16  ;;  %v4547_v15 = vld [vmem:[%s9668_s2 + $0xd0] sm:$0xff] }
 0x260   : > { %6673 = vmatprep.mubr.msk.bf16.mxu0 %vm7641_vm0, %v9765_v16  ;;  %4608 = vperm.xlu0 %7442, %v4533_v34   ;;  %v1872_v34 = vor.u32 %v1871_v53, %v1868_v47  ;;  %v9810_v53 = vshrl.u32 %v8514_v23, 16  ;;  %v4555_v23 = vld [vmem:[%s9668_s2 + $0x110] sm:$0xff] }
 0x261   : > { %4603 = vperm.xlu1 %7443, %v4532_v35   ;;  %v4134_v29 = vrot.slane %v9806_v4, 1  ;;  %v1878_v35 = vshll.u32 %v5320_v36, 16  ;;  %v4552_v4 = vld [vmem:[%s9668_s2 + $0xf8] sm:$0xff] }
 0x262   : > { %v4142_v30 = vrot.slane %v9810_v53, 1 }
 0x264   : > { %4618 = vperm.xlu0 %7442, %v4535_v62   ;;  %v4544_v62 = vld [vmem:[%s9668_s2 + $0xb8] sm:$0xff] }
 0x266   : > { %6234 = vmatmul.mubr.bf16.gmra.mrb[32].mxu1 %v9009_v60  ;;  %v4534_v60 = vld [vmem:[%s9668_s2 + $0x68] sm:$0xff] }
 0x267   : > { %6674 = vmatmul.mubr.bf16.gmra.mrb[72].mxu0 %v3788_v46  ;;  %6237 = vmatprep.mubr.msk.bf16.mxu1 %vm7641_vm0, %v9765_v16  ;;  %v1875_v46 = vshrl.u32 %v5320_v36, 16  ;;  %v4143_v36 = vrot.slane %v9811_v24, 2 }
 0x268   : > { %6677 = vmatprep.mubr.msk.bf16.mxu0 %vm7641_vm0, %v9765_v16  ;;  %4613 = vperm.xlu1 %7443, %v4534_v60  }
 0x269   : > { %4628 = vperm.xlu0 %7442, %v4537_v57   ;;  %v1877_v60 = vrot.slane %v1875_v46, 3  ;;  %v1880_v57 = vrot.slane %v1878_v35, 4  ;;  %v7625_v46 = vld [vmem:[%s7727_s14 + $0x94] sm:$0xf]  ;;  %v7626_v35 = vld [vmem:[%s7727_s14 + $0x98] sm:$0xf] }
 0x26b   : > { %v1881_v40 = vor.u32 %v1880_v57, %v1877_v60  ;;  %v9812_v60 = vshrl.u32 %v8543_v7, 16 }
 0x26c   : > { %4623 = vperm.xlu1 %7443, %v4536_v14   ;;  %v7622_v14 = vld [vmem:[%s7727_s14 + $0x88] sm:$0xf] }
 0x26d   : > { %4638 = vperm.xlu0 %7442, %v4539_v43   ;;  %v1882_v9 = vsel %vm1182_vm4, %v1872_v34, %v1881_v40  ;;  %v4146_v57 = vrot.slane %v9812_v60, 1 }
 0x26e   : > { %6238 = vmatmul.mubr.bf16.gmra.mrb[36].mxu1 %v9033_v27  ;;  %v4538_v27 = vld [vmem:[%s9668_s2 + $0x88] sm:$0xff] }
 0x26f   : > { %6678 = vmatmul.mubr.bf16.gmra.mrb[76].mxu0 %v3790_v48  ;;  %6241 = vmatprep.mubr.msk.bf16.mxu1 %vm7641_vm0, %v9765_v16  ;;  %v7621_v48 = vld [vmem:[%s7727_s14 + $0x84] sm:$0xf] }
 0x270   : > { %6681 = vmatprep.mubr.msk.bf16.mxu0 %vm7641_vm0, %v9765_v16  ;;  %4633 = vperm.xlu1 %7443, %v4538_v27   ;;  %v5321_v43 = vcombine.low %v7621_v48, %v7622_v14  ;;  %v9813_v48 = vshll.u32 %v8543_v7, 16  ;;  %v4559_v7 = vld [vmem:[%s9668_s2 + $0x130] sm:$0xff] }
 0x271   : > { %4648 = vperm.xlu0 %7442, %v4541_v21   ;;  %v9808_v21 = vshrl.u32 %v8485_v38, 16 }
 0x272   : > { %v1884_v31 = vshrl.u32 %v5321_v43, 16  ;;  %v4147_v14 = vrot.slane %v9813_v48, 2  ;;  %v7631_v48 = vld [vmem:[%s7727_s14 + $0xac] sm:$0xf] }
 0x273   : > { %v4138_v54 = vrot.slane %v9808_v21, 1 }
 0x274   : > { %4643 = vperm.xlu1 %7443, %v4540_v13   ;;  %v7624_v13 = vld [vmem:[%s7727_s14 + $0x90] sm:$0xf]  ;;  %v4148_v21 = vor.u32 %v4147_v14, %v4146_v57 }
 0x275   : > { %4658 = vperm.xlu0 %7442, %v4543_v50   ;;  %v5322_v50 = vcombine.low %v7623_v28, %v7624_v13 }
 0x276   : > { %6242 = vmatmul.mubr.bf16.gmra.mrb[40].mxu1 %v9052_v6  ;;  %v4132_v6 = vor.u32 %v4131_v26, %v4130_v8  ;;  %v1887_v8 = vshll.u32 %v5321_v43, 16  ;;  %v1886_v26 = vrot.slane %v1884_v31, 3  ;;  %v7628_v31 = vld [vmem:[%s7727_s14 + $0xa0] sm:$0xf] }
 0x277   : > { %6682 = vmatmul.mubr.bf16.gmra.mrb[80].mxu0 %v3789_v45  ;;  %6245 = vmatprep.mubr.msk.bf16.mxu1 %vm7641_vm0, %v9765_v16  ;;  %v1873_v45 = vsel %vm1182_vm4, %v9067_v22, %v1872_v34  ;;  %v9809_v22 = vshll.u32 %v8485_v38, 16  ;;  %v4551_v38 = vld [vmem:[%s9668_s2 + $0xf0] sm:$0xff] }
 0x278   : > { %6701 = vmatprep.mubr.msk.bf16.mxu0 %vm7641_vm0, %v9765_v16  ;;  %v4133_v1 = vsel %vm4121_vm6, %v4129_v33, %v4132_v6  ;;  %4653 = vperm.xlu1 %7443, %v4542_v18   ;;  %v1889_v0 = vrot.slane %v1887_v8, 4  ;;  %v4550_v33 = vld [vmem:[%s9668_s2 + $0xe8] sm:$0xff] }
 0x279   : > { %4668 = vperm.xlu0 %7442, %v4545_v61   ;;  %v4139_v5 = vrot.slane %v9809_v22, 2  ;;  %v1893_v61 = vshrl.u32 %v5322_v50, 16 }
 0x27a   : > { %v1890_v18 = vor.u32 %v1889_v0, %v1886_v26  ;;  %v9815_v0 = vshll.u32 %v8572_v58, 16 }
 0x27b   : > { %v4140_v11 = vor.u32 %v4139_v5, %v4138_v54 }
 0x27c   : > { %4663 = vperm.xlu1 %7443, %v4544_v62   ;;  %v1891_v63 = vsel %vm1182_vm4, %v1881_v40, %v1890_v18  ;;  %v5323_v62 = vcombine.low %v7625_v46, %v7626_v35  ;;  %v7627_v40 = vld [vmem:[%s7727_s14 + $0x9c] sm:$0xf]  ;;  %v4151_v28 = vrot.slane %v9815_v0, 2 }
 0x27d   : > { %4678 = vperm.xlu0 %7442, %v4547_v15   ;;  %v4554_v15 = vld [vmem:[%s9668_s2 + $0x108] sm:$0xff]  ;;  %v5324_v8 = vcombine.low %v7627_v40, %v7628_v31  ;;  %v4564_v46 = vld [vmem:[%s9668_s2 + $0x158] sm:$0xff] }
 0x27e   : > { %6246 = vmatmul.mubr.bf16.gmra.mrb[44].mxu1 %v9071_v56  ;;  %v4136_v56 = vor.u32 %v4135_v2, %v4134_v29  ;;  %v4144_v29 = vor.u32 %v4143_v36, %v4142_v30  ;;  %v1895_v2 = vrot.slane %v1893_v61, 3  ;;  %v7629_v36 = vld [vmem:[%s7727_s14 + $0xa4] sm:$0xf] }
 0x27f   : > { %6702 = vmatmul.mubr.bf16.vlgmr.msra.gmra.mrb[0].mxu0 %v4133_v1  ;;  %6249 = vmatprep.mubr.msk.bf16.mxu1 %vm7641_vm0, %v9765_v16  ;;  %v1896_v1 = vshll.u32 %v5322_v50, 16  ;;  %v1911_v50 = vshrl.u32 %v5324_v8, 16 }
 0x280   : > { %6705 = vmatprep.mubr.msk.bf16.mxu0 %vm7641_vm0, %v9765_v16  ;;  %v4137_v27 = vsel %vm4121_vm6, %v4132_v6, %v4136_v56  ;;  %4673 = vperm.xlu1 %7443, %v4546_v41   ;;  %v4553_v6 = vld [vmem:[%s9668_s2 + $0x100] sm:$0xff]  ;;  %v4141_v47 = vsel %vm4121_vm6, %v4136_v56, %v4140_v11  ;;  %v1902_v41 = vshrl.u32 %v5323_v62, 16 }
 0x281   : > { %4688 = vperm.xlu0 %7442, %v4549_v52   ;;  %v1898_v34 = vrot.slane %v1896_v1, 4  ;;  %v4557_v56 = vld [vmem:[%s9668_s2 + $0x120] sm:$0xff]  ;;  %v1905_v52 = vshll.u32 %v5323_v62, 16  ;;  %v1913_v30 = vrot.slane %v1911_v50, 3  ;;  %v4562_v1 = vld [vmem:[%s9668_s2 + $0x148] sm:$0xff]  ;;  %v9822_v50 = vshrl.u32 %v8655_v37, 16 }
 0x282   : > { %v1904_v22 = vrot.slane %v1902_v41, 3  ;;  %v9818_v41 = vshrl.u32 %v8619_v44, 16 }
 0x283   : > { %v1899_v43 = vor.u32 %v1898_v34, %v1895_v2  ;;  %v1907_v5 = vrot.slane %v1905_v52, 4  ;;  %v9817_v2 = vshll.u32 %v8598_v19, 16 }
 0x284   : > { %4683 = vperm.xlu1 %7443, %v4548_v55   ;;  %v4558_v55 = vld [vmem:[%s9668_s2 + $0x128] sm:$0xff]  ;;  %v4158_v52 = vrot.slane %v9818_v41, 1  ;;  %v9835_v41 = vshll.u32 %v8767_v42, 16  ;;  %v9839_v42 = vld [vmem:[#allocation6_spill] sm:$0xff] }
 0x285   : > { %4698 = vperm.xlu0 %7442, %v4551_v38   ;;  %v1900_v54 = vsel %vm1182_vm4, %v1890_v18, %v1899_v43  ;;  %v4561_v38 = vld [vmem:[%s9668_s2 + $0x140] sm:$0xff]  ;;  %v1908_v13 = vor.u32 %v1907_v5, %v1904_v22  ;;  %v7630_v18 = vld [vmem:[%s7727_s14 + $0xa8] sm:$0xf]  ;;  %v4155_v34 = vrot.slane %v9817_v2, 2  ;;  %v9829_v2 = vshrl.u32 %v8712_v51, 16 }
 0x286   : > { %6250 = vmatmul.mubr.bf16.gmra.mrb[48].mxu1 %v1873_v45  ;;  %v4145_v45 = vsel %vm4121_vm6, %v4140_v11, %v4144_v29  ;;  %v4149_v11 = vsel %vm4121_vm6, %v4144_v29, %v4148_v21  ;;  %v5325_v61 = vcombine.low %v7629_v36, %v7630_v18  ;;  %v9816_v29 = vshrl.u32 %v8598_v19, 16 }
 0x287   : > { %6706 = vmatmul.mubr.bf16.gmra.mrb[4].mxu0 %v4137_v27  ;;  %6253 = vmatprep.mubr.msk.bf16.mxu1 %vm7641_vm0, %v9765_v16  ;;  %v4556_v27 = vld [vmem:[%s9668_s2 + $0x118] sm:$0xff]  ;;  %v1909_v53 = vsel %vm1182_vm4, %v1899_v43, %v1908_v13 }
 0x288   : > { %6709 = vmatprep.mubr.msk.bf16.mxu0 %vm7641_vm0, %v9765_v16  ;;  %4693 = vperm.xlu1 %7443, %v4550_v33   ;;  %v1914_v33 = vshll.u32 %v5324_v8, 16  ;;  %v1920_v62 = vshrl.u32 %v5325_v61, 16 }
 0x289   : > { %4708 = vperm.xlu0 %7442, %v4553_v6   ;;  %v4560_v6 = vld [vmem:[%s9668_s2 + $0x138] sm:$0xff] }
 0x28a   : > { %v1916_v24 = vrot.slane %v1914_v33, 4  ;;  %v1922_v60 = vrot.slane %v1920_v62, 3  ;;  %v4166_v33 = vrot.slane %v9822_v50, 1  ;;  %v9844_v50 = vshll.u32 %v8845_v20, 16 }
 0x28c   : > { %4703 = vperm.xlu1 %7443, %v4552_v4   ;;  %v4565_v4 = vld [vmem:[%s9668_s2 + $0x160] sm:$0xf]  ;;  %v1917_v35 = vor.u32 %v1916_v24, %v1913_v30  ;;  %v9825_v24 = vshll.u32 %v8672_v32, 16 }
 0x28d   : > { %4718 = vperm.xlu0 %7442, %v4555_v23  }
 0x28e   : > { %6254 = vmatmul.mubr.bf16.gmra.mrb[52].mxu1 %v1882_v9  ;;  %v9814_v9 = vshrl.u32 %v8572_v58, 16  ;;  %v4563_v58 = vld [vmem:[%s9668_s2 + $0x150] sm:$0xff]  ;;  %v4171_v36 = vrot.slane %v9825_v24, 2 }
 0x28f   : > { %6710 = vmatmul.mubr.bf16.gmra.mrb[8].mxu0 %v4141_v47  ;;  %6257 = vmatprep.mubr.msk.bf16.mxu1 %vm7641_vm0, %v9765_v16 }
 0x290   : > { %6713 = vmatprep.mubr.msk.bf16.mxu0 %vm7641_vm0, %v9765_v16  ;;  %4713 = vperm.xlu1 %7443, %v4554_v15   ;;  %v4150_v26 = vrot.slane %v9814_v9, 1  ;;  %v1923_v15 = vshll.u32 %v5325_v61, 16  ;;  %v9826_v61 = vshrl.u32 %v8690_v59, 16 }
 0x291   : > { %4728 = vperm.xlu0 %7442, %v4557_v56   ;;  %v9437_v56 = vld [vmem:[%s7727_s14 + $0xb0] sm:$0x3] }
 0x292   : > { %v4152_v47 = vor.u32 %v4151_v28, %v4150_v26  ;;  %v1925_v57 = vrot.slane %v1923_v15, 4  ;;  %v5326_v14 = vcombine.low %v7631_v48, %v9437_v56 }
 0x294   : > { %4723 = vperm.xlu1 %7443, %v4556_v27   ;;  %v4153_v23 = vsel %vm4121_vm6, %v4148_v21, %v4152_v47  ;;  %v9819_v27 = vshll.u32 %v8619_v44, 16  ;;  %v1926_v21 = vor.u32 %v1925_v57, %v1922_v60  ;;  %v1932_v22 = vshll.u32 %v5326_v14, 16 }
 0x295   : > { %4738 = vperm.xlu0 %7442, %v4559_v7   ;;  %v9820_v44 = vshrl.u32 %v8640_v12, 16  ;;  %v9833_v60 = vshll.u32 %v8739_v25, 16 }
 0x296   : > { %6258 = vmatmul.mubr.bf16.gmra.mrb[56].mxu1 %v1891_v63  ;;  %v4154_v63 = vrot.slane %v9816_v29, 1  ;;  %v4159_v7 = vrot.slane %v9819_v27, 2  ;;  %v1927_v40 = vsel %vm1182_vm4, %v1917_v35, %v1926_v21  ;;  %v1934_v8 = vrot.slane %v1932_v22, 4  ;;  %v9828_v29 = vld [vmem:[#allocation2_spill] sm:$0xff] }
 0x297   : > { %6714 = vmatmul.mubr.bf16.gmra.mrb[12].mxu0 %v4145_v45  ;;  %6261 = vmatprep.mubr.msk.bf16.mxu1 %vm7641_vm0, %v9765_v16  ;;  %v1918_v45 = vsel %vm1182_vm4, %v1908_v13, %v1917_v35  ;;  %v4183_v57 = vrot.slane %v9833_v60, 2 }
 0x298   : > { %6717 = vmatprep.mubr.msk.bf16.mxu0 %vm7641_vm0, %v9765_v16  ;;  %4733 = vperm.xlu1 %7443, %v4558_v55   ;;  %v4156_v19 = vor.u32 %v4155_v34, %v4154_v63  ;;  %v4160_v5 = vor.u32 %v4159_v7, %v4158_v52  ;;  %v4178_v34 = vrot.slane %v9829_v2, 1  ;;  %v4187_v52 = vrot.slane %v9835_v41, 2 }
 0x299   : > { %4748 = vperm.xlu0 %7442, %v4561_v38   ;;  %v4162_v38 = vrot.slane %v9820_v44, 1 }
 0x29a   : > { %v4157_v43 = vsel %vm4121_vm6, %v4152_v47, %v4156_v19  ;;  %v4161_v55 = vsel %vm4121_vm6, %v4156_v19, %v4160_v5  ;;  %v9832_v19 = vshrl.u32 %v8739_v25, 16  ;;  %v9836_v25 = vld [vmem:[#allocation5_spill] sm:$0xff] }
 0x29c   : > { %4743 = vperm.xlu1 %7443, %v4560_v6  }
 0x29d   : > { %4758 = vperm.xlu0 %7442, %v4563_v58  }
 0x29e   : > { %6262 = vmatmul.mubr.bf16.gmra.mrb[60].mxu1 %v1900_v54  ;;  %v1929_v54 = vshrl.u32 %v5326_v14, 16 }
 0x29f   : > { %6718 = vmatmul.mubr.bf16.gmra.mrb[16].mxu0 %v4149_v11  ;;  %6265 = vmatprep.mubr.msk.bf16.mxu1 %vm7641_vm0, %v9765_v16  ;;  %v9821_v11 = vshll.u32 %v8640_v12, 16  ;;  %v9823_v12 = vshll.u32 %v8655_v37, 16 }
 0x2a0   : > { %6721 = vmatprep.mubr.msk.bf16.mxu0 %vm7641_vm0, %v9765_v16  ;;  %4753 = vperm.xlu1 %7443, %v4562_v1   ;;  %v1931_v31 = vrot.slane %v1929_v54, 3  ;;  %v4174_v1 = vrot.slane %v9826_v61, 1  ;;  %v9847_v61 = vld [vmem:[#allocation9_spill] sm:$0xff] }
 0x2a1   : > { %4768 = vperm.xlu0 %7442, %v4565_v4   ;;  %v4163_v9 = vrot.slane %v9821_v11, 2  ;;  %v4167_v6 = vrot.slane %v9823_v12, 2  ;;  %v9827_v4 = vshll.u32 %v8690_v59, 16  ;;  %v9831_v59 = vld [vmem:[#allocation3_spill] sm:$0xff]  ;;  %v9845_v12 = vld [vmem:[#allocation8_spill] sm:$0xff] }
 0x2a2   : > { %v1935_v26 = vor.u32 %v1934_v8, %v1931_v31  ;;  %v9840_v31 = vshrl.u32 %v8821_v39, 16 }
 0x2a3   : > { %v4164_v0 = vor.u32 %v4163_v9, %v4162_v38  ;;  %v4168_v58 = vor.u32 %v4167_v6, %v4166_v33  ;;  %v4199_v33 = vrot.slane %v9844_v50, 2 }
 0x2a4   : > { %4763 = vperm.xlu1 %7443, %v4564_v46   ;;  %v1936_v28 = vsel %vm1182_vm4, %v1926_v21, %v1935_v26  ;;  %v9830_v46 = vshll.u32 %v8712_v51, 16  ;;  %v9834_v51 = vld [vmem:[#allocation4_spill] sm:$0xff]  ;;  %v9837_v21 = vshrl.u32 %v8797_v17, 16  ;;  %v4194_v8 = vrot.slane %v9840_v31, 1 }
 0x2a5   : > { %v4165_v13 = vsel %vm4121_vm6, %v4160_v5, %v4164_v0  ;;  %v4169_v47 = vsel %vm4121_vm6, %v4164_v0, %v4168_v58 }
 0x2a6   : > { %6266 = vmatmul.mubr.bf16.gmra.mrb[64].mxu1 %v1909_v53  ;;  %v9824_v53 = vshrl.u32 %v8672_v32, 16  ;;  %v4179_v35 = vrot.slane %v9830_v46, 2  ;;  %v4190_v54 = vrot.slane %v9837_v21, 1  ;;  %v9848_v46 = vld [vmem:[#allocation10_spill] sm:$0xff] }
 0x2a7   : > { %6722 = vmatmul.mubr.bf16.gmra.mrb[20].mxu0 %v4153_v23  ;;  %6269 = vmatprep.mubr.msk.bf16.mxu1 %vm7641_vm0, %v9765_v16  ;;  %v4175_v23 = vrot.slane %v9827_v4, 2 }
 0x2a8   : > { %6725 = vmatprep.mubr.msk.bf16.mxu0 %vm7641_vm0, %v9765_v16  ;;  %v4170_v30 = vrot.slane %v9824_v53, 1  ;;  %v4180_v62 = vor.u32 %v4179_v35, %v4178_v34 }
 0x2a9   : > { %v4176_v32 = vor.u32 %v4175_v23, %v4174_v1 }
 0x2aa   : > { %v4172_v37 = vor.u32 %v4171_v36, %v4170_v30  ;;  %v9846_v36 = vshll.u32 %v8869_v3, 16 }
 0x2ab   : > { %v4181_v15 = vsel %vm4121_vm6, %v4176_v32, %v4180_v62 }
 0x2ac   : > { %v4173_v18 = vsel %vm4121_vm6, %v4168_v58, %v4172_v37  ;;  %v4177_v63 = vsel %vm4121_vm6, %v4172_v37, %v4176_v32  ;;  %v4203_v37 = vrot.slane %v9846_v36, 2 }
 0x2ae   : > { %6270 = vmatmul.mubr.bf16.gmra.mrb[68].mxu1 %v1918_v45  ;;  %v4182_v45 = vrot.slane %v9832_v19, 1 }
 0x2af   : > { %6726 = vmatmul.mubr.bf16.gmra.mrb[24].mxu0 %v4157_v43  ;;  %6273 = vmatprep.mubr.msk.bf16.mxu1 %vm7641_vm0, %v9765_v16  ;;  %v4186_v43 = vrot.slane %v3376_v10, 1  ;;  %v9838_v10 = vshll.u32 %v8797_v17, 16  ;;  %v9842_v17 = vld [vmem:[#allocation7_spill] sm:$0xff] }
 0x2b0   : > { %6729 = vmatprep.mubr.msk.bf16.mxu0 %vm7641_vm0, %v9765_v16  ;;  %v4184_v48 = vor.u32 %v4183_v57, %v4182_v45 }
 0x2b1   : > { %v4188_v27 = vor.u32 %v4187_v52, %v4186_v43  ;;  %v4191_v22 = vrot.slane %v9838_v10, 2 }
 0x2b2   : > { %v4185_v14 = vsel %vm4121_vm6, %v4180_v62, %v4184_v48 }
 0x2b3   : > { %v4189_v7 = vsel %vm4121_vm6, %v4184_v48, %v4188_v27  ;;  %v4192_v5 = vor.u32 %v4191_v22, %v4190_v54 }
 0x2b6   : > { %6274 = vmatmul.mubr.bf16.gmra.mrb[72].mxu1 %v1927_v40  ;;  %v4193_v40 = vsel %vm4121_vm6, %v4188_v27, %v4192_v5 }
 0x2b7   : > { %6730 = vmatmul.mubr.bf16.gmra.mrb[28].mxu0 %v4161_v55  ;;  %6277 = vmatprep.mubr.msk.bf16.mxu1 %vm7641_vm0, %v9765_v16  ;;  %v9841_v55 = vshll.u32 %v8821_v39, 16 }
 0x2b8   : > { %6733 = vmatprep.mubr.msk.bf16.mxu0 %vm7641_vm0, %v9765_v16 }
 0x2b9   : > { %v4195_v44 = vrot.slane %v9841_v55, 2 }
 0x2bb   : > { %v4196_v38 = vor.u32 %v4195_v44, %v4194_v8 }
 0x2bd   : > { %v4197_v39 = vsel %vm4121_vm6, %v4192_v5, %v4196_v38 }
 0x2be   : > { %6278 = vmatmul.mubr.bf16.gmra.mrb[76].mxu1 %v1936_v28  ;;  %v9843_v28 = vshrl.u32 %v8845_v20, 16  ;;  %v4202_v20 = vrot.slane %v3408_v49, 1 }
 0x2bf   : > { %6734 = vmatmul.mubr.bf16.gmra.mrb[32].mxu0 %v4165_v13  ;;  %6281 = vmatprep.mubr.msk.bf16.mxu1 %vm7641_vm0, %v9765_v16 }
 0x2c0   : > { %6737 = vmatprep.mubr.msk.bf16.mxu0 %vm7641_vm0, %v9765_v16  ;;  %v4198_v13 = vrot.slane %v9843_v28, 1  ;;  %v4204_v1 = vor.u32 %v4203_v37, %v4202_v20  ;;  %v4579_v20 = vpop.permute.xlu1 %4578 }
 0x2c2   : > { %v4200_v6 = vor.u32 %v4199_v33, %v4198_v13 }
 0x2c4   : > { %v4201_v24 = vsel %vm4121_vm6, %v4196_v38, %v4200_v6 }
 0x2c6   : > { %6282 = vmatmul.mubr.bf16.gmra.mrb[80].mxu1 %v1935_v26 }
 0x2c7   : > { %6738 = vmatmul.mubr.bf16.gmra.mrb[36].mxu0 %v4169_v47  ;;  %6345 = vmatprep.mubr.msk.bf16.mxu1 %vm7641_vm0, %v9765_v16  ;;  %v4569_v28 = vpop.permute.xlu0 %4568 }
 0x2c8   : > { %6741 = vmatprep.mubr.msk.bf16.mxu0 %vm7641_vm0, %v9765_v16 }
 0x2ce   : > { %6346 = vmatmul.mubr.bf16.vlgmr.msra.gmra.mrb[44].mxu1 %v9828_v29 }
 0x2cf   : > { %6742 = vmatmul.mubr.bf16.gmra.mrb[40].mxu0 %v4173_v18  ;;  %6349 = vmatprep.mubr.msk.bf16.mxu1 %vm7641_vm0, %v9765_v16  ;;  %v7604_v18 = vld [vmem:[%s7727_s14 + $0xb8] ss:$0 sps:$4 sm:$0xff]   ;;  %s5258_s14 = sshll.u32 %s9850_s16, 1 }
 0x2d0   : > { %6745 = vmatprep.mubr.msk.bf16.mxu0 %vm7641_vm0, %v9765_v16  ;;  %v4207_v4 = vshrl.u32 %v7604_v18, 16  ;;  %v4210_v23 = vshll.u32 %v7604_v18, 16  ;;  %s208_s23 = scalar_lea.vmem %s9670_s4, %s5258_s14 }
 0x2d2   : > { %v4209_v2 = vrot.slane %v4207_v4, 1  ;;  %v4212_v34 = vrot.slane %v4210_v23, 2 }
 0x2d4   : > { %v4213_v35 = vor.u32 %v4212_v34, %v4209_v2 }
 0x2d6   : > { %6350 = vmatmul.mubr.bf16.gmra.mrb[48].mxu1 %v9831_v59  ;;  %v4214_v60 = vsel %vm4121_vm6, %v4204_v1, %v4213_v35 }
 0x2d7   : > { %6746 = vmatmul.mubr.bf16.gmra.mrb[44].mxu0 %v4177_v63  ;;  %6353 = vmatprep.mubr.msk.bf16.mxu1 %vm7641_vm0, %v9765_v16  ;;  %v4205_v63 = vsel %vm4121_vm6, %v4200_v6, %v4204_v1  ;;  %v4574_v6 = vpop.permute.xlu0 %4573 }
 0x2d8   : > { %6749 = vmatprep.mubr.msk.bf16.mxu0 %vm7641_vm0, %v9765_v16 }
 0x2de   : > { %6354 = vmatmul.mubr.bf16.gmra.mrb[52].mxu1 %v9834_v51 }
 0x2df   : > { %6750 = vmatmul.mubr.bf16.gmra.mrb[48].mxu0 %v4181_v15  ;;  %6357 = vmatprep.mubr.msk.bf16.mxu1 %vm7641_vm0, %v9765_v16  ;;  %v5355_v15 = vcombine.low %v9437_v56, %v9437_v56 }
 0x2e0   : > { %6753 = vmatprep.mubr.msk.bf16.mxu0 %vm7641_vm0, %v9765_v16 }
 0x2e6   : > { %6358 = vmatmul.mubr.bf16.gmra.mrb[56].mxu1 %v9836_v25 }
 0x2e7   : > { %6754 = vmatmul.mubr.bf16.gmra.mrb[52].mxu0 %v4185_v14  ;;  %6361 = vmatprep.mubr.msk.bf16.mxu1 %vm7641_vm0, %v9765_v16 }
 0x2e8   : > { %6757 = vmatprep.mubr.msk.bf16.mxu0 %vm7641_vm0, %v9765_v16 }
 0x2ee   : > { %6362 = vmatmul.mubr.bf16.gmra.mrb[60].mxu1 %v9839_v42 }
 0x2ef   : > { %6758 = vmatmul.mubr.bf16.gmra.mrb[56].mxu0 %v4189_v7  ;;  %6365 = vmatprep.mubr.msk.bf16.mxu1 %vm7641_vm0, %v9765_v16 }
 0x2f0   : > { %6761 = vmatprep.mubr.msk.bf16.mxu0 %vm7641_vm0, %v9765_v16 }
 0x2f6   : > { %6366 = vmatmul.mubr.bf16.gmra.mrb[64].mxu1 %v9842_v17 }
 0x2f7   : > { %6762 = vmatmul.mubr.bf16.gmra.mrb[60].mxu0 %v4193_v40  ;;  %6369 = vmatprep.mubr.msk.bf16.mxu1 %vm7641_vm0, %v9765_v16 }
 0x2f8   : > { %6765 = vmatprep.mubr.msk.bf16.mxu0 %vm7641_vm0, %v9765_v16 }
 0x2f9   : > { %v9540_v11 = vpop.f32.mrb[0].mxu1 }
 0x2fa   : > { %v6203_v9 = vpop.f32.mrb[1].mxu1 }
 0x2fb   : > { %v9542_v26 = vpop.f32.mrb[2].mxu1 }
 0x2fc   : > { %v6204_v0 = vpop.f32.mrb[3].mxu1 }
 0x2fe   : > { %6370 = vmatmul.mubr.bf16.gmra.mrb[68].mxu1 %v9845_v12 }
 0x2ff   : > { %6766 = vmatmul.mubr.bf16.gmra.mrb[64].mxu0 %v4197_v39  ;;  %6373 = vmatprep.mubr.msk.bf16.mxu1 %vm7641_vm0, %v9765_v16 }
 0x300   : > { %6769 = vmatprep.mubr.msk.bf16.mxu0 %vm7641_vm0, %v9765_v16 }
 0x301   : > { %v9554_v58 = vpop.f32.mrb[4].mxu1 }
 0x302   : > { %v6207_v47 = vpop.f32.mrb[5].mxu1 }
 0x303   : > { %v9556_v53 = vpop.f32.mrb[6].mxu1 }
 0x304   : > { %v6208_v30 = vpop.f32.mrb[7].mxu1 }
 0x306   : > { %6374 = vmatmul.mubr.bf16.gmra.mrb[72].mxu1 %v9847_v61 }
 0x307   : > { %6770 = vmatmul.mubr.bf16.gmra.mrb[68].mxu0 %v4201_v24  ;;  %6377 = vmatprep.mubr.msk.bf16.mxu1 %vm7641_vm0, %v9765_v16 }
 0x308   : > { %6773 = vmatprep.mubr.msk.bf16.mxu0 %vm7641_vm0, %v9765_v16 }
 0x309   : > { %v9569_v29 = vpop.f32.mrb[8].mxu1 }
 0x30a   : > { %v6211_v32 = vpop.f32.mrb[9].mxu1 }
 0x30b   : > { %v9571_v49 = vpop.f32.mrb[10].mxu1 }
 0x30c   : > { %v6212_v3 = vpop.f32.mrb[11].mxu1 }
 0x30e   : > { %6378 = vmatmul.mubr.bf16.gmra.mrb[76].mxu1 %v9848_v46 }
 0x30f   : > { %6774 = vmatmul.mubr.bf16.gmra.mrb[72].mxu0 %v4205_v63  ;;  %6381 = vmatprep.mubr.msk.bf16.mxu1 %vm7641_vm0, %v9765_v16  ;;  %v4584_v63 = vpop.permute.xlu1 %4583 }
 0x310   : > { %6777 = vmatprep.mubr.msk.bf16.mxu0 %vm7641_vm0, %v9765_v16 }
 0x311   : > { %v9579_v59 = vpop.f32.mrb[12].mxu1 }
 0x312   : > { %v6215_v62 = vpop.f32.mrb[13].mxu1 }
 0x313   : > { %v9583_v19 = vpop.f32.mrb[14].mxu1 }
 0x314   : > { %v6216_v45 = vpop.f32.mrb[15].mxu1 }
 0x316   : > { %6382 = vmatmul.mubr.bf16.gmra.mrb[80].mxu1 %v5355_v15 }
 0x317   : > { %6778 = vmatmul.mubr.bf16.gmra.mrb[76].mxu0 %v4214_v60 }
 0x318   : > { %6781 = vmatprep.mubr.msk.bf16.mxu0 %vm7641_vm0, %v9765_v16 }
 0x319   : > { %v9588_v57 = vpop.f32.mrb[16].mxu1 }
 0x31a   : > { %v6219_v51 = vpop.f32.mrb[17].mxu1 }
 0x31b   : > { %v9590_v48 = vpop.f32.mrb[18].mxu1 }
 0x31c   : > { %v6220_v14 = vpop.f32.mrb[19].mxu1 }
 0x31f   : > { %6782 = vmatmul.mubr.bf16.gmra.mrb[80].mxu0 %v4213_v35 }
 0x321   : > { %v9592_v43 = vpop.f32.mrb[20].mxu1 }
 0x322   : > { %v6223_v56 = vpop.f32.mrb[21].mxu1 }
 0x323   : > { %v9594_v41 = vpop.f32.mrb[22].mxu1 }
 0x324   : > { %v6224_v52 = vpop.f32.mrb[23].mxu1 }
 0x329   : > { %v9596_v25 = vpop.f32.mrb[24].mxu1 }
 0x32a   : > { %v6227_v27 = vpop.f32.mrb[25].mxu1 }
 0x32b   : > { %v9598_v7 = vpop.f32.mrb[26].mxu1  ;;  %v4589_v27 = vpop.permute.xlu0 %4588 }
 0x32c   : > { %v6228_v21 = vpop.f32.mrb[27].mxu1 }
 0x331   : > { %v9600_v16 = vpop.f32.mrb[28].mxu1 }
 0x332   : > { %v6231_v54 = vpop.f32.mrb[29].mxu1 }
 0x333   : > { %v9602_v10 = vpop.f32.mrb[30].mxu1 }
 0x334   : > { %v6232_v22 = vpop.f32.mrb[31].mxu1 }
 0x339   : > { %v9604_v42 = vpop.f32.mrb[32].mxu1 }
 0x33a   : > { %v6235_v5 = vpop.f32.mrb[33].mxu1 }
 0x33b   : > { %v9606_v40 = vpop.f32.mrb[34].mxu1  ;;  %v4594_v5 = vpop.permute.xlu1 %4593 }
 0x33c   : > { %v6236_v31 = vpop.f32.mrb[35].mxu1 }
 0x341   : > { %v9608_v8 = vpop.f32.mrb[36].mxu1 }
 0x342   : > { %v6239_v55 = vpop.f32.mrb[37].mxu1 }
 0x343   : > { %v9610_v44 = vpop.f32.mrb[38].mxu1 }
 0x344   : > { %v6240_v17 = vpop.f32.mrb[39].mxu1 }
 0x349   : > { %v9612_v38 = vpop.f32.mrb[40].mxu1 }
 0x34a   : > { %v6243_v9 = vpop.f32.mrb[41].mxu1 }
 0x34b   : > { %v9614_v0 = vpop.f32.mrb[42].mxu1 }
 0x34c   : > { %v6244_v39 = vpop.f32.mrb[43].mxu1 }
 0x352   : > { %v4318_v13 = vpop.f32.mrb[0].mxu0 }
 0x353   : > { %v6801_v50 = vadd.f32 %v4318_v13, %v9540_v11  ;;  %v6703_v33 = vpop.f32.mrb[1].mxu0 }
 0x354   : > { %v4321_v12 = vpop.f32.mrb[2].mxu0 }
 0x355   : > { %v4771_v47 = vmul.f32 %v6801_v50, %v4569_v28  ;;  %v6802_v30 = vadd.f32 %v4321_v12, %v9542_v26  ;;  %v6704_v24 = vpop.f32.mrb[3].mxu0 }
 0x357   : > { %v5507_v36 = vpack.c.bf16 %v6802_v30, %v6801_v50  ;;  %v4772_v37 = vmul.f32 %v6802_v30, %v4574_v6  ;;  %v4861_v18 = vmul.f32 %v4771_v47, %v4771_v47  ;;  %v4599_v6 = vpop.permute.xlu0 %4598 }
 0x359   : > { %5604 = vst [vmem:[%s9186_s27 + $0x10] sm:$0xff] %v5507_v36   ;;  %v4812_v61 = vadd.f32 %v4772_v37, %v4771_v47  ;;  %v4862_v1 = vmul.f32 %v4772_v37, %v4772_v37 }
 0x35a   : > { %v4326_v4 = vpop.f32.mrb[4].mxu0 }
 0x35b   : > { %v4902_v23 = vadd.f32 %v4862_v1, %v4861_v18  ;;  %v6803_v32 = vadd.f32 %v4326_v4, %v9554_v58  ;;  %v6707_v11 = vpop.f32.mrb[5].mxu0 }
 0x35c   : > { %v4329_v3 = vpop.f32.mrb[6].mxu0 }
 0x35d   : > { %v4773_v2 = vmul.f32 %v6803_v32, %v4579_v20  ;;  %v6804_v34 = vadd.f32 %v4329_v3, %v9556_v53  ;;  %v6708_v26 = vpop.f32.mrb[7].mxu0  ;;  %v4604_v20 = vpop.permute.xlu1 %4603 }
 0x35f   : > { %v4863_v46 = vmul.f32 %v4773_v2, %v4773_v2  ;;  %v5512_v35 = vpack.c.bf16 %v6804_v34, %v6803_v32  ;;  %v4774_v62 = vmul.f32 %v6804_v34, %v4584_v63  ;;  %v4813_v15 = vadd.f32 %v4812_v61, %v4773_v2  ;;  %v4609_v63 = vpop.permute.xlu0 %4608 }
 0x361   : > { %5605 = vst [vmem:[%s9186_s27 + $0x18] sm:$0xff] %v5512_v35   ;;  %v4814_v45 = vadd.f32 %v4813_v15, %v4774_v62  ;;  %v4864_v60 = vmul.f32 %v4774_v62, %v4774_v62  ;;  %v4903_v51 = vadd.f32 %v4902_v23, %v4863_v46  ;;  %v4614_v46 = vpop.permute.xlu1 %4613 }
 0x362   : > { %v4334_v14 = vpop.f32.mrb[8].mxu0 }
 0x363   : > { %v4904_v56 = vadd.f32 %v4903_v51, %v4864_v60  ;;  %v6805_v58 = vadd.f32 %v4334_v14, %v9569_v29  ;;  %v6711_v52 = vpop.f32.mrb[9].mxu0 }
 0x364   : > { %v4337_v21 = vpop.f32.mrb[10].mxu0 }
 0x365   : > { %v4775_v54 = vmul.f32 %v6805_v58, %v4589_v27  ;;  %v6806_v53 = vadd.f32 %v4337_v21, %v9571_v49  ;;  %v6712_v22 = vpop.f32.mrb[11].mxu0  ;;  %v4619_v27 = vpop.permute.xlu0 %4618 }
 0x366   : > { %v4624_v22 = vpop.permute.xlu1 %4623 }
 0x367   : > { %v4815_v31 = vadd.f32 %v4814_v45, %v4775_v54  ;;  %v4865_v55 = vmul.f32 %v4775_v54, %v4775_v54  ;;  %v4776_v17 = vmul.f32 %v6806_v53, %v4594_v5  ;;  %v5517_v9 = vpack.c.bf16 %v6806_v53, %v6805_v58 }
 0x369   : > { %v4905_v39 = vadd.f32 %v4904_v56, %v4865_v55  ;;  %v4816_v28 = vadd.f32 %v4815_v31, %v4776_v17  ;;  %v4866_v13 = vmul.f32 %v4776_v17, %v4776_v17  ;;  %5606 = vst [vmem:[%s9186_s27 + $0x20] sm:$0xff] %v5517_v9  }
 0x36a   : > { %v4342_v50 = vpop.f32.mrb[12].mxu0 }
 0x36b   : > { %v4906_v33 = vadd.f32 %v4905_v39, %v4866_v13  ;;  %v6807_v29 = vadd.f32 %v4342_v50, %v9579_v59  ;;  %v6715_v12 = vpop.f32.mrb[13].mxu0 }
 0x36c   : > { %v4345_v47 = vpop.f32.mrb[14].mxu0 }
 0x36d   : > { %v4777_v30 = vmul.f32 %v6807_v29, %v4599_v6  ;;  %v6808_v49 = vadd.f32 %v4345_v47, %v9583_v19  ;;  %v6716_v24 = vpop.f32.mrb[15].mxu0 }
 0x36f   : > { %v4817_v36 = vadd.f32 %v4816_v28, %v4777_v30  ;;  %v4867_v37 = vmul.f32 %v4777_v30, %v4777_v30  ;;  %v4778_v18 = vmul.f32 %v6808_v49, %v4604_v20  ;;  %v5522_v61 = vpack.c.bf16 %v6808_v49, %v6807_v29  ;;  %v4629_v29 = vpop.permute.xlu0 %4628  ;;  %v4634_v30 = vpop.permute.xlu1 %4633 }
 0x371   : > { %v4907_v1 = vadd.f32 %v4906_v33, %v4867_v37  ;;  %v4818_v4 = vadd.f32 %v4817_v36, %v4778_v18  ;;  %v4868_v23 = vmul.f32 %v4778_v18, %v4778_v18  ;;  %5607 = vst [vmem:[%s9186_s27 + $0x28] sm:$0xff] %v5522_v61  }
 0x372   : > { %v4350_v32 = vpop.f32.mrb[16].mxu0 }
 0x373   : > { %v4908_v11 = vadd.f32 %v4907_v1, %v4868_v23  ;;  %v6809_v59 = vadd.f32 %v4350_v32, %v9588_v57  ;;  %v6719_v3 = vpop.f32.mrb[17].mxu0  ;;  %v4639_v32 = vpop.permute.xlu0 %4638 }
 0x374   : > { %v4353_v2 = vpop.f32.mrb[18].mxu0 }
 0x375   : > { %v4779_v34 = vmul.f32 %v6809_v59, %v4609_v63  ;;  %v6810_v19 = vadd.f32 %v4353_v2, %v9590_v48  ;;  %v6720_v26 = vpop.f32.mrb[19].mxu0  ;;  %v4644_v63 = vpop.permute.xlu1 %4643 }
 0x377   : > { %v4819_v35 = vadd.f32 %v4818_v4, %v4779_v34  ;;  %v4869_v62 = vmul.f32 %v4779_v34, %v4779_v34  ;;  %v4780_v15 = vmul.f32 %v6810_v19, %v4614_v46  ;;  %v5527_v45 = vpack.c.bf16 %v6810_v19, %v6809_v59 }
 0x379   : > { %v4909_v60 = vadd.f32 %v4908_v11, %v4869_v62  ;;  %v4820_v51 = vadd.f32 %v4819_v35, %v4780_v15  ;;  %v4870_v14 = vmul.f32 %v4780_v15, %v4780_v15  ;;  %5608 = vst [vmem:[%s9186_s27 + $0x30] sm:$0xff] %v5527_v45  }
 0x37a   : > { %v4358_v56 = vpop.f32.mrb[20].mxu0 }
 0x37b   : > { %v4910_v58 = vadd.f32 %v4909_v60, %v4870_v14  ;;  %v6811_v57 = vadd.f32 %v4358_v56, %v9592_v43  ;;  %v6723_v52 = vpop.f32.mrb[21].mxu0 }
 0x37c   : > { %v4361_v21 = vpop.f32.mrb[22].mxu0 }
 0x37d   : > { %v4781_v54 = vmul.f32 %v6811_v57, %v4619_v27  ;;  %v6812_v48 = vadd.f32 %v4361_v21, %v9594_v41  ;;  %v6724_v53 = vpop.f32.mrb[23].mxu0 }
 0x37f   : > { %v4821_v5 = vadd.f32 %v4820_v51, %v4781_v54  ;;  %v4871_v31 = vmul.f32 %v4781_v54, %v4781_v54  ;;  %v4782_v55 = vmul.f32 %v6812_v48, %v4624_v22  ;;  %v5532_v17 = vpack.c.bf16 %v6812_v48, %v6811_v57  ;;  %v4649_v51 = vpop.permute.xlu0 %4648  ;;  %v4654_v57 = vpop.permute.xlu1 %4653 }
 0x381   : > { %v4911_v9 = vadd.f32 %v4910_v58, %v4871_v31  ;;  %v4822_v39 = vadd.f32 %v4821_v5, %v4782_v55  ;;  %v4872_v28 = vmul.f32 %v4782_v55, %v4782_v55  ;;  %5609 = vst [vmem:[%s9186_s27 + $0x38] sm:$0xff] %v5532_v17  }
 0x382   : > { %v4366_v13 = vpop.f32.mrb[24].mxu0 }
 0x383   : > { %v4912_v50 = vadd.f32 %v4911_v9, %v4872_v28  ;;  %v6813_v43 = vadd.f32 %v4366_v13, %v9596_v25  ;;  %v6727_v33 = vpop.f32.mrb[25].mxu0  ;;  %v4659_v31 = vpop.permute.xlu0 %4658 }
 0x384   : > { %v4369_v12 = vpop.f32.mrb[26].mxu0  ;;  %v4664_v13 = vpop.permute.xlu1 %4663 }
 0x385   : > { %v4783_v6 = vmul.f32 %v6813_v43, %v4629_v29  ;;  %v6814_v41 = vadd.f32 %v4369_v12, %v9598_v7  ;;  %v6728_v47 = vpop.f32.mrb[27].mxu0 }
 0x387   : > { %v4823_v49 = vadd.f32 %v4822_v39, %v4783_v6  ;;  %v4873_v24 = vmul.f32 %v4783_v6, %v4783_v6  ;;  %v4784_v20 = vmul.f32 %v6814_v41, %v4634_v30  ;;  %v5537_v36 = vpack.c.bf16 %v6814_v41, %v6813_v43  ;;  %v4669_v12 = vpop.permute.xlu0 %4668 }
 0x389   : > { %v4913_v37 = vadd.f32 %v4912_v50, %v4873_v24  ;;  %v4824_v18 = vadd.f32 %v4823_v49, %v4784_v20  ;;  %v4874_v61 = vmul.f32 %v4784_v20, %v4784_v20  ;;  %5610 = vst [vmem:[%s9186_s27 + $0x40] sm:$0xff] %v5537_v36  }
 0x38a   : > { %v4374_v1 = vpop.f32.mrb[28].mxu0 }
 0x38b   : > { %v4914_v4 = vadd.f32 %v4913_v37, %v4874_v61  ;;  %v6815_v25 = vadd.f32 %v4374_v1, %v9600_v16  ;;  %v6731_v23 = vpop.f32.mrb[29].mxu0 }
 0x38c   : > { %v4377_v11 = vpop.f32.mrb[30].mxu0 }
 0x38d   : > { %v4785_v59 = vmul.f32 %v6815_v25, %v4639_v32  ;;  %v6816_v7 = vadd.f32 %v4377_v11, %v9602_v10  ;;  %v6732_v3 = vpop.f32.mrb[31].mxu0 }
 0x38f   : > { %v4825_v2 = vadd.f32 %v4824_v18, %v4785_v59  ;;  %v4875_v34 = vmul.f32 %v4785_v59, %v4785_v59  ;;  %v4786_v19 = vmul.f32 %v6816_v7, %v4644_v63  ;;  %v5542_v26 = vpack.c.bf16 %v6816_v7, %v6815_v25  ;;  %v4674_v25 = vpop.permute.xlu1 %4673  ;;  %v4679_v7 = vpop.permute.xlu0 %4678 }
 0x391   : > { %v4915_v46 = vadd.f32 %v4914_v4, %v4875_v34  ;;  %v4826_v35 = vadd.f32 %v4825_v2, %v4786_v19  ;;  %v4876_v62 = vmul.f32 %v4786_v19, %v4786_v19  ;;  %5611 = vst [vmem:[%s9186_s27 + $0x48] sm:$0xff] %v5542_v26  }
 0x392   : > { %v4382_v15 = vpop.f32.mrb[32].mxu0 }
 0x393   : > { %v4916_v45 = vadd.f32 %v4915_v46, %v4876_v62  ;;  %v6817_v16 = vadd.f32 %v4382_v15, %v9604_v42  ;;  %v6735_v60 = vpop.f32.mrb[33].mxu0 }
 0x394   : > { %v4385_v14 = vpop.f32.mrb[34].mxu0 }
 0x395   : > { %v4787_v56 = vmul.f32 %v6817_v16, %v4649_v51  ;;  %v6818_v10 = vadd.f32 %v4385_v14, %v9606_v40  ;;  %v6736_v58 = vpop.f32.mrb[35].mxu0  ;;  %v4684_v51 = vpop.permute.xlu1 %4683 }
 0x397   : > { %v4827_v52 = vadd.f32 %v4826_v35, %v4787_v56  ;;  %v4877_v27 = vmul.f32 %v4787_v56, %v4787_v56  ;;  %v4788_v21 = vmul.f32 %v6818_v10, %v4654_v57  ;;  %v5547_v54 = vpack.c.bf16 %v6818_v10, %v6817_v16  ;;  %v4689_v57 = vpop.permute.xlu0 %4688 }
 0x399   : > { %v4917_v48 = vadd.f32 %v4916_v45, %v4877_v27  ;;  %v4828_v53 = vadd.f32 %v4827_v52, %v4788_v21  ;;  %v4878_v22 = vmul.f32 %v4788_v21, %v4788_v21  ;;  %5612 = vst [vmem:[%s9186_s27 + $0x50] sm:$0xff] %v5547_v54  }
 0x39a   : > { %v4390_v5 = vpop.f32.mrb[36].mxu0 }
 0x39b   : > { %v4918_v55 = vadd.f32 %v4917_v48, %v4878_v22  ;;  %v6819_v42 = vadd.f32 %v4390_v5, %v9608_v8  ;;  %v6739_v17 = vpop.f32.mrb[37].mxu0 }
 0x39c   : > { %v4393_v9 = vpop.f32.mrb[38].mxu0 }
 0x39d   : > { %v4789_v39 = vmul.f32 %v6819_v42, %v4659_v31  ;;  %v6820_v40 = vadd.f32 %v4393_v9, %v9610_v44  ;;  %v6740_v28 = vpop.f32.mrb[39].mxu0 }
 0x39e   : > { %v4694_v28 = vpop.permute.xlu1 %4693 }
 0x39f   : > { %v4829_v50 = vadd.f32 %v4828_v53, %v4789_v39  ;;  %v4879_v43 = vmul.f32 %v4789_v39, %v4789_v39  ;;  %v4790_v33 = vmul.f32 %v6820_v40, %v4664_v13  ;;  %v5552_v29 = vpack.c.bf16 %v6820_v40, %v6819_v42 }
 0x3a1   : > { %v4919_v6 = vadd.f32 %v4918_v55, %v4879_v43  ;;  %v4830_v41 = vadd.f32 %v4829_v50, %v4790_v33  ;;  %v4880_v47 = vmul.f32 %v4790_v33, %v4790_v33  ;;  %5613 = vst [vmem:[%s9186_s27 + $0x58] sm:$0xff] %v5552_v29   ;;  %v2475_v30 = vpop.f32.mrb[44].mxu1  ;;  %v4699_v29 = vpop.permute.xlu0 %4698 }
 0x3a2   : > { %v4398_v49 = vpop.f32.mrb[40].mxu0  ;;  %v6347_v24 = vpop.f32.mrb[45].mxu1 }
 0x3a3   : > { %v4920_v8 = vadd.f32 %v4919_v6, %v4880_v47  ;;  %v6821_v20 = vadd.f32 %v4398_v49, %v9612_v38  ;;  %v6743_v36 = vpop.f32.mrb[41].mxu0  ;;  %v2478_v44 = vpop.f32.mrb[46].mxu1 }
 0x3a4   : > { %v4401_v37 = vpop.f32.mrb[42].mxu0  ;;  %v6348_v18 = vpop.f32.mrb[47].mxu1 }
 0x3a5   : > { %v4791_v61 = vmul.f32 %v6821_v20, %v4669_v12  ;;  %v6822_v1 = vadd.f32 %v4401_v37, %v9614_v0  ;;  %v6744_v4 = vpop.f32.mrb[43].mxu0 }
 0x3a6   : > { %v4704_v4 = vpop.permute.xlu1 %4703 }
 0x3a7   : > { %v4831_v23 = vadd.f32 %v4830_v41, %v4791_v61  ;;  %v4881_v32 = vmul.f32 %v4791_v61, %v4791_v61  ;;  %v4792_v11 = vmul.f32 %v6822_v1, %v4674_v25  ;;  %v5557_v59 = vpack.c.bf16 %v6822_v1, %v6821_v20 }
 0x3a9   : > { %v4921_v3 = vadd.f32 %v4920_v8, %v4881_v32  ;;  %v4832_v63 = vadd.f32 %v4831_v23, %v4792_v11  ;;  %v4882_v2 = vmul.f32 %v4792_v11, %v4792_v11  ;;  %5614 = vst [vmem:[%s9186_s27 + $0x60] sm:$0xff] %v5557_v59   ;;  %v2483_v38 = vpop.f32.mrb[48].mxu1  ;;  %v4709_v59 = vpop.permute.xlu0 %4708 }
 0x3aa   : > { %v4406_v34 = vpop.f32.mrb[44].mxu0  ;;  %v6351_v19 = vpop.f32.mrb[49].mxu1 }
 0x3ab   : > { %v4922_v26 = vadd.f32 %v4921_v3, %v4882_v2  ;;  %v6823_v46 = vadd.f32 %v4406_v34, %v2475_v30  ;;  %v6747_v35 = vpop.f32.mrb[45].mxu0  ;;  %v2486_v62 = vpop.f32.mrb[50].mxu1 }
 0x3ac   : > { %v4409_v0 = vpop.f32.mrb[46].mxu0  ;;  %v6352_v15 = vpop.f32.mrb[51].mxu1 }
 0x3ad   : > { %v4793_v45 = vmul.f32 %v6823_v46, %v4679_v7  ;;  %v6824_v16 = vadd.f32 %v4409_v0, %v2478_v44  ;;  %v6748_v60 = vpop.f32.mrb[47].mxu0 }
 0x3ae   : > { %v4714_v60 = vpop.permute.xlu1 %4713 }
 0x3af   : > { %v4833_v14 = vadd.f32 %v4832_v63, %v4793_v45  ;;  %v4883_v56 = vmul.f32 %v4793_v45, %v4793_v45  ;;  %v4794_v10 = vmul.f32 %v6824_v16, %v4684_v51  ;;  %v5562_v58 = vpack.c.bf16 %v6824_v16, %v6823_v46 }
 0x3b1   : > { %v4923_v52 = vadd.f32 %v4922_v26, %v4883_v56  ;;  %v4834_v27 = vadd.f32 %v4833_v14, %v4794_v10  ;;  %v4884_v21 = vmul.f32 %v4794_v10, %v4794_v10  ;;  %5615 = vst [vmem:[%s9186_s27 + $0x68] sm:$0xff] %v5562_v58   ;;  %v2491_v54 = vpop.f32.mrb[52].mxu1  ;;  %v4719_v58 = vpop.permute.xlu0 %4718 }
 0x3b2   : > { %v4414_v48 = vpop.f32.mrb[48].mxu0  ;;  %v6355_v53 = vpop.f32.mrb[53].mxu1 }
 0x3b3   : > { %v4924_v22 = vadd.f32 %v4923_v52, %v4884_v21  ;;  %v6825_v5 = vadd.f32 %v4414_v48, %v2483_v38  ;;  %v6751_v31 = vpop.f32.mrb[49].mxu0  ;;  %v2494_v55 = vpop.f32.mrb[54].mxu1 }
 0x3b4   : > { %v4417_v42 = vpop.f32.mrb[50].mxu0  ;;  %v6356_v17 = vpop.f32.mrb[55].mxu1 }
 0x3b5   : > { %v4795_v9 = vmul.f32 %v6825_v5, %v4689_v57  ;;  %v6826_v39 = vadd.f32 %v4417_v42, %v2486_v62  ;;  %v6752_v40 = vpop.f32.mrb[51].mxu0 }
 0x3b6   : > { %v4724_v40 = vpop.permute.xlu1 %4723 }
 0x3b7   : > { %v4835_v13 = vadd.f32 %v4834_v27, %v4795_v9  ;;  %v4885_v50 = vmul.f32 %v4795_v9, %v4795_v9  ;;  %v4796_v43 = vmul.f32 %v6826_v39, %v4694_v28  ;;  %v5567_v33 = vpack.c.bf16 %v6826_v39, %v6825_v5 }
 0x3b9   : > { %v4925_v12 = vadd.f32 %v4924_v22, %v4885_v50  ;;  %v4836_v6 = vadd.f32 %v4835_v13, %v4796_v43  ;;  %v4886_v41 = vmul.f32 %v4796_v43, %v4796_v43  ;;  %5616 = vst [vmem:[%s9186_s27 + $0x70] sm:$0xff] %v5567_v33   ;;  %v2499_v47 = vpop.f32.mrb[56].mxu1  ;;  %v4729_v33 = vpop.permute.xlu0 %4728 }
 0x3ba   : > { %v4422_v30 = vpop.f32.mrb[52].mxu0  ;;  %v6359_v49 = vpop.f32.mrb[57].mxu1 }
 0x3bb   : > { %v4926_v24 = vadd.f32 %v4925_v12, %v4886_v41  ;;  %v6827_v8 = vadd.f32 %v4422_v30, %v2491_v54  ;;  %v6755_v20 = vpop.f32.mrb[53].mxu0  ;;  %v2502_v36 = vpop.f32.mrb[58].mxu1 }
 0x3bc   : > { %v4425_v44 = vpop.f32.mrb[54].mxu0  ;;  %v6360_v37 = vpop.f32.mrb[59].mxu1 }
 0x3bd   : > { %v4797_v18 = vmul.f32 %v6827_v8, %v4699_v29  ;;  %v6828_v61 = vadd.f32 %v4425_v44, %v2494_v55  ;;  %v6756_v1 = vpop.f32.mrb[55].mxu0 }
 0x3be   : > { %v4734_v1 = vpop.permute.xlu1 %4733 }
 0x3bf   : > { %v4837_v25 = vadd.f32 %v4836_v6, %v4797_v18  ;;  %v4887_v23 = vmul.f32 %v4797_v18, %v4797_v18  ;;  %v4798_v32 = vmul.f32 %v6828_v61, %v4704_v4  ;;  %v5572_v11 = vpack.c.bf16 %v6828_v61, %v6827_v8 }
 0x3c1   : > { %v4927_v7 = vadd.f32 %v4926_v24, %v4887_v23  ;;  %v4838_v3 = vadd.f32 %v4837_v25, %v4798_v32  ;;  %v4888_v63 = vmul.f32 %v4798_v32, %v4798_v32  ;;  %5617 = vst [vmem:[%s9186_s27 + $0x78] sm:$0xff] %v5572_v11   ;;  %v2507_v2 = vpop.f32.mrb[60].mxu1  ;;  %v4739_v11 = vpop.permute.xlu0 %4738 }
 0x3c2   : > { %v4430_v38 = vpop.f32.mrb[56].mxu0  ;;  %v6363_v34 = vpop.f32.mrb[61].mxu1 }
 0x3c3   : > { %v4928_v19 = vadd.f32 %v4927_v7, %v4888_v63  ;;  %v6829_v26 = vadd.f32 %v4430_v38, %v2499_v47  ;;  %v6759_v46 = vpop.f32.mrb[57].mxu0  ;;  %v2510_v35 = vpop.f32.mrb[62].mxu1 }
 0x3c4   : > { %v4433_v62 = vpop.f32.mrb[58].mxu0  ;;  %v6364_v0 = vpop.f32.mrb[63].mxu1 }
 0x3c5   : > { %v4799_v15 = vmul.f32 %v6829_v26, %v4709_v59  ;;  %v6830_v45 = vadd.f32 %v4433_v62, %v2502_v36  ;;  %v6760_v16 = vpop.f32.mrb[59].mxu0 }
 0x3c6   : > { %v4744_v16 = vpop.permute.xlu1 %4743 }
 0x3c7   : > { %v4839_v51 = vadd.f32 %v4838_v3, %v4799_v15  ;;  %v4889_v14 = vmul.f32 %v4799_v15, %v4799_v15  ;;  %v4800_v56 = vmul.f32 %v6830_v45, %v4714_v60  ;;  %v5577_v10 = vpack.c.bf16 %v6830_v45, %v6829_v26 }
 0x3c9   : > { %v4929_v57 = vadd.f32 %v4928_v19, %v4889_v14  ;;  %v4840_v52 = vadd.f32 %v4839_v51, %v4800_v56  ;;  %v4890_v27 = vmul.f32 %v4800_v56, %v4800_v56  ;;  %5618 = vst [vmem:[%s9186_s27 + $0x80] sm:$0xff] %v5577_v10   ;;  %v2515_v21 = vpop.f32.mrb[64].mxu1  ;;  %v4749_v10 = vpop.permute.xlu0 %4748 }
 0x3ca   : > { %v4438_v54 = vpop.f32.mrb[60].mxu0  ;;  %v6367_v48 = vpop.f32.mrb[65].mxu1 }
 0x3cb   : > { %v4930_v53 = vadd.f32 %v4929_v57, %v4890_v27  ;;  %v6831_v22 = vadd.f32 %v4438_v54, %v2507_v2  ;;  %v6763_v5 = vpop.f32.mrb[61].mxu0  ;;  %v2518_v31 = vpop.f32.mrb[66].mxu1 }
 0x3cc   : > { %v4441_v55 = vpop.f32.mrb[62].mxu0  ;;  %v6368_v42 = vpop.f32.mrb[67].mxu1 }
 0x3cd   : > { %v4801_v17 = vmul.f32 %v6831_v22, %v4719_v58  ;;  %v6832_v9 = vadd.f32 %v4441_v55, %v2510_v35  ;;  %v6764_v39 = vpop.f32.mrb[63].mxu0 }
 0x3ce   : > { %v4754_v39 = vpop.permute.xlu1 %4753 }
 0x3cf   : > { %v4841_v28 = vadd.f32 %v4840_v52, %v4801_v17  ;;  %v4891_v13 = vmul.f32 %v4801_v17, %v4801_v17  ;;  %v4802_v50 = vmul.f32 %v6832_v9, %v4724_v40  ;;  %v5582_v43 = vpack.c.bf16 %v6832_v9, %v6831_v22 }
 0x3d1   : > { %v4931_v29 = vadd.f32 %v4930_v53, %v4891_v13  ;;  %v4842_v12 = vadd.f32 %v4841_v28, %v4802_v50  ;;  %v4892_v6 = vmul.f32 %v4802_v50, %v4802_v50  ;;  %5619 = vst [vmem:[%s9186_s27 + $0x88] sm:$0xff] %v5582_v43   ;;  %v2523_v41 = vpop.f32.mrb[68].mxu1  ;;  %v4759_v43 = vpop.permute.xlu0 %4758 }
 0x3d2   : > { %v4446_v47 = vpop.f32.mrb[64].mxu0  ;;  %v6371_v30 = vpop.f32.mrb[69].mxu1 }
 0x3d3   : > { %v4932_v49 = vadd.f32 %v4931_v29, %v4892_v6  ;;  %v6833_v24 = vadd.f32 %v4446_v47, %v2515_v21  ;;  %v6767_v8 = vpop.f32.mrb[65].mxu0  ;;  %v2526_v20 = vpop.f32.mrb[70].mxu1 }
 0x3d4   : > { %v4449_v36 = vpop.f32.mrb[66].mxu0  ;;  %v6372_v44 = vpop.f32.mrb[71].mxu1 }
 0x3d5   : > { %v4803_v37 = vmul.f32 %v6833_v24, %v4729_v33  ;;  %v6834_v18 = vadd.f32 %v4449_v36, %v2518_v31  ;;  %v6768_v61 = vpop.f32.mrb[67].mxu0 }
 0x3d6   : > { %v4764_v61 = vpop.permute.xlu1 %4763 }
 0x3d7   : > { %v4843_v4 = vadd.f32 %v4842_v12, %v4803_v37  ;;  %v4893_v25 = vmul.f32 %v4803_v37, %v4803_v37  ;;  %v4804_v23 = vmul.f32 %v6834_v18, %v4734_v1  ;;  %v5587_v32 = vpack.c.bf16 %v6834_v18, %v6833_v24 }
 0x3d9   : > { %v4933_v59 = vadd.f32 %v4932_v49, %v4893_v25  ;;  %v4844_v7 = vadd.f32 %v4843_v4, %v4804_v23  ;;  %v4894_v3 = vmul.f32 %v4804_v23, %v4804_v23  ;;  %5620 = vst [vmem:[%s9186_s27 + $0x90] sm:$0xff] %v5587_v32   ;;  %v2531_v63 = vpop.f32.mrb[72].mxu1 }
 0x3da   : > { %v4454_v2 = vpop.f32.mrb[68].mxu0  ;;  %v6375_v38 = vpop.f32.mrb[73].mxu1 }
 0x3db   : > { %v4934_v34 = vadd.f32 %v4933_v59, %v4894_v3  ;;  %v6835_v19 = vadd.f32 %v4454_v2, %v2523_v41  ;;  %v6771_v26 = vpop.f32.mrb[69].mxu0  ;;  %v2534_v46 = vpop.f32.mrb[74].mxu1 }
 0x3dc   : > { %v4457_v35 = vpop.f32.mrb[70].mxu0  ;;  %v6376_v62 = vpop.f32.mrb[75].mxu1 }
 0x3dd   : > { %v4805_v0 = vmul.f32 %v6835_v19, %v4739_v11  ;;  %v6836_v15 = vadd.f32 %v4457_v35, %v2526_v20  ;;  %v6772_v45 = vpop.f32.mrb[71].mxu0  ;;  %v4769_v38 = vpop.permute.xlu0 %4768 }
 0x3df   : > { %v4845_v60 = vadd.f32 %v4844_v7, %v4805_v0  ;;  %v4895_v51 = vmul.f32 %v4805_v0, %v4805_v0  ;;  %v4806_v14 = vmul.f32 %v6836_v15, %v4744_v16  ;;  %v5592_v56 = vpack.c.bf16 %v6836_v15, %v6835_v19 }
 0x3e1   : > { %v4935_v58 = vadd.f32 %v4934_v34, %v4895_v51  ;;  %v4846_v57 = vadd.f32 %v4845_v60, %v4806_v14  ;;  %v4896_v52 = vmul.f32 %v4806_v14, %v4806_v14  ;;  %5621 = vst [vmem:[%s9186_s27 + $0x98] sm:$0xff] %v5592_v56   ;;  %v2539_v27 = vpop.f32.mrb[76].mxu1 }
 0x3e2   : > { %v4462_v21 = vpop.f32.mrb[72].mxu0  ;;  %v6379_v54 = vpop.f32.mrb[77].mxu1 }
 0x3e3   : > { %v4936_v48 = vadd.f32 %v4935_v58, %v4896_v52  ;;  %v6837_v53 = vadd.f32 %v4462_v21, %v2531_v63  ;;  %v6775_v22 = vpop.f32.mrb[73].mxu0  ;;  %v2542_v5 = vpop.f32.mrb[78].mxu1 }
 0x3e4   : > { %v4465_v31 = vpop.f32.mrb[74].mxu0  ;;  %v6380_v55 = vpop.f32.mrb[79].mxu1 }
 0x3e5   : > { %v4807_v42 = vmul.f32 %v6837_v53, %v4749_v10  ;;  %v6838_v17 = vadd.f32 %v4465_v31, %v2534_v46  ;;  %v6776_v9 = vpop.f32.mrb[75].mxu0 }
 0x3e7   : > { %v4847_v40 = vadd.f32 %v4846_v57, %v4807_v42  ;;  %v4897_v28 = vmul.f32 %v4807_v42, %v4807_v42  ;;  %v4808_v13 = vmul.f32 %v6838_v17, %v4754_v39  ;;  %v5597_v50 = vpack.c.bf16 %v6838_v17, %v6837_v53 }
 0x3e9   : > { %v4937_v33 = vadd.f32 %v4936_v48, %v4897_v28  ;;  %v4848_v29 = vadd.f32 %v4847_v40, %v4808_v13  ;;  %v4898_v12 = vmul.f32 %v4808_v13, %v4808_v13  ;;  %5622 = vst [vmem:[%s9186_s27 + $0xa0] sm:$0xff] %v5597_v50   ;;  %v2547_v6 = vpop.f32.mrb[80].mxu1 }
 0x3ea   : > { %v4470_v41 = vpop.f32.mrb[76].mxu0  ;;  %v6383_v47 = vpop.f32.mrb[81].mxu1 }
 0x3eb   : > { %v4938_v30 = vadd.f32 %v4937_v33, %v4898_v12  ;;  %v6839_v49 = vadd.f32 %v4470_v41, %v2539_v27  ;;  %v6779_v24 = vpop.f32.mrb[77].mxu0  ;;  %v2550_v8 = vpop.f32.mrb[82].mxu1 }
 0x3ec   : > { %v4473_v20 = vpop.f32.mrb[78].mxu0  ;;  %v6384_v36 = vpop.f32.mrb[83].mxu1 }
 0x3ed   : > { %v4809_v44 = vmul.f32 %v6839_v49, %v4759_v43  ;;  %v6840_v37 = vadd.f32 %v4473_v20, %v2542_v5  ;;  %v6780_v18 = vpop.f32.mrb[79].mxu0 }
 0x3ef   : > { %v4849_v1 = vadd.f32 %v4848_v29, %v4809_v44  ;;  %v4899_v4 = vmul.f32 %v4809_v44, %v4809_v44  ;;  %v4810_v25 = vmul.f32 %v6840_v37, %v4764_v61  ;;  %v5602_v23 = vpack.c.bf16 %v6840_v37, %v6839_v49 }
 0x3f1   : > { %v4939_v32 = vadd.f32 %v4938_v30, %v4899_v4  ;;  %v4850_v11 = vadd.f32 %v4849_v1, %v4810_v25  ;;  %v4900_v59 = vmul.f32 %v4810_v25, %v4810_v25  ;;  %5623 = vst [vmem:[%s9186_s27 + $0xa8] sm:$0xff] %v5602_v23  }
 0x3f2   : > { %v4478_v7 = vpop.f32.mrb[80].mxu0 }
 0x3f3   : > { %v4940_v3 = vadd.f32 %v4939_v32, %v4900_v59  ;;  %v6841_v63 = vadd.f32 %v4478_v7, %v2547_v6  ;;  %v6783_v2 = vpop.f32.mrb[81].mxu0 }
 0x3f4   : > { %v4481_v34 = vpop.f32.mrb[82].mxu0 }
 0x3f5   : > { %v4811_v19 = vmul.f32 %v6841_v63, %v4769_v38  ;;  %v5503_v26 = vpack.c.bf16 %v6841_v63, %v6841_v63  ;;  %v6784_v46 = vpop.f32.mrb[83].mxu0 }
 0x3f7   : > { %v4852_v35 = vsel %vm4851_vm7, %v4811_v19, 0.0  ;;  %v4901_v62 = vmul.f32 %v4811_v19, %v4811_v19  ;;  %5159 = vst [vmem:[%s9186_s27 + $0xb0] sm:$0x3] %v5503_v26 }
 0x3f8   : > { %v4853_v0 = vadd.f32 %v4852_v35, %v4850_v11 }
 0x3f9   : > { %v4941_v15 = vsel %vm4851_vm7, %v4901_v62, 0.0 }
 0x3fa   : > { %v4854_v45 = vrot.slane %v4853_v0, 4  ;;  %v4942_v16 = vadd.f32 %v4941_v15, %v4940_v3 }
 0x3fc   : > { %v4855_v60 = vadd.f32 %v4854_v45, %v4853_v0  ;;  %v4943_v51 = vrot.slane %v4942_v16, 4 }
 0x3fe   : > { %v4856_v14 = vrot.slane %v4855_v60, 2  ;;  %v4944_v56 = vadd.f32 %v4943_v51, %v4942_v16 }
 0x400   : > { %v4857_v10 = vadd.f32 %v4856_v14, %v4855_v60  ;;  %v4945_v58 = vrot.slane %v4944_v56, 2 }
 0x402   : > { %v4858_v57 = vrot.slane %v4857_v10, 1  ;;  %v4946_v52 = vadd.f32 %v4945_v58, %v4944_v56 }
 0x404   : > { %v4859_v27 = vadd.f32 %v4858_v57, %v4857_v10  ;;  %v4947_v21 = vrot.slane %v4946_v52, 1 }
 0x406   : > { %4860 = vst [vmem:[%s208_s23] sm:$0x1] %v4859_v27  ;;  %v4948_v54 = vadd.f32 %v4947_v21, %v4946_v52 }
 0x408   : > { %4949 = vst [vmem:[%s208_s23 + $0x1] sm:$0x1] %v4948_v54 }
 0x409 PF: > { %s15_s15 = sadd.s32 1, %s7638_s15  }
 0x40a   : > { %p12_p4 = scmp.ge.s32.totalorder %s15_s15, 4  }
 0x40c   :  { %14 = sbr.rel (!%p12_p4) target bundleno = 1 (0x1), region = 74 }

// kernel: residual_block_forward.4
= control target key start
LH: loop header
LB: loop body
LE: loop exit
PB: predicated region body
PF: predicated region fallthrough
CT: control target
= control target key end

     0   :  { %s8651_s18 = smov 0   ;;  %s11399_s0 = inlined_call_operand.vmem [shape: bf16[2,388,128], index: 0, kind: input, shape index: {}]   ;;  %s11400_s1 = inlined_call_operand.vmem [shape: f32[8,128], index: 1, kind: input, shape index: {}]   ;;  %s11401_s2 = inlined_call_operand.vmem [shape: f32[388,1], index: 2, kind: input, shape index: {}]   ;;  %s11402_s3 = inlined_call_operand.vmem [shape: bf16[1152,128], index: 3, kind: input, shape index: {}]   ;;  %s11403_s4 = inlined_call_operand.vmem [shape: bf16[2,388,128], index: 4, kind: output, shape index: {0}]   ;;  %s11404_s5 = inlined_call_operand.vmem [shape: f32[2,2,128], index: 5, kind: output, shape index: {1}]  }
   0x1 LB: > { %s5876_s19 = sadd.s32 4294967295, %s8616_s18   ;;  %p5880_p0 = scmp.ge.s32.totalorder %s8616_s18, 1  ;;  %s8616_s18 = sphi %s8651_s18, %s16_s18  }
   0x2   : > { %p190_p1 = scmp.lt.s32.totalorder %s8616_s18, 3 }
   0x4   : > { %p191_p2 = pnand %p5880_p0, %p190_p1 }
   0x6   : > { %194 = sbr.rel (%p191_p2) target bundleno = 1158 (0x486), region = 36 }
   0xd   : > { %p222_p3 = scmp.lt.s32.totalorder %s5876_s19, 1  ;;  %v243_v0 = vld [vmem:[%s11401_s2 + $0x20] sm:$0xff]  ;;  %v8618_v2 = vmov 0   ;;  %v244_v3 = vld [vmem:[%s11401_s2 + $0x28] sm:$0xff]  ;;  %v11406_v5 = vmov 0.0   ;;  %v241_v6 = vld [vmem:[%s11401_s2 + $0x10] sm:$0xff] }
   0xe   : > { %v239_v1 = vld [vmem:[%s11401_s2] sm:$0xff]  ;;  %8430 = vset.pattern.permute.xlu1 %v8618_v2  ;;  %8429 = vset.pattern.permute.xlu0 %v8618_v2  ;;  %v240_v4 = vld [vmem:[%s11401_s2 + $0x8] sm:$0xff]  ;;  %v242_v7 = vld [vmem:[%s11401_s2 + $0x18] sm:$0xff]  ;;  %vm8620_vm0 = vmmov 0   ;;  %vm1261_vm1 = vcmask 1044480   ;;  %vm4620_vm5 = vcmask 1046528  }
   0xf   : > { %s11866_s19 = smov (!%p222_p3, %s5876_s19), 1  ;;  %563 = vperm.xlu0 %8429, %v243_v0   ;;  %543 = vperm.xlu1 %8430, %v239_v1   ;;  %v245_v8 = vld [vmem:[%s11401_s2 + $0x30] sm:$0xff]  ;;  %v246_v9 = vld [vmem:[%s11401_s2 + $0x38] sm:$0xff]  ;;  %v247_v10 = vld [vmem:[%s11401_s2 + $0x40] sm:$0xff]  ;;  %vm3485_vm2 = vsmask.f32 7424 }
  0x10   : > { %7272 = vmatprep.subr.bf16.mxu0 %v11406_v5  ;;  %6872 = vmatprep.subr.bf16.mxu1 %v11406_v5  ;;  %s8417_s28 = smul.u32 196, %s11866_s19  ;;  %v248_v11 = vld [vmem:[%s11401_s2 + $0x48] sm:$0xff]  ;;  %v249_v12 = vld [vmem:[%s11401_s2 + $0x50] sm:$0xff]  ;;  %v250_v13 = vld [vmem:[%s11401_s2 + $0x58] sm:$0xff]  ;;  %vm2053_vm3 = vsmask.f32 4352 }
  0x11   : > { %v8431_v14 = vld [vmem:[%s11402_s3 + $0x100] sm:$0xff]   ;;  %v8432_v15 = vld [vmem:[%s11402_s3 + $0x108] sm:$0xff]   ;;  %7288 = vmatprep.mubr.msk.bf16.mxu0 %vm8620_vm0, %v11406_v5  ;;  %6888 = vmatprep.mubr.msk.bf16.mxu1 %vm8620_vm0, %v11406_v5  ;;  %v8434_v20 = vld [vmem:[%s11402_s3 + $0x110] sm:$0xff]   ;;  %vm1575_vm4 = vsmask.f32 5376  ;;  %vm5476_vm7 = vcmask 1043456  }
  0x12   : > { %s8681_s6 = scalar_lea.vmem %s11403_s4, %s8417_s28  ;;  %7273 = vmatpush3.bf16.msra.mxu0 %v8431_v14  ;;  %v8433_v16 = vld [vmem:[%s11402_s3 + $0x40] sm:$0xff]   ;;  %v8435_v17 = vld [vmem:[%s11402_s3 + $0x48] sm:$0xff]   ;;  %v8437_v21 = vld [vmem:[%s11402_s3 + $0x50] sm:$0xff]   ;;  %s8900_s29 = scalar_lea.vmem %s11399_s0, %s8417_s28  ;;  %vm4992_vm6 = vsmask.f32 6400 }
  0x13   : > { %568 = vperm.xlu0 %8429, %v244_v3   ;;  %548 = vperm.xlu1 %8430, %v240_v4   ;;  %5575 = vst [vmem:[%s8681_s6] sm:$0xf] %v8618_v2  ;;  %5576 = vst [vmem:[%s8681_s6 + $0x4] sm:$0xf] %v8618_v2  ;;  %v251_v18 = vld [vmem:[%s11401_s2 + $0x60] sm:$0xff]  ;;  %v252_v19 = vld [vmem:[%s11401_s2 + $0x68] sm:$0xff]  ;;  %s5883_s10 = sshll.u32 %s11866_s19, 1 }
  0x14   : > { %5577 = vst [vmem:[%s8681_s6 + $0x8] sm:$0xf] %v8618_v2  ;;  %5578 = vst [vmem:[%s8681_s6 + $0xc] sm:$0xf] %v8618_v2  ;;  %7274 = vmatprep.subr.bf16.mxu0 %v11406_v5  ;;  %6873 = vmatpush3.bf16.msra.mxu1 %v8433_v16  ;;  %v253_v22 = vld [vmem:[%s11401_s2 + $0x70] sm:$0xff]  ;;  %v254_v23 = vld [vmem:[%s11401_s2 + $0x78] sm:$0xff]  ;;  %s235_s13 = scalar_lea.vmem %s11404_s5, %s5883_s10 }
  0x15   : > { %5785 = vst [vmem:[%s8681_s6 + $0xb0] sm:$0xc] %v8618_v2  ;;  %5786 = vst [vmem:[%s8681_s6 + $0xb4] sm:$0xf] %v8618_v2  ;;  %6874 = vmatprep.subr.bf16.mxu1 %v11406_v5  ;;  %v8436_v24 = vld [vmem:[%s11402_s3 + $0x118] sm:$0xff]   ;;  %v255_v26 = vld [vmem:[%s11401_s2 + $0x80] sm:$0xff] }
  0x16   : > { %5787 = vst [vmem:[%s8681_s6 + $0xb8] sm:$0xf] %v8618_v2  ;;  %5788 = vst [vmem:[%s8681_s6 + $0xbc] sm:$0xf] %v8618_v2  ;;  %7275 = vmatpush3.bf16.msra.mxu0 %v8432_v15  ;;  %v8439_v25 = vld [vmem:[%s11402_s3 + $0x58] sm:$0xff]   ;;  %v256_v27 = vld [vmem:[%s11401_s2 + $0x88] sm:$0xff] }
  0x17   : > { %5789 = vst [vmem:[%s8681_s6 + $0xc0] sm:$0x3] %v8618_v2  ;;  %553 = vperm.xlu0 %8429, %v241_v6   ;;  %558 = vperm.xlu1 %8430, %v242_v7   ;;  %v8438_v28 = vld [vmem:[%s11402_s3 + $0x120] sm:$0xff]   ;;  %v257_v29 = vld [vmem:[%s11401_s2 + $0x90] sm:$0xff]  ;;  %v258_v31 = vld [vmem:[%s11401_s2 + $0x98] sm:$0xff] }
  0x18   : > { %7276 = vmatprep.subr.bf16.mxu0 %v11406_v5  ;;  %6875 = vmatpush3.bf16.msra.mxu1 %v8435_v17  ;;  %v8441_v30 = vld [vmem:[%s11402_s3 + $0x60] sm:$0xff]   ;;  %v8440_v32 = vld [vmem:[%s11402_s3 + $0x128] sm:$0xff]   ;;  %v8442_v36 = vld [vmem:[%s11402_s3 + $0x130] sm:$0xff]  }
  0x19   : > { %6876 = vmatprep.subr.bf16.mxu1 %v11406_v5  ;;  %v8443_v33 = vld [vmem:[%s11402_s3 + $0x68] sm:$0xff]   ;;  %v259_v34 = vld [vmem:[%s11401_s2 + $0xa0] sm:$0xff]  ;;  %v8445_v37 = vld [vmem:[%s11402_s3 + $0x70] sm:$0xff]  }
  0x1a   : > { %7277 = vmatpush3.bf16.msra.mxu0 %v8434_v20  ;;  %v260_v35 = vld [vmem:[%s11401_s2 + $0xa8] sm:$0xff]  ;;  %v261_v38 = vld [vmem:[%s11401_s2 + $0xb0] sm:$0xff]  ;;  %v262_v39 = vld [vmem:[%s11401_s2 + $0xb8] sm:$0xff] }
  0x1b   : > { %573 = vperm.xlu0 %8429, %v245_v8   ;;  %578 = vperm.xlu1 %8430, %v246_v9   ;;  %v8444_v40 = vld [vmem:[%s11402_s3 + $0x138] sm:$0xff]   ;;  %v263_v42 = vld [vmem:[%s11401_s2 + $0xc0] sm:$0xff]  ;;  %v264_v43 = vld [vmem:[%s11401_s2 + $0xc8] sm:$0xff] }
  0x1c   : > { %7278 = vmatprep.subr.bf16.mxu0 %v11406_v5  ;;  %6877 = vmatpush3.bf16.msra.mxu1 %v8437_v21  ;;  %v8449_v41 = vld [vmem:[%s11402_s3 + $0x78] sm:$0xff]   ;;  %v265_v44 = vld [vmem:[%s11401_s2 + $0xd0] sm:$0xff]  ;;  %v267_v46 = vld [vmem:[%s11401_s2 + $0xe0] sm:$0xff] }
  0x1d   : > { %6878 = vmatprep.subr.bf16.mxu1 %v11406_v5  ;;  %v266_v45 = vld [vmem:[%s11401_s2 + $0xd8] sm:$0xff]  ;;  %v268_v47 = vld [vmem:[%s11401_s2 + $0xe8] sm:$0xff]  ;;  %v269_v48 = vld [vmem:[%s11401_s2 + $0xf0] sm:$0xff] }
  0x1e   : > { %7279 = vmatpush3.bf16.msra.mxu0 %v8436_v24  ;;  %v270_v49 = vld [vmem:[%s11401_s2 + $0xf8] sm:$0xff]  ;;  %v271_v50 = vld [vmem:[%s11401_s2 + $0x100] sm:$0xff]  ;;  %v272_v51 = vld [vmem:[%s11401_s2 + $0x108] sm:$0xff] }
  0x1f   : > { %583 = vperm.xlu0 %8429, %v247_v10   ;;  %588 = vperm.xlu1 %8430, %v248_v11   ;;  %v273_v52 = vld [vmem:[%s11401_s2 + $0x110] sm:$0xff]  ;;  %v274_v53 = vld [vmem:[%s11401_s2 + $0x118] sm:$0xff]  ;;  %v275_v54 = vld [vmem:[%s11401_s2 + $0x120] sm:$0xff] }
  0x20   : > { %7280 = vmatprep.subr.bf16.mxu0 %v11406_v5  ;;  %6879 = vmatpush3.bf16.msra.mxu1 %v8439_v25  ;;  %v276_v55 = vld [vmem:[%s11401_s2 + $0x128] sm:$0xff]  ;;  %v277_v56 = vld [vmem:[%s11401_s2 + $0x130] sm:$0xff]  ;;  %v278_v57 = vld [vmem:[%s11401_s2 + $0x138] sm:$0xff] }
  0x21   : > { %6880 = vmatprep.subr.bf16.mxu1 %v11406_v5  ;;  %v279_v58 = vld [vmem:[%s11401_s2 + $0x140] sm:$0xff]  ;;  %v280_v59 = vld [vmem:[%s11401_s2 + $0x148] sm:$0xff]  ;;  %v281_v60 = vld [vmem:[%s11401_s2 + $0x150] sm:$0xff] }
  0x22   : > { %7281 = vmatpush3.bf16.msra.mxu0 %v8438_v28  ;;  %v282_v61 = vld [vmem:[%s11401_s2 + $0x158] sm:$0xff]  ;;  %v283_v62 = vld [vmem:[%s11401_s2 + $0x160] sm:$0xff]  ;;  %v284_v63 = vld [vmem:[%s11401_s2 + $0x168] sm:$0xff] }
  0x23   : > { %593 = vperm.xlu0 %8429, %v249_v12   ;;  %598 = vperm.xlu1 %8430, %v250_v13   ;;  %v285_v0 = vld [vmem:[%s11401_s2 + $0x170] sm:$0xff]  ;;  %v286_v1 = vld [vmem:[%s11401_s2 + $0x178] sm:$0xff]  ;;  %v287_v2 = vld [vmem:[%s11401_s2 + $0x180] sm:$0xf] }
  0x24   : > { %7282 = vmatprep.subr.bf16.mxu0 %v11406_v5  ;;  %6881 = vmatpush3.bf16.msra.mxu1 %v8441_v30  ;;  %v6546_v3 = vld [vmem:[%s8900_s29 + $0x10] sm:$0xff]   ;;  %v6230_v4 = vld [vmem:[%s8900_s29] sm:$0xff]   ;;  %v6545_v10 = vld [vmem:[%s8900_s29 + $0x8] sm:$0xff]  }
  0x25   : > { %6882 = vmatprep.subr.bf16.mxu1 %v11406_v5  ;;  %v6239_v6 = vunpack.c.l.bf16 %v6546_v3  ;;  %v8907_v7 = vld [vmem:[%s11400_s1] ss:$0 sm:$0xff]  ;;  %v6231_v8 = vunpack.c.l.bf16 %v6230_v4  ;;  %v6240_v9 = vunpack.c.h.bf16 %v6546_v3  ;;  %v6232_v12 = vunpack.c.h.bf16 %v6230_v4  ;;  %v8914_v13 = vld [vmem:[%s11400_s1 + $0x1] ss:$0 sm:$0xff]  ;;  %v6547_v15 = vld [vmem:[%s8900_s29 + $0x18] sm:$0xff]  }
  0x26   : > { %7283 = vmatpush3.bf16.msra.mxu0 %v8440_v32  ;;  %v6235_v17 = vunpack.c.l.bf16 %v6545_v10  ;;  %v6243_v21 = vunpack.c.l.bf16 %v6547_v15  ;;  %v6550_v25 = vld [vmem:[%s8900_s29 + $0x30] sm:$0xff]   ;;  %v6551_v30 = vld [vmem:[%s8900_s29 + $0x38] sm:$0xff]  }
  0x27   : > { %603 = vperm.xlu0 %8429, %v251_v18   ;;  %608 = vperm.xlu1 %8430, %v252_v19   ;;  %v394_v11 = vmul.f32 %v6239_v6, %v8907_v7  ;;  %v390_v14 = vmul.f32 %v6231_v8, %v8907_v7  ;;  %v395_v16 = vmul.f32 %v6240_v9, %v8907_v7  ;;  %v6236_v18 = vunpack.c.h.bf16 %v6545_v10  ;;  %v6554_v6 = vld [vmem:[%s8900_s29 + $0x50] sm:$0xff]  }
  0x28   : > { %7284 = vmatprep.subr.bf16.mxu0 %v11406_v5  ;;  %6883 = vmatpush3.bf16.msra.mxu1 %v8443_v33  ;;  %v391_v20 = vmul.f32 %v6232_v12, %v8907_v7 }
  0x29   : > { %6884 = vmatprep.subr.bf16.mxu1 %v11406_v5  ;;  %v8920_v19 = vadd.f32 %v8914_v13, %v394_v11  ;;  %v8926_v24 = vadd.f32 %v8914_v13, %v390_v14  ;;  %v393_v28 = vmul.f32 %v6236_v18, %v8907_v7 }
  0x2a   : > { %7285 = vmatpush3.bf16.msra.mxu0 %v8442_v36  ;;  %v8937_v36 = vadd.f32 %v8914_v13, %v391_v20 }
  0x2b   : > { %613 = vperm.xlu0 %8429, %v253_v22   ;;  %618 = vperm.xlu1 %8430, %v254_v23   ;;  %v6548_v22 = vld [vmem:[%s8900_s29 + $0x20] sm:$0xff]   ;;  %v6549_v23 = vld [vmem:[%s8900_s29 + $0x28] sm:$0xff]  }
  0x2c   : > { %7286 = vmatprep.subr.bf16.mxu0 %v11406_v5  ;;  %6885 = vmatpush3.bf16.msra.mxu1 %v8445_v37  ;;  %v6248_v32 = vunpack.c.h.bf16 %v6548_v22  ;;  %v6251_v33 = vunpack.c.l.bf16 %v6549_v23  ;;  %v396_v37 = vmul.f32 %v6243_v21, %v8907_v7 }
  0x2d   : > { %6886 = vmatprep.subr.bf16.mxu1 %v11406_v5 }
  0x2e   : > { %7287 = vmatpush3.bf16.msra.mxu0 %v8444_v40  ;;  %v6256_v40 = vunpack.c.h.bf16 %v6550_v25 }
  0x2f   : > { %623 = vperm.xlu0 %8429, %v255_v26   ;;  %628 = vperm.xlu1 %8430, %v256_v27   ;;  %v8930_v26 = vadd.f32 %v8914_v13, %v395_v16  ;;  %v392_v27 = vmul.f32 %v6235_v17, %v8907_v7  ;;  %v6555_v17 = vld [vmem:[%s8900_s29 + $0x58] sm:$0xff]  }
  0x30   : > { %7372 = vmatprep.subr.bf16.mxu0 %v11406_v5  ;;  %6887 = vmatpush3.bf16.msra.mxu1 %v8449_v41  ;;  %v6259_v41 = vunpack.c.l.bf16 %v6551_v30 }
  0x31   : > { %6972 = vmatprep.subr.bf16.mxu1 %v11406_v5 }
  0x33   : > { %633 = vperm.xlu0 %8429, %v257_v29   ;;  %638 = vperm.xlu1 %8430, %v258_v31   ;;  %v6244_v29 = vunpack.c.h.bf16 %v6547_v15  ;;  %v6247_v31 = vunpack.c.l.bf16 %v6548_v22 }
  0x37   : > { %643 = vperm.xlu0 %8429, %v259_v34   ;;  %648 = vperm.xlu1 %8430, %v260_v35   ;;  %v6252_v34 = vunpack.c.h.bf16 %v6549_v23  ;;  %v496_v35 = vmax.f32 %v8920_v19, 0.0  ;;  %v6271_v23 = vunpack.c.l.bf16 %v6554_v6 }
  0x3b   : > { %653 = vperm.xlu0 %8429, %v261_v38   ;;  %658 = vperm.xlu1 %8430, %v262_v39   ;;  %v6255_v38 = vunpack.c.l.bf16 %v6550_v25  ;;  %v492_v39 = vmax.f32 %v8926_v24, 0.0  ;;  %v6272_v25 = vunpack.c.h.bf16 %v6554_v6  ;;  %v6558_v24 = vld [vmem:[%s8900_s29 + $0x70] sm:$0xff]  }
  0x3f   : > { %663 = vperm.xlu0 %8429, %v263_v42   ;;  %668 = vperm.xlu1 %8430, %v264_v43   ;;  %v6260_v42 = vunpack.c.h.bf16 %v6551_v30  ;;  %v6552_v43 = vld [vmem:[%s8900_s29 + $0x40] sm:$0xff]  }
  0x43   : > { %673 = vperm.xlu0 %8429, %v265_v44   ;;  %678 = vperm.xlu1 %8430, %v266_v45   ;;  %v497_v44 = vmax.f32 %v8930_v26, 0.0  ;;  %v8944_v45 = vadd.f32 %v8914_v13, %v392_v27 }
  0x47   : > { %683 = vperm.xlu0 %8429, %v267_v46   ;;  %688 = vperm.xlu1 %8430, %v268_v47   ;;  %v8947_v46 = vadd.f32 %v8914_v13, %v393_v28  ;;  %v397_v47 = vmul.f32 %v6244_v29, %v8907_v7 }
  0x4b   : > { %693 = vperm.xlu0 %8429, %v269_v48   ;;  %698 = vperm.xlu1 %8430, %v270_v49   ;;  %v398_v48 = vmul.f32 %v6247_v31, %v8907_v7  ;;  %v399_v49 = vmul.f32 %v6248_v32, %v8907_v7 }
  0x4f   : > { %703 = vperm.xlu0 %8429, %v271_v50   ;;  %708 = vperm.xlu1 %8430, %v272_v51   ;;  %v400_v50 = vmul.f32 %v6251_v33, %v8907_v7  ;;  %v401_v51 = vmul.f32 %v6252_v34, %v8907_v7  ;;  %v6275_v34 = vunpack.c.l.bf16 %v6555_v17 }
  0x51   : > { %v8975_v3 = vadd.f32 %v8914_v13, %v400_v50  ;;  %v8978_v4 = vadd.f32 %v8914_v13, %v401_v51  ;;  %v6276_v50 = vunpack.c.h.bf16 %v6555_v17  ;;  %v6557_v51 = vld [vmem:[%s8900_s29 + $0x68] sm:$0xff]  }
  0x53   : > { %713 = vperm.xlu0 %8429, %v273_v52   ;;  %718 = vperm.xlu1 %8430, %v274_v53   ;;  %v6553_v52 = vld [vmem:[%s8900_s29 + $0x48] sm:$0xff]   ;;  %v493_v53 = vmax.f32 %v8937_v36, 0.0  ;;  %v502_v29 = vmax.f32 %v8975_v3, 0.0  ;;  %v503_v30 = vmax.f32 %v8978_v4, 0.0 }
  0x54   : > { %v6268_v11 = vunpack.c.h.bf16 %v6553_v52 }
  0x56   : > { %v409_v33 = vmul.f32 %v6268_v11, %v8907_v7 }
  0x57   : > { %723 = vperm.xlu0 %8429, %v275_v54   ;;  %728 = vperm.xlu1 %8430, %v276_v55   ;;  %v8957_v54 = vadd.f32 %v8914_v13, %v396_v37  ;;  %v402_v55 = vmul.f32 %v6255_v38, %v8907_v7 }
  0x59   : > { %v498_v8 = vmax.f32 %v8957_v54, 0.0  ;;  %v8983_v9 = vadd.f32 %v8914_v13, %v402_v55  ;;  %v8448_v54 = vld [vmem:[%s11402_s3 + $0x140] sm:$0xff]  }
  0x5b   : > { %733 = vperm.xlu0 %8429, %v277_v56   ;;  %738 = vperm.xlu1 %8430, %v278_v57   ;;  %v6263_v56 = vunpack.c.l.bf16 %v6552_v43  ;;  %v403_v57 = vmul.f32 %v6256_v40, %v8907_v7  ;;  %v504_v31 = vmax.f32 %v8983_v9, 0.0 }
  0x5d   : > { %v406_v10 = vmul.f32 %v6263_v56, %v8907_v7  ;;  %v8987_v12 = vadd.f32 %v8914_v13, %v403_v57 }
  0x5f   : > { %743 = vperm.xlu0 %8429, %v279_v58   ;;  %748 = vperm.xlu1 %8430, %v280_v59   ;;  %v404_v58 = vmul.f32 %v6259_v41, %v8907_v7  ;;  %v405_v59 = vmul.f32 %v6260_v42, %v8907_v7  ;;  %v9007_v32 = vadd.f32 %v8914_v13, %v406_v10  ;;  %v505_v36 = vmax.f32 %v8987_v12, 0.0  ;;  %v6556_v41 = vld [vmem:[%s8900_s29 + $0x60] sm:$0xff]   ;;  %v8460_v12 = vld [vmem:[%s11402_s3 + $0x150] sm:$0xff]  }
  0x60   : > { %v6283_v10 = vunpack.c.l.bf16 %v6557_v51 }
  0x61   : > { %v8990_v14 = vadd.f32 %v8914_v13, %v404_v58  ;;  %v8993_v15 = vadd.f32 %v8914_v13, %v405_v59  ;;  %v9035_v59 = vadd.f32 %v8914_v13, %v409_v33 }
  0x63   : > { %753 = vperm.xlu0 %8429, %v281_v60   ;;  %758 = vperm.xlu1 %8430, %v282_v61   ;;  %v6264_v60 = vunpack.c.h.bf16 %v6552_v43  ;;  %v494_v61 = vmax.f32 %v8944_v45, 0.0  ;;  %v506_v37 = vmax.f32 %v8990_v14, 0.0  ;;  %v507_v38 = vmax.f32 %v8993_v15, 0.0  ;;  %v8468_v15 = vld [vmem:[%s11402_s3 + $0x158] sm:$0xff]  }
  0x65   : > { %v407_v16 = vmul.f32 %v6264_v60, %v8907_v7  ;;  %v412_v60 = vmul.f32 %v6275_v34, %v8907_v7 }
  0x67   : > { %763 = vperm.xlu0 %8429, %v283_v62   ;;  %768 = vperm.xlu1 %8430, %v284_v63   ;;  %v495_v62 = vmax.f32 %v8947_v46, 0.0  ;;  %v8966_v63 = vadd.f32 %v8914_v13, %v397_v47  ;;  %v9014_v40 = vadd.f32 %v8914_v13, %v407_v16  ;;  %v6284_v16 = vunpack.c.h.bf16 %v6557_v51 }
  0x68   : > { %v416_v46 = vmul.f32 %v6283_v10, %v8907_v7 }
  0x69   : > { %v499_v21 = vmax.f32 %v8966_v63, 0.0 }
  0x6b   : > { %773 = vperm.xlu0 %8429, %v285_v0   ;;  %778 = vperm.xlu1 %8430, %v286_v1   ;;  %v6267_v0 = vunpack.c.l.bf16 %v6553_v52  ;;  %v8969_v1 = vadd.f32 %v8914_v13, %v398_v48  ;;  %v410_v48 = vmul.f32 %v6271_v23, %v8907_v7 }
  0x6d   : > { %v408_v22 = vmul.f32 %v6267_v0, %v8907_v7  ;;  %v500_v27 = vmax.f32 %v8969_v1, 0.0  ;;  %v6279_v0 = vunpack.c.l.bf16 %v6556_v41 }
  0x6f   : > { %783 = vperm.xlu0 %8429, %v287_v2   ;;  %v8972_v2 = vadd.f32 %v8914_v13, %v399_v49  ;;  %v9020_v47 = vadd.f32 %v8914_v13, %v408_v22  ;;  %v411_v49 = vmul.f32 %v6272_v25, %v8907_v7  ;;  %v6559_v25 = vld [vmem:[%s8900_s29 + $0x78] sm:$0xff]   ;;  %v414_v34 = vmul.f32 %v6279_v0, %v8907_v7 }
  0x71   : > { %v501_v28 = vmax.f32 %v8972_v2, 0.0  ;;  %v9050_v23 = vadd.f32 %v8914_v13, %v411_v49  ;;  %v8456_v2 = vld [vmem:[%s11402_s3 + $0x148] sm:$0xff]  }
  0x8e   : > { %v8997_v18 = vpop.permute.xlu0 %563  ;;  %v544_v20 = vpop.permute.xlu1 %543 }
  0x8f   : > { %11524 = vst [vmem:[#allocation3_spill] sm:$0xff] %v8997_v18  ;;  %v790_v52 = vmul.f32 %v8997_v18, %v496_v35  ;;  %v786_v55 = vmul.f32 %v544_v20, %v492_v39  ;;  %v6280_v35 = vunpack.c.h.bf16 %v6556_v41  ;;  %v6287_v41 = vunpack.c.l.bf16 %v6558_v24 }
  0x91   : > { %v415_v45 = vmul.f32 %v6280_v35, %v8907_v7  ;;  %v418_v35 = vmul.f32 %v6287_v41, %v8907_v7 }
  0x92   : > { %v9017_v42 = vpop.permute.xlu0 %568  ;;  %v549_v43 = vpop.permute.xlu1 %548 }
  0x93   : > { %11525 = vst [vmem:[#allocation4_spill] sm:$0xff] %v9017_v42  ;;  %v791_v56 = vmul.f32 %v9017_v42, %v497_v44  ;;  %v787_v57 = vmul.f32 %v549_v43, %v493_v53  ;;  %v9041_v44 = vadd.f32 %v8914_v13, %v410_v48  ;;  %v413_v53 = vmul.f32 %v6276_v50, %v8907_v7 }
  0x94   : > { %v6288_v43 = vunpack.c.h.bf16 %v6558_v24  ;;  %v9056_v50 = vadd.f32 %v8914_v13, %v412_v60 }
  0x95   : > { %v6338_v6 = vpack.c.bf16 %v791_v56, %v790_v52  ;;  %v6328_v19 = vpack.c.bf16 %v787_v57, %v786_v55  ;;  %v9067_v52 = vadd.f32 %v8914_v13, %v413_v53  ;;  %v417_v55 = vmul.f32 %v6284_v16, %v8907_v7 }
  0x96   : > { %v554_v39 = vpop.permute.xlu0 %553  ;;  %v559_v11 = vpop.permute.xlu1 %558  ;;  %v6291_v56 = vunpack.c.l.bf16 %v6559_v25  ;;  %v419_v10 = vmul.f32 %v6288_v43, %v8907_v7  ;;  %v9104_v43 = vld [vmem:[%s8900_s29 + $0x88] sm:$0xff]  }
  0x97   : > { %6569 = vst [vmem:[#allocation2 + $0x10] sm:$0xff] %v6338_v6   ;;  %6329 = vst [vmem:[#allocation2] sm:$0xff] %v6328_v19   ;;  %v788_v17 = vmul.f32 %v554_v39, %v494_v61  ;;  %v789_v20 = vmul.f32 %v559_v11, %v495_v62  ;;  %v6560_v61 = vld [vmem:[%s8900_s29 + $0x80] sm:$0xff]   ;;  %v6292_v6 = vunpack.c.h.bf16 %v6559_v25  ;;  %v9078_v19 = vadd.f32 %v8914_v13, %v414_v34 }
  0x98   : > { %v6295_v24 = vunpack.c.l.bf16 %v6560_v61  ;;  %v9100_v25 = vadd.f32 %v8914_v13, %v417_v55  ;;  %v420_v34 = vmul.f32 %v6291_v56, %v8907_v7  ;;  %v6296_v41 = vunpack.c.h.bf16 %v6560_v61 }
  0x99   : > { %v6333_v48 = vpack.c.bf16 %v789_v20, %v788_v17  ;;  %v421_v55 = vmul.f32 %v6292_v6, %v8907_v7  ;;  %v9118_v61 = vadd.f32 %v8914_v13, %v418_v35  ;;  %v9121_v56 = vadd.f32 %v8914_v13, %v419_v10 }
  0x9a   : > { %v9061_v62 = vpop.permute.xlu0 %573  ;;  %v9063_v49 = vpop.permute.xlu1 %578  ;;  %v422_v1 = vmul.f32 %v6295_v24, %v8907_v7  ;;  %v6299_v6 = vunpack.c.l.bf16 %v9104_v43  ;;  %v9152_v63 = vadd.f32 %v8914_v13, %v420_v34  ;;  %v8453_v34 = vld [vmem:[%s11402_s3] sm:$0xff]   ;;  %v6300_v0 = vunpack.c.h.bf16 %v9104_v43 }
  0x9b   : > { %11526 = vst [vmem:[#allocation5_spill] sm:$0xff] %v9061_v62  ;;  %11527 = vst [vmem:[#allocation6_spill] sm:$0xff] %v9063_v49  ;;  %v792_v57 = vmul.f32 %v9061_v62, %v498_v8  ;;  %v793_v60 = vmul.f32 %v9063_v49, %v499_v21  ;;  %v9087_v8 = vadd.f32 %v8914_v13, %v415_v45 }
  0x9c   : > { %6568 = vst [vmem:[#allocation2 + $0x8] sm:$0xff] %v6333_v48   ;;  %v9090_v21 = vadd.f32 %v8914_v13, %v416_v46 }
  0x9d   : > { %v6343_v39 = vpack.c.bf16 %v793_v60, %v792_v57 }
  0x9e   : > { %v9092_v11 = vpop.permute.xlu0 %583  ;;  %v9094_v53 = vpop.permute.xlu1 %588  ;;  %v2458_v16 = vld [vmem:[#allocation2 + $0x10] sm:$0xf]  ;;  %v9096_v17 = vld [vmem:[#allocation2 + $0x14] sm:$0xf]  ;;  %v1139_v57 = vld [vmem:[#allocation2 + $0x4] sm:$0x8] }
  0x9f   : > { %11528 = vst [vmem:[#allocation7_spill] sm:$0xff] %v9092_v11  ;;  %11529 = vst [vmem:[#allocation8_spill] sm:$0xff] %v9094_v53  ;;  %v794_v48 = vmul.f32 %v9092_v11, %v500_v27  ;;  %v795_v45 = vmul.f32 %v9094_v53, %v501_v28  ;;  %v9113_v46 = vcombine.low %v2458_v16, %v9096_v17 }
  0xa0   : > { %6570 = vst [vmem:[#allocation2 + $0x18] sm:$0xff] %v6343_v39  }
  0xa1   : > { %v6348_v27 = vpack.c.bf16 %v795_v45, %v794_v48  ;;  %7289 = vmatmul.mubr.bf16.vlgmr.msra.gmra.mrb[0].mxu0 %v9113_v46  ;;  %v3489_v35 = vshll.u32 %v9113_v46, 16  ;;  %v423_v45 = vmul.f32 %v6296_v41, %v8907_v7  ;;  %v9155_v41 = vadd.f32 %v8914_v13, %v421_v55 }
  0xa2   : > { %7373 = vmatpush3.bf16.msra.mxu0 %v8448_v54  ;;  %v9132_v10 = vpop.permute.xlu0 %593  ;;  %v9134_v39 = vpop.permute.xlu1 %598  ;;  %7292 = vmatprep.mubr.msk.bf16.mxu0 %vm8620_vm0, %v11406_v5  ;;  %v424_v55 = vmul.f32 %v6299_v6, %v8907_v7 }
  0xa3   : > { %11530 = vst [vmem:[#allocation9_spill] sm:$0xff] %v9132_v10  ;;  %11531 = vst [vmem:[#allocation10_spill] sm:$0xff] %v9134_v39  ;;  %v9136_v24 = vld [vmem:[#allocation2 + $0x8] sm:$0xf]  ;;  %v2457_v60 = vld [vmem:[#allocation2 + $0xc] sm:$0x8]  ;;  %v796_v28 = vmul.f32 %v9132_v10, %v502_v29  ;;  %v797_v54 = vmul.f32 %v9134_v39, %v503_v30  ;;  %7374 = vmatprep.subr.bf16.mxu0 %v11406_v5  ;;  %v9163_v30 = vadd.f32 %v8914_v13, %v422_v1 }
  0xa4   : > { %6571 = vst [vmem:[#allocation2 + $0x20] sm:$0xff] %v6348_v27   ;;  %v9148_v20 = vld [vmem:[#allocation2 + $0xc] sm:$0xff]   ;;  %v9158_v3 = vcombine.low %v1139_v57, %v9136_v24  ;;  %v9171_v57 = vcombine.low %v2457_v60, %v2458_v16  ;;  %v3491_v51 = vrot.slane %v3489_v35, 1  ;;  %v9179_v33 = vadd.f32 %v8914_v13, %v423_v45 }
  0xa5   : > { %v6353_v27 = vpack.c.bf16 %v797_v54, %v796_v28  ;;  %v11405_v48 = vrot.slane %v9148_v20, 3  ;;  %v11554_v39 = vmax.f32 %v9050_v23, 0.0 }
  0xa6   : > { %11532 = vst [vmem:[#allocation11_spill] sm:$0xff] %v9158_v3  ;;  %v9173_v29 = vpop.permute.xlu0 %603  ;;  %v9175_v4 = vpop.permute.xlu1 %608  ;;  %v1262_v1 = vrot.slane %v9158_v3, 3  ;;  %7375 = vmatpush3.bf16.msra.mxu0 %v8456_v2  ;;  %v3487_v2 = vshrl.u32 %v9113_v46, 16  ;;  %v8464_v46 = vld [vmem:[%s11402_s3 + $0x8] sm:$0xff]  }
  0xa7   : > { %11533 = vst [vmem:[#allocation12_spill] sm:$0xff] %v9173_v29  ;;  %11534 = vst [vmem:[#allocation13_spill] sm:$0xff] %v9175_v4  ;;  %v2460_v28 = vld [vmem:[#allocation2 + $0x18] sm:$0xf]  ;;  %v2461_v54 = vld [vmem:[#allocation2 + $0x1c] sm:$0xf]  ;;  %v798_v43 = vmul.f32 %v9173_v29, %v504_v31  ;;  %v799_v16 = vmul.f32 %v9175_v4, %v505_v36  ;;  %7376 = vmatprep.subr.bf16.mxu0 %v11406_v5 }
  0xa8   : > { %6572 = vst [vmem:[#allocation2 + $0x28] sm:$0xff] %v6353_v27   ;;  %v1264_v35 = vsel %vm1261_vm1, %v1262_v1, %v11405_v48  ;;  %v5983_v9 = vcombine.low %v9096_v17, %v2460_v28  ;;  %v9195_v45 = vcombine.low %v2460_v28, %v2461_v54  ;;  %v9197_v31 = vld [vmem:[#allocation2 + $0x14] sm:$0xff]   ;;  %v9207_v1 = vadd.f32 %v8914_v13, %v424_v55 }
  0xa9   : > { %v6358_v36 = vpack.c.bf16 %v799_v16, %v798_v43  ;;  %6889 = vmatmul.mubr.bf16.vlgmr.msra.gmra.mrb[0].mxu1 %v1264_v35  ;;  %v425_v17 = vmul.f32 %v6300_v0, %v8907_v7  ;;  %v2621_v28 = vshrl.u32 %v9171_v57, 16  ;;  %v9219_v27 = vld [vmem:[%s8900_s29 + $0x90] sm:$0xff]   ;;  %v3492_v55 = vor.u32 %v3491_v51, %v3487_v2 }
  0xaa   : > { %6973 = vmatpush3.bf16.msra.mxu1 %v8453_v34  ;;  %7293 = vmatmul.mubr.bf16.gmra.mrb[4].mxu0 %v9195_v45  ;;  %v3494_v6 = vshll.u32 %v9195_v45, 16  ;;  %v9213_v43 = vpop.permute.xlu0 %613  ;;  %v9215_v16 = vpop.permute.xlu1 %618  ;;  %v2629_v48 = vshrl.u32 %v5983_v9, 16  ;;  %v11542_v4 = vrot.slane %v9197_v31, 3 }
  0xab   : > { %11535 = vst [vmem:[#allocation14_spill] sm:$0xff] %v9213_v43  ;;  %11536 = vst [vmem:[#allocation15_spill] sm:$0xff] %v9215_v16  ;;  %v2462_v35 = vld [vmem:[#allocation2 + $0x20] sm:$0xf]  ;;  %v800_v0 = vmul.f32 %v9213_v43, %v506_v37  ;;  %v801_v34 = vmul.f32 %v9215_v16, %v507_v38  ;;  %6892 = vmatprep.mubr.msk.bf16.mxu1 %vm8620_vm0, %v11406_v5  ;;  %7296 = vmatprep.mubr.msk.bf16.mxu0 %vm8620_vm0, %v11406_v5  ;;  %v2463_v22 = vld [vmem:[#allocation2 + $0x24] sm:$0xf] }
  0xac   : > { %6573 = vst [vmem:[#allocation2 + $0x30] sm:$0xff] %v6358_v36   ;;  %v9231_v60 = vcombine.low %v2461_v54, %v2462_v35  ;;  %v3496_v51 = vrot.slane %v3494_v6, 1  ;;  %v9234_v14 = vcombine.low %v2462_v35, %v2463_v22  ;;  %7377 = vmatpush3.bf16.msra.mxu0 %v8460_v12  ;;  %6974 = vmatprep.subr.bf16.mxu1 %v11406_v5  ;;  %v2624_v37 = vshll.u32 %v9171_v57, 16  ;;  %v9241_v26 = vld [vmem:[#allocation2 + $0x1c] sm:$0xff]  }
  0xad   : > { %v2632_v38 = vshll.u32 %v5983_v9, 16  ;;  %v6363_v36 = vpack.c.bf16 %v801_v34, %v800_v0  ;;  %7378 = vmatprep.subr.bf16.mxu0 %v11406_v5  ;;  %v9250_v58 = vadd.f32 %v8914_v13, %v425_v17  ;;  %v6303_v57 = vunpack.c.l.bf16 %v9219_v27 }
  0xae   : > { %v9245_v6 = vpop.permute.xlu0 %623  ;;  %v9247_v35 = vpop.permute.xlu1 %628  ;;  %6975 = vmatpush3.bf16.msra.mxu1 %v8464_v46  ;;  %v9254_v9 = vsel %vm3485_vm2, %v3492_v55, %v3496_v51  ;;  %v9256_v0 = vrot.slane %v2621_v28, 3  ;;  %v11539_v34 = vmax.f32 %v9007_v32, 0.0  ;;  %v11540_v5 = vmax.f32 %v9014_v40, 0.0  ;;  %v8472_v32 = vld [vmem:[%s11402_s3 + $0x160] sm:$0xff]  }
  0xaf   : > { %11537 = vst [vmem:[#allocation16_spill] sm:$0xff] %v9245_v6  ;;  %11538 = vst [vmem:[#allocation17_spill] sm:$0xff] %v9247_v35  ;;  %v2464_v12 = vld [vmem:[#allocation2 + $0x28] sm:$0xf]  ;;  %v2465_v2 = vld [vmem:[#allocation2 + $0x2c] sm:$0xf] }
  0xb0   : > { %6574 = vst [vmem:[#allocation2 + $0x38] sm:$0xff] %v6363_v36   ;;  %v802_v54 = vmul.f32 %v9245_v6, %v11539_v34  ;;  %v803_v16 = vmul.f32 %v9247_v35, %v11540_v5  ;;  %v9264_v46 = vcombine.low %v2463_v22, %v2464_v12  ;;  %v11541_v17 = vmov 0.0   ;;  %7379 = vmatpush3.bf16.msra.mxu0 %v8468_v15  ;;  %v8476_v5 = vld [vmem:[%s11402_s3 + $0x10] sm:$0xff]  }
  0xb1   : > { %6976 = vmatprep.subr.bf16.mxu1 %v11541_v17  ;;  %v2631_v43 = vrot.slane %v2629_v48, 3  ;;  %v11543_v55 = vrot.slane %v9148_v20, 3  ;;  %v9272_v36 = vcombine.low %v2464_v12, %v2465_v2  ;;  %v3502_v40 = vshll.u32 %v9234_v14, 16  ;;  %7380 = vmatprep.subr.bf16.mxu0 %v11541_v17 }
  0xb2   : > { %v2634_v22 = vrot.slane %v2632_v38, 4  ;;  %v6368_v48 = vpack.c.bf16 %v803_v16, %v802_v54  ;;  %7297 = vmatmul.mubr.bf16.gmra.mrb[8].mxu0 %v9234_v14  ;;  %v9285_v15 = vpop.permute.xlu0 %633  ;;  %v9287_v12 = vpop.permute.xlu1 %638  ;;  %v6304_v16 = vunpack.c.h.bf16 %v9219_v27  ;;  %v2626_v38 = vrot.slane %v2624_v37, 4  ;;  %6977 = vmatpush3.bf16.msra.mxu1 %v8476_v5  ;;  %v8478_v27 = vld [vmem:[%s11402_s3 + $0x168] sm:$0xff]  }
  0xb3   : > { %v1266_v28 = vsel %vm1261_vm1, %v11543_v55, %v11542_v4  ;;  %v3498_v4 = vshrl.u32 %v9195_v45, 16  ;;  %11544 = vst [vmem:[#allocation18_spill] sm:$0xff] %v9285_v15  ;;  %11545 = vst [vmem:[#allocation19_spill] sm:$0xff] %v9287_v12  ;;  %v2466_v55 = vld [vmem:[#allocation2 + $0x30] sm:$0xf]  ;;  %v11546_v54 = vmax.f32 %v9020_v47, 0.0  ;;  %7300 = vmatprep.mubr.msk.bf16.mxu0 %vm8620_vm0, %v11541_v17  ;;  %6978 = vmatprep.subr.bf16.mxu1 %v11541_v17 }
  0xb4   : > { %6893 = vmatmul.mubr.bf16.gmra.mrb[4].mxu1 %v1266_v28  ;;  %v2467_v35 = vld [vmem:[#allocation2 + $0x34] sm:$0xf]  ;;  %6575 = vst [vmem:[#allocation2 + $0x40] sm:$0xff] %v6368_v48   ;;  %v11547_v45 = vmax.f32 %v9035_v59, 0.0  ;;  %v9300_v6 = vcombine.low %v2465_v2, %v2466_v55  ;;  %7381 = vmatpush3.bf16.msra.mxu0 %v8472_v32  ;;  %v8486_v47 = vld [vmem:[%s11402_s3 + $0x18] sm:$0xff]   ;;  %v3504_v37 = vrot.slane %v3502_v40, 1 }
  0xb5   : > { %6896 = vmatprep.mubr.msk.bf16.mxu1 %vm8620_vm0, %v11541_v17  ;;  %v804_v28 = vmul.f32 %v9285_v15, %v11546_v54  ;;  %v9302_v29 = vcombine.low %v2466_v55, %v2467_v35  ;;  %v3500_v59 = vor.u32 %v3498_v4, %v3496_v51  ;;  %v3510_v48 = vshll.u32 %v9272_v36, 16  ;;  %7382 = vmatprep.subr.bf16.mxu0 %v11541_v17 }
  0xb6   : > { %v805_v34 = vmul.f32 %v9287_v12, %v11547_v45  ;;  %v426_v55 = vmul.f32 %v6303_v57, %v8907_v7  ;;  %v3506_v32 = vshrl.u32 %v9234_v14, 16  ;;  %v9316_v5 = vpop.permute.xlu0 %643  ;;  %v9318_v45 = vpop.permute.xlu1 %648  ;;  %v11550_v51 = vrot.slane %v9241_v26, 3  ;;  %6979 = vmatpush3.bf16.msra.mxu1 %v8486_v47 }
  0xb7   : > { %11548 = vst [vmem:[#allocation20_spill] sm:$0xff] %v9316_v5  ;;  %11549 = vst [vmem:[#allocation21_spill] sm:$0xff] %v9318_v45  ;;  %v11551_v40 = vrot.slane %v9197_v31, 3  ;;  %v2468_v4 = vld [vmem:[#allocation2 + $0x38] sm:$0xf]  ;;  %v427_v57 = vmul.f32 %v6304_v16, %v8907_v7  ;;  %v9327_v2 = vsel %vm3485_vm2, %v3500_v59, %v3504_v37  ;;  %v9329_v12 = vor.u32 %v2634_v22, %v2631_v43 }
  0xb8   : > { %v6373_v54 = vpack.c.bf16 %v805_v34, %v804_v28  ;;  %v2469_v28 = vld [vmem:[#allocation2 + $0x3c] sm:$0xf]  ;;  %v11553_v14 = vmax.f32 %v9041_v44, 0.0  ;;  %v807_v10 = vmul.f32 %v9318_v45, %v11554_v39  ;;  %v2627_v16 = vor.u32 %v2626_v38, %v9256_v0  ;;  %7383 = vmatpush3.bf16.msra.mxu0 %v8478_v27  ;;  %v8484_v44 = vld [vmem:[%s11402_s3 + $0x170] sm:$0xff]   ;;  %v8498_v0 = vld [vmem:[%s11402_s3 + $0x20] sm:$0xff]   ;;  %6980 = vmatprep.subr.bf16.mxu1 %v11541_v17 }
  0xb9   : > { %v1268_v34 = vsel %vm1261_vm1, %v11551_v40, %v11550_v51  ;;  %11552 = vst [vmem:[#allocation22_spill] sm:$0xff] %v9329_v12  ;;  %v9337_v51 = vld [vmem:[#allocation2 + $0x24] sm:$0xff]   ;;  %v9339_v40 = vcombine.low %v2467_v35, %v2468_v4  ;;  %v9342_v59 = vcombine.low %v2468_v4, %v2469_v28  ;;  %v3508_v43 = vor.u32 %v3506_v32, %v3504_v37  ;;  %v9352_v35 = vld [vmem:[%s8900_s29 + $0x98] sm:$0xff]  }
  0xba   : > { %6576 = vst [vmem:[#allocation2 + $0x48] sm:$0xff] %v6373_v54   ;;  %v806_v15 = vmul.f32 %v9316_v5, %v11553_v14  ;;  %v3512_v22 = vrot.slane %v3510_v48, 1  ;;  %v3518_v23 = vshll.u32 %v9302_v29, 16  ;;  %v9349_v39 = vadd.f32 %v8914_v13, %v426_v55  ;;  %7384 = vmatprep.subr.bf16.mxu0 %v11541_v17  ;;  %7301 = vmatmul.mubr.bf16.gmra.mrb[12].mxu0 %v9272_v36  ;;  %v9360_v27 = vpop.permute.xlu0 %653  ;;  %v9417_v5 = vld [vmem:[#allocation2 + $0x2c] sm:$0xff]   ;;  %v9484_v62 = vld [vmem:[#allocation2 + $0x34] sm:$0xff]  }
  0xbb   : > { %v3514_v38 = vshrl.u32 %v9272_v36, 16  ;;  %11555 = vst [vmem:[#allocation23_spill] sm:$0xff] %v9360_v27  ;;  %v2471_v47 = vld [vmem:[#allocation2 + $0x44] sm:$0xf]  ;;  %v9367_v37 = vadd.f32 %v8914_v13, %v427_v57  ;;  %v9374_v55 = vsel %vm2053_vm3, %v2627_v16, %v9329_v12  ;;  %v11558_v36 = vmax.f32 %v9056_v50, 0.0  ;;  %7304 = vmatprep.mubr.msk.bf16.mxu0 %vm8620_vm0, %v11541_v17  ;;  %v8489_v50 = vld [vmem:[%s11402_s3 + $0x178] sm:$0xff]   ;;  %6981 = vmatpush3.bf16.msra.mxu1 %v8498_v0 }
  0xbc   : > { %v6378_v54 = vpack.c.bf16 %v807_v10, %v806_v15  ;;  %6897 = vmatmul.mubr.bf16.gmra.mrb[8].mxu1 %v1268_v34  ;;  %v9362_v10 = vpop.permute.xlu1 %658  ;;  %v2470_v15 = vld [vmem:[#allocation2 + $0x40] sm:$0xf]  ;;  %v9370_v48 = vsel %vm3485_vm2, %v3508_v43, %v3512_v22  ;;  %11557 = vst [vmem:[#allocation25_spill] sm:$0xff] %v9374_v55  ;;  %v11559_v34 = vmax.f32 %v9067_v52, 0.0  ;;  %7385 = vmatpush3.bf16.msra.mxu0 %v8484_v44  ;;  %v3520_v52 = vrot.slane %v3518_v23, 1 }
  0xbd   : > { %11556 = vst [vmem:[#allocation24_spill] sm:$0xff] %v9362_v10  ;;  %6900 = vmatprep.mubr.msk.bf16.mxu1 %vm8620_vm0, %v11541_v17  ;;  %v808_v32 = vmul.f32 %v9360_v27, %v11558_v36  ;;  %v9385_v57 = vcombine.low %v2469_v28, %v2470_v15  ;;  %v9387_v43 = vcombine.low %v2470_v15, %v2471_v47  ;;  %v6307_v14 = vunpack.c.l.bf16 %v9352_v35 }
  0xbe   : > { %6577 = vst [vmem:[#allocation2 + $0x50] sm:$0xff] %v6378_v54   ;;  %v809_v4 = vmul.f32 %v9362_v10, %v11559_v34  ;;  %v3516_v16 = vor.u32 %v3514_v38, %v3512_v22  ;;  %v3526_v54 = vshll.u32 %v9342_v59, 16  ;;  %7386 = vmatprep.subr.bf16.mxu0 %v11541_v17  ;;  %v3522_v28 = vshrl.u32 %v9302_v29, 16  ;;  %v9398_v44 = vpop.permute.xlu0 %663  ;;  %6982 = vmatprep.subr.bf16.mxu1 %v11541_v17 }
  0xbf   : > { %11560 = vst [vmem:[#allocation26_spill] sm:$0xff] %v9398_v44  ;;  %v11562_v23 = vmax.f32 %v9078_v19, 0.0  ;;  %v11563_v0 = vmax.f32 %v9087_v8, 0.0  ;;  %v11565_v34 = vrot.slane %v9241_v26, 3  ;;  %v8503_v19 = vld [vmem:[%s11402_s3 + $0x28] sm:$0xff]   ;;  %v11574_v49 = vrot.slane %v9417_v5, 3 }
  0xc0   : > { %v6383_v36 = vpack.c.bf16 %v809_v4, %v808_v32  ;;  %v9400_v15 = vpop.permute.xlu1 %668  ;;  %v9404_v22 = vsel %vm3485_vm2, %v3516_v16, %v3520_v52  ;;  %v11564_v4 = vrot.slane %v9337_v51, 3  ;;  %7387 = vmatpush3.bf16.msra.mxu0 %v8489_v50  ;;  %v3524_v8 = vor.u32 %v3522_v28, %v3520_v52  ;;  %6983 = vmatpush3.bf16.msra.mxu1 %v8503_v19 }
  0xc1   : > { %11561 = vst [vmem:[#allocation27_spill] sm:$0xff] %v9400_v15  ;;  %v2472_v10 = vld [vmem:[#allocation2 + $0x48] sm:$0xf]  ;;  %v2473_v27 = vld [vmem:[#allocation2 + $0x4c] sm:$0xf]  ;;  %v810_v38 = vmul.f32 %v9398_v44, %v11562_v23  ;;  %v811_v32 = vmul.f32 %v9400_v15, %v11563_v0  ;;  %v3528_v23 = vrot.slane %v3526_v54, 1  ;;  %7472 = vmatprep.subr.bf16.mxu0 %v11541_v17  ;;  %6984 = vmatprep.subr.bf16.mxu1 %v11541_v17 }
  0xc2   : > { %6578 = vst [vmem:[#allocation2 + $0x58] sm:$0xff] %v6383_v36   ;;  %v1270_v45 = vsel %vm1261_vm1, %v11565_v34, %v11564_v4  ;;  %v9419_v16 = vcombine.low %v2471_v47, %v2472_v10  ;;  %v9421_v36 = vcombine.low %v2472_v10, %v2473_v27  ;;  %v3534_v0 = vshll.u32 %v9387_v43, 16  ;;  %v6564_v4 = vld [vmem:[%s8900_s29 + $0xa0] sm:$0xff]   ;;  %7305 = vmatmul.mubr.bf16.gmra.mrb[16].mxu0 %v9302_v29  ;;  %v9433_v47 = vpop.permute.xlu0 %673 }
  0xc3   : > { %v6388_v15 = vpack.c.bf16 %v811_v32, %v810_v38  ;;  %v428_v34 = vmul.f32 %v6307_v14, %v8907_v7  ;;  %v3530_v10 = vshrl.u32 %v9342_v59, 16  ;;  %11566 = vst [vmem:[#allocation28_spill] sm:$0xff] %v9433_v47  ;;  %v9441_v14 = vsel %vm3485_vm2, %v3524_v8, %v3528_v23  ;;  %7308 = vmatprep.mubr.msk.bf16.mxu0 %vm8620_vm0, %v11541_v17 }
  0xc4   : > { %6901 = vmatmul.mubr.bf16.gmra.mrb[12].mxu1 %v1270_v45  ;;  %v9435_v50 = vpop.permute.xlu1 %678  ;;  %v6308_v45 = vunpack.c.h.bf16 %v9352_v35  ;;  %v11568_v28 = vmax.f32 %v9090_v21, 0.0  ;;  %v11569_v29 = vmax.f32 %v9100_v25, 0.0  ;;  %v8507_v21 = vld [vmem:[%s11402_s3 + $0x30] sm:$0xff]   ;;  %v3542_v25 = vshll.u32 %v9421_v36, 16 }
  0xc5   : > { %11567 = vst [vmem:[#allocation29_spill] sm:$0xff] %v9435_v50  ;;  %6904 = vmatprep.mubr.msk.bf16.mxu1 %vm8620_vm0, %v11541_v17  ;;  %v2474_v52 = vld [vmem:[#allocation2 + $0x50] sm:$0xf]  ;;  %v2475_v54 = vld [vmem:[#allocation2 + $0x54] sm:$0xf]  ;;  %6579 = vst [vmem:[#allocation2 + $0x60] sm:$0xff] %v6388_v15   ;;  %v3532_v8 = vor.u32 %v3530_v10, %v3528_v23  ;;  %v6311_v44 = vunpack.c.l.bf16 %v6564_v4  ;;  %6985 = vmatpush3.bf16.msra.mxu1 %v8507_v21 }
  0xc6   : > { %v812_v38 = vmul.f32 %v9433_v47, %v11568_v28  ;;  %v813_v32 = vmul.f32 %v9435_v50, %v11569_v29  ;;  %v9452_v35 = vcombine.low %v2473_v27, %v2474_v52  ;;  %v9454_v53 = vcombine.low %v2474_v52, %v2475_v54  ;;  %v9465_v52 = vpop.permute.xlu0 %683  ;;  %6986 = vmatprep.subr.bf16.mxu1 %v11541_v17 }
  0xc7   : > { %v3536_v15 = vrot.slane %v3534_v0, 1  ;;  %v9461_v29 = vadd.f32 %v8914_v13, %v428_v34  ;;  %v3538_v27 = vshrl.u32 %v9387_v43, 16  ;;  %11570 = vst [vmem:[#allocation30_spill] sm:$0xff] %v9465_v52  ;;  %v429_v23 = vmul.f32 %v6308_v45, %v8907_v7 }
  0xc8   : > { %v6393_v28 = vpack.c.bf16 %v813_v32, %v812_v38  ;;  %v9467_v19 = vpop.permute.xlu1 %688  ;;  %v6312_v0 = vunpack.c.h.bf16 %v6564_v4  ;;  %v11572_v34 = vmax.f32 %v9118_v61, 0.0  ;;  %v11573_v32 = vmax.f32 %v9121_v56, 0.0  ;;  %v8512_v56 = vld [vmem:[%s11402_s3 + $0x38] sm:$0xff]  }
  0xc9   : > { %11571 = vst [vmem:[#allocation31_spill] sm:$0xff] %v9467_v19  ;;  %v2476_v10 = vld [vmem:[#allocation2 + $0x58] sm:$0xf]  ;;  %v2477_v50 = vld [vmem:[#allocation2 + $0x5c] sm:$0xf]  ;;  %v9471_v47 = vsel %vm3485_vm2, %v3532_v8, %v3536_v15  ;;  %v11575_v45 = vrot.slane %v9337_v51, 3  ;;  %v3540_v61 = vor.u32 %v3538_v27, %v3536_v15  ;;  %6987 = vmatpush3.bf16.msra.mxu1 %v8512_v56 }
  0xca   : > { %6580 = vst [vmem:[#allocation2 + $0x68] sm:$0xff] %v6393_v28   ;;  %v814_v38 = vmul.f32 %v9465_v52, %v11572_v34  ;;  %v815_v11 = vmul.f32 %v9467_v19, %v11573_v32  ;;  %v9486_v8 = vcombine.low %v2475_v54, %v2476_v10  ;;  %v9488_v28 = vcombine.low %v2476_v10, %v2477_v50  ;;  %v9500_v15 = vpop.permute.xlu0 %693 }
  0xcb   : > { %v1272_v4 = vsel %vm1261_vm1, %v11575_v45, %v11574_v49  ;;  %v3544_v42 = vrot.slane %v3542_v25, 1  ;;  %v3550_v34 = vshll.u32 %v9454_v53, 16  ;;  %v430_v49 = vmul.f32 %v6311_v44, %v8907_v7  ;;  %v6565_v45 = vld [vmem:[%s8900_s29 + $0xa8] sm:$0xff]   ;;  %7309 = vmatmul.mubr.bf16.gmra.mrb[20].mxu0 %v9342_v59  ;;  %11576 = vst [vmem:[#allocation32_spill] sm:$0xff] %v9500_v15  ;;  %7072 = vmatprep.subr.bf16.mxu1 %v11541_v17 }
  0xcc   : > { %v6398_v32 = vpack.c.bf16 %v815_v11, %v814_v38  ;;  %6905 = vmatmul.mubr.bf16.gmra.mrb[16].mxu1 %v1272_v4  ;;  %v3546_v54 = vshrl.u32 %v9421_v36, 16  ;;  %v9502_v21 = vpop.permute.xlu1 %698  ;;  %v9507_v11 = vadd.f32 %v8914_v13, %v429_v23  ;;  %v431_v25 = vmul.f32 %v6312_v0, %v8907_v7  ;;  %v2478_v44 = vld [vmem:[#allocation2 + $0x60] sm:$0xf]  ;;  %v2479_v27 = vld [vmem:[#allocation2 + $0x64] sm:$0xf]  ;;  %7312 = vmatprep.mubr.msk.bf16.mxu0 %vm8620_vm0, %v11541_v17 }
  0xcd   : > { %11577 = vst [vmem:[#allocation33_spill] sm:$0xff] %v9502_v21  ;;  %6908 = vmatprep.mubr.msk.bf16.mxu1 %vm8620_vm0, %v11541_v17  ;;  %v9511_v10 = vsel %vm3485_vm2, %v3540_v61, %v3544_v42  ;;  %v11578_v59 = vmax.f32 %v9152_v63, 0.0  ;;  %v11579_v4 = vmax.f32 %v9155_v41, 0.0  ;;  %v9522_v7 = vcombine.low %v2477_v50, %v2478_v44  ;;  %v1081_v23 = vld [vmem:[#allocation2 + $0x4] sm:$0xc] }
  0xce   : > { %6581 = vst [vmem:[#allocation2 + $0x70] sm:$0xff] %v6398_v32   ;;  %v9524_v0 = vcombine.low %v2478_v44, %v2479_v27  ;;  %v3548_v61 = vor.u32 %v3546_v54, %v3544_v42  ;;  %v3552_v32 = vrot.slane %v3550_v34, 1  ;;  %v3558_v63 = vshll.u32 %v9488_v28, 16  ;;  %v9539_v42 = vld [vmem:[%s11400_s1 + $0x1] ss:$0 sm:$0xff] }
  0xcf   : > { %v816_v38 = vmul.f32 %v9500_v15, %v11578_v59  ;;  %v817_v19 = vmul.f32 %v9502_v21, %v11579_v4  ;;  %v5964_v59 = vcombine.low %v1081_v23, %v9136_v24  ;;  %v9529_v4 = vadd.f32 %v8914_v13, %v430_v49  ;;  %v9532_v21 = vpop.permute.xlu0 %703  ;;  %v9564_v15 = vld [vmem:[#allocation2 + $0x3c] sm:$0xff]  }
  0xd0   : > { %v6315_v52 = vunpack.c.l.bf16 %v6565_v45  ;;  %11580 = vst [vmem:[#allocation34_spill] sm:$0xff] %v9532_v21  ;;  %v9534_v50 = vpop.permute.xlu1 %708  ;;  %v9542_v34 = vadd.f32 %v9539_v42, %v431_v25  ;;  %v6316_v24 = vunpack.c.h.bf16 %v6565_v45  ;;  %v9547_v13 = vsel %vm3485_vm2, %v3548_v61, %v3552_v32 }
  0xd1   : > { %v6403_v41 = vpack.c.bf16 %v817_v19, %v816_v38  ;;  %11581 = vst [vmem:[#allocation35_spill] sm:$0xff] %v9534_v50  ;;  %v9544_v19 = vld [vmem:[#allocation2 + $0x68] sm:$0xf]  ;;  %v3554_v56 = vshrl.u32 %v9454_v53, 16  ;;  %v11582_v49 = vmax.f32 %v9163_v30, 0.0  ;;  %v11583_v44 = vmax.f32 %v9179_v33, 0.0 }
  0xd2   : > { %v11584_v25 = vrot.slane %v9484_v62, 3  ;;  %v11585_v45 = vrot.slane %v9417_v5, 3  ;;  %v9562_v61 = vcombine.low %v2479_v27, %v9544_v19  ;;  %v3560_v18 = vrot.slane %v3558_v63, 1  ;;  %v9575_v27 = vld [vmem:[#allocation2 + $0x6c] sm:$0xf] }
  0xd3   : > { %6582 = vst [vmem:[#allocation2 + $0x78] sm:$0xff] %v6403_v41   ;;  %v818_v54 = vmul.f32 %v9532_v21, %v11582_v49  ;;  %v819_v38 = vmul.f32 %v9534_v50, %v11583_v44  ;;  %v3556_v41 = vor.u32 %v3554_v56, %v3552_v32  ;;  %v3562_v30 = vshrl.u32 %v9488_v28, 16  ;;  %v9571_v44 = vld [vmem:[%s11400_s1] ss:$0 sm:$0xff]  ;;  %7313 = vmatmul.mubr.bf16.gmra.mrb[24].mxu0 %v9387_v43  ;;  %v9578_v32 = vpop.permute.xlu0 %713 }
  0xd4   : > { %v1274_v23 = vsel %vm1261_vm1, %v11585_v45, %v11584_v25  ;;  %v3566_v49 = vshll.u32 %v9524_v0, 16  ;;  %v432_v25 = vmul.f32 %v9571_v44, %v6315_v52  ;;  %v6566_v45 = vld [vmem:[%s8900_s29 + $0xb0] sm:$0xff]   ;;  %v1577_v50 = vshrl.u32 %v5964_v59, 16  ;;  %11586 = vst [vmem:[#allocation36_spill] sm:$0xff] %v9578_v32  ;;  %v9580_v63 = vpop.permute.xlu1 %718  ;;  %7316 = vmatprep.mubr.msk.bf16.mxu0 %vm8620_vm0, %v11541_v17 }
  0xd5   : > { %v6408_v33 = vpack.c.bf16 %v819_v38, %v818_v54  ;;  %6909 = vmatmul.mubr.bf16.gmra.mrb[20].mxu1 %v1274_v23  ;;  %v1580_v21 = vshll.u32 %v5964_v59, 16  ;;  %11587 = vst [vmem:[#allocation37_spill] sm:$0xff] %v9580_v63  ;;  %v433_v56 = vmul.f32 %v9571_v44, %v6316_v24  ;;  %v9585_v54 = vld [vmem:[#allocation2 + $0x70] sm:$0xf]  ;;  %v9588_v52 = vsel %vm3485_vm2, %v3556_v41, %v3560_v18 }
  0xd6   : > { %6912 = vmatprep.mubr.msk.bf16.mxu1 %vm8620_vm0, %v11541_v17  ;;  %v3564_v38 = vor.u32 %v3562_v30, %v3560_v18  ;;  %v9590_v23 = vrot.slane %v3566_v49, 1  ;;  %v11588_v43 = vmax.f32 %v9207_v1, 0.0  ;;  %v11589_v55 = vmax.f32 %v9250_v58, 0.0 }
  0xd7   : > { %6583 = vst [vmem:[#allocation2 + $0x80] sm:$0xff] %v6408_v33   ;;  %v9602_v24 = vcombine.low %v9575_v27, %v9585_v54  ;;  %v1275_v41 = vrot.slane %v9564_v15, 3  ;;  %v6319_v30 = vunpack.c.l.bf16 %v6566_v45  ;;  %v6320_v1 = vunpack.c.h.bf16 %v6566_v45 }
  0xd8   : > { %v820_v59 = vmul.f32 %v9578_v32, %v11588_v43  ;;  %v821_v3 = vmul.f32 %v9580_v63, %v11589_v55  ;;  %v9608_v49 = vsel %vm3485_vm2, %v3564_v38, %v9590_v23  ;;  %v531_v55 = vmax.f32 %v9507_v11, 0.0  ;;  %v9611_v63 = vpop.permute.xlu0 %723  ;;  %v9613_v32 = vpop.permute.xlu1 %728  ;;  %v6567_v38 = vld [vmem:[%s8900_s29 + $0xb8] sm:$0xff]  }
  0xd9   : > { %11590 = vst [vmem:[#allocation38_spill] sm:$0xff] %v9602_v24  ;;  %11591 = vst [vmem:[#allocation39_spill] sm:$0xff] %v9608_v49  ;;  %v1579_v33 = vrot.slane %v1577_v50, 2  ;;  %v1582_v43 = vrot.slane %v1580_v21, 3  ;;  %v532_v18 = vmax.f32 %v9529_v4, 0.0  ;;  %v533_v24 = vmax.f32 %v9542_v34, 0.0 }
  0xda   : > { %v6413_v58 = vpack.c.bf16 %v821_v3, %v820_v59  ;;  %11592 = vst [vmem:[#allocation40_spill] sm:$0xff] %v9611_v63  ;;  %11593 = vst [vmem:[#allocation41_spill] sm:$0xff] %v9613_v32  ;;  %v9618_v12 = vadd.f32 %v9539_v42, %v432_v25  ;;  %v9621_v45 = vadd.f32 %v9539_v42, %v433_v56  ;;  %v11594_v3 = vmax.f32 %v9349_v39, 0.0  ;;  %v9636_v49 = vld [vmem:[#allocation2 + $0x44] sm:$0xff]  }
  0xdb   : > { %v11595_v21 = vmax.f32 %v9367_v37, 0.0  ;;  %v11596_v4 = vshrl.u32 %v9148_v20, 16  ;;  %v11446_v34 = vshll.u32 %v9148_v20, 16  ;;  %v11597_v25 = vrot.slane %v9484_v62, 3  ;;  %7317 = vmatmul.mubr.bf16.gmra.mrb[28].mxu0 %v9421_v36 }
  0xdc   : > { %6584 = vst [vmem:[#allocation2 + $0x88] sm:$0xff] %v6413_v58   ;;  %v822_v11 = vmul.f32 %v9611_v63, %v11594_v3  ;;  %v434_v39 = vmul.f32 %v9571_v44, %v6319_v30  ;;  %v435_v58 = vmul.f32 %v9571_v44, %v6320_v1  ;;  %v1583_v3 = vor.u32 %v1582_v43, %v1579_v33  ;;  %v9645_v63 = vpop.permute.xlu0 %733 }
  0xdd   : > { %v823_v50 = vmul.f32 %v9613_v32, %v11595_v21  ;;  %v1587_v59 = vrot.slane %v11596_v4, 2  ;;  %v1276_v56 = vsel %vm1261_vm1, %v11597_v25, %v1275_v41  ;;  %v1590_v21 = vrot.slane %v11446_v34, 3  ;;  %11598 = vst [vmem:[#allocation42_spill] sm:$0xff] %v9645_v63  ;;  %v9647_v25 = vpop.permute.xlu1 %738  ;;  %7320 = vmatprep.mubr.msk.bf16.mxu0 %vm8620_vm0, %v11541_v17 }
  0xde   : > { %6913 = vmatmul.mubr.bf16.gmra.mrb[24].mxu1 %v1276_v56  ;;  %v11448_v4 = vshrl.u32 %v9197_v31, 16  ;;  %v11450_v32 = vshll.u32 %v9197_v31, 16  ;;  %11599 = vst [vmem:[#allocation43_spill] sm:$0xff] %v9647_v25  ;;  %v534_v30 = vmax.f32 %v9618_v12, 0.0  ;;  %v535_v1 = vmax.f32 %v9621_v45, 0.0 }
  0xdf   : > { %v6418_v37 = vpack.c.bf16 %v823_v50, %v822_v11  ;;  %6916 = vmatprep.mubr.msk.bf16.mxu1 %vm8620_vm0, %v11541_v17  ;;  %v6323_v33 = vunpack.c.l.bf16 %v6567_v38  ;;  %v6324_v43 = vunpack.c.h.bf16 %v6567_v38  ;;  %v11600_v11 = vmax.f32 %v9461_v29, 0.0 }
  0xe0   : > { %v825_v36 = vmul.f32 %v9647_v25, %v531_v55  ;;  %v1591_v56 = vor.u32 %v1590_v21, %v1587_v59  ;;  %v1596_v34 = vrot.slane %v11448_v4, 2  ;;  %v1277_v12 = vrot.slane %v9636_v49, 3  ;;  %v9670_v25 = vpop.permute.xlu0 %743 }
  0xe1   : > { %6585 = vst [vmem:[#allocation2 + $0x90] sm:$0xff] %v6418_v37   ;;  %v824_v50 = vmul.f32 %v9645_v63, %v11600_v11  ;;  %v487_v45 = vadd.f32 %v9539_v42, %v434_v39  ;;  %v1599_v38 = vrot.slane %v11450_v32, 3  ;;  %v488_v29 = vadd.f32 %v9539_v42, %v435_v58  ;;  %11602 = vst [vmem:[#allocation45_spill] sm:$0xff] %v9670_v25  ;;  %v9672_v59 = vpop.permute.xlu1 %748  ;;  %v9682_v32 = vld [vmem:[#allocation2 + $0x4c] sm:$0xff]  }
  0xe2   : > { %v9667_v11 = vsel %vm1575_vm4, %v1583_v3, %v1591_v56  ;;  %v11453_v55 = vshrl.u32 %v9241_v26, 16  ;;  %11603 = vst [vmem:[#allocation46_spill] sm:$0xff] %v9672_v59  ;;  %v436_v21 = vmul.f32 %v9571_v44, %v6323_v33  ;;  %v437_v4 = vmul.f32 %v9571_v44, %v6324_v43 }
  0xe3   : > { %v6423_v37 = vpack.c.bf16 %v825_v36, %v824_v50  ;;  %11601 = vst [vmem:[#allocation44_spill] sm:$0xff] %v9667_v11  ;;  %v1600_v39 = vor.u32 %v1599_v38, %v1596_v34  ;;  %v11451_v63 = vshll.u32 %v9241_v26, 16  ;;  %v826_v50 = vmul.f32 %v9670_v25, %v532_v18  ;;  %7321 = vmatmul.mubr.bf16.gmra.mrb[32].mxu0 %v9454_v53 }
  0xe4   : > { %v827_v58 = vmul.f32 %v9672_v59, %v533_v24  ;;  %v1605_v3 = vrot.slane %v11453_v55, 2  ;;  %v1278_v36 = vsel %vm1261_vm1, %v1275_v41, %v1277_v12  ;;  %v11452_v33 = vshrl.u32 %v9337_v51, 16  ;;  %v9691_v24 = vpop.permute.xlu0 %753  ;;  %7324 = vmatprep.mubr.msk.bf16.mxu0 %vm8620_vm0, %v11541_v17 }
  0xe5   : > { %6586 = vst [vmem:[#allocation2 + $0x98] sm:$0xff] %v6423_v37   ;;  %v9685_v11 = vsel %vm1575_vm4, %v1591_v56, %v1600_v39  ;;  %v1608_v44 = vrot.slane %v11451_v63, 3  ;;  %11604 = vst [vmem:[#allocation47_spill] sm:$0xff] %v9691_v24  ;;  %v9693_v18 = vpop.permute.xlu1 %758  ;;  %v536_v43 = vmax.f32 %v487_v45, 0.0  ;;  %v537_v41 = vmax.f32 %v488_v29, 0.0 }
  0xe6   : > { %v6428_v34 = vpack.c.bf16 %v827_v58, %v826_v50  ;;  %6917 = vmatmul.mubr.bf16.gmra.mrb[28].mxu1 %v1278_v36  ;;  %11605 = vst [vmem:[#allocation48_spill] sm:$0xff] %v9693_v18  ;;  %v489_v56 = vadd.f32 %v9539_v42, %v436_v21  ;;  %v828_v37 = vmul.f32 %v9691_v24, %v534_v30  ;;  %v1279_v58 = vrot.slane %v9682_v32, 3 }
  0xe7   : > { %6920 = vmatprep.mubr.msk.bf16.mxu1 %vm8620_vm0, %v11541_v17  ;;  %v1609_v38 = vor.u32 %v1608_v44, %v1605_v3  ;;  %v829_v50 = vmul.f32 %v9693_v18, %v535_v1  ;;  %v490_v53 = vadd.f32 %v9539_v42, %v437_v4  ;;  %v1614_v29 = vrot.slane %v11452_v33, 2  ;;  %v9717_v33 = vld [vmem:[#allocation2 + $0x54] sm:$0xff]  }
  0xe8   : > { %6587 = vst [vmem:[#allocation2 + $0xa0] sm:$0xff] %v6428_v34   ;;  %v11468_v21 = vshll.u32 %v9337_v51, 16  ;;  %v11462_v30 = vshrl.u32 %v9417_v5, 16  ;;  %v9711_v36 = vpop.permute.xlu0 %763  ;;  %v538_v44 = vmax.f32 %v489_v56, 0.0  ;;  %v1280_v63 = vsel %vm1261_vm1, %v1277_v12, %v1279_v58 }
  0xe9   : > { %v9705_v45 = vsel %vm1575_vm4, %v1600_v39, %v1609_v38  ;;  %v6433_v3 = vpack.c.bf16 %v829_v50, %v828_v37  ;;  %11606 = vst [vmem:[#allocation49_spill] sm:$0xff] %v9711_v36  ;;  %v769_v1 = vpop.permute.xlu1 %768  ;;  %v830_v4 = vmul.f32 %v9711_v36, %v536_v43  ;;  %v539_v34 = vmax.f32 %v490_v53, 0.0 }
  0xea   : > { %v1617_v42 = vrot.slane %v11468_v21, 3  ;;  %v831_v39 = vmul.f32 %v769_v1, %v537_v41  ;;  %v1623_v37 = vrot.slane %v11462_v30, 2  ;;  %v11461_v50 = vshll.u32 %v9417_v5, 16 }
  0xeb   : > { %6588 = vst [vmem:[#allocation2 + $0xa8] sm:$0xff] %v6433_v3   ;;  %7325 = vmatmul.mubr.bf16.gmra.mrb[36].mxu0 %v9488_v28  ;;  %v11457_v1 = vshll.u32 %v9484_v62, 16 }
  0xec   : > { %v1618_v55 = vor.u32 %v1617_v42, %v1614_v29  ;;  %v6438_v18 = vpack.c.bf16 %v831_v39, %v830_v4  ;;  %v774_v56 = vpop.permute.xlu0 %773  ;;  %v1626_v12 = vrot.slane %v11461_v50, 3  ;;  %7328 = vmatprep.mubr.msk.bf16.mxu0 %vm8620_vm0, %v11541_v17  ;;  %v11460_v29 = vshrl.u32 %v9484_v62, 16 }
  0xed   : > { %v779_v3 = vpop.permute.xlu1 %778  ;;  %v832_v41 = vmul.f32 %v774_v56, %v538_v44  ;;  %v1635_v44 = vrot.slane %v11457_v1, 3  ;;  %v11456_v56 = vshrl.u32 %v9564_v15, 16 }
  0xee   : > { %6921 = vmatmul.mubr.bf16.gmra.mrb[32].mxu1 %v1280_v63  ;;  %v9726_v43 = vsel %vm1575_vm4, %v1609_v38, %v1618_v55  ;;  %6589 = vst [vmem:[#allocation2 + $0xb0] sm:$0xff] %v6438_v18   ;;  %v833_v53 = vmul.f32 %v779_v3, %v539_v34  ;;  %v1281_v63 = vrot.slane %v9717_v33, 3  ;;  %v1627_v28 = vor.u32 %v1626_v12, %v1623_v37  ;;  %v9743_v34 = vld [vmem:[#allocation2 + $0x5c] sm:$0xff]  }
  0xef   : > { %6924 = vmatprep.mubr.msk.bf16.mxu1 %vm8620_vm0, %v11541_v17  ;;  %v1632_v18 = vrot.slane %v11460_v29, 2  ;;  %v11455_v3 = vshll.u32 %v9564_v15, 16  ;;  %v1641_v12 = vrot.slane %v11456_v56, 2  ;;  %v8497_v56 = vld [vmem:[%s11402_s3 + $0x180] sm:$0xff]   ;;  %v11463_v29 = vshrl.u32 %v9717_v33, 16 }
  0xf0   : > { %v6443_v42 = vpack.c.bf16 %v833_v53, %v832_v41  ;;  %v784_v4 = vpop.permute.xlu0 %783  ;;  %v9736_v38 = vsel %vm1575_vm4, %v1618_v55, %v1627_v28  ;;  %v1282_v39 = vsel %vm1261_vm1, %v1279_v58, %v1281_v63  ;;  %v11459_v41 = vshrl.u32 %v9636_v49, 16 }
  0xf1   : > { %v1636_v37 = vor.u32 %v1635_v44, %v1632_v18  ;;  %v1644_v58 = vrot.slane %v11455_v3, 3  ;;  %v11458_v53 = vshll.u32 %v9636_v49, 16  ;;  %v11465_v44 = vshrl.u32 %v9682_v32, 16 }
  0xf2   : > { %6590 = vst [vmem:[#allocation2 + $0xb8] sm:$0xff] %v6443_v42   ;;  %v1283_v42 = vrot.slane %v9743_v34, 3 }
  0xf3   : > { %7329 = vmatmul.mubr.bf16.gmra.mrb[40].mxu0 %v9524_v0  ;;  %v9751_v55 = vsel %vm1575_vm4, %v1627_v28, %v1636_v37  ;;  %v1645_v4 = vor.u32 %v1644_v58, %v1641_v12  ;;  %v1650_v28 = vrot.slane %v11459_v41, 2  ;;  %v1653_v18 = vrot.slane %v11458_v53, 3  ;;  %v9779_v41 = vld [vmem:[#allocation2 + $0x64] sm:$0xff]  }
  0xf4   : > { %7388 = vmatprep.mubr.msk.bf16.mxu0 %vm8620_vm0, %v11541_v17  ;;  %v1659_v12 = vrot.slane %v11465_v44, 2  ;;  %v1284_v53 = vsel %vm1261_vm1, %v1281_v63, %v1283_v42  ;;  %v1668_v63 = vrot.slane %v11463_v29, 2  ;;  %v11472_v44 = vshll.u32 %v9779_v41, 16 }
  0xf5   : > { %v9769_v3 = vsel %vm1575_vm4, %v1636_v37, %v1645_v4  ;;  %v1654_v1 = vor.u32 %v1653_v18, %v1650_v28  ;;  %v11466_v37 = vshll.u32 %v9717_v33, 16  ;;  %v11467_v28 = vshrl.u32 %v9743_v34, 16 }
  0xf6   : > { %6925 = vmatmul.mubr.bf16.gmra.mrb[36].mxu1 %v1282_v39  ;;  %v11464_v39 = vshll.u32 %v9682_v32, 16  ;;  %11607 = vst [vmem:[#allocation50_spill] sm:$0xff] %v9769_v3 }
  0xf7   : > { %6928 = vmatprep.mubr.msk.bf16.mxu1 %vm8620_vm0, %v11541_v17  ;;  %v9784_v50 = vsel %vm1575_vm4, %v1645_v4, %v1654_v1  ;;  %v1677_v18 = vrot.slane %v11467_v28, 2  ;;  %v8506_v28 = vld [vmem:[%s11402_s3 + $0x190] sm:$0xff]  }
  0xf8   : > { %v1662_v58 = vrot.slane %v11464_v39, 3  ;;  %11608 = vst [vmem:[#allocation51_spill] sm:$0xff] %v9784_v50 }
  0xfa   : > { %v1663_v30 = vor.u32 %v1662_v58, %v1659_v12  ;;  %v11470_v12 = vshll.u32 %v9743_v34, 16  ;;  %v9807_v58 = vld [vmem:[#allocation2 + $0x6c] sm:$0xff]  }
  0xfb   : > { %7389 = vmatmul.mubr.bf16.vlgmr.msra.gmra.mrb[0].mxu0 %v9254_v9  ;;  %v1671_v9 = vrot.slane %v11466_v37, 3  ;;  %v9813_v37 = vld [vmem:[#allocation2 + $0x74] sm:$0xff]   ;;  %v11474_v24 = vshrl.u32 %v9807_v58, 16 }
  0xfc   : > { %7473 = vmatpush3.bf16.msra.mxu0 %v8497_v56  ;;  %7392 = vmatprep.mubr.msk.bf16.mxu0 %vm8620_vm0, %v11541_v17  ;;  %v9798_v4 = vsel %vm1575_vm4, %v1654_v1, %v1663_v30  ;;  %v1285_v56 = vrot.slane %v9779_v41, 3  ;;  %v1680_v39 = vrot.slane %v11470_v12, 3  ;;  %v11473_v1 = vshrl.u32 %v9779_v41, 16 }
  0xfd   : > { %11609 = vst [vmem:[#allocation52_spill] sm:$0xff] %v9798_v4  ;;  %7474 = vmatprep.subr.bf16.mxu0 %v11541_v17  ;;  %v1672_v29 = vor.u32 %v1671_v9, %v1668_v63 }
  0xfe   : > { %6929 = vmatmul.mubr.bf16.gmra.mrb[40].mxu1 %v1284_v53  ;;  %v8501_v53 = vld [vmem:[%s11402_s3 + $0x188] sm:$0xff]   ;;  %v1681_v36 = vor.u32 %v1680_v39, %v1677_v18  ;;  %v1686_v63 = vrot.slane %v11473_v1, 2  ;;  %v1286_v9 = vsel %vm1261_vm1, %v1283_v42, %v1285_v56  ;;  %v9835_v39 = vld [vmem:[#allocation2 + $0x7c] sm:$0xff]   ;;  %v1695_v18 = vrot.slane %v11474_v24, 2 }
  0xff   : > { %6932 = vmatprep.mubr.msk.bf16.mxu1 %vm8620_vm0, %v11541_v17  ;;  %v9819_v21 = vsel %vm1575_vm4, %v1663_v30, %v1672_v29  ;;  %v11475_v30 = vshll.u32 %v9807_v58, 16  ;;  %v11481_v59 = vshrl.u32 %v9835_v39, 16  ;;  %v11480_v25 = vshll.u32 %v9835_v39, 16 }
 0x100   : > { %7475 = vmatpush3.bf16.msra.mxu0 %v8501_v53  ;;  %11610 = vst [vmem:[#allocation53_spill] sm:$0xff] %v9819_v21  ;;  %v1689_v53 = vrot.slane %v11472_v44, 3  ;;  %v9828_v12 = vsel %vm1575_vm4, %v1672_v29, %v1681_v36  ;;  %v8511_v29 = vld [vmem:[%s11402_s3 + $0x198] sm:$0xff]   ;;  %v1287_v44 = vrot.slane %v9807_v58, 3 }
 0x101   : > { %7476 = vmatprep.subr.bf16.mxu0 %v11541_v17  ;;  %11611 = vst [vmem:[#allocation54_spill] sm:$0xff] %v9828_v12  ;;  %v9861_v12 = vld [vmem:[#allocation2 + $0x8c] sm:$0xff]  }
 0x102   : > { %v1690_v42 = vor.u32 %v1689_v53, %v1686_v63  ;;  %v9853_v53 = vld [vmem:[#allocation2 + $0x84] sm:$0xff]  }
 0x103   : > { %7393 = vmatmul.mubr.bf16.gmra.mrb[4].mxu0 %v9327_v2  ;;  %v1698_v2 = vrot.slane %v11475_v30, 3  ;;  %v11483_v21 = vshll.u32 %v9853_v53, 16 }
 0x104   : > { %7396 = vmatprep.mubr.msk.bf16.mxu0 %vm8620_vm0, %v11541_v17  ;;  %7477 = vmatpush3.bf16.msra.mxu0 %v8506_v28  ;;  %v9850_v63 = vsel %vm1575_vm4, %v1681_v36, %v1690_v42  ;;  %v11478_v28 = vshll.u32 %v9813_v37, 16  ;;  %v8514_v36 = vld [vmem:[%s11402_s3 + $0x1a0] sm:$0xff]  }
 0x105   : > { %7478 = vmatprep.subr.bf16.mxu0 %v11541_v17  ;;  %11612 = vst [vmem:[#allocation55_spill] sm:$0xff] %v9850_v63  ;;  %v1699_v1 = vor.u32 %v1698_v2, %v1695_v18  ;;  %v1288_v18 = vsel %vm1261_vm1, %v1285_v56, %v1287_v44  ;;  %v9880_v56 = vld [vmem:[#allocation2 + $0x94] sm:$0xff]  }
 0x106   : > { %6933 = vmatmul.mubr.bf16.gmra.mrb[44].mxu1 %v1286_v9  ;;  %v11479_v9 = vshrl.u32 %v9813_v37, 16  ;;  %v1707_v30 = vrot.slane %v11478_v28, 3  ;;  %v1713_v28 = vrot.slane %v11481_v59, 2  ;;  %v1122_v59 = vld [vmem:[#allocation2 + $0xa8] sm:$0x1]  ;;  %v11486_v4 = vshll.u32 %v9880_v56, 16 }
 0x107   : > { %6936 = vmatprep.mubr.msk.bf16.mxu1 %vm8620_vm0, %v11541_v17  ;;  %v9867_v63 = vsel %vm1575_vm4, %v1690_v42, %v1699_v1  ;;  %v1289_v42 = vrot.slane %v9813_v37, 3 }
 0x108   : > { %v1704_v24 = vrot.slane %v11479_v9, 2  ;;  %7479 = vmatpush3.bf16.msra.mxu0 %v8511_v29  ;;  %11613 = vst [vmem:[#allocation56_spill] sm:$0xff] %v9867_v63  ;;  %v1716_v9 = vrot.slane %v11480_v25, 3  ;;  %v11482_v29 = vshrl.u32 %v9853_v53, 16  ;;  %v1725_v25 = vrot.slane %v11483_v21, 3 }
 0x109   : > { %7480 = vmatprep.subr.bf16.mxu0 %v11541_v17  ;;  %v11489_v21 = vshrl.u32 %v9880_v56, 16  ;;  %v1290_v50 = vsel %vm1261_vm1, %v1287_v44, %v1289_v42  ;;  %v1743_v44 = vrot.slane %v11486_v4, 3 }
 0x10a   : > { %v1708_v2 = vor.u32 %v1707_v30, %v1704_v24  ;;  %v1717_v30 = vor.u32 %v1716_v9, %v1713_v28  ;;  %v11484_v28 = vshll.u32 %v9861_v12, 16 }
 0x10b   : > { %7397 = vmatmul.mubr.bf16.gmra.mrb[8].mxu0 %v9370_v48  ;;  %v1722_v48 = vrot.slane %v11482_v29, 2 }
 0x10c   : > { %v9883_v24 = vsel %vm1575_vm4, %v1699_v1, %v1708_v2  ;;  %7400 = vmatprep.mubr.msk.bf16.mxu0 %vm8620_vm0, %v11541_v17  ;;  %7481 = vmatpush3.bf16.msra.mxu0 %v8514_v36  ;;  %v11485_v1 = vshrl.u32 %v9861_v12, 16  ;;  %v9898_v9 = vsel %vm1575_vm4, %v1708_v2, %v1717_v30  ;;  %v9901_v36 = vld [vmem:[#allocation2 + $0x9c] sm:$0xff]   ;;  %v1734_v29 = vrot.slane %v11484_v28, 3  ;;  %v1121_v2 = vld [vmem:[#allocation2 + $0xa4] sm:$0xf] }
 0x10d   : > { %11614 = vst [vmem:[#allocation57_spill] sm:$0xff] %v9883_v24  ;;  %7482 = vmatprep.subr.bf16.mxu0 %v11541_v17  ;;  %11615 = vst [vmem:[#allocation58_spill] sm:$0xff] %v9898_v9  ;;  %v1726_v24 = vor.u32 %v1725_v25, %v1722_v48  ;;  %v8523_v9 = vld [vmem:[%s11402_s3 + $0x1b0] sm:$0xff]   ;;  %v9916_v48 = vcombine.low %v1121_v2, %v1122_v59  ;;  %v11488_v3 = vshll.u32 %v9901_v36, 16 }
 0x10e   : > { %6937 = vmatmul.mubr.bf16.gmra.mrb[48].mxu1 %v1288_v18  ;;  %v8519_v18 = vld [vmem:[%s11402_s3 + $0x1a8] sm:$0xff]   ;;  %v1731_v63 = vrot.slane %v11485_v1, 2  ;;  %v1740_v1 = vrot.slane %v11489_v21, 2 }
 0x10f   : > { %6940 = vmatprep.mubr.msk.bf16.mxu1 %vm8620_vm0, %v11541_v17  ;;  %v9914_v25 = vsel %vm1575_vm4, %v1717_v30, %v1726_v24  ;;  %v1291_v30 = vrot.slane %v9835_v39, 3 }
 0x110   : > { %7483 = vmatpush3.bf16.msra.mxu0 %v8519_v18  ;;  %v1735_v28 = vor.u32 %v1734_v29, %v1731_v63  ;;  %v11487_v18 = vshrl.u32 %v9901_v36, 16  ;;  %v1744_v63 = vor.u32 %v1743_v44, %v1740_v1  ;;  %v1756_v1 = vshrl.u32 %v9916_v48, 16 }
 0x111   : > { %7484 = vmatprep.subr.bf16.mxu0 %v11541_v17 }
 0x112   : > { %v9929_v59 = vsel %vm1575_vm4, %v1726_v24, %v1735_v28  ;;  %v1749_v29 = vrot.slane %v11487_v18, 2  ;;  %v9943_v24 = vsel %vm1575_vm4, %v1735_v28, %v1744_v63  ;;  %v1758_v44 = vrot.slane %v1756_v1, 2 }
 0x113   : > { %7401 = vmatmul.mubr.bf16.gmra.mrb[12].mxu0 %v9404_v22  ;;  %v1752_v22 = vrot.slane %v11488_v3, 3  ;;  %11616 = vst [vmem:[#allocation59_spill] sm:$0xff] %v9943_v24  ;;  %v1292_v3 = vsel %vm1261_vm1, %v1289_v42, %v1291_v30  ;;  %v11636_v24 = vshll.u32 %v9564_v15, 16 }
 0x114   : > { %7404 = vmatprep.mubr.msk.bf16.mxu0 %vm8620_vm0, %v11541_v17  ;;  %7485 = vmatpush3.bf16.msra.mxu0 %v8523_v9  ;;  %v1759_v9 = vshll.u32 %v9916_v48, 16 }
 0x115   : > { %7486 = vmatprep.subr.bf16.mxu0 %v11541_v17  ;;  %v1753_v2 = vor.u32 %v1752_v22, %v1749_v29  ;;  %v11621_v29 = vshll.u32 %v9148_v20, 16  ;;  %v11623_v22 = vshll.u32 %v9197_v31, 16 }
 0x116   : > { %6941 = vmatmul.mubr.bf16.gmra.mrb[52].mxu1 %v1290_v50  ;;  %v8528_v50 = vld [vmem:[%s11402_s3 + $0x1b8] sm:$0xff]   ;;  %v1761_v4 = vrot.slane %v1759_v9, 3  ;;  %v11624_v9 = vshrl.u32 %v9241_v26, 16 }
 0x117   : > { %6944 = vmatprep.mubr.msk.bf16.mxu1 %vm8620_vm0, %v11541_v17  ;;  %v9948_v18 = vsel %vm1575_vm4, %v1744_v63, %v1753_v2  ;;  %v2063_v42 = vrot.slane %v11621_v29, 4  ;;  %v2067_v1 = vrot.slane %v11623_v22, 4  ;;  %v11625_v29 = vshll.u32 %v9241_v26, 16 }
 0x118   : > { %7487 = vmatpush3.bf16.msra.mxu0 %v8528_v50  ;;  %11617 = vst [vmem:[#allocation60_spill] sm:$0xff] %v9948_v18  ;;  %v9952_v21 = vor.u32 %v1761_v4, %v1758_v44  ;;  %v11620_v50 = vshrl.u32 %v9148_v20, 16  ;;  %v9974_v44 = vld [vmem:[#allocation2 + $0x1c] sm:$0xf] }
 0x119   : > { %7572 = vmatprep.subr.bf16.mxu0 %v11541_v17 }
 0x11a   : > { %11618 = vst [vmem:[#allocation61_spill] sm:$0xff] %v9952_v21  ;;  %v9959_v28 = vsel %vm1575_vm4, %v1753_v2, %v9952_v21  ;;  %v2062_v63 = vrot.slane %v11620_v50, 3  ;;  %v2070_v2 = vrot.slane %v11624_v9, 3  ;;  %v2071_v21 = vrot.slane %v11625_v29, 4 }
 0x11b   : > { %7405 = vmatmul.mubr.bf16.gmra.mrb[16].mxu0 %v9441_v14  ;;  %11619 = vst [vmem:[#allocation62_spill] sm:$0xff] %v9959_v28  ;;  %v11622_v14 = vshrl.u32 %v9197_v31, 16  ;;  %v4600_v28 = vld [vmem:[#allocation2 + $0x18] sm:$0xe]  ;;  %v11626_v9 = vshrl.u32 %v9337_v51, 16 }
 0x11c   : > { %7408 = vmatprep.mubr.msk.bf16.mxu0 %vm8620_vm0, %v11541_v17  ;;  %v9976_v50 = vor.u32 %v2063_v42, %v2062_v63  ;;  %v2072_v22 = vor.u32 %v2071_v21, %v2070_v2  ;;  %v9994_v29 = vcombine.low %v4600_v28, %v9974_v44  ;;  %v11629_v2 = vshrl.u32 %v9417_v5, 16 }
 0x11d   : > { %v2066_v4 = vrot.slane %v11622_v14, 3  ;;  %v2074_v63 = vrot.slane %v11626_v9, 3 }
 0x11e   : > { %6945 = vmatmul.mubr.bf16.gmra.mrb[56].mxu1 %v1292_v3  ;;  %v1293_v3 = vrot.slane %v9853_v53, 3 }
 0x11f   : > { %6948 = vmatprep.mubr.msk.bf16.mxu1 %vm8620_vm0, %v11541_v17  ;;  %v2068_v20 = vor.u32 %v2067_v1, %v2066_v4  ;;  %v11627_v4 = vshll.u32 %v9337_v51, 16  ;;  %v11630_v51 = vshll.u32 %v9417_v5, 16 }
 0x120   : > { %v1294_v14 = vsel %vm1261_vm1, %v1291_v30, %v1293_v3  ;;  %v9998_v30 = vcombine.low %v9544_v19, %v9575_v27  ;;  %v11633_v19 = vshll.u32 %v9484_v62, 16 }
 0x121   : > { %v9985_v31 = vsel %vm2053_vm3, %v9976_v50, %v2068_v20  ;;  %v2075_v1 = vrot.slane %v11627_v4, 4  ;;  %v10004_v21 = vsel %vm2053_vm3, %v2068_v20, %v2072_v22  ;;  %v2079_v9 = vrot.slane %v11630_v51, 4 }
 0x122   : > { %11628 = vst [vmem:[#allocation63_spill] sm:$0xff] %v9998_v30  ;;  %v1295_v20 = vrot.slane %v9861_v12, 3  ;;  %v2083_v28 = vrot.slane %v11633_v19, 4  ;;  %v3574_v27 = vshll.u32 %v9998_v30, 16  ;;  %v11635_v51 = vshrl.u32 %v9564_v15, 16  ;;  %v10106_v19 = vld [vmem:[#allocation2 + $0x38] sm:$0xff]  }
 0x123   : > { %7409 = vmatmul.mubr.bf16.gmra.mrb[20].mxu0 %v9471_v47  ;;  %v2076_v47 = vor.u32 %v2075_v1, %v2074_v63  ;;  %v11639_v15 = vshll.u32 %v9636_v49, 16  ;;  %v11646_v63 = vshrl.u32 %v9743_v34, 16 }
 0x124   : > { %7412 = vmatprep.mubr.msk.bf16.mxu0 %vm8620_vm0, %v11541_v17 }
 0x125   : > { %v10022_v4 = vsel %vm2053_vm3, %v2072_v22, %v2076_v47  ;;  %v2086_v22 = vrot.slane %v11635_v51, 3 }
 0x126   : > { %6949 = vmatmul.mubr.bf16.gmra.mrb[60].mxu1 %v1294_v14  ;;  %v2078_v14 = vrot.slane %v11629_v2, 3  ;;  %v11631_v2 = vshrl.u32 %v9484_v62, 16  ;;  %11632 = vst [vmem:[#allocation64_spill] sm:$0xff] %v10022_v4  ;;  %v2087_v62 = vrot.slane %v11636_v24, 4  ;;  %v2091_v24 = vrot.slane %v11639_v15, 4  ;;  %v10312_v4 = vld [vmem:[#allocation2 + $0xb0] sm:$0xff]  }
 0x127   : > { %6952 = vmatprep.mubr.msk.bf16.mxu1 %vm8620_vm0, %v11541_v17  ;;  %v2102_v15 = vrot.slane %v11646_v63, 3 }
 0x128   : > { %v2080_v26 = vor.u32 %v2079_v9, %v2078_v14  ;;  %v2082_v42 = vrot.slane %v11631_v2, 3  ;;  %v2483_v2 = vld [vmem:[#allocation2 + $0x74] sm:$0xf] }
 0x12a   : > { %v10030_v14 = vsel %vm2053_vm3, %v2076_v47, %v2080_v26  ;;  %v2084_v5 = vor.u32 %v2083_v28, %v2082_v42  ;;  %v1296_v47 = vsel %vm1261_vm1, %v1293_v3, %v1295_v20  ;;  %v2088_v42 = vor.u32 %v2087_v62, %v2086_v22 }
 0x12b   : > { %11634 = vst [vmem:[#allocation65_spill] sm:$0xff] %v10030_v14  ;;  %v11638_v28 = vshrl.u32 %v9636_v49, 16  ;;  %7413 = vmatmul.mubr.bf16.gmra.mrb[24].mxu0 %v9511_v10  ;;  %v3570_v3 = vshrl.u32 %v9524_v0, 16  ;;  %v1297_v22 = vrot.slane %v9880_v56, 3  ;;  %v11641_v10 = vshrl.u32 %v9682_v32, 16 }
 0x12c   : > { %v10042_v9 = vsel %vm2053_vm3, %v2080_v26, %v2084_v5  ;;  %v10056_v26 = vcombine.low %v9585_v54, %v2483_v2  ;;  %7416 = vmatprep.mubr.msk.bf16.mxu0 %vm8620_vm0, %v11541_v17  ;;  %v10062_v49 = vsel %vm2053_vm3, %v2084_v5, %v2088_v42  ;;  %v10069_v54 = vld [vmem:[#allocation2 + $0x20] sm:$0xff]   ;;  %v11642_v2 = vshll.u32 %v9682_v32, 16 }
 0x12d   : > { %11637 = vst [vmem:[#allocation66_spill] sm:$0xff] %v10042_v9  ;;  %v2090_v51 = vrot.slane %v11638_v28, 3  ;;  %11640 = vst [vmem:[#allocation67_spill] sm:$0xff] %v10062_v49  ;;  %v2094_v28 = vrot.slane %v11641_v10, 3  ;;  %v11645_v32 = vshll.u32 %v9717_v33, 16  ;;  %v1298_v1 = vsel %vm1261_vm1, %v1295_v20, %v1297_v22 }
 0x12e   : > { %6953 = vmatmul.mubr.bf16.gmra.mrb[64].mxu1 %v1296_v47  ;;  %v10053_v47 = vrot.slane %v3574_v27, 1  ;;  %v3572_v27 = vor.u32 %v3570_v3, %v9590_v23  ;;  %v2095_v18 = vrot.slane %v11642_v2, 4  ;;  %v10084_v23 = vld [vmem:[#allocation2 + $0x28] sm:$0xff]   ;;  %v11649_v20 = vrot.slane %v9901_v36, 3 }
 0x12f   : > { %6956 = vmatprep.mubr.msk.bf16.mxu1 %vm8620_vm0, %v11541_v17  ;;  %v2092_v62 = vor.u32 %v2091_v24, %v2090_v51  ;;  %v11644_v24 = vshrl.u32 %v9717_v33, 16  ;;  %v2099_v2 = vrot.slane %v11645_v32, 4  ;;  %v4621_v33 = vrot.slane %v9994_v29, 1  ;;  %v10134_v32 = vld [vmem:[#allocation2 + $0x48] sm:$0xff]  }
 0x130   : > { %v10082_v0 = vsel %vm3485_vm2, %v3572_v27, %v10053_v47  ;;  %v2096_v3 = vor.u32 %v2095_v18, %v2094_v28  ;;  %v11647_v27 = vshll.u32 %v9743_v34, 16  ;;  %v4622_v28 = vrot.slane %v10069_v54, 1 }
 0x131   : > { %v10076_v51 = vsel %vm2053_vm3, %v2088_v42, %v2092_v62  ;;  %v2098_v10 = vrot.slane %v11644_v24, 3  ;;  %v10093_v24 = vld [vmem:[#allocation2 + $0x30] sm:$0xff]   ;;  %v1300_v63 = vsel %vm1261_vm1, %v1297_v22, %v11649_v20  ;;  %v11650_v34 = vshrl.u32 %v9779_v41, 16 }
 0x132   : > { %11643 = vst [vmem:[#allocation68_spill] sm:$0xff] %v10076_v51  ;;  %v2103_v5 = vrot.slane %v11647_v27, 4  ;;  %v10098_v51 = vsel %vm2053_vm3, %v2092_v62, %v2096_v3  ;;  %v10113_v62 = vld [vmem:[#allocation2 + $0x40] sm:$0xff]   ;;  %v10119_v22 = vsel %vm4620_vm5, %v4621_v33, %v4622_v28  ;;  %v4626_v33 = vrot.slane %v10093_v24, 1 }
 0x133   : > { %11648 = vst [vmem:[#allocation69_spill] sm:$0xff] %v10098_v51  ;;  %v2100_v18 = vor.u32 %v2099_v2, %v2098_v10  ;;  %v2106_v27 = vrot.slane %v11650_v34, 3  ;;  %7417 = vmatmul.mubr.bf16.gmra.mrb[28].mxu0 %v9547_v13  ;;  %11652 = vst [vmem:[#allocation71_spill] sm:$0xff] %v10119_v22  ;;  %v11653_v10 = vshll.u32 %v9779_v41, 16  ;;  %v11658_v22 = vshrl.u32 %v9813_v37, 16  ;;  %v10143_v51 = vld [vmem:[#allocation2 + $0x50] sm:$0xff]  }
 0x134   : > { %v2104_v42 = vor.u32 %v2103_v5, %v2102_v15  ;;  %v4624_v15 = vrot.slane %v10084_v23, 1  ;;  %7420 = vmatprep.mubr.msk.bf16.mxu0 %vm8620_vm0, %v11541_v17  ;;  %v11655_v5 = vshrl.u32 %v9807_v58, 16  ;;  %v11661_v49 = vshrl.u32 %v9835_v39, 16 }
 0x135   : > { %v2107_v2 = vrot.slane %v11653_v10, 4 }
 0x136   : > { %6957 = vmatmul.mubr.bf16.gmra.mrb[68].mxu1 %v1298_v1  ;;  %v10116_v1 = vsel %vm2053_vm3, %v2096_v3, %v2100_v18  ;;  %v10127_v13 = vsel %vm2053_vm3, %v2100_v18, %v2104_v42  ;;  %v2110_v20 = vrot.slane %v11655_v5, 3  ;;  %v11656_v3 = vshll.u32 %v9807_v58, 16 }
 0x137   : > { %6960 = vmatprep.mubr.msk.bf16.mxu1 %vm8620_vm0, %v11541_v17  ;;  %11651 = vst [vmem:[#allocation70_spill] sm:$0xff] %v10116_v1  ;;  %11654 = vst [vmem:[#allocation72_spill] sm:$0xff] %v10127_v13  ;;  %v2108_v41 = vor.u32 %v2107_v2, %v2106_v27  ;;  %v10137_v10 = vsel %vm4620_vm5, %v4622_v28, %v4624_v15  ;;  %v2114_v1 = vrot.slane %v11658_v22, 3  ;;  %v11659_v18 = vshll.u32 %v9813_v37, 16 }
 0x138   : > { %v2111_v34 = vrot.slane %v11656_v3, 4  ;;  %11657 = vst [vmem:[#allocation73_spill] sm:$0xff] %v10137_v10  ;;  %v10146_v58 = vsel %vm4620_vm5, %v4624_v15, %v4626_v33  ;;  %v4628_v3 = vrot.slane %v10106_v19, 1  ;;  %v2118_v27 = vrot.slane %v11661_v49, 3 }
 0x139   : > { %v2115_v13 = vrot.slane %v11659_v18, 4  ;;  %11660 = vst [vmem:[#allocation74_spill] sm:$0xff] %v10146_v58  ;;  %v10152_v28 = vsel %vm2053_vm3, %v2104_v42, %v2108_v41  ;;  %v11663_v22 = vshll.u32 %v9835_v39, 16  ;;  %v4630_v37 = vrot.slane %v10113_v62, 1  ;;  %v10157_v18 = vld [vmem:[#allocation2 + $0x58] sm:$0xff]  }
 0x13a   : > { %v2112_v5 = vor.u32 %v2111_v34, %v2110_v20  ;;  %11662 = vst [vmem:[#allocation75_spill] sm:$0xff] %v10152_v28  ;;  %v10163_v15 = vsel %vm4620_vm5, %v4626_v33, %v4628_v3  ;;  %v11666_v34 = vshrl.u32 %v9853_v53, 16  ;;  %v11667_v42 = vshll.u32 %v9853_v53, 16  ;;  %v10178_v33 = vld [vmem:[#allocation2 + $0x68] sm:$0xff]  }
 0x13b   : > { %v2116_v2 = vor.u32 %v2115_v13, %v2114_v1  ;;  %v2119_v10 = vrot.slane %v11663_v22, 4  ;;  %11665 = vst [vmem:[#allocation77_spill] sm:$0xff] %v10163_v15  ;;  %v10169_v1 = vld [vmem:[#allocation2 + $0x60] sm:$0xff]   ;;  %v10175_v22 = vsel %vm4620_vm5, %v4628_v3, %v4630_v37  ;;  %v11671_v53 = vshll.u32 %v9861_v12, 16  ;;  %7421 = vmatmul.mubr.bf16.gmra.mrb[32].mxu0 %v9588_v52  ;;  %v10202_v52 = vld [vmem:[#allocation2 + $0x78] sm:$0xff]  }
 0x13c   : > { %v10160_v20 = vsel %vm2053_vm3, %v2108_v41, %v2112_v5  ;;  %v2122_v49 = vrot.slane %v11666_v34, 3  ;;  %v2123_v58 = vrot.slane %v11667_v42, 4  ;;  %11669 = vst [vmem:[#allocation79_spill] sm:$0xff] %v10175_v22  ;;  %v4632_v41 = vrot.slane %v10134_v32, 1  ;;  %7424 = vmatprep.mubr.msk.bf16.mxu0 %vm8620_vm0, %v11541_v17 }
 0x13d   : > { %11664 = vst [vmem:[#allocation76_spill] sm:$0xff] %v10160_v20  ;;  %v10172_v39 = vsel %vm2053_vm3, %v2112_v5, %v2116_v2  ;;  %v2120_v13 = vor.u32 %v2119_v10, %v2118_v27  ;;  %v11670_v34 = vshrl.u32 %v9861_v12, 16  ;;  %v2127_v42 = vrot.slane %v11671_v53, 4  ;;  %v10188_v10 = vld [vmem:[#allocation2 + $0x70] sm:$0xff]  }
 0x13e   : > { %11668 = vst [vmem:[#allocation78_spill] sm:$0xff] %v10172_v39  ;;  %6961 = vmatmul.mubr.bf16.gmra.mrb[72].mxu1 %v1300_v63  ;;  %v2124_v15 = vor.u32 %v2123_v58, %v2122_v49  ;;  %v4634_v28 = vrot.slane %v10143_v51, 1  ;;  %v10194_v5 = vsel %vm4620_vm5, %v4630_v37, %v4632_v41  ;;  %v11674_v58 = vshrl.u32 %v9880_v56, 16 }
 0x13f   : > { %v2126_v20 = vrot.slane %v11670_v34, 3  ;;  %6964 = vmatprep.mubr.msk.bf16.mxu1 %vm8620_vm0, %v11541_v17  ;;  %v10191_v63 = vsel %vm2053_vm3, %v2116_v2, %v2120_v13  ;;  %11673 = vst [vmem:[#allocation81_spill] sm:$0xff] %v10194_v5  ;;  %v11675_v12 = vshll.u32 %v9880_v56, 16  ;;  %v4636_v37 = vrot.slane %v10157_v18, 1 }
 0x140   : > { %11672 = vst [vmem:[#allocation80_spill] sm:$0xff] %v10191_v63  ;;  %v2130_v3 = vrot.slane %v11674_v58, 3  ;;  %v10205_v49 = vsel %vm2053_vm3, %v2120_v13, %v2124_v15  ;;  %v10208_v2 = vsel %vm4620_vm5, %v4632_v41, %v4634_v28  ;;  %v11678_v58 = vshrl.u32 %v9901_v36, 16 }
 0x141   : > { %v2131_v27 = vrot.slane %v11675_v12, 4  ;;  %11676 = vst [vmem:[#allocation82_spill] sm:$0xff] %v10205_v49  ;;  %v2128_v34 = vor.u32 %v2127_v42, %v2126_v20  ;;  %11677 = vst [vmem:[#allocation83_spill] sm:$0xff] %v10208_v2  ;;  %v11679_v56 = vshll.u32 %v9901_v36, 16  ;;  %v4638_v22 = vrot.slane %v10169_v1, 1  ;;  %v10221_v20 = vld [vmem:[#allocation2 + $0x80] sm:$0xff]  }
 0x142   : > { %v2134_v5 = vrot.slane %v11678_v58, 3  ;;  %v11680_v63 = vshrl.u32 %v9998_v30, 16  ;;  %v10227_v42 = vsel %vm4620_vm5, %v4634_v28, %v4636_v37  ;;  %v2485_v58 = vld [vmem:[#allocation2 + $0x7c] sm:$0xf]  ;;  %v11687_v28 = vrot.slane %v9901_v36, 3 }
 0x143   : > { %v2132_v53 = vor.u32 %v2131_v27, %v2130_v3  ;;  %v2135_v12 = vrot.slane %v11679_v56, 4  ;;  %v10224_v41 = vsel %vm2053_vm3, %v2124_v15, %v2128_v34  ;;  %11682 = vst [vmem:[#allocation85_spill] sm:$0xff] %v10227_v42  ;;  %v4640_v3 = vrot.slane %v10178_v33, 1  ;;  %v2484_v27 = vld [vmem:[#allocation2 + $0x78] sm:$0xf]  ;;  %v10230_v56 = vld [vmem:[#allocation2 + $0x88] sm:$0xff]  }
 0x144   : > { %v10219_v13 = vor.u32 %v11680_v63, %v10053_v47  ;;  %11681 = vst [vmem:[#allocation84_spill] sm:$0xff] %v10224_v41  ;;  %v10238_v47 = vsel %vm4620_vm5, %v4636_v37, %v4638_v22  ;;  %v4642_v15 = vrot.slane %v10188_v10, 1  ;;  %v11686_v63 = vrot.slane %v9916_v48, 3 }
 0x145   : > { %v10233_v2 = vsel %vm2053_vm3, %v2128_v34, %v2132_v53  ;;  %v10235_v30 = vor.u32 %v2135_v12, %v2134_v5  ;;  %11685 = vst [vmem:[#allocation88_spill] sm:$0xff] %v10238_v47  ;;  %v11688_v41 = vshll.u32 %v10056_v26, 16  ;;  %v10251_v34 = vsel %vm4620_vm5, %v4638_v22, %v4640_v3  ;;  %v10254_v12 = vld [vmem:[#allocation2 + $0x90] sm:$0xff]  }
 0x146   : > { %11683 = vst [vmem:[#allocation86_spill] sm:$0xff] %v10233_v2  ;;  %v1302_v42 = vsel %vm1261_vm1, %v11687_v28, %v11686_v63  ;;  %11689 = vst [vmem:[#allocation89_spill] sm:$0xff] %v10251_v34  ;;  %v4644_v5 = vrot.slane %v10202_v52, 1  ;;  %v10261_v47 = vsel %vm4620_vm5, %v4640_v3, %v4642_v15  ;;  %v11692_v36 = vshrl.u32 %v9231_v60, 16  ;;  %v10277_v3 = vld [vmem:[#allocation2 + $0x98] sm:$0xff]  }
 0x147   : > { %11684 = vst [vmem:[#allocation87_spill] sm:$0xff] %v10235_v30  ;;  %v10248_v49 = vrot.slane %v11688_v41, 1  ;;  %v10258_v37 = vsel %vm2053_vm3, %v2132_v53, %v10235_v30  ;;  %11691 = vst [vmem:[#allocation91_spill] sm:$0xff] %v10261_v47  ;;  %v11693_v41 = vshll.u32 %v9231_v60, 16  ;;  %6965 = vmatmul.mubr.bf16.gmra.mrb[76].mxu1 %v1302_v42  ;;  %v10267_v22 = vcombine.low %v2484_v27, %v2485_v58  ;;  %v11695_v30 = vld [vmem:[#allocation39_spill] sm:$0xff] }
 0x148   : > { %11690 = vst [vmem:[#allocation90_spill] sm:$0xff] %v10258_v37  ;;  %v2640_v63 = vrot.slane %v11692_v36, 3  ;;  %v10271_v2 = vsel %vm4620_vm5, %v4642_v15, %v4644_v5  ;;  %v4646_v53 = vrot.slane %v10221_v20, 1  ;;  %7425 = vmatmul.mubr.bf16.gmra.mrb[36].mxu0 %v11695_v30  ;;  %6968 = vmatprep.mubr.msk.bf16.mxu1 %vm8620_vm0, %v11541_v17  ;;  %v11696_v60 = vshrl.u32 %v9264_v46, 16  ;;  %v10287_v30 = vld [vmem:[#allocation2 + $0xa0] sm:$0xff]  }
 0x149   : > { %v2643_v28 = vrot.slane %v11693_v41, 4  ;;  %11694 = vst [vmem:[#allocation92_spill] sm:$0xff] %v10271_v2  ;;  %v11697_v27 = vshll.u32 %v9264_v46, 16  ;;  %v4648_v41 = vrot.slane %v10230_v56, 1  ;;  %7428 = vmatprep.mubr.msk.bf16.mxu0 %vm8620_vm0, %v11541_v17  ;;  %v10296_v46 = vld [vmem:[#allocation2 + $0xa8] sm:$0xff]   ;;  %v4650_v39 = vrot.slane %v10254_v12, 1 }
 0x14a   : > { %v2649_v42 = vrot.slane %v11696_v60, 3  ;;  %v10290_v34 = vsel %vm4620_vm5, %v4644_v5, %v4646_v53  ;;  %v11700_v60 = vshll.u32 %v9300_v6, 16  ;;  %v11704_v5 = vshrl.u32 %v10069_v54, 16 }
 0x14b   : > { %v2644_v36 = vor.u32 %v2643_v28, %v2640_v63  ;;  %v2652_v58 = vrot.slane %v11697_v27, 4  ;;  %11698 = vst [vmem:[#allocation39_spill] sm:$0xff] %v10290_v34  ;;  %v11699_v63 = vshrl.u32 %v9300_v6, 16  ;;  %v11701_v27 = vld [vmem:[#allocation22_spill] sm:$0xff]  ;;  %v10303_v15 = vsel %vm4620_vm5, %v4646_v53, %v4648_v41 }
 0x14c   : > { %v2661_v2 = vrot.slane %v11700_v60, 4  ;;  %11703 = vst [vmem:[#allocation93_spill] sm:$0xff] %v10303_v15  ;;  %v5001_v34 = vrot.slane %v11704_v5, 1  ;;  %v11706_v60 = vshll.u32 %v9339_v40, 16  ;;  %v10318_v53 = vsel %vm4620_vm5, %v4648_v41, %v4650_v39 }
 0x14d   : > { %v2658_v28 = vrot.slane %v11699_v63, 3  ;;  %v10300_v47 = vsel %vm2053_vm3, %v11701_v27, %v2644_v36  ;;  %v2653_v37 = vor.u32 %v2652_v58, %v2649_v42  ;;  %v11705_v63 = vshrl.u32 %v9339_v40, 16  ;;  %11708 = vst [vmem:[#allocation95_spill] sm:$0xff] %v10318_v53 }
 0x14e   : > { %11702 = vst [vmem:[#allocation22_spill] sm:$0xff] %v10300_v47  ;;  %v2670_v14 = vrot.slane %v11706_v60, 4  ;;  %v4652_v42 = vrot.slane %v10277_v3, 1  ;;  %v11709_v58 = vshrl.u32 %v9385_v57, 16  ;;  %v11711_v41 = vshrl.u32 %v9419_v16, 16 }
 0x14f   : > { %v2662_v9 = vor.u32 %v2661_v2, %v2658_v28  ;;  %v2667_v6 = vrot.slane %v11705_v63, 3  ;;  %v10315_v27 = vsel %vm2053_vm3, %v2644_v36, %v2653_v37  ;;  %v10323_v2 = vld [vmem:[#allocation2 + $0xb8] ss:$0 sps:$4 sm:$0x77]   ;;  %v11710_v63 = vshll.u32 %v9385_v57, 16 }
 0x150   : > { %11707 = vst [vmem:[#allocation94_spill] sm:$0xff] %v10315_v27  ;;  %v2676_v5 = vrot.slane %v11709_v58, 3  ;;  %v4654_v36 = vrot.slane %v10287_v30, 1  ;;  %v10332_v15 = vsel %vm4620_vm5, %v4650_v39, %v4652_v42  ;;  %v2685_v53 = vrot.slane %v11711_v41, 3  ;;  %7429 = vmatmul.mubr.bf16.gmra.mrb[40].mxu0 %v10082_v0 }
 0x151   : > { %v10326_v28 = vsel %vm2053_vm3, %v2653_v37, %v2662_v9  ;;  %v2671_v40 = vor.u32 %v2670_v14, %v2667_v6  ;;  %v2679_v60 = vrot.slane %v11710_v63, 4  ;;  %v11712_v27 = vshll.u32 %v9419_v16, 16  ;;  %7432 = vmatprep.mubr.msk.bf16.mxu0 %vm8620_vm0, %v11541_v17 }
 0x152   : > { %v4656_v47 = vrot.slane %v10296_v46, 1  ;;  %v11713_v37 = vrot.slane %v9916_v48, 3  ;;  %v10345_v6 = vsel %vm4620_vm5, %v4652_v42, %v4654_v36  ;;  %v11715_v39 = vshrl.u32 %v9452_v35, 16 }
 0x153   : > { %v2688_v58 = vrot.slane %v11712_v27, 4  ;;  %v10342_v14 = vsel %vm2053_vm3, %v2662_v9, %v2671_v40  ;;  %v2680_v57 = vor.u32 %v2679_v60, %v2676_v5  ;;  %11714 = vst [vmem:[#allocation96_spill] sm:$0xff] %v10345_v6  ;;  %v11717_v48 = vshll.u32 %v9452_v35, 16  ;;  %v2487_v6 = vld [vmem:[#allocation2 + $0x84] sm:$0xf] }
 0x154   : > { %6969 = vmatmul.mubr.bf16.gmra.mrb[80].mxu1 %v11713_v37  ;;  %v2694_v63 = vrot.slane %v11715_v39, 3  ;;  %v10353_v27 = vsel %vm4620_vm5, %v4654_v36, %v4656_v47  ;;  %v4658_v5 = vrot.slane %v10312_v4, 1  ;;  %v11718_v0 = vshrl.u32 %v9486_v8, 16 }
 0x155   : > { %6988 = vmatprep.mubr.msk.bf16.mxu1 %vm8620_vm0, %v11541_v17  ;;  %v2689_v16 = vor.u32 %v2688_v58, %v2685_v53  ;;  %11716 = vst [vmem:[#allocation97_spill] sm:$0xff] %v10353_v27  ;;  %v2697_v9 = vrot.slane %v11717_v48, 4  ;;  %v10361_v42 = vsel %vm2053_vm3, %v2671_v40, %v2680_v57  ;;  %v11719_v41 = vshll.u32 %v9486_v8, 16 }
 0x156   : > { %v2703_v60 = vrot.slane %v11718_v0, 3  ;;  %v11493_v36 = vrot.slane %v10323_v2, 1  ;;  %v10372_v37 = vsel %vm4620_vm5, %v4656_v47, %v4658_v5  ;;  %v11722_v39 = vshrl.u32 %v9522_v7, 16  ;;  %v8515_v47 = vld [vmem:[%s11402_s3 + $0x80] sm:$0xff]  }
 0x157   : > { %v2706_v53 = vrot.slane %v11719_v41, 4  ;;  %v10369_v58 = vsel %vm2053_vm3, %v2680_v57, %v2689_v16  ;;  %v2698_v35 = vor.u32 %v2697_v9, %v2694_v63  ;;  %11721 = vst [vmem:[#allocation99_spill] sm:$0xff] %v10372_v37  ;;  %v11724_v8 = vshll.u32 %v9522_v7, 16 }
 0x158   : > { %11720 = vst [vmem:[#allocation98_spill] sm:$0xff] %v10369_v58  ;;  %v2712_v48 = vrot.slane %v11722_v39, 3  ;;  %v10379_v0 = vsel %vm4620_vm5, %v4658_v5, %v11493_v36  ;;  %v11725_v27 = vshrl.u32 %v9562_v61, 16  ;;  %v3585_v63 = vsel %vm3485_vm2, %v10219_v13, %v10248_v49  ;;  %v11729_v13 = vld [vmem:[#allocation38_spill] sm:$0xff] }
 0x159   : > { %v2707_v40 = vor.u32 %v2706_v53, %v2703_v60  ;;  %11723 = vst [vmem:[#allocation100_spill] sm:$0xff] %v10379_v0  ;;  %v2715_v41 = vrot.slane %v11724_v8, 4  ;;  %v10392_v9 = vsel %vm2053_vm3, %v2689_v16, %v2698_v35  ;;  %v11727_v5 = vshll.u32 %v9562_v61, 16  ;;  %7433 = vmatmul.mubr.bf16.gmra.mrb[44].mxu0 %v3585_v63 }
 0x15a   : > { %v2721_v57 = vrot.slane %v11725_v27, 3  ;;  %11726 = vst [vmem:[#allocation101_spill] sm:$0xff] %v10392_v9  ;;  %v4994_v7 = vshrl.u32 %v9994_v29, 16  ;;  %v4997_v39 = vshll.u32 %v9994_v29, 16  ;;  %v11728_v8 = vshll.u32 %v10069_v54, 16  ;;  %v11730_v9 = vld [vmem:[#allocation44_spill] sm:$0xff]  ;;  %7436 = vmatprep.mubr.msk.bf16.mxu0 %vm8620_vm0, %v11541_v17 }
 0x15b   : > { %v2724_v60 = vrot.slane %v11727_v5, 4  ;;  %v10398_v53 = vsel %vm2053_vm3, %v2698_v35, %v2707_v40  ;;  %v2716_v27 = vor.u32 %v2715_v41, %v2712_v48  ;;  %v2728_v58 = vshrl.u32 %v11729_v13, 16  ;;  %v2486_v5 = vld [vmem:[#allocation2 + $0x80] sm:$0xf]  ;;  %v8520_v41 = vld [vmem:[%s11402_s3 + $0x88] sm:$0xff]  }
 0x15c   : > { %v5002_v36 = vrot.slane %v11728_v8, 2  ;;  %v4996_v37 = vrot.slane %v4994_v7, 1  ;;  %v2731_v16 = vshll.u32 %v11729_v13, 16  ;;  %6989 = vmatmul.mubr.bf16.vlgmr.msra.gmra.mrb[0].mxu1 %v11730_v9  ;;  %v3590_v61 = vshll.u32 %v10267_v22, 16  ;;  %v2489_v8 = vld [vmem:[#allocation2 + $0x8c] sm:$0xf] }
 0x15d   : > { %v2725_v0 = vor.u32 %v2724_v60, %v2721_v57  ;;  %v10408_v35 = vsel %vm2053_vm3, %v2707_v40, %v2716_v27  ;;  %v4999_v48 = vrot.slane %v4997_v39, 2  ;;  %7073 = vmatpush3.bf16.msra.mxu1 %v8515_v47  ;;  %v2730_v9 = vrot.slane %v2728_v58, 3  ;;  %6992 = vmatprep.mubr.msk.bf16.mxu1 %vm8620_vm0, %v11541_v17 }
 0x15e   : > { %v10410_v29 = vor.u32 %v5002_v36, %v5001_v34  ;;  %v2733_v60 = vrot.slane %v2731_v16, 4  ;;  %7074 = vmatprep.subr.bf16.mxu1 %v11541_v17  ;;  %v3586_v40 = vshrl.u32 %v10056_v26, 16  ;;  %v3592_v47 = vrot.slane %v3590_v61, 1 }
 0x15f   : > { %v10416_v57 = vsel %vm2053_vm3, %v2716_v27, %v2725_v0  ;;  %v5000_v34 = vor.u32 %v4999_v48, %v4996_v37  ;;  %v10426_v63 = vcombine.low %v2486_v5, %v2487_v6  ;;  %v8525_v27 = vld [vmem:[%s11402_s3 + $0x90] sm:$0xff]   ;;  %v8534_v5 = vld [vmem:[%s11402_s3 + $0xa0] sm:$0xff]  }
 0x160   : > { %v10423_v36 = vor.u32 %v2733_v60, %v2730_v9  ;;  %v3588_v37 = vor.u32 %v3586_v40, %v10248_v49  ;;  %v8529_v49 = vld [vmem:[%s11402_s3 + $0x98] sm:$0xff]   ;;  %v10467_v9 = vld [vmem:[#allocation2 + $0x90] sm:$0xf]  ;;  %v2491_v60 = vld [vmem:[#allocation2 + $0x94] sm:$0xf] }
 0x161   : > { %v10430_v58 = vsel %vm4992_vm6, %v5000_v34, %v10410_v29  ;;  %7075 = vmatpush3.bf16.msra.mxu1 %v8520_v41  ;;  %v3598_v39 = vshll.u32 %v10426_v63, 16  ;;  %v8539_v34 = vld [vmem:[%s11402_s3 + $0xa8] sm:$0xff]  }
 0x162   : > { %v10434_v7 = vsel %vm2053_vm3, %v2725_v0, %v10423_v36  ;;  %7076 = vmatprep.subr.bf16.mxu1 %v11541_v17  ;;  %v3593_v6 = vsel %vm3485_vm2, %v3588_v37, %v3592_v47  ;;  %v10446_v0 = vld [vmem:[#allocation2 + $0x88] sm:$0xf] }
 0x163   : > { %7437 = vmatmul.mubr.bf16.gmra.mrb[48].mxu0 %v3593_v6  ;;  %v3600_v13 = vrot.slane %v3598_v39, 1  ;;  %v10456_v16 = vcombine.low %v10446_v0, %v2489_v8  ;;  %v10488_v8 = vld [vmem:[#allocation2 + $0x98] sm:$0xf] }
 0x164   : > { %6993 = vmatmul.mubr.bf16.gmra.mrb[4].mxu1 %v9685_v11  ;;  %7440 = vmatprep.mubr.msk.bf16.mxu0 %vm8620_vm0, %v11541_v17  ;;  %v3594_v11 = vshrl.u32 %v10267_v22, 16 }
 0x165   : > { %6996 = vmatprep.mubr.msk.bf16.mxu1 %vm8620_vm0, %v11541_v17  ;;  %7077 = vmatpush3.bf16.msra.mxu1 %v8525_v27  ;;  %v3606_v41 = vshll.u32 %v10456_v16, 16  ;;  %v8543_v27 = vld [vmem:[%s11402_s3 + $0xb0] sm:$0xff]  }
 0x166   : > { %7078 = vmatprep.subr.bf16.mxu1 %v11541_v17  ;;  %v3596_v61 = vor.u32 %v3594_v11, %v3592_v47  ;;  %v10477_v47 = vcombine.low %v10467_v9, %v2491_v60  ;;  %v3610_v11 = vshrl.u32 %v10456_v16, 16  ;;  %v10509_v60 = vld [vmem:[#allocation2 + $0xa0] sm:$0xf] }
 0x167   : > { %v3608_v40 = vrot.slane %v3606_v41, 1 }
 0x168   : > { %v3601_v48 = vsel %vm3485_vm2, %v3596_v61, %v3600_v13  ;;  %11731 = vst [vmem:[#allocation38_spill] sm:$0xff] %v10477_v47  ;;  %v3614_v39 = vshll.u32 %v10477_v47, 16 }
 0x169   : > { %7079 = vmatpush3.bf16.msra.mxu1 %v8529_v49  ;;  %v10490_v49 = vld [vmem:[#allocation2 + $0x9c] sm:$0xf] }
 0x16a   : > { %7080 = vmatprep.subr.bf16.mxu1 %v11541_v17  ;;  %v10501_v61 = vcombine.low %v10488_v8, %v10490_v49 }
 0x16b   : > { %7441 = vmatmul.mubr.bf16.gmra.mrb[52].mxu0 %v3601_v48 }
 0x16c   : > { %6997 = vmatmul.mubr.bf16.gmra.mrb[8].mxu1 %v9705_v45  ;;  %7444 = vmatprep.mubr.msk.bf16.mxu0 %vm8620_vm0, %v11541_v17  ;;  %v3602_v45 = vshrl.u32 %v10426_v63, 16  ;;  %11732 = vst [vmem:[#allocation44_spill] sm:$0xff] %v10501_v61  ;;  %v3622_v41 = vshll.u32 %v10501_v61, 16 }
 0x16d   : > { %7000 = vmatprep.mubr.msk.bf16.mxu1 %vm8620_vm0, %v11541_v17  ;;  %7081 = vmatpush3.bf16.msra.mxu1 %v8534_v5  ;;  %v3612_v5 = vor.u32 %v3610_v11, %v3608_v40  ;;  %v3626_v11 = vshrl.u32 %v10501_v61, 16 }
 0x16e   : > { %7082 = vmatprep.subr.bf16.mxu1 %v11541_v17  ;;  %v3604_v37 = vor.u32 %v3602_v45, %v3600_v13  ;;  %v3616_v13 = vrot.slane %v3614_v39, 1  ;;  %v3618_v45 = vshrl.u32 %v10477_v47, 16  ;;  %v10525_v39 = vld [vmem:[#allocation2 + $0xa8] sm:$0xf] }
 0x16f   : > { %v11736_v47 = vld [vmem:[#allocation51_spill] sm:$0xff] }
 0x170   : > { %v3609_v6 = vsel %vm3485_vm2, %v3604_v37, %v3608_v40  ;;  %v3617_v48 = vsel %vm3485_vm2, %v3612_v5, %v3616_v13  ;;  %v3624_v40 = vrot.slane %v3622_v41, 1  ;;  %v3620_v37 = vor.u32 %v3618_v45, %v3616_v13 }
 0x171   : > { %7083 = vmatpush3.bf16.msra.mxu1 %v8539_v34  ;;  %v10511_v34 = vld [vmem:[#allocation2 + $0xa4] sm:$0xf] }
 0x172   : > { %7084 = vmatprep.subr.bf16.mxu1 %v11541_v17  ;;  %v3628_v5 = vor.u32 %v3626_v11, %v3624_v40 }
 0x173   : > { %7445 = vmatmul.mubr.bf16.gmra.mrb[56].mxu0 %v3609_v6 }
 0x174   : > { %7001 = vmatmul.mubr.bf16.gmra.mrb[12].mxu1 %v9726_v43  ;;  %7448 = vmatprep.mubr.msk.bf16.mxu0 %vm8620_vm0, %v11541_v17  ;;  %v8548_v43 = vld [vmem:[%s11402_s3 + $0xb8] sm:$0xff]  }
 0x175   : > { %7004 = vmatprep.mubr.msk.bf16.mxu1 %vm8620_vm0, %v11541_v17  ;;  %7085 = vmatpush3.bf16.msra.mxu1 %v8543_v27  ;;  %v3625_v27 = vsel %vm3485_vm2, %v3620_v37, %v3624_v40 }
 0x176   : > { %7086 = vmatprep.subr.bf16.mxu1 %v11541_v17 }
 0x179   : > { %7087 = vmatpush3.bf16.msra.mxu1 %v8548_v43  ;;  %v10527_v43 = vld [vmem:[#allocation2 + $0xac] sm:$0xf] }
 0x17a   : > { %7172 = vmatprep.subr.bf16.mxu1 %v11541_v17 }
 0x17b   : > { %7449 = vmatmul.mubr.bf16.gmra.mrb[60].mxu0 %v3617_v48  ;;  %v11735_v48 = vld [vmem:[#allocation50_spill] sm:$0xff] }
 0x17c   : > { %7005 = vmatmul.mubr.bf16.gmra.mrb[16].mxu1 %v9736_v38  ;;  %7452 = vmatprep.mubr.msk.bf16.mxu0 %vm8620_vm0, %v11541_v17  ;;  %v10518_v38 = vcombine.low %v10509_v60, %v10511_v34 }
 0x17d   : > { %7008 = vmatprep.mubr.msk.bf16.mxu1 %vm8620_vm0, %v11541_v17 }
 0x17e   : > { %11733 = vst [vmem:[#allocation102_spill] sm:$0xff] %v10518_v38  ;;  %v3630_v6 = vshll.u32 %v10518_v38, 16  ;;  %v3634_v37 = vshrl.u32 %v10518_v38, 16  ;;  %v3963_v38 = vld [vmem:[#allocation2 + $0x18] sm:$0xf] }
 0x180   : > { %v3632_v13 = vrot.slane %v3630_v6, 1  ;;  %v8530_v6 = vld [vmem:[#allocation2 + $0xb0] ss:$0 sps:$4 sm:$0x77]  }
 0x181   : > { %v3646_v11 = vshll.u32 %v8530_v6, 16 }
 0x182   : > { %v3633_v41 = vsel %vm3485_vm2, %v3628_v5, %v3632_v13  ;;  %v3636_v61 = vor.u32 %v3634_v37, %v3632_v13  ;;  %v3650_v37 = vshrl.u32 %v8530_v6, 16  ;;  %v8533_v6 = vld [vmem:[%s11402_s3 + $0x1c0] sm:$0xff]  }
 0x183   : > { %7453 = vmatmul.mubr.bf16.gmra.mrb[64].mxu0 %v3625_v27 }
 0x184   : > { %7009 = vmatmul.mubr.bf16.gmra.mrb[20].mxu1 %v9751_v55  ;;  %7456 = vmatprep.mubr.msk.bf16.mxu0 %vm8620_vm0, %v11541_v17  ;;  %v10534_v55 = vcombine.low %v10525_v39, %v10527_v43 }
 0x185   : > { %7012 = vmatprep.mubr.msk.bf16.mxu1 %vm8620_vm0, %v11541_v17 }
 0x186   : > { %11734 = vst [vmem:[#allocation103_spill] sm:$0xff] %v10534_v55  ;;  %v3638_v45 = vshll.u32 %v10534_v55, 16  ;;  %v3642_v5 = vshrl.u32 %v10534_v55, 16  ;;  %v11738_v55 = vld [vmem:[#allocation53_spill] sm:$0xff] }
 0x188   : > { %v3640_v27 = vrot.slane %v3638_v45, 1  ;;  %v11737_v45 = vld [vmem:[#allocation52_spill] sm:$0xff] }
 0x18a   : > { %v3641_v40 = vsel %vm3485_vm2, %v3636_v61, %v3640_v27 }
 0x18b   : > { %7457 = vmatmul.mubr.bf16.gmra.mrb[68].mxu0 %v3633_v41  ;;  %v3648_v41 = vrot.slane %v3646_v11, 1  ;;  %v11739_v11 = vshll.u32 %v10069_v54, 16 }
 0x18c   : > { %7013 = vmatmul.mubr.bf16.gmra.mrb[24].mxu1 %v11735_v48  ;;  %7460 = vmatprep.mubr.msk.bf16.mxu0 %vm8620_vm0, %v11541_v17  ;;  %v3644_v48 = vor.u32 %v3642_v5, %v3640_v27 }
 0x18d   : > { %7016 = vmatprep.mubr.msk.bf16.mxu1 %vm8620_vm0, %v11541_v17  ;;  %v4133_v5 = vrot.slane %v11739_v11, 1 }
 0x18e   : > { %v3649_v13 = vsel %vm3485_vm2, %v3644_v48, %v3648_v41  ;;  %v11740_v48 = vld [vmem:[#allocation54_spill] sm:$0xff] }
 0x193   : > { %7461 = vmatmul.mubr.bf16.gmra.mrb[72].mxu0 %v3641_v40  ;;  %v3652_v40 = vor.u32 %v3650_v37, %v3648_v41  ;;  %v4139_v41 = vshll.u32 %v10084_v23, 16  ;;  %v8542_v37 = vld [vmem:[%s11402_s3 + $0x1d0] sm:$0xff]  }
 0x194   : > { %7017 = vmatmul.mubr.bf16.gmra.mrb[28].mxu1 %v11736_v47  ;;  %7464 = vmatprep.mubr.msk.bf16.mxu0 %vm8620_vm0, %v11541_v17  ;;  %v6049_v47 = vcombine.low %v3963_v38, %v9974_v44 }
 0x195   : > { %7020 = vmatprep.mubr.msk.bf16.mxu1 %vm8620_vm0, %v11541_v17 }
 0x196   : > { %v4126_v61 = vshll.u32 %v6049_v47, 16  ;;  %v4124_v44 = vshrl.u32 %v6049_v47, 16  ;;  %v11741_v47 = vshrl.u32 %v10069_v54, 16  ;;  %v8546_v54 = vld [vmem:[%s11402_s3 + $0x1d8] sm:$0xff]  }
 0x198   : > { %v4128_v27 = vrot.slane %v4126_v61, 1  ;;  %v4137_v61 = vor.u32 %v11741_v47, %v4133_v5  ;;  %v4151_v47 = vshrl.u32 %v10093_v24, 16 }
 0x19a   : > { %v4129_v38 = vor.u32 %v4128_v27, %v4124_v44  ;;  %v4147_v44 = vshll.u32 %v10093_v24, 16 }
 0x19b   : > { %7465 = vmatmul.mubr.bf16.gmra.mrb[76].mxu0 %v3649_v13  ;;  %v4141_v13 = vrot.slane %v4139_v41, 1 }
 0x19c   : > { %7021 = vmatmul.mubr.bf16.gmra.mrb[32].mxu1 %v11737_v45  ;;  %7468 = vmatprep.mubr.msk.bf16.mxu0 %vm8620_vm0, %v11541_v17  ;;  %v8537_v45 = vld [vmem:[%s11402_s3 + $0x1c8] sm:$0xff]   ;;  %v4149_v11 = vrot.slane %v4147_v44, 1 }
 0x19d   : > { %7024 = vmatprep.mubr.msk.bf16.mxu1 %vm8620_vm0, %v11541_v17  ;;  %v4142_v27 = vsel %vm3485_vm2, %v4137_v61, %v4141_v13 }
 0x1a3   : > { %7469 = vmatmul.mubr.bf16.gmra.mrb[80].mxu0 %v3652_v40  ;;  %v11742_v40 = vld [vmem:[#allocation55_spill] sm:$0xff] }
 0x1a4   : > { %7025 = vmatmul.mubr.bf16.gmra.mrb[36].mxu1 %v11738_v55  ;;  %7488 = vmatprep.mubr.msk.bf16.mxu0 %vm8620_vm0, %v11541_v17  ;;  %v4134_v55 = vsel %vm3485_vm2, %v4129_v38, %v4133_v5  ;;  %v4143_v38 = vshrl.u32 %v10084_v23, 16 }
 0x1a5   : > { %7028 = vmatprep.mubr.msk.bf16.mxu1 %vm8620_vm0, %v11541_v17 }
 0x1a6   : > { %v4145_v5 = vor.u32 %v4143_v38, %v4141_v13  ;;  %v8556_v13 = vld [vmem:[%s11402_s3 + $0x1e8] sm:$0xff]  }
 0x1ab   : > { %7489 = vmatmul.mubr.bf16.vlgmr.msra.gmra.mrb[0].mxu0 %v4134_v55  ;;  %v4150_v55 = vsel %vm3485_vm2, %v4145_v5, %v4149_v11  ;;  %v11506_v5 = vshll.u32 %v10113_v62, 16 }
 0x1ac   : > { %7029 = vmatmul.mubr.bf16.gmra.mrb[40].mxu1 %v11740_v48  ;;  %7573 = vmatpush3.bf16.msra.mxu0 %v8533_v6  ;;  %v8551_v6 = vld [vmem:[%s11402_s3 + $0x1e0] sm:$0xff]   ;;  %v11743_v48 = vld [vmem:[#allocation56_spill] sm:$0xff] }
 0x1ad   : > { %7032 = vmatprep.mubr.msk.bf16.mxu1 %vm8620_vm0, %v11541_v17  ;;  %7492 = vmatprep.mubr.msk.bf16.mxu0 %vm8620_vm0, %v11541_v17 }
 0x1ae   : > { %7574 = vmatprep.subr.bf16.mxu0 %v11541_v17 }
 0x1b0   : > { %7575 = vmatpush3.bf16.msra.mxu0 %v8537_v45  ;;  %v11509_v45 = vshll.u32 %v10106_v19, 16 }
 0x1b1   : > { %7576 = vmatprep.subr.bf16.mxu0 %v11541_v17 }
 0x1b2   : > { %v4157_v61 = vrot.slane %v11509_v45, 1  ;;  %v4219_v45 = vshll.u32 %v10202_v52, 16 }
 0x1b3   : > { %7493 = vmatmul.mubr.bf16.gmra.mrb[4].mxu0 %v4142_v27  ;;  %v11744_v27 = vld [vmem:[#allocation57_spill] sm:$0xff] }
 0x1b4   : > { %7033 = vmatmul.mubr.bf16.gmra.mrb[44].mxu1 %v11742_v40  ;;  %7496 = vmatprep.mubr.msk.bf16.mxu0 %vm8620_vm0, %v11541_v17  ;;  %v8560_v40 = vld [vmem:[%s11402_s3 + $0x1f0] sm:$0xff]  }
 0x1b5   : > { %7036 = vmatprep.mubr.msk.bf16.mxu1 %vm8620_vm0, %v11541_v17  ;;  %7577 = vmatpush3.bf16.msra.mxu0 %v8542_v37  ;;  %v4153_v37 = vor.u32 %v4151_v47, %v4149_v11  ;;  %v8565_v11 = vld [vmem:[%s11402_s3 + $0x1f8] sm:$0xff]  }
 0x1b6   : > { %7578 = vmatprep.subr.bf16.mxu0 %v11541_v17 }
 0x1b9   : > { %7579 = vmatpush3.bf16.msra.mxu0 %v8546_v54  ;;  %v4158_v54 = vsel %vm3485_vm2, %v4153_v37, %v4157_v61 }
 0x1ba   : > { %7580 = vmatprep.subr.bf16.mxu0 %v11541_v17 }
 0x1bb   : > { %7497 = vmatmul.mubr.bf16.gmra.mrb[8].mxu0 %v4150_v55 }
 0x1bc   : > { %7037 = vmatmul.mubr.bf16.gmra.mrb[48].mxu1 %v11743_v48  ;;  %7500 = vmatprep.mubr.msk.bf16.mxu0 %vm8620_vm0, %v11541_v17  ;;  %v4165_v48 = vrot.slane %v11506_v5, 1  ;;  %v4207_v5 = vshrl.u32 %v10178_v33, 16 }
 0x1bd   : > { %7040 = vmatprep.mubr.msk.bf16.mxu1 %vm8620_vm0, %v11541_v17  ;;  %7581 = vmatpush3.bf16.msra.mxu0 %v8551_v6  ;;  %v4159_v6 = vshrl.u32 %v10106_v19, 16 }
 0x1be   : > { %7582 = vmatprep.subr.bf16.mxu0 %v11541_v17 }
 0x1bf   : > { %v4161_v55 = vor.u32 %v4159_v6, %v4157_v61 }
 0x1c1   : > { %7583 = vmatpush3.bf16.msra.mxu0 %v8556_v13  ;;  %v11745_v13 = vld [vmem:[#allocation58_spill] sm:$0xff]  ;;  %v4166_v37 = vsel %vm3485_vm2, %v4161_v55, %v4165_v48  ;;  %v11498_v55 = vshll.u32 %v10143_v51, 16 }
 0x1c2   : > { %7584 = vmatprep.subr.bf16.mxu0 %v11541_v17 }
 0x1c3   : > { %7501 = vmatmul.mubr.bf16.gmra.mrb[12].mxu0 %v4158_v54 }
 0x1c4   : > { %7041 = vmatmul.mubr.bf16.gmra.mrb[52].mxu1 %v11744_v27  ;;  %7504 = vmatprep.mubr.msk.bf16.mxu0 %vm8620_vm0, %v11541_v17  ;;  %v11508_v27 = vshrl.u32 %v10113_v62, 16 }
 0x1c5   : > { %7044 = vmatprep.mubr.msk.bf16.mxu1 %vm8620_vm0, %v11541_v17  ;;  %7585 = vmatpush3.bf16.msra.mxu0 %v8560_v40  ;;  %v11499_v40 = vshll.u32 %v10134_v32, 16 }
 0x1c6   : > { %7586 = vmatprep.subr.bf16.mxu0 %v11541_v17  ;;  %v4169_v54 = vor.u32 %v11508_v27, %v4165_v48 }
 0x1c7   : > { %v4173_v61 = vrot.slane %v11499_v40, 1  ;;  %v11503_v40 = vshrl.u32 %v10157_v18, 16 }
 0x1c9   : > { %7587 = vmatpush3.bf16.msra.mxu0 %v8565_v11  ;;  %v4174_v11 = vsel %vm3485_vm2, %v4169_v54, %v4173_v61  ;;  %v11500_v54 = vshll.u32 %v10157_v18, 16 }
 0x1ca   : > { %7672 = vmatprep.subr.bf16.mxu0 %v11541_v17 }
 0x1cb   : > { %7505 = vmatmul.mubr.bf16.gmra.mrb[16].mxu0 %v4166_v37  ;;  %v4181_v37 = vrot.slane %v11498_v55, 1  ;;  %v4189_v55 = vrot.slane %v11500_v54, 1 }
 0x1cc   : > { %7045 = vmatmul.mubr.bf16.gmra.mrb[56].mxu1 %v11745_v13  ;;  %7508 = vmatprep.mubr.msk.bf16.mxu0 %vm8620_vm0, %v11541_v17  ;;  %v11504_v13 = vshrl.u32 %v10134_v32, 16 }
 0x1cd   : > { %7048 = vmatprep.mubr.msk.bf16.mxu1 %vm8620_vm0, %v11541_v17 }
 0x1ce   : > { %v4177_v48 = vor.u32 %v11504_v13, %v4173_v61 }
 0x1d3   : > { %7509 = vmatmul.mubr.bf16.gmra.mrb[20].mxu0 %v4174_v11  ;;  %v11501_v11 = vshrl.u32 %v10143_v51, 16 }
 0x1d4   : > { %7049 = vmatmul.mubr.bf16.gmra.mrb[60].mxu1 %v9914_v25  ;;  %7512 = vmatprep.mubr.msk.bf16.mxu0 %vm8620_vm0, %v11541_v17  ;;  %v4182_v25 = vsel %vm3485_vm2, %v4177_v48, %v4181_v37 }
 0x1d5   : > { %7052 = vmatprep.mubr.msk.bf16.mxu1 %vm8620_vm0, %v11541_v17  ;;  %v4185_v61 = vor.u32 %v11501_v11, %v4181_v37  ;;  %v4193_v37 = vor.u32 %v11503_v40, %v4189_v55  ;;  %v11507_v11 = vshrl.u32 %v10169_v1, 16  ;;  %v11749_v40 = vld [vmem:[#allocation11_spill] sm:$0xff] }
 0x1d6   : > { %v2055_v13 = vshrl.u32 %v11749_v40, 16 }
 0x1d7   : > { %v4190_v48 = vsel %vm3485_vm2, %v4185_v61, %v4189_v55 }
 0x1db   : > { %7513 = vmatmul.mubr.bf16.gmra.mrb[24].mxu0 %v4182_v25  ;;  %v11502_v25 = vshll.u32 %v10169_v1, 16 }
 0x1dc   : > { %7053 = vmatmul.mubr.bf16.gmra.mrb[64].mxu1 %v9929_v59  ;;  %7516 = vmatprep.mubr.msk.bf16.mxu0 %vm8620_vm0, %v11541_v17  ;;  %v11746_v59 = vld [vmem:[#allocation59_spill] sm:$0xff] }
 0x1dd   : > { %7056 = vmatprep.mubr.msk.bf16.mxu1 %vm8620_vm0, %v11541_v17  ;;  %v4197_v54 = vrot.slane %v11502_v25, 1 }
 0x1df   : > { %v4198_v61 = vsel %vm3485_vm2, %v4193_v37, %v4197_v54  ;;  %v4201_v55 = vor.u32 %v11507_v11, %v4197_v54  ;;  %v11750_v11 = vld [vmem:[#allocation61_spill] sm:$0xff] }
 0x1e3   : > { %7517 = vmatmul.mubr.bf16.gmra.mrb[28].mxu0 %v4190_v48  ;;  %v11505_v48 = vshll.u32 %v10178_v33, 16 }
 0x1e4   : > { %7057 = vmatmul.mubr.bf16.gmra.mrb[68].mxu1 %v11746_v59  ;;  %7520 = vmatprep.mubr.msk.bf16.mxu0 %vm8620_vm0, %v11541_v17  ;;  %v11747_v59 = vld [vmem:[#allocation60_spill] sm:$0xff] }
 0x1e5   : > { %7060 = vmatprep.mubr.msk.bf16.mxu1 %vm8620_vm0, %v11541_v17  ;;  %v4205_v25 = vrot.slane %v11505_v48, 1  ;;  %v2058_v48 = vshll.u32 %v11749_v40, 16 }
 0x1e7   : > { %v4206_v37 = vsel %vm3485_vm2, %v4201_v55, %v4205_v25  ;;  %v4209_v55 = vor.u32 %v4207_v5, %v4205_v25 }
 0x1eb   : > { %7521 = vmatmul.mubr.bf16.gmra.mrb[32].mxu0 %v4198_v61  ;;  %v11510_v61 = vshll.u32 %v10188_v10, 16 }
 0x1ec   : > { %7061 = vmatmul.mubr.bf16.gmra.mrb[72].mxu1 %v11747_v59  ;;  %7524 = vmatprep.mubr.msk.bf16.mxu0 %vm8620_vm0, %v11541_v17  ;;  %v11748_v59 = vld [vmem:[#allocation62_spill] sm:$0xff] }
 0x1ed   : > { %7064 = vmatprep.mubr.msk.bf16.mxu1 %vm8620_vm0, %v11541_v17  ;;  %v4213_v54 = vrot.slane %v11510_v61, 1  ;;  %v4215_v61 = vshrl.u32 %v10188_v10, 16 }
 0x1ef   : > { %v4214_v27 = vsel %vm3485_vm2, %v4209_v55, %v4213_v54  ;;  %v4217_v25 = vor.u32 %v4215_v61, %v4213_v54  ;;  %v11523_v55 = vshll.u32 %v10221_v20, 16 }
 0x1f1   : > { %v4229_v54 = vrot.slane %v11523_v55, 1  ;;  %v11775_v55 = vld [vmem:[#allocation88_spill] sm:$0xff] }
 0x1f3   : > { %7525 = vmatmul.mubr.bf16.gmra.mrb[36].mxu0 %v4206_v37  ;;  %v2060_v37 = vrot.slane %v2058_v48, 4 }
 0x1f4   : > { %7065 = vmatmul.mubr.bf16.gmra.mrb[76].mxu1 %v11748_v59  ;;  %7528 = vmatprep.mubr.msk.bf16.mxu0 %vm8620_vm0, %v11541_v17  ;;  %v2057_v59 = vrot.slane %v2055_v13, 3  ;;  %v4221_v13 = vrot.slane %v4219_v45, 1 }
 0x1f5   : > { %7068 = vmatprep.mubr.msk.bf16.mxu1 %vm8620_vm0, %v11541_v17 }
 0x1f6   : > { %v2061_v40 = vor.u32 %v2060_v37, %v2057_v59  ;;  %v4222_v48 = vsel %vm3485_vm2, %v4217_v25, %v4221_v13  ;;  %v8557_v59 = vld [vmem:[%s11402_s3 + $0xc8] sm:$0xff]   ;;  %v11511_v25 = vshll.u32 %v10230_v56, 16 }
 0x1fb   : > { %7529 = vmatmul.mubr.bf16.gmra.mrb[40].mxu0 %v4214_v27  ;;  %v2065_v27 = vsel %vm2053_vm3, %v2061_v40, %v9976_v50  ;;  %v4223_v50 = vshrl.u32 %v10202_v52, 16  ;;  %v8562_v40 = vld [vmem:[%s11402_s3 + $0xd0] sm:$0xff]  }
 0x1fc   : > { %7069 = vmatmul.mubr.bf16.gmra.mrb[80].mxu1 %v11750_v11  ;;  %7532 = vmatprep.mubr.msk.bf16.mxu0 %vm8620_vm0, %v11541_v17  ;;  %v8552_v11 = vld [vmem:[%s11402_s3 + $0xc0] sm:$0xff]  }
 0x1fd   : > { %7088 = vmatprep.mubr.msk.bf16.mxu1 %vm8620_vm0, %v11541_v17  ;;  %v4225_v37 = vor.u32 %v4223_v50, %v4221_v13  ;;  %v8566_v13 = vld [vmem:[%s11402_s3 + $0xd8] sm:$0xff]  }
 0x203   : > { %7533 = vmatmul.mubr.bf16.gmra.mrb[44].mxu0 %v4222_v48 }
 0x204   : > { %7089 = vmatmul.mubr.bf16.vlgmr.msra.gmra.mrb[0].mxu1 %v2065_v27  ;;  %7536 = vmatprep.mubr.msk.bf16.mxu0 %vm8620_vm0, %v11541_v17  ;;  %v4237_v27 = vrot.slane %v11511_v25, 1  ;;  %v11513_v25 = vshll.u32 %v10277_v3, 16 }
 0x205   : > { %7173 = vmatpush3.bf16.msra.mxu1 %v8552_v11  ;;  %7092 = vmatprep.mubr.msk.bf16.mxu1 %vm8620_vm0, %v11541_v17  ;;  %v4230_v11 = vsel %vm3485_vm2, %v4225_v37, %v4229_v54 }
 0x206   : > { %7174 = vmatprep.subr.bf16.mxu1 %v11541_v17 }
 0x209   : > { %7175 = vmatpush3.bf16.msra.mxu1 %v8557_v59  ;;  %v8570_v59 = vld [vmem:[%s11402_s3 + $0xe0] sm:$0xff]  }
 0x20a   : > { %7176 = vmatprep.subr.bf16.mxu1 %v11541_v17 }
 0x20b   : > { %7537 = vmatmul.mubr.bf16.gmra.mrb[48].mxu0 %v4230_v11 }
 0x20c   : > { %7093 = vmatmul.mubr.bf16.gmra.mrb[4].mxu1 %v9985_v31  ;;  %7540 = vmatprep.mubr.msk.bf16.mxu0 %vm8620_vm0, %v11541_v17  ;;  %v4231_v31 = vshrl.u32 %v10221_v20, 16 }
 0x20d   : > { %7096 = vmatprep.mubr.msk.bf16.mxu1 %vm8620_vm0, %v11541_v17  ;;  %7177 = vmatpush3.bf16.msra.mxu1 %v8562_v40  ;;  %v11512_v40 = vshll.u32 %v10254_v12, 16 }
 0x20e   : > { %7178 = vmatprep.subr.bf16.mxu1 %v11541_v17  ;;  %v4233_v48 = vor.u32 %v4231_v31, %v4229_v54  ;;  %v8572_v54 = vld [vmem:[%s11402_s3 + $0xe8] sm:$0xff]  }
 0x20f   : > { %v4245_v11 = vrot.slane %v11512_v40, 1  ;;  %v11515_v40 = vshll.u32 %v10287_v30, 16 }
 0x210   : > { %v4238_v37 = vsel %vm3485_vm2, %v4233_v48, %v4237_v27  ;;  %v8574_v48 = vld [vmem:[%s11402_s3 + $0xf0] sm:$0xff]  }
 0x211   : > { %7179 = vmatpush3.bf16.msra.mxu1 %v8566_v13 }
 0x212   : > { %7180 = vmatprep.subr.bf16.mxu1 %v11541_v17 }
 0x213   : > { %7541 = vmatmul.mubr.bf16.gmra.mrb[52].mxu0 %v4238_v37 }
 0x214   : > { %7097 = vmatmul.mubr.bf16.gmra.mrb[8].mxu1 %v10004_v21  ;;  %7544 = vmatprep.mubr.msk.bf16.mxu0 %vm8620_vm0, %v11541_v17  ;;  %v11519_v21 = vshrl.u32 %v10230_v56, 16 }
 0x215   : > { %7100 = vmatprep.mubr.msk.bf16.mxu1 %vm8620_vm0, %v11541_v17  ;;  %7181 = vmatpush3.bf16.msra.mxu1 %v8570_v59  ;;  %v11751_v59 = vld [vmem:[#allocation64_spill] sm:$0xff] }
 0x216   : > { %7182 = vmatprep.subr.bf16.mxu1 %v11541_v17  ;;  %v4241_v13 = vor.u32 %v11519_v21, %v4237_v27  ;;  %v8576_v27 = vld [vmem:[%s11402_s3 + $0xf8] sm:$0xff]  }
 0x218   : > { %v4246_v37 = vsel %vm3485_vm2, %v4241_v13, %v4245_v11  ;;  %v4253_v13 = vrot.slane %v11513_v25, 1  ;;  %v11516_v25 = vshrl.u32 %v10277_v3, 16 }
 0x219   : > { %7183 = vmatpush3.bf16.msra.mxu1 %v8572_v54  ;;  %v11514_v54 = vshrl.u32 %v10254_v12, 16 }
 0x21a   : > { %7184 = vmatprep.subr.bf16.mxu1 %v11541_v17 }
 0x21b   : > { %7545 = vmatmul.mubr.bf16.gmra.mrb[56].mxu0 %v4246_v37  ;;  %v11752_v37 = vld [vmem:[#allocation65_spill] sm:$0xff] }
 0x21c   : > { %7101 = vmatmul.mubr.bf16.gmra.mrb[12].mxu1 %v11751_v59  ;;  %7548 = vmatprep.mubr.msk.bf16.mxu0 %vm8620_vm0, %v11541_v17  ;;  %v4249_v59 = vor.u32 %v11514_v54, %v4245_v11  ;;  %v4261_v11 = vrot.slane %v11515_v40, 1  ;;  %v11518_v54 = vshrl.u32 %v10287_v30, 16 }
 0x21d   : > { %7104 = vmatprep.mubr.msk.bf16.mxu1 %vm8620_vm0, %v11541_v17  ;;  %7185 = vmatpush3.bf16.msra.mxu1 %v8574_v48 }
 0x21e   : > { %7186 = vmatprep.subr.bf16.mxu1 %v11541_v17  ;;  %v4254_v48 = vsel %vm3485_vm2, %v4249_v59, %v4253_v13 }
 0x221   : > { %7187 = vmatpush3.bf16.msra.mxu1 %v8576_v27  ;;  %v4257_v27 = vor.u32 %v11516_v25, %v4253_v13  ;;  %v4265_v13 = vor.u32 %v11518_v54, %v4261_v11  ;;  %v11521_v25 = vshrl.u32 %v10296_v46, 16  ;;  %v11522_v54 = vshrl.u32 %v10312_v4, 16 }
 0x222   : > { %7772 = vmatprep.subr.bf16.mxu1 %v11541_v17 }
 0x223   : > { %7549 = vmatmul.mubr.bf16.gmra.mrb[60].mxu0 %v4254_v48  ;;  %v4262_v59 = vsel %vm3485_vm2, %v4257_v27, %v4261_v11  ;;  %v11517_v48 = vshll.u32 %v10296_v46, 16 }
 0x224   : > { %7105 = vmatmul.mubr.bf16.gmra.mrb[16].mxu1 %v11752_v37  ;;  %7552 = vmatprep.mubr.msk.bf16.mxu0 %vm8620_vm0, %v11541_v17  ;;  %v11753_v37 = vld [vmem:[#allocation66_spill] sm:$0xff] }
 0x225   : > { %7108 = vmatprep.mubr.msk.bf16.mxu1 %vm8620_vm0, %v11541_v17  ;;  %v4269_v40 = vrot.slane %v11517_v48, 1 }
 0x227   : > { %v4270_v27 = vsel %vm3485_vm2, %v4265_v13, %v4269_v40  ;;  %v4273_v11 = vor.u32 %v11521_v25, %v4269_v40  ;;  %v11756_v40 = vld [vmem:[#allocation69_spill] sm:$0xff]  ;;  %v11757_v25 = vld [vmem:[#allocation70_spill] sm:$0xff] }
 0x22b   : > { %7553 = vmatmul.mubr.bf16.gmra.mrb[64].mxu0 %v4262_v59  ;;  %v11520_v59 = vshll.u32 %v10312_v4, 16 }
 0x22c   : > { %7109 = vmatmul.mubr.bf16.gmra.mrb[20].mxu1 %v11753_v37  ;;  %7556 = vmatprep.mubr.msk.bf16.mxu0 %vm8620_vm0, %v11541_v17  ;;  %v11754_v37 = vld [vmem:[#allocation67_spill] sm:$0xff] }
 0x22d   : > { %7112 = vmatprep.mubr.msk.bf16.mxu1 %vm8620_vm0, %v11541_v17  ;;  %v4277_v48 = vrot.slane %v11520_v59, 1 }
 0x22f   : > { %v4278_v13 = vsel %vm3485_vm2, %v4273_v11, %v4277_v48  ;;  %v4281_v59 = vor.u32 %v11522_v54, %v4277_v48  ;;  %v4287_v11 = vshrl.u32 %v10323_v2, 16  ;;  %v8569_v48 = vld [vmem:[%s11402_s3 + $0x200] sm:$0xff]  }
 0x230   : > { %v11774_v54 = vld [vmem:[#allocation90_spill] sm:$0xff] }
 0x233   : > { %7557 = vmatmul.mubr.bf16.gmra.mrb[68].mxu0 %v4270_v27  ;;  %v4283_v27 = vshll.u32 %v10323_v2, 16 }
 0x234   : > { %7113 = vmatmul.mubr.bf16.gmra.mrb[24].mxu1 %v11754_v37  ;;  %7560 = vmatprep.mubr.msk.bf16.mxu0 %vm8620_vm0, %v11541_v17  ;;  %v11755_v37 = vld [vmem:[#allocation68_spill] sm:$0xff] }
 0x235   : > { %7116 = vmatprep.mubr.msk.bf16.mxu1 %vm8620_vm0, %v11541_v17  ;;  %v4285_v21 = vrot.slane %v4283_v27, 1  ;;  %v11759_v27 = vld [vmem:[#allocation71_spill] sm:$0xff] }
 0x23b   : > { %7561 = vmatmul.mubr.bf16.gmra.mrb[72].mxu0 %v4278_v13  ;;  %v4289_v13 = vor.u32 %v4287_v11, %v4285_v21  ;;  %v8575_v11 = vld [vmem:[%s11402_s3 + $0x218] sm:$0xff]  }
 0x23c   : > { %7117 = vmatmul.mubr.bf16.gmra.mrb[28].mxu1 %v11755_v37  ;;  %7564 = vmatprep.mubr.msk.bf16.mxu0 %vm8620_vm0, %v11541_v17  ;;  %v4286_v37 = vsel %vm3485_vm2, %v4281_v59, %v4285_v21  ;;  %v11758_v59 = vld [vmem:[#allocation72_spill] sm:$0xff] }
 0x23d   : > { %7120 = vmatprep.mubr.msk.bf16.mxu1 %vm8620_vm0, %v11541_v17  ;;  %v8573_v21 = vld [vmem:[%s11402_s3 + $0x210] sm:$0xff]  }
 0x243   : > { %7565 = vmatmul.mubr.bf16.gmra.mrb[76].mxu0 %v4286_v37  ;;  %v11761_v37 = vld [vmem:[#allocation73_spill] sm:$0xff] }
 0x244   : > { %7121 = vmatmul.mubr.bf16.gmra.mrb[32].mxu1 %v11756_v40  ;;  %7568 = vmatprep.mubr.msk.bf16.mxu0 %vm8620_vm0, %v11541_v17  ;;  %v11760_v40 = vld [vmem:[#allocation75_spill] sm:$0xff] }
 0x245   : > { %7124 = vmatprep.mubr.msk.bf16.mxu1 %vm8620_vm0, %v11541_v17 }
 0x24b   : > { %7569 = vmatmul.mubr.bf16.gmra.mrb[80].mxu0 %v4289_v13  ;;  %v8578_v13 = vld [vmem:[%s11402_s3 + $0x220] sm:$0xff]  }
 0x24c   : > { %7125 = vmatmul.mubr.bf16.gmra.mrb[36].mxu1 %v11757_v25  ;;  %7588 = vmatprep.mubr.msk.bf16.mxu0 %vm8620_vm0, %v11541_v17  ;;  %v8571_v25 = vld [vmem:[%s11402_s3 + $0x208] sm:$0xff]  }
 0x24d   : > { %7128 = vmatprep.mubr.msk.bf16.mxu1 %vm8620_vm0, %v11541_v17 }
 0x253   : > { %7589 = vmatmul.mubr.bf16.vlgmr.msra.gmra.mrb[0].mxu0 %v11759_v27  ;;  %v8579_v27 = vld [vmem:[%s11402_s3 + $0x228] sm:$0xff]  }
 0x254   : > { %7129 = vmatmul.mubr.bf16.gmra.mrb[40].mxu1 %v11758_v59  ;;  %7673 = vmatpush3.bf16.msra.mxu0 %v8569_v48  ;;  %v11762_v48 = vld [vmem:[#allocation76_spill] sm:$0xff]  ;;  %v11763_v59 = vld [vmem:[#allocation74_spill] sm:$0xff] }
 0x255   : > { %7132 = vmatprep.mubr.msk.bf16.mxu1 %vm8620_vm0, %v11541_v17  ;;  %7592 = vmatprep.mubr.msk.bf16.mxu0 %vm8620_vm0, %v11541_v17 }
 0x256   : > { %7674 = vmatprep.subr.bf16.mxu0 %v11541_v17 }
 0x258   : > { %7675 = vmatpush3.bf16.msra.mxu0 %v8571_v25  ;;  %v8580_v25 = vld [vmem:[%s11402_s3 + $0x230] sm:$0xff]  }
 0x259   : > { %7676 = vmatprep.subr.bf16.mxu0 %v11541_v17 }
 0x25b   : > { %7593 = vmatmul.mubr.bf16.gmra.mrb[4].mxu0 %v11761_v37  ;;  %v8581_v37 = vld [vmem:[%s11402_s3 + $0x238] sm:$0xff]  }
 0x25c   : > { %7133 = vmatmul.mubr.bf16.gmra.mrb[44].mxu1 %v11760_v40  ;;  %7596 = vmatprep.mubr.msk.bf16.mxu0 %vm8620_vm0, %v11541_v17  ;;  %v11765_v40 = vld [vmem:[#allocation77_spill] sm:$0xff] }
 0x25d   : > { %7136 = vmatprep.mubr.msk.bf16.mxu1 %vm8620_vm0, %v11541_v17  ;;  %7677 = vmatpush3.bf16.msra.mxu0 %v8573_v21  ;;  %v11764_v21 = vld [vmem:[#allocation78_spill] sm:$0xff] }
 0x25e   : > { %7678 = vmatprep.subr.bf16.mxu0 %v11541_v17 }
 0x261   : > { %7679 = vmatpush3.bf16.msra.mxu0 %v8575_v11  ;;  %v11766_v11 = vld [vmem:[#allocation80_spill] sm:$0xff] }
 0x262   : > { %7680 = vmatprep.subr.bf16.mxu0 %v11541_v17 }
 0x263   : > { %7597 = vmatmul.mubr.bf16.gmra.mrb[8].mxu0 %v11763_v59  ;;  %v11769_v59 = vld [vmem:[#allocation81_spill] sm:$0xff] }
 0x264   : > { %7137 = vmatmul.mubr.bf16.gmra.mrb[48].mxu1 %v11762_v48  ;;  %7600 = vmatprep.mubr.msk.bf16.mxu0 %vm8620_vm0, %v11541_v17  ;;  %v11768_v48 = vld [vmem:[#allocation82_spill] sm:$0xff] }
 0x265   : > { %7140 = vmatprep.mubr.msk.bf16.mxu1 %vm8620_vm0, %v11541_v17  ;;  %7681 = vmatpush3.bf16.msra.mxu0 %v8578_v13  ;;  %v11767_v13 = vld [vmem:[#allocation79_spill] sm:$0xff] }
 0x266   : > { %7682 = vmatprep.subr.bf16.mxu0 %v11541_v17 }
 0x269   : > { %7683 = vmatpush3.bf16.msra.mxu0 %v8579_v27  ;;  %v11770_v27 = vld [vmem:[#allocation84_spill] sm:$0xff] }
 0x26a   : > { %7684 = vmatprep.subr.bf16.mxu0 %v11541_v17 }
 0x26b   : > { %7601 = vmatmul.mubr.bf16.gmra.mrb[12].mxu0 %v11765_v40  ;;  %v8594_v40 = vld [vmem:[#allocation2 + $0xa4] sm:$0xf] }
 0x26c   : > { %7141 = vmatmul.mubr.bf16.gmra.mrb[52].mxu1 %v11764_v21  ;;  %7604 = vmatprep.mubr.msk.bf16.mxu0 %vm8620_vm0, %v11541_v17  ;;  %v2033_v21 = vld [vmem:[#allocation2 + $0xa8] sm:$0x3] }
 0x26d   : > { %7144 = vmatprep.mubr.msk.bf16.mxu1 %vm8620_vm0, %v11541_v17  ;;  %7685 = vmatpush3.bf16.msra.mxu0 %v8580_v25  ;;  %v11771_v25 = vld [vmem:[#allocation83_spill] sm:$0xff] }
 0x26e   : > { %7686 = vmatprep.subr.bf16.mxu0 %v11541_v17 }
 0x271   : > { %7687 = vmatpush3.bf16.msra.mxu0 %v8581_v37  ;;  %v5973_v37 = vcombine.low %v8594_v40, %v2033_v21  ;;  %v11776_v40 = vld [vmem:[#allocation87_spill] sm:$0xff] }
 0x273   : > { %7605 = vmatmul.mubr.bf16.gmra.mrb[16].mxu0 %v11767_v13  ;;  %v11773_v13 = vld [vmem:[#allocation85_spill] sm:$0xff] }
 0x274   : > { %7145 = vmatmul.mubr.bf16.gmra.mrb[56].mxu1 %v11766_v11  ;;  %7608 = vmatprep.mubr.msk.bf16.mxu0 %vm8620_vm0, %v11541_v17  ;;  %v11772_v11 = vld [vmem:[#allocation86_spill] sm:$0xff] }
 0x275   : > { %7148 = vmatprep.mubr.msk.bf16.mxu1 %vm8620_vm0, %v11541_v17 }
 0x27b   : > { %7609 = vmatmul.mubr.bf16.gmra.mrb[20].mxu0 %v11769_v59  ;;  %v2142_v59 = vshll.u32 %v5973_v37, 16 }
 0x27c   : > { %7149 = vmatmul.mubr.bf16.gmra.mrb[60].mxu1 %v11768_v48  ;;  %7612 = vmatprep.mubr.msk.bf16.mxu0 %vm8620_vm0, %v11541_v17  ;;  %v2139_v48 = vshrl.u32 %v5973_v37, 16  ;;  %v8595_v37 = vld [vmem:[%s11402_s3 + $0x100] sm:$0xff]  }
 0x27d   : > { %7152 = vmatprep.mubr.msk.bf16.mxu1 %vm8620_vm0, %v11541_v17 }
 0x283   : > { %7613 = vmatmul.mubr.bf16.gmra.mrb[24].mxu0 %v11771_v25  ;;  %v2144_v25 = vrot.slane %v2142_v59, 4  ;;  %v8596_v59 = vld [vmem:[%s11402_s3 + $0x108] sm:$0xff]  }
 0x284   : > { %7153 = vmatmul.mubr.bf16.gmra.mrb[64].mxu1 %v11770_v27  ;;  %7616 = vmatprep.mubr.msk.bf16.mxu0 %vm8620_vm0, %v11541_v17  ;;  %v2141_v27 = vrot.slane %v2139_v48, 3  ;;  %v11780_v48 = vld [vmem:[#allocation92_spill] sm:$0xff] }
 0x285   : > { %7156 = vmatprep.mubr.msk.bf16.mxu1 %vm8620_vm0, %v11541_v17 }
 0x286   : > { %v2145_v21 = vor.u32 %v2144_v25, %v2141_v27  ;;  %v11781_v27 = vld [vmem:[#allocation22_spill] sm:$0xff]  ;;  %v11782_v25 = vld [vmem:[#allocation39_spill] sm:$0xff] }
 0x28b   : > { %7617 = vmatmul.mubr.bf16.gmra.mrb[28].mxu0 %v11773_v13  ;;  %v11777_v13 = vld [vmem:[#allocation89_spill] sm:$0xff] }
 0x28c   : > { %7157 = vmatmul.mubr.bf16.gmra.mrb[68].mxu1 %v11772_v11  ;;  %7620 = vmatprep.mubr.msk.bf16.mxu0 %vm8620_vm0, %v11541_v17  ;;  %v2146_v11 = vsel %vm2053_vm3, %v11776_v40, %v2145_v21  ;;  %v8598_v40 = vld [vmem:[%s11402_s3 + $0x118] sm:$0xff]  }
 0x28d   : > { %7160 = vmatprep.mubr.msk.bf16.mxu1 %vm8620_vm0, %v11541_v17 }
 0x293   : > { %7621 = vmatmul.mubr.bf16.gmra.mrb[32].mxu0 %v11775_v55  ;;  %v11778_v55 = vld [vmem:[#allocation91_spill] sm:$0xff] }
 0x294   : > { %7161 = vmatmul.mubr.bf16.gmra.mrb[72].mxu1 %v11774_v54  ;;  %7624 = vmatprep.mubr.msk.bf16.mxu0 %vm8620_vm0, %v11541_v17  ;;  %v11779_v54 = vld [vmem:[#allocation25_spill] sm:$0xff] }
 0x295   : > { %7164 = vmatprep.mubr.msk.bf16.mxu1 %vm8620_vm0, %v11541_v17 }
 0x29b   : > { %7625 = vmatmul.mubr.bf16.gmra.mrb[36].mxu0 %v11777_v13  ;;  %v11784_v13 = vld [vmem:[#allocation93_spill] sm:$0xff] }
 0x29c   : > { %7165 = vmatmul.mubr.bf16.gmra.mrb[76].mxu1 %v2146_v11  ;;  %7628 = vmatprep.mubr.msk.bf16.mxu0 %vm8620_vm0, %v11541_v17  ;;  %v11783_v11 = vld [vmem:[#allocation94_spill] sm:$0xff] }
 0x29d   : > { %7168 = vmatprep.mubr.msk.bf16.mxu1 %vm8620_vm0, %v11541_v17 }
 0x2a3   : > { %7629 = vmatmul.mubr.bf16.gmra.mrb[40].mxu0 %v11778_v55  ;;  %v8599_v55 = vld [vmem:[%s11402_s3 + $0x120] sm:$0xff]  }
 0x2a4   : > { %7169 = vmatmul.mubr.bf16.gmra.mrb[80].mxu1 %v2145_v21  ;;  %7632 = vmatprep.mubr.msk.bf16.mxu0 %vm8620_vm0, %v11541_v17  ;;  %v8597_v21 = vld [vmem:[%s11402_s3 + $0x110] sm:$0xff]  }
 0x2a5   : > { %7188 = vmatprep.mubr.msk.bf16.mxu1 %vm8620_vm0, %v11541_v17 }
 0x2ab   : > { %7633 = vmatmul.mubr.bf16.gmra.mrb[44].mxu0 %v11780_v48  ;;  %v8601_v48 = vld [vmem:[%s11402_s3 + $0x130] sm:$0xff]  }
 0x2ac   : > { %7189 = vmatmul.mubr.bf16.vlgmr.msra.gmra.mrb[0].mxu1 %v11779_v54  ;;  %7636 = vmatprep.mubr.msk.bf16.mxu0 %vm8620_vm0, %v11541_v17  ;;  %v8600_v54 = vld [vmem:[%s11402_s3 + $0x128] sm:$0xff]  }
 0x2ad   : > { %7780 = vmatpush3.bf16.msra.mxu1 %v8595_v37  ;;  %7192 = vmatprep.mubr.msk.bf16.mxu1 %vm8620_vm0, %v11541_v17  ;;  %v11785_v37 = vld [vmem:[#allocation95_spill] sm:$0xff] }
 0x2ae   : > { %7773 = vmatprep.subr.bf16.mxu1 %v11541_v17 }
 0x2b1   : > { %7781 = vmatpush3.bf16.msra.mxu1 %v8596_v59  ;;  %v8602_v59 = vld [vmem:[%s11402_s3 + $0x138] sm:$0xff]  }
 0x2b2   : > { %7774 = vmatprep.subr.bf16.mxu1 %v11541_v17 }
 0x2b3   : > { %7637 = vmatmul.mubr.bf16.gmra.mrb[48].mxu0 %v11782_v25  ;;  %v11791_v25 = vld [vmem:[#allocation100_spill] sm:$0xff] }
 0x2b4   : > { %7193 = vmatmul.mubr.bf16.gmra.mrb[4].mxu1 %v11781_v27  ;;  %7640 = vmatprep.mubr.msk.bf16.mxu0 %vm8620_vm0, %v11541_v17  ;;  %v11787_v27 = vld [vmem:[#allocation98_spill] sm:$0xff] }
 0x2b5   : > { %7196 = vmatprep.mubr.msk.bf16.mxu1 %vm8620_vm0, %v11541_v17  ;;  %7782 = vmatpush3.bf16.msra.mxu1 %v8597_v21  ;;  %v11792_v21 = vrot.slane %v10323_v2, 1 }
 0x2b6   : > { %7775 = vmatprep.subr.bf16.mxu1 %v11541_v17 }
 0x2b9   : > { %7783 = vmatpush3.bf16.msra.mxu1 %v8598_v40  ;;  %v8604_v40 = vld [vmem:[#allocation2 + $0x78] sm:$0xf] }
 0x2ba   : > { %7776 = vmatprep.subr.bf16.mxu1 %v11541_v17 }
 0x2bb   : > { %7641 = vmatmul.mubr.bf16.gmra.mrb[52].mxu0 %v11784_v13  ;;  %v5005_v13 = vrot.slane %v4143_v38, 1 }
 0x2bc   : > { %7197 = vmatmul.mubr.bf16.gmra.mrb[8].mxu1 %v11783_v11  ;;  %7644 = vmatprep.mubr.msk.bf16.mxu0 %vm8620_vm0, %v11541_v17 }
 0x2bd   : > { %7200 = vmatprep.mubr.msk.bf16.mxu1 %vm8620_vm0, %v11541_v17  ;;  %7784 = vmatpush3.bf16.msra.mxu1 %v8599_v55 }
 0x2be   : > { %7777 = vmatprep.subr.bf16.mxu1 %v11541_v17 }
 0x2c1   : > { %7785 = vmatpush3.bf16.msra.mxu1 %v8600_v54 }
 0x2c2   : > { %7778 = vmatprep.subr.bf16.mxu1 %v11541_v17 }
 0x2c3   : > { %7645 = vmatmul.mubr.bf16.gmra.mrb[56].mxu0 %v11785_v37 }
 0x2c4   : > { %7201 = vmatmul.mubr.bf16.gmra.mrb[12].mxu1 %v10326_v28  ;;  %7648 = vmatprep.mubr.msk.bf16.mxu0 %vm8620_vm0, %v11541_v17  ;;  %v11786_v28 = vld [vmem:[#allocation96_spill] sm:$0xff] }
 0x2c5   : > { %7204 = vmatprep.mubr.msk.bf16.mxu1 %vm8620_vm0, %v11541_v17  ;;  %7786 = vmatpush3.bf16.msra.mxu1 %v8601_v48 }
 0x2c6   : > { %7779 = vmatprep.subr.bf16.mxu1 %v11541_v17 }
 0x2c9   : > { %7787 = vmatpush3.bf16.msra.mxu1 %v8602_v59  ;;  %v8606_v59 = vld [vmem:[#allocation2 + $0x80] sm:$0xf] }
 0x2cb   : > { %7649 = vmatmul.mubr.bf16.gmra.mrb[60].mxu0 %v10332_v15  ;;  %v11789_v15 = vld [vmem:[#allocation101_spill] sm:$0xff] }
 0x2cc   : > { %7205 = vmatmul.mubr.bf16.gmra.mrb[16].mxu1 %v10342_v14  ;;  %7652 = vmatprep.mubr.msk.bf16.mxu0 %vm8620_vm0, %v11541_v17  ;;  %v11788_v14 = vld [vmem:[#allocation97_spill] sm:$0xff] }
 0x2cd   : > { %7208 = vmatprep.mubr.msk.bf16.mxu1 %vm8620_vm0, %v11541_v17 }
 0x2d3   : > { %7653 = vmatmul.mubr.bf16.gmra.mrb[64].mxu0 %v11786_v28 }
 0x2d4   : > { %7209 = vmatmul.mubr.bf16.gmra.mrb[20].mxu1 %v10361_v42  ;;  %7656 = vmatprep.mubr.msk.bf16.mxu0 %vm8620_vm0, %v11541_v17  ;;  %v11790_v42 = vld [vmem:[#allocation99_spill] sm:$0xff] }
 0x2d5   : > { %7212 = vmatprep.mubr.msk.bf16.mxu1 %vm8620_vm0, %v11541_v17 }
 0x2db   : > { %7657 = vmatmul.mubr.bf16.gmra.mrb[68].mxu0 %v11788_v14 }
 0x2dc   : > { %7213 = vmatmul.mubr.bf16.gmra.mrb[24].mxu1 %v11787_v27  ;;  %7660 = vmatprep.mubr.msk.bf16.mxu0 %vm8620_vm0, %v11541_v17 }
 0x2dd   : > { %7216 = vmatprep.mubr.msk.bf16.mxu1 %vm8620_vm0, %v11541_v17 }
 0x2e3   : > { %7661 = vmatmul.mubr.bf16.gmra.mrb[72].mxu0 %v11790_v42 }
 0x2e4   : > { %7217 = vmatmul.mubr.bf16.gmra.mrb[28].mxu1 %v11789_v15  ;;  %7664 = vmatprep.mubr.msk.bf16.mxu0 %vm8620_vm0, %v11541_v17 }
 0x2e5   : > { %7220 = vmatprep.mubr.msk.bf16.mxu1 %vm8620_vm0, %v11541_v17 }
 0x2eb   : > { %7665 = vmatmul.mubr.bf16.gmra.mrb[76].mxu0 %v11791_v25  ;;  %v5013_v25 = vrot.slane %v4159_v6, 1 }
 0x2ec   : > { %7221 = vmatmul.mubr.bf16.gmra.mrb[32].mxu1 %v10398_v53  ;;  %7668 = vmatprep.mubr.msk.bf16.mxu0 %vm8620_vm0, %v11541_v17  ;;  %v8603_v53 = vld [vmem:[#allocation2 + $0x74] sm:$0xf] }
 0x2ed   : > { %7224 = vmatprep.mubr.msk.bf16.mxu1 %vm8620_vm0, %v11541_v17  ;;  %v5995_v11 = vcombine.low %v8603_v53, %v8604_v40 }
 0x2ef   : > { %v2737_v2 = vshrl.u32 %v5995_v11, 16  ;;  %v2740_v55 = vshll.u32 %v5995_v11, 16 }
 0x2f1   : > { %v2739_v37 = vrot.slane %v2737_v2, 3  ;;  %v2742_v48 = vrot.slane %v2740_v55, 4  ;;  %v8608_v55 = vld [vmem:[#allocation2 + $0x8c] sm:$0xf] }
 0x2f2   : > { %v5998_v6 = vcombine.low %v8608_v55, %v10467_v9 }
 0x2f3   : > { %7669 = vmatmul.mubr.bf16.gmra.mrb[80].mxu0 %v11792_v21  ;;  %v2743_v38 = vor.u32 %v2742_v48, %v2739_v37  ;;  %v11793_v21 = vshll.u32 %v10106_v19, 16  ;;  %v11795_v48 = vshll.u32 %v10113_v62, 16 }
 0x2f4   : > { %7225 = vmatmul.mubr.bf16.gmra.mrb[36].mxu1 %v10408_v35  ;;  %7688 = vmatprep.mubr.msk.bf16.mxu0 %vm8620_vm0, %v11541_v17  ;;  %v5006_v35 = vrot.slane %v4139_v41, 2  ;;  %v5010_v41 = vrot.slane %v4147_v44, 2 }
 0x2f5   : > { %7228 = vmatprep.mubr.msk.bf16.mxu1 %vm8620_vm0, %v11541_v17  ;;  %v5014_v53 = vrot.slane %v11793_v21, 2 }
 0x2f6   : > { %v5007_v54 = vor.u32 %v5006_v35, %v5005_v13 }
 0x2f8   : > { %v5008_v23 = vsel %vm4992_vm6, %v10410_v29, %v5007_v54  ;;  %v2744_v29 = vsel %vm2053_vm3, %v10423_v36, %v2743_v38 }
 0x2fb   : > { %7689 = vmatmul.mubr.bf16.vlgmr.msra.gmra.mrb[0].mxu0 %v10430_v58  ;;  %v5009_v58 = vrot.slane %v4151_v47, 1  ;;  %v8607_v47 = vld [vmem:[#allocation2 + $0x84] sm:$0xf] }
 0x2fc   : > { %7229 = vmatmul.mubr.bf16.gmra.mrb[40].mxu1 %v10416_v57  ;;  %7692 = vmatprep.mubr.msk.bf16.mxu0 %vm8620_vm0, %v11541_v17  ;;  %v8605_v57 = vld [vmem:[#allocation2 + $0x7c] sm:$0xf]  ;;  %v5997_v24 = vcombine.low %v8607_v47, %v10446_v0  ;;  %v5015_v0 = vor.u32 %v5014_v53, %v5013_v25 }
 0x2fd   : > { %7232 = vmatprep.mubr.msk.bf16.mxu1 %vm8620_vm0, %v11541_v17  ;;  %v5996_v28 = vcombine.low %v8605_v57, %v8606_v59  ;;  %v5018_v57 = vrot.slane %v11795_v48, 2 }
 0x2fe   : > { %v2755_v40 = vshrl.u32 %v5997_v24, 16  ;;  %v2758_v11 = vshll.u32 %v5997_v24, 16 }
 0x2ff   : > { %v2746_v27 = vshrl.u32 %v5996_v28, 16  ;;  %v2749_v14 = vshll.u32 %v5996_v28, 16  ;;  %v2764_v28 = vshrl.u32 %v5998_v6, 16 }
 0x300   : > { %v2757_v35 = vrot.slane %v2755_v40, 3  ;;  %v2760_v2 = vrot.slane %v2758_v11, 4  ;;  %v11798_v40 = vshrl.u32 %v10143_v51, 16 }
 0x301   : > { %v2748_v15 = vrot.slane %v2746_v27, 3  ;;  %v2751_v42 = vrot.slane %v2749_v14, 4  ;;  %v8609_v27 = vld [vmem:[#allocation2 + $0x94] sm:$0xf] }
 0x302   : > { %v2761_v59 = vor.u32 %v2760_v2, %v2757_v35  ;;  %v5999_v14 = vcombine.low %v8609_v27, %v10488_v8  ;;  %v5025_v11 = vrot.slane %v11798_v40, 1 }
 0x303   : > { %7693 = vmatmul.mubr.bf16.gmra.mrb[4].mxu0 %v5008_v23  ;;  %v2752_v36 = vor.u32 %v2751_v42, %v2748_v15  ;;  %v2767_v23 = vshll.u32 %v5998_v6, 16  ;;  %v11797_v15 = vshll.u32 %v10134_v32, 16 }
 0x304   : > { %7233 = vmatmul.mubr.bf16.gmra.mrb[44].mxu1 %v10434_v7  ;;  %7696 = vmatprep.mubr.msk.bf16.mxu0 %vm8620_vm0, %v11541_v17  ;;  %v5011_v7 = vor.u32 %v5010_v41, %v5009_v58  ;;  %v2766_v41 = vrot.slane %v2764_v28, 3  ;;  %v2773_v24 = vshrl.u32 %v5999_v14, 16 }
 0x305   : > { %7236 = vmatprep.mubr.msk.bf16.mxu1 %vm8620_vm0, %v11541_v17  ;;  %v2753_v13 = vsel %vm2053_vm3, %v2743_v38, %v2752_v36  ;;  %v2762_v58 = vsel %vm2053_vm3, %v2752_v36, %v2761_v59  ;;  %v2769_v38 = vrot.slane %v2767_v23, 4  ;;  %v5022_v42 = vrot.slane %v11797_v15, 2 }
 0x306   : > { %v5012_v44 = vsel %vm4992_vm6, %v5007_v54, %v5011_v7  ;;  %v5016_v19 = vsel %vm4992_vm6, %v5011_v7, %v5015_v0  ;;  %v11794_v54 = vshrl.u32 %v10113_v62, 16  ;;  %v11796_v7 = vshrl.u32 %v10134_v32, 16 }
 0x307   : > { %v2770_v47 = vor.u32 %v2769_v38, %v2766_v41  ;;  %v2775_v21 = vrot.slane %v2773_v24, 3  ;;  %v6000_v36 = vcombine.low %v10490_v49, %v10509_v60 }
 0x308   : > { %v5017_v37 = vrot.slane %v11794_v54, 1  ;;  %v6001_v54 = vcombine.low %v10511_v34, %v10525_v39  ;;  %v11137_v39 = vld [vmem:[#allocation2 + $0xb0] sm:$0x3] }
 0x309   : > { %v2771_v25 = vsel %vm2053_vm3, %v2761_v59, %v2770_v47  ;;  %v2782_v2 = vshrl.u32 %v6000_v36, 16  ;;  %v2785_v55 = vshll.u32 %v6000_v36, 16 }
 0x30a   : > { %v5019_v9 = vor.u32 %v5018_v57, %v5017_v37  ;;  %v11800_v37 = vshrl.u32 %v10157_v18, 16  ;;  %v11801_v57 = vshll.u32 %v10157_v18, 16  ;;  %v2791_v23 = vshrl.u32 %v6001_v54, 16 }
 0x30b   : > { %7697 = vmatmul.mubr.bf16.gmra.mrb[8].mxu0 %v5012_v44  ;;  %v2776_v44 = vshll.u32 %v5999_v14, 16  ;;  %v2784_v6 = vrot.slane %v2782_v2, 3  ;;  %v6002_v18 = vcombine.low %v10527_v43, %v11137_v39  ;;  %v11802_v14 = vshrl.u32 %v10169_v1, 16 }
 0x30c   : > { %7237 = vmatmul.mubr.bf16.gmra.mrb[48].mxu1 %v2744_v29  ;;  %7700 = vmatprep.mubr.msk.bf16.mxu0 %vm8620_vm0, %v11541_v17  ;;  %v5020_v62 = vsel %vm4992_vm6, %v5015_v0, %v5019_v9  ;;  %v5021_v29 = vrot.slane %v11796_v7, 1  ;;  %v11799_v0 = vshll.u32 %v10143_v51, 16  ;;  %v5029_v48 = vrot.slane %v11800_v37, 1 }
 0x30d   : > { %7240 = vmatprep.mubr.msk.bf16.mxu1 %vm8620_vm0, %v11541_v17  ;;  %v2778_v53 = vrot.slane %v2776_v44, 4  ;;  %v5030_v59 = vrot.slane %v11801_v57, 2  ;;  %v2793_v41 = vrot.slane %v2791_v23, 3  ;;  %v11803_v7 = vshll.u32 %v10169_v1, 16 }
 0x30e   : > { %v5023_v8 = vor.u32 %v5022_v42, %v5021_v29  ;;  %v2800_v42 = vshrl.u32 %v6002_v18, 16  ;;  %v5037_v1 = vrot.slane %v4207_v5, 1  ;;  %v5041_v5 = vrot.slane %v4215_v61, 1 }
 0x30f   : > { %v2779_v35 = vor.u32 %v2778_v53, %v2775_v21  ;;  %v5031_v34 = vor.u32 %v5030_v59, %v5029_v48  ;;  %v5034_v29 = vrot.slane %v11803_v7, 2  ;;  %v11804_v21 = vshll.u32 %v10178_v33, 16 }
 0x310   : > { %v5024_v32 = vsel %vm4992_vm6, %v5019_v9, %v5023_v8  ;;  %v2794_v9 = vshll.u32 %v6001_v54, 16  ;;  %v2802_v44 = vrot.slane %v2800_v42, 3  ;;  %v11805_v33 = vshll.u32 %v10188_v10, 16 }
 0x311   : > { %v2780_v60 = vsel %vm2053_vm3, %v2770_v47, %v2779_v35  ;;  %v2803_v47 = vshll.u32 %v6002_v18, 16  ;;  %v5038_v53 = vrot.slane %v11804_v21, 2  ;;  %v5045_v2 = vrot.slane %v4223_v50, 1  ;;  %v8590_v21 = vld [vmem:[#allocation2 + $0xb8] ss:$0 sps:$4 sm:$0xff]  }
 0x312   : > { %v2796_v38 = vrot.slane %v2794_v9, 4  ;;  %v5046_v61 = vrot.slane %v4219_v45, 2  ;;  %v11807_v50 = vshll.u32 %v10221_v20, 16  ;;  %v11810_v37 = vshrl.u32 %v10254_v12, 16 }
 0x313   : > { %7701 = vmatmul.mubr.bf16.gmra.mrb[12].mxu0 %v5016_v19  ;;  %v2787_v19 = vrot.slane %v2785_v55, 4  ;;  %v11806_v55 = vld [vmem:[#allocation63_spill] sm:$0xff]  ;;  %v11811_v57 = vshll.u32 %v10254_v12, 16  ;;  %v11813_v9 = vshll.u32 %v10277_v3, 16  ;;  %v11818_v7 = vshll.u32 %v10296_v46, 16 }
 0x314   : > { %7241 = vmatmul.mubr.bf16.gmra.mrb[52].mxu1 %v2753_v13  ;;  %7704 = vmatprep.mubr.msk.bf16.mxu0 %vm8620_vm0, %v11541_v17  ;;  %v5026_v13 = vrot.slane %v11799_v0, 2  ;;  %v2797_v15 = vor.u32 %v2796_v38, %v2793_v41  ;;  %v5042_v0 = vrot.slane %v11805_v33, 2  ;;  %v5047_v10 = vor.u32 %v5046_v61, %v5045_v2 }
 0x315   : > { %7244 = vmatprep.mubr.msk.bf16.mxu1 %vm8620_vm0, %v11541_v17  ;;  %v2788_v28 = vor.u32 %v2787_v19, %v2784_v6  ;;  %v5050_v6 = vrot.slane %v11807_v50, 2  ;;  %v11808_v19 = vshrl.u32 %v10230_v56, 16  ;;  %v5057_v48 = vrot.slane %v11810_v37, 1 }
 0x316   : > { %v5027_v49 = vor.u32 %v5026_v13, %v5025_v11  ;;  %v5043_v13 = vor.u32 %v5042_v0, %v5041_v5  ;;  %v5058_v59 = vrot.slane %v11811_v57, 2  ;;  %v11815_v38 = vshll.u32 %v10287_v30, 16  ;;  %v11822_v0 = vld [vmem:[#allocation102_spill] sm:$0xff] }
 0x317   : > { %v2798_v24 = vsel %vm2053_vm3, %v2788_v28, %v2797_v15  ;;  %v5053_v54 = vrot.slane %v11808_v19, 1 }
 0x318   : > { %v5028_v51 = vsel %vm4992_vm6, %v5023_v8, %v5027_v49  ;;  %v5032_v27 = vsel %vm4992_vm6, %v5027_v49, %v5031_v34  ;;  %v2805_v8 = vrot.slane %v2803_v47, 4  ;;  %v5048_v49 = vsel %vm4992_vm6, %v5043_v13, %v5047_v10 }
 0x319   : > { %v5066_v18 = vrot.slane %v11815_v38, 2 }
 0x31a   : > { %v2806_v36 = vor.u32 %v2805_v8, %v2802_v44 }
 0x31b   : > { %7705 = vmatmul.mubr.bf16.gmra.mrb[16].mxu0 %v5020_v62  ;;  %v5033_v62 = vrot.slane %v11802_v14, 1  ;;  %v11817_v14 = vshrl.u32 %v10296_v46, 16  ;;  %v11820_v46 = vshrl.u32 %v10312_v4, 16 }
 0x31c   : > { %7245 = vmatmul.mubr.bf16.gmra.mrb[56].mxu1 %v2762_v58  ;;  %7708 = vmatprep.mubr.msk.bf16.mxu0 %vm8620_vm0, %v11541_v17  ;;  %v2789_v58 = vsel %vm2053_vm3, %v2779_v35, %v2788_v28  ;;  %v2807_v40 = vsel %vm2053_vm3, %v2797_v15, %v2806_v36  ;;  %v11812_v28 = vshrl.u32 %v10277_v3, 16 }
 0x31d   : > { %7248 = vmatprep.mubr.msk.bf16.mxu1 %vm8620_vm0, %v11541_v17  ;;  %v5035_v43 = vor.u32 %v5034_v29, %v5033_v62  ;;  %v5069_v62 = vrot.slane %v11817_v14, 1  ;;  %v5070_v29 = vrot.slane %v11818_v7, 2  ;;  %v5073_v8 = vrot.slane %v11820_v46, 1 }
 0x31e   : > { %v5061_v23 = vrot.slane %v11812_v28, 1 }
 0x31f   : > { %v5071_v42 = vor.u32 %v5070_v29, %v5069_v62 }
 0x323   : > { %7709 = vmatmul.mubr.bf16.gmra.mrb[20].mxu0 %v5024_v32  ;;  %v5039_v32 = vor.u32 %v5038_v53, %v5037_v1 }
 0x324   : > { %7249 = vmatmul.mubr.bf16.gmra.mrb[60].mxu1 %v2771_v25  ;;  %7712 = vmatprep.mubr.msk.bf16.mxu0 %vm8620_vm0, %v11541_v17  ;;  %v5036_v25 = vsel %vm4992_vm6, %v5031_v34, %v5035_v43  ;;  %v5062_v34 = vrot.slane %v11813_v9, 2 }
 0x325   : > { %7252 = vmatprep.mubr.msk.bf16.mxu1 %vm8620_vm0, %v11541_v17  ;;  %v5040_v11 = vsel %vm4992_vm6, %v5035_v43, %v5039_v32  ;;  %v5044_v35 = vsel %vm4992_vm6, %v5039_v32, %v5043_v13 }
 0x326   : > { %v5063_v12 = vor.u32 %v5062_v34, %v5061_v23 }
 0x32b   : > { %7713 = vmatmul.mubr.bf16.gmra.mrb[24].mxu0 %v5028_v51 }
 0x32c   : > { %7253 = vmatmul.mubr.bf16.gmra.mrb[64].mxu1 %v2780_v60  ;;  %7716 = vmatprep.mubr.msk.bf16.mxu0 %vm8620_vm0, %v11541_v17  ;;  %v5049_v60 = vrot.slane %v4231_v31, 1  ;;  %v11809_v31 = vshll.u32 %v10230_v56, 16  ;;  %v5059_v56 = vor.u32 %v5058_v59, %v5057_v48 }
 0x32d   : > { %7256 = vmatprep.mubr.msk.bf16.mxu1 %vm8620_vm0, %v11541_v17 }
 0x32e   : > { %v5051_v52 = vor.u32 %v5050_v6, %v5049_v60  ;;  %v5054_v51 = vrot.slane %v11809_v31, 2  ;;  %v11823_v60 = vld [vmem:[#allocation103_spill] sm:$0xff] }
 0x330   : > { %v5052_v45 = vsel %vm4992_vm6, %v5047_v10, %v5051_v52  ;;  %v5055_v20 = vor.u32 %v5054_v51, %v5053_v54  ;;  %v6031_v54 = vcombine.low %v11137_v39, %v11137_v39 }
 0x333   : > { %7717 = vmatmul.mubr.bf16.gmra.mrb[28].mxu0 %v5032_v27  ;;  %v11816_v27 = vld [vmem:[#allocation38_spill] sm:$0xff] }
 0x334   : > { %7257 = vmatmul.mubr.bf16.gmra.mrb[68].mxu1 %v2789_v58  ;;  %7720 = vmatprep.mubr.msk.bf16.mxu0 %vm8620_vm0, %v11541_v17  ;;  %v11814_v58 = vshrl.u32 %v10287_v30, 16 }
 0x335   : > { %7260 = vmatprep.mubr.msk.bf16.mxu1 %vm8620_vm0, %v11541_v17 }
 0x336   : > { %v5065_v41 = vrot.slane %v11814_v58, 1 }
 0x338   : > { %v5067_v3 = vor.u32 %v5066_v18, %v5065_v41 }
 0x33a   : > { %v5072_v44 = vsel %vm4992_vm6, %v5067_v3, %v5071_v42 }
 0x33b   : > { %7721 = vmatmul.mubr.bf16.gmra.mrb[32].mxu0 %v5036_v25  ;;  %v11821_v25 = vshll.u32 %v10312_v4, 16 }
 0x33c   : > { %7261 = vmatmul.mubr.bf16.gmra.mrb[72].mxu1 %v2798_v24  ;;  %7724 = vmatprep.mubr.msk.bf16.mxu0 %vm8620_vm0, %v11541_v17  ;;  %v11819_v24 = vld [vmem:[#allocation44_spill] sm:$0xff] }
 0x33d   : > { %7264 = vmatprep.mubr.msk.bf16.mxu1 %vm8620_vm0, %v11541_v17  ;;  %v5074_v1 = vrot.slane %v11821_v25, 2  ;;  %v11825_v25 = vld [vmem:[#allocation4_spill] sm:$0xff] }
 0x33f   : > { %v5075_v32 = vor.u32 %v5074_v1, %v5073_v8 }
 0x341   : > { %v5076_v4 = vsel %vm4992_vm6, %v5071_v42, %v5075_v32 }
 0x343   : > { %7725 = vmatmul.mubr.bf16.gmra.mrb[36].mxu0 %v5040_v11  ;;  %v5081_v11 = vshll.u32 %v8590_v21, 16 }
 0x344   : > { %7265 = vmatmul.mubr.bf16.gmra.mrb[76].mxu1 %v2807_v40  ;;  %7728 = vmatprep.mubr.msk.bf16.mxu0 %vm8620_vm0, %v11541_v17  ;;  %v5078_v40 = vshrl.u32 %v8590_v21, 16 }
 0x345   : > { %7268 = vmatprep.mubr.msk.bf16.mxu1 %vm8620_vm0, %v11541_v17 }
 0x346   : > { %v5080_v13 = vrot.slane %v5078_v40, 1 }
 0x34b   : > { %7729 = vmatmul.mubr.bf16.gmra.mrb[40].mxu0 %v5044_v35  ;;  %v5083_v35 = vrot.slane %v5081_v11, 2 }
 0x34c   : > { %7269 = vmatmul.mubr.bf16.gmra.mrb[80].mxu1 %v2806_v36  ;;  %7732 = vmatprep.mubr.msk.bf16.mxu0 %vm8620_vm0, %v11541_v17 }
 0x34d   : > { %7332 = vmatprep.mubr.msk.bf16.mxu1 %vm8620_vm0, %v11541_v17  ;;  %v5084_v10 = vor.u32 %v5083_v35, %v5080_v13  ;;  %v11826_v13 = vld [vmem:[#allocation5_spill] sm:$0xff] }
 0x34f   : > { %v5085_v50 = vsel %vm4992_vm6, %v5075_v32, %v5084_v10 }
 0x353   : > { %7733 = vmatmul.mubr.bf16.gmra.mrb[44].mxu0 %v5048_v49 }
 0x354   : > { %7333 = vmatmul.mubr.bf16.vlgmr.msra.gmra.mrb[44].mxu1 %v11806_v55  ;;  %7736 = vmatprep.mubr.msk.bf16.mxu0 %vm8620_vm0, %v11541_v17 }
 0x355   : > { %7336 = vmatprep.mubr.msk.bf16.mxu1 %vm8620_vm0, %v11541_v17 }
 0x35b   : > { %7737 = vmatmul.mubr.bf16.gmra.mrb[48].mxu0 %v5052_v45 }
 0x35c   : > { %7337 = vmatmul.mubr.bf16.gmra.mrb[48].mxu1 %v10056_v26  ;;  %7740 = vmatprep.mubr.msk.bf16.mxu0 %vm8620_vm0, %v11541_v17  ;;  %v5056_v26 = vsel %vm4992_vm6, %v5051_v52, %v5055_v20 }
 0x35d   : > { %7340 = vmatprep.mubr.msk.bf16.mxu1 %vm8620_vm0, %v11541_v17 }
 0x363   : > { %7741 = vmatmul.mubr.bf16.gmra.mrb[52].mxu0 %v5056_v26 }
 0x364   : > { %7341 = vmatmul.mubr.bf16.gmra.mrb[52].mxu1 %v10267_v22  ;;  %7744 = vmatprep.mubr.msk.bf16.mxu0 %vm8620_vm0, %v11541_v17  ;;  %v5060_v22 = vsel %vm4992_vm6, %v5055_v20, %v5059_v56 }
 0x365   : > { %7344 = vmatprep.mubr.msk.bf16.mxu1 %vm8620_vm0, %v11541_v17 }
 0x36b   : > { %7745 = vmatmul.mubr.bf16.gmra.mrb[56].mxu0 %v5060_v22 }
 0x36c   : > { %7345 = vmatmul.mubr.bf16.gmra.mrb[56].mxu1 %v10426_v63  ;;  %7748 = vmatprep.mubr.msk.bf16.mxu0 %vm8620_vm0, %v11541_v17  ;;  %v5064_v63 = vsel %vm4992_vm6, %v5059_v56, %v5063_v12 }
 0x36d   : > { %7348 = vmatprep.mubr.msk.bf16.mxu1 %vm8620_vm0, %v11541_v17 }
 0x373   : > { %7749 = vmatmul.mubr.bf16.gmra.mrb[60].mxu0 %v5064_v63 }
 0x374   : > { %7349 = vmatmul.mubr.bf16.gmra.mrb[60].mxu1 %v10456_v16  ;;  %7752 = vmatprep.mubr.msk.bf16.mxu0 %vm8620_vm0, %v11541_v17  ;;  %v5068_v16 = vsel %vm4992_vm6, %v5063_v12, %v5067_v3 }
 0x375   : > { %7352 = vmatprep.mubr.msk.bf16.mxu1 %vm8620_vm0, %v11541_v17 }
 0x37b   : > { %7753 = vmatmul.mubr.bf16.gmra.mrb[64].mxu0 %v5068_v16 }
 0x37c   : > { %7353 = vmatmul.mubr.bf16.gmra.mrb[64].mxu1 %v11816_v27  ;;  %7756 = vmatprep.mubr.msk.bf16.mxu0 %vm8620_vm0, %v11541_v17 }
 0x37d   : > { %7356 = vmatprep.mubr.msk.bf16.mxu1 %vm8620_vm0, %v11541_v17 }
 0x37f   : > { %v11240_v30 = vpop.f32.mrb[0].mxu1 }
 0x380   : > { %v7190_v15 = vpop.f32.mrb[1].mxu1 }
 0x381   : > { %v11242_v47 = vpop.f32.mrb[2].mxu1 }
 0x382   : > { %v7191_v43 = vpop.f32.mrb[3].mxu1 }
 0x383   : > { %7757 = vmatmul.mubr.bf16.gmra.mrb[68].mxu0 %v5072_v44 }
 0x384   : > { %7357 = vmatmul.mubr.bf16.gmra.mrb[68].mxu1 %v11819_v24  ;;  %7760 = vmatprep.mubr.msk.bf16.mxu0 %vm8620_vm0, %v11541_v17  ;;  %v11824_v24 = vld [vmem:[#allocation3_spill] sm:$0xff] }
 0x385   : > { %7360 = vmatprep.mubr.msk.bf16.mxu1 %vm8620_vm0, %v11541_v17 }
 0x387   : > { %v11254_v53 = vpop.f32.mrb[4].mxu1 }
 0x388   : > { %v7194_v36 = vpop.f32.mrb[5].mxu1 }
 0x389   : > { %v11256_v5 = vpop.f32.mrb[6].mxu1 }
 0x38a   : > { %v7195_v33 = vpop.f32.mrb[7].mxu1 }
 0x38b   : > { %7761 = vmatmul.mubr.bf16.gmra.mrb[72].mxu0 %v5076_v4 }
 0x38c   : > { %7361 = vmatmul.mubr.bf16.gmra.mrb[72].mxu1 %v11822_v0  ;;  %7764 = vmatprep.mubr.msk.bf16.mxu0 %vm8620_vm0, %v11541_v17 }
 0x38d   : > { %7364 = vmatprep.mubr.msk.bf16.mxu1 %vm8620_vm0, %v11541_v17 }
 0x38f   : > { %v11264_v2 = vpop.f32.mrb[8].mxu1 }
 0x390   : > { %v7198_v61 = vpop.f32.mrb[9].mxu1 }
 0x391   : > { %v11266_v55 = vpop.f32.mrb[10].mxu1 }
 0x392   : > { %v7199_v49 = vpop.f32.mrb[11].mxu1 }
 0x393   : > { %7765 = vmatmul.mubr.bf16.gmra.mrb[76].mxu0 %v5085_v50 }
 0x394   : > { %7365 = vmatmul.mubr.bf16.gmra.mrb[76].mxu1 %v11823_v60  ;;  %7768 = vmatprep.mubr.msk.bf16.mxu0 %vm8620_vm0, %v11541_v17  ;;  %v11827_v60 = vld [vmem:[#allocation6_spill] sm:$0xff] }
 0x395   : > { %7368 = vmatprep.mubr.msk.bf16.mxu1 %vm8620_vm0, %v11541_v17 }
 0x397   : > { %v11274_v6 = vpop.f32.mrb[12].mxu1 }
 0x398   : > { %v7202_v52 = vpop.f32.mrb[13].mxu1 }
 0x399   : > { %v11276_v45 = vpop.f32.mrb[14].mxu1 }
 0x39a   : > { %v7203_v19 = vpop.f32.mrb[15].mxu1 }
 0x39b   : > { %7769 = vmatmul.mubr.bf16.gmra.mrb[80].mxu0 %v5084_v10 }
 0x39c   : > { %7369 = vmatmul.mubr.bf16.gmra.mrb[80].mxu1 %v6031_v54 }
 0x39f   : > { %v11280_v31 = vpop.f32.mrb[16].mxu1 }
 0x3a0   : > { %v7206_v51 = vpop.f32.mrb[17].mxu1 }
 0x3a1   : > { %v11282_v20 = vpop.f32.mrb[18].mxu1 }
 0x3a2   : > { %v7207_v26 = vpop.f32.mrb[19].mxu1 }
 0x3a7   : > { %v11284_v37 = vpop.f32.mrb[20].mxu1 }
 0x3a8   : > { %v7210_v17 = vpop.f32.mrb[21].mxu1 }
 0x3a9   : > { %v11286_v48 = vpop.f32.mrb[22].mxu1 }
 0x3aa   : > { %v7211_v57 = vpop.f32.mrb[23].mxu1 }
 0x3af   : > { %v11288_v59 = vpop.f32.mrb[24].mxu1 }
 0x3b0   : > { %v7214_v56 = vpop.f32.mrb[25].mxu1 }
 0x3b1   : > { %v11290_v22 = vpop.f32.mrb[26].mxu1 }
 0x3b2   : > { %v7215_v39 = vpop.f32.mrb[27].mxu1 }
 0x3b3   : > { %v11828_v39 = vld [vmem:[#allocation7_spill] sm:$0xff] }
 0x3b7   : > { %v11292_v28 = vpop.f32.mrb[28].mxu1 }
 0x3b8   : > { %v7218_v23 = vpop.f32.mrb[29].mxu1 }
 0x3b9   : > { %v11294_v9 = vpop.f32.mrb[30].mxu1 }
 0x3ba   : > { %v7219_v34 = vpop.f32.mrb[31].mxu1 }
 0x3bf   : > { %v11296_v12 = vpop.f32.mrb[32].mxu1 }
 0x3c0   : > { %v7222_v63 = vpop.f32.mrb[33].mxu1 }
 0x3c1   : > { %v11298_v58 = vpop.f32.mrb[34].mxu1 }
 0x3c2   : > { %v7223_v41 = vpop.f32.mrb[35].mxu1 }
 0x3c7   : > { %v11300_v38 = vpop.f32.mrb[36].mxu1 }
 0x3c8   : > { %v7226_v18 = vpop.f32.mrb[37].mxu1 }
 0x3c9   : > { %v11302_v3 = vpop.f32.mrb[38].mxu1  ;;  %v11829_v18 = vld [vmem:[#allocation8_spill] sm:$0xff] }
 0x3ca   : > { %v7227_v27 = vpop.f32.mrb[39].mxu1 }
 0x3ce   : > { %v5189_v62 = vpop.f32.mrb[0].mxu0 }
 0x3cf   : > { %v11304_v16 = vpop.f32.mrb[40].mxu1  ;;  %v7788_v7 = vadd.f32 %v5189_v62, %v11240_v30  ;;  %v7690_v15 = vpop.f32.mrb[1].mxu0 }
 0x3d0   : > { %v7230_v14 = vpop.f32.mrb[41].mxu1  ;;  %v5192_v43 = vpop.f32.mrb[2].mxu0 }
 0x3d1   : > { %v11307_v29 = vpop.f32.mrb[42].mxu1  ;;  %v5396_v44 = vmul.f32 %v7788_v7, %v11824_v24  ;;  %v7789_v46 = vadd.f32 %v5192_v43, %v11242_v47  ;;  %v7691_v8 = vpop.f32.mrb[3].mxu0 }
 0x3d2   : > { %v7231_v42 = vpop.f32.mrb[43].mxu1 }
 0x3d3   : > { %v5397_v1 = vmul.f32 %v7789_v46, %v11825_v25  ;;  %v6448_v21 = vpack.c.bf16 %v7789_v46, %v7788_v7  ;;  %v5486_v36 = vmul.f32 %v5396_v44, %v5396_v44  ;;  %v11830_v46 = vld [vmem:[#allocation9_spill] sm:$0xff] }
 0x3d5   : > { %v5437_v32 = vadd.f32 %v5397_v1, %v5396_v44  ;;  %v5487_v40 = vmul.f32 %v5397_v1, %v5397_v1  ;;  %6591 = vst [vmem:[%s8681_s6 + $0x10] sm:$0xff] %v6448_v21  }
 0x3d6   : > { %v5197_v11 = vpop.f32.mrb[4].mxu0 }
 0x3d7   : > { %v5527_v30 = vadd.f32 %v5487_v40, %v5486_v36  ;;  %v7790_v33 = vadd.f32 %v5197_v11, %v11254_v53  ;;  %v7694_v0 = vpop.f32.mrb[5].mxu0  ;;  %v11831_v36 = vld [vmem:[#allocation10_spill] sm:$0xff] }
 0x3d8   : > { %v5200_v4 = vpop.f32.mrb[6].mxu0 }
 0x3d9   : > { %v5398_v35 = vmul.f32 %v7790_v33, %v11826_v13  ;;  %v7791_v61 = vadd.f32 %v5200_v4, %v11256_v5  ;;  %v7695_v47 = vpop.f32.mrb[7].mxu0 }
 0x3db   : > { %v5438_v10 = vadd.f32 %v5437_v32, %v5398_v35  ;;  %v5488_v49 = vmul.f32 %v5398_v35, %v5398_v35  ;;  %v5399_v50 = vmul.f32 %v7791_v61, %v11827_v60  ;;  %v6453_v52 = vpack.c.bf16 %v7791_v61, %v7790_v33  ;;  %v11832_v61 = vld [vmem:[#allocation12_spill] sm:$0xff] }
 0x3dd   : > { %v5528_v19 = vadd.f32 %v5527_v30, %v5488_v49  ;;  %v5439_v54 = vadd.f32 %v5438_v10, %v5399_v50  ;;  %v5489_v51 = vmul.f32 %v5399_v50, %v5399_v50  ;;  %6592 = vst [vmem:[%s8681_s6 + $0x18] sm:$0xff] %v6453_v52   ;;  %v11833_v50 = vld [vmem:[#allocation13_spill] sm:$0xff] }
 0x3de   : > { %v5205_v26 = vpop.f32.mrb[8].mxu0 }
 0x3df   : > { %v5529_v17 = vadd.f32 %v5528_v19, %v5489_v51  ;;  %v7792_v53 = vadd.f32 %v5205_v26, %v11264_v2  ;;  %v7698_v57 = vpop.f32.mrb[9].mxu0 }
 0x3e0   : > { %v5208_v56 = vpop.f32.mrb[10].mxu0 }
 0x3e1   : > { %v5400_v23 = vmul.f32 %v7792_v53, %v11828_v39  ;;  %v7793_v5 = vadd.f32 %v5208_v56, %v11266_v55  ;;  %v7699_v34 = vpop.f32.mrb[11].mxu0  ;;  %v11834_v39 = vld [vmem:[#allocation14_spill] sm:$0xff] }
 0x3e3   : > { %v5440_v63 = vadd.f32 %v5439_v54, %v5400_v23  ;;  %v5490_v41 = vmul.f32 %v5400_v23, %v5400_v23  ;;  %v5401_v27 = vmul.f32 %v7793_v5, %v11829_v18  ;;  %v6458_v14 = vpack.c.bf16 %v7793_v5, %v7792_v53 }
 0x3e5   : > { %v5530_v62 = vadd.f32 %v5529_v17, %v5490_v41  ;;  %v5441_v7 = vadd.f32 %v5440_v63, %v5401_v27  ;;  %v5491_v15 = vmul.f32 %v5401_v27, %v5401_v27  ;;  %6593 = vst [vmem:[%s8681_s6 + $0x20] sm:$0xff] %v6458_v14   ;;  %v11835_v41 = vld [vmem:[#allocation15_spill] sm:$0xff] }
 0x3e6   : > { %v5213_v42 = vpop.f32.mrb[12].mxu0 }
 0x3e7   : > { %v5531_v43 = vadd.f32 %v5530_v62, %v5491_v15  ;;  %v7794_v2 = vadd.f32 %v5213_v42, %v11274_v6  ;;  %v7702_v24 = vpop.f32.mrb[13].mxu0 }
 0x3e8   : > { %v5216_v44 = vpop.f32.mrb[14].mxu0  ;;  %v11836_v24 = vld [vmem:[#allocation16_spill] sm:$0xff] }
 0x3e9   : > { %v5402_v8 = vmul.f32 %v7794_v2, %v11830_v46  ;;  %v7795_v55 = vadd.f32 %v5216_v44, %v11276_v45  ;;  %v7703_v25 = vpop.f32.mrb[15].mxu0 }
 0x3ea   : > { %v11837_v25 = vld [vmem:[#allocation17_spill] sm:$0xff] }
 0x3eb   : > { %v5442_v1 = vadd.f32 %v5441_v7, %v5402_v8  ;;  %v5492_v21 = vmul.f32 %v5402_v8, %v5402_v8  ;;  %v5403_v32 = vmul.f32 %v7795_v55, %v11831_v36  ;;  %v6463_v40 = vpack.c.bf16 %v7795_v55, %v7794_v2 }
 0x3ed   : > { %v5532_v11 = vadd.f32 %v5531_v43, %v5492_v21  ;;  %v5443_v30 = vadd.f32 %v5442_v1, %v5403_v32  ;;  %v5493_v33 = vmul.f32 %v5403_v32, %v5403_v32  ;;  %6594 = vst [vmem:[%s8681_s6 + $0x28] sm:$0xff] %v6463_v40  }
 0x3ee   : > { %v5221_v0 = vpop.f32.mrb[16].mxu0 }
 0x3ef   : > { %v5533_v4 = vadd.f32 %v5532_v11, %v5493_v33  ;;  %v7796_v6 = vadd.f32 %v5221_v0, %v11280_v31  ;;  %v7706_v13 = vpop.f32.mrb[17].mxu0 }
 0x3f0   : > { %v5224_v35 = vpop.f32.mrb[18].mxu0 }
 0x3f1   : > { %v5404_v47 = vmul.f32 %v7796_v6, %v11832_v61  ;;  %v7797_v45 = vadd.f32 %v5224_v35, %v11282_v20  ;;  %v7707_v10 = vpop.f32.mrb[19].mxu0 }
 0x3f3   : > { %v5444_v49 = vadd.f32 %v5443_v30, %v5404_v47  ;;  %v5494_v60 = vmul.f32 %v5404_v47, %v5404_v47  ;;  %v5405_v52 = vmul.f32 %v7797_v45, %v11833_v50  ;;  %v6468_v19 = vpack.c.bf16 %v7797_v45, %v7796_v6  ;;  %v11839_v47 = vld [vmem:[#allocation19_spill] sm:$0xff] }
 0x3f5   : > { %v5534_v54 = vadd.f32 %v5533_v4, %v5494_v60  ;;  %v5445_v51 = vadd.f32 %v5444_v49, %v5405_v52  ;;  %v5495_v26 = vmul.f32 %v5405_v52, %v5405_v52  ;;  %6595 = vst [vmem:[%s8681_s6 + $0x30] sm:$0xff] %v6468_v19   ;;  %v11838_v4 = vld [vmem:[#allocation18_spill] sm:$0xff] }
 0x3f6   : > { %v5229_v17 = vpop.f32.mrb[20].mxu0 }
 0x3f7   : > { %v5535_v53 = vadd.f32 %v5534_v54, %v5495_v26  ;;  %v7798_v31 = vadd.f32 %v5229_v17, %v11284_v37  ;;  %v7710_v57 = vpop.f32.mrb[21].mxu0  ;;  %v11840_v26 = vld [vmem:[#allocation20_spill] sm:$0xff] }
 0x3f8   : > { %v5232_v56 = vpop.f32.mrb[22].mxu0 }
 0x3f9   : > { %v5406_v23 = vmul.f32 %v7798_v31, %v11834_v39  ;;  %v7799_v20 = vadd.f32 %v5232_v56, %v11286_v48  ;;  %v7711_v5 = vpop.f32.mrb[23].mxu0  ;;  %v11841_v56 = vld [vmem:[#allocation21_spill] sm:$0xff] }
 0x3fb   : > { %v5446_v34 = vadd.f32 %v5445_v51, %v5406_v23  ;;  %v5496_v63 = vmul.f32 %v5406_v23, %v5406_v23  ;;  %v5407_v18 = vmul.f32 %v7799_v20, %v11835_v41  ;;  %v6473_v27 = vpack.c.bf16 %v7799_v20, %v7798_v31 }
 0x3fd   : > { %v5536_v14 = vadd.f32 %v5535_v53, %v5496_v63  ;;  %v5447_v62 = vadd.f32 %v5446_v34, %v5407_v18  ;;  %v5497_v7 = vmul.f32 %v5407_v18, %v5407_v18  ;;  %6596 = vst [vmem:[%s8681_s6 + $0x38] sm:$0xff] %v6473_v27  }
 0x3fe   : > { %v5237_v15 = vpop.f32.mrb[24].mxu0 }
 0x3ff   : > { %v5537_v42 = vadd.f32 %v5536_v14, %v5497_v7  ;;  %v7800_v37 = vadd.f32 %v5237_v15, %v11288_v59  ;;  %v7714_v43 = vpop.f32.mrb[25].mxu0  ;;  %v11842_v14 = vld [vmem:[#allocation23_spill] sm:$0xff] }
 0x400   : > { %v5240_v2 = vpop.f32.mrb[26].mxu0 }
 0x401   : > { %v5408_v44 = vmul.f32 %v7800_v37, %v11836_v24  ;;  %v7801_v48 = vadd.f32 %v5240_v2, %v11290_v22  ;;  %v7715_v46 = vpop.f32.mrb[27].mxu0 }
 0x403   : > { %v5448_v8 = vadd.f32 %v5447_v62, %v5408_v44  ;;  %v5498_v55 = vmul.f32 %v5408_v44, %v5408_v44  ;;  %v5409_v1 = vmul.f32 %v7801_v48, %v11837_v25  ;;  %v6478_v21 = vpack.c.bf16 %v7801_v48, %v7800_v37  ;;  %v11843_v37 = vld [vmem:[#allocation24_spill] sm:$0xff] }
 0x405   : > { %v5538_v36 = vadd.f32 %v5537_v42, %v5498_v55  ;;  %v5449_v32 = vadd.f32 %v5448_v8, %v5409_v1  ;;  %v5499_v40 = vmul.f32 %v5409_v1, %v5409_v1  ;;  %6597 = vst [vmem:[%s8681_s6 + $0x40] sm:$0xff] %v6478_v21   ;;  %v11844_v1 = vld [vmem:[#allocation26_spill] sm:$0xff] }
 0x406   : > { %v5245_v11 = vpop.f32.mrb[28].mxu0 }
 0x407   : > { %v5539_v30 = vadd.f32 %v5538_v36, %v5499_v40  ;;  %v7802_v59 = vadd.f32 %v5245_v11, %v11292_v28  ;;  %v7718_v33 = vpop.f32.mrb[29].mxu0  ;;  %v11845_v11 = vld [vmem:[#allocation27_spill] sm:$0xff] }
 0x408   : > { %v5248_v0 = vpop.f32.mrb[30].mxu0 }
 0x409   : > { %v5410_v6 = vmul.f32 %v7802_v59, %v11838_v4  ;;  %v7803_v22 = vadd.f32 %v5248_v0, %v11294_v9  ;;  %v7719_v13 = vpop.f32.mrb[31].mxu0 }
 0x40b   : > { %v5450_v35 = vadd.f32 %v5449_v32, %v5410_v6  ;;  %v5500_v61 = vmul.f32 %v5410_v6, %v5410_v6  ;;  %v5411_v45 = vmul.f32 %v7803_v22, %v11839_v47  ;;  %v6483_v10 = vpack.c.bf16 %v7803_v22, %v7802_v59 }
 0x40d   : > { %v5540_v49 = vadd.f32 %v5539_v30, %v5500_v61  ;;  %v5451_v60 = vadd.f32 %v5450_v35, %v5411_v45  ;;  %v5501_v50 = vmul.f32 %v5411_v45, %v5411_v45  ;;  %6598 = vst [vmem:[%s8681_s6 + $0x48] sm:$0xff] %v6483_v10   ;;  %v11846_v10 = vld [vmem:[#allocation28_spill] sm:$0xff] }
 0x40e   : > { %v5253_v52 = vpop.f32.mrb[32].mxu0 }
 0x40f   : > { %v5541_v19 = vadd.f32 %v5540_v49, %v5501_v50  ;;  %v7804_v28 = vadd.f32 %v5253_v52, %v11296_v12  ;;  %v7722_v54 = vpop.f32.mrb[33].mxu0 }
 0x410   : > { %v5256_v51 = vpop.f32.mrb[34].mxu0 }
 0x411   : > { %v5412_v17 = vmul.f32 %v7804_v28, %v11840_v26  ;;  %v7805_v9 = vadd.f32 %v5256_v51, %v11298_v58  ;;  %v7723_v53 = vpop.f32.mrb[35].mxu0 }
 0x413   : > { %v5452_v31 = vadd.f32 %v5451_v60, %v5412_v17  ;;  %v5502_v57 = vmul.f32 %v5412_v17, %v5412_v17  ;;  %v5413_v39 = vmul.f32 %v7805_v9, %v11841_v56  ;;  %v6488_v23 = vpack.c.bf16 %v7805_v9, %v7804_v28  ;;  %v11847_v28 = vld [vmem:[#allocation29_spill] sm:$0xff] }
 0x415   : > { %v5542_v20 = vadd.f32 %v5541_v19, %v5502_v57  ;;  %v5453_v5 = vadd.f32 %v5452_v31, %v5413_v39  ;;  %v5503_v34 = vmul.f32 %v5413_v39, %v5413_v39  ;;  %6599 = vst [vmem:[%s8681_s6 + $0x50] sm:$0xff] %v6488_v23  }
 0x416   : > { %v5261_v63 = vpop.f32.mrb[36].mxu0 }
 0x417   : > { %v5543_v41 = vadd.f32 %v5542_v20, %v5503_v34  ;;  %v7806_v12 = vadd.f32 %v5261_v63, %v11300_v38  ;;  %v7726_v18 = vpop.f32.mrb[37].mxu0  ;;  %v11848_v63 = vld [vmem:[#allocation30_spill] sm:$0xff] }
 0x418   : > { %v5264_v27 = vpop.f32.mrb[38].mxu0 }
 0x419   : > { %v5414_v62 = vmul.f32 %v7806_v12, %v11842_v14  ;;  %v7807_v58 = vadd.f32 %v5264_v27, %v11302_v3  ;;  %v7727_v7 = vpop.f32.mrb[39].mxu0 }
 0x41b   : > { %v5454_v15 = vadd.f32 %v5453_v5, %v5414_v62  ;;  %v5504_v42 = vmul.f32 %v5414_v62, %v5414_v62  ;;  %v5415_v43 = vmul.f32 %v7807_v58, %v11843_v37  ;;  %v6493_v2 = vpack.c.bf16 %v7807_v58, %v7806_v12  ;;  %v11849_v62 = vld [vmem:[#allocation31_spill] sm:$0xff] }
 0x41d   : > { %v5544_v24 = vadd.f32 %v5543_v41, %v5504_v42  ;;  %v5455_v44 = vadd.f32 %v5454_v15, %v5415_v43  ;;  %v5505_v48 = vmul.f32 %v5415_v43, %v5415_v43  ;;  %6600 = vst [vmem:[%s8681_s6 + $0x58] sm:$0xff] %v6493_v2  }
 0x41e   : > { %v5269_v46 = vpop.f32.mrb[40].mxu0 }
 0x41f   : > { %v5545_v8 = vadd.f32 %v5544_v24, %v5505_v48  ;;  %v7808_v38 = vadd.f32 %v5269_v46, %v11304_v16  ;;  %v7730_v55 = vpop.f32.mrb[41].mxu0 }
 0x420   : > { %v5272_v25 = vpop.f32.mrb[42].mxu0 }
 0x421   : > { %v5416_v21 = vmul.f32 %v7808_v38, %v11844_v1  ;;  %v7809_v3 = vadd.f32 %v5272_v25, %v11307_v29  ;;  %v7731_v36 = vpop.f32.mrb[43].mxu0  ;;  %v11850_v25 = vld [vmem:[#allocation32_spill] sm:$0xff] }
 0x423   : > { %v5456_v32 = vadd.f32 %v5455_v44, %v5416_v21  ;;  %v5506_v40 = vmul.f32 %v5416_v21, %v5416_v21  ;;  %v5417_v30 = vmul.f32 %v7809_v3, %v11845_v11  ;;  %v6498_v59 = vpack.c.bf16 %v7809_v3, %v7808_v38 }
 0x425   : > { %v5546_v33 = vadd.f32 %v5545_v8, %v5506_v40  ;;  %v5457_v0 = vadd.f32 %v5456_v32, %v5417_v30  ;;  %v5507_v4 = vmul.f32 %v5417_v30, %v5417_v30  ;;  %6601 = vst [vmem:[%s8681_s6 + $0x60] sm:$0xff] %v6498_v59   ;;  %v11851_v40 = vld [vmem:[#allocation33_spill] sm:$0xff] }
 0x426   : > { %v5277_v13 = vpop.f32.mrb[44].mxu0 }
 0x427   : > { %v3346_v6 = vpop.f32.mrb[44].mxu1  ;;  %v5547_v16 = vadd.f32 %v5546_v33, %v5507_v4  ;;  %v7734_v47 = vpop.f32.mrb[45].mxu0 }
 0x428   : > { %v7334_v22 = vpop.f32.mrb[45].mxu1  ;;  %v7810_v35 = vadd.f32 %v5277_v13, %v3346_v6  ;;  %v5280_v29 = vpop.f32.mrb[46].mxu0 }
 0x429   : > { %v3349_v61 = vpop.f32.mrb[46].mxu1  ;;  %v7735_v50 = vpop.f32.mrb[47].mxu0 }
 0x42a   : > { %v7335_v45 = vpop.f32.mrb[47].mxu1  ;;  %v5418_v49 = vmul.f32 %v7810_v35, %v11846_v10  ;;  %v7811_v60 = vadd.f32 %v5280_v29, %v3349_v61  ;;  %v11852_v29 = vld [vmem:[#allocation34_spill] sm:$0xff] }
 0x42c   : > { %v5458_v52 = vadd.f32 %v5457_v0, %v5418_v49  ;;  %v5508_v19 = vmul.f32 %v5418_v49, %v5418_v49  ;;  %v5419_v54 = vmul.f32 %v7811_v60, %v11847_v28  ;;  %v6503_v51 = vpack.c.bf16 %v7811_v60, %v7810_v35 }
 0x42e   : > { %v5548_v26 = vadd.f32 %v5547_v16, %v5508_v19  ;;  %v5459_v17 = vadd.f32 %v5458_v52, %v5419_v54  ;;  %v5509_v9 = vmul.f32 %v5419_v54, %v5419_v54  ;;  %6602 = vst [vmem:[%s8681_s6 + $0x68] sm:$0xff] %v6503_v51   ;;  %v5285_v57 = vpop.f32.mrb[48].mxu0  ;;  %v11853_v19 = vld [vmem:[#allocation35_spill] sm:$0xff] }
 0x42f   : > { %v3354_v53 = vpop.f32.mrb[48].mxu1  ;;  %v7738_v20 = vpop.f32.mrb[49].mxu0 }
 0x430   : > { %v7338_v31 = vpop.f32.mrb[49].mxu1  ;;  %v5549_v56 = vadd.f32 %v5548_v26, %v5509_v9  ;;  %v7812_v39 = vadd.f32 %v5285_v57, %v3354_v53  ;;  %v5288_v34 = vpop.f32.mrb[50].mxu0 }
 0x431   : > { %v3357_v23 = vpop.f32.mrb[50].mxu1  ;;  %v7739_v18 = vpop.f32.mrb[51].mxu0 }
 0x432   : > { %v7339_v5 = vpop.f32.mrb[51].mxu1  ;;  %v5420_v41 = vmul.f32 %v7812_v39, %v11848_v63  ;;  %v7813_v12 = vadd.f32 %v5288_v34, %v3357_v23  ;;  %v11854_v34 = vld [vmem:[#allocation36_spill] sm:$0xff] }
 0x434   : > { %v5460_v27 = vadd.f32 %v5459_v17, %v5420_v41  ;;  %v5510_v14 = vmul.f32 %v5420_v41, %v5420_v41  ;;  %v5421_v58 = vmul.f32 %v7813_v12, %v11849_v62  ;;  %v6508_v7 = vpack.c.bf16 %v7813_v12, %v7812_v39 }
 0x436   : > { %v5550_v15 = vadd.f32 %v5549_v56, %v5510_v14  ;;  %v5461_v42 = vadd.f32 %v5460_v27, %v5421_v58  ;;  %v5511_v37 = vmul.f32 %v5421_v58, %v5421_v58  ;;  %6603 = vst [vmem:[%s8681_s6 + $0x70] sm:$0xff] %v6508_v7   ;;  %v5293_v24 = vpop.f32.mrb[52].mxu0  ;;  %v11855_v14 = vld [vmem:[#allocation37_spill] sm:$0xff] }
 0x437   : > { %v3362_v43 = vpop.f32.mrb[52].mxu1  ;;  %v7742_v8 = vpop.f32.mrb[53].mxu0 }
 0x438   : > { %v7342_v2 = vpop.f32.mrb[53].mxu1  ;;  %v5551_v44 = vadd.f32 %v5550_v15, %v5511_v37  ;;  %v7814_v48 = vadd.f32 %v5293_v24, %v3362_v43  ;;  %v5296_v55 = vpop.f32.mrb[54].mxu0 }
 0x439   : > { %v3365_v46 = vpop.f32.mrb[54].mxu1  ;;  %v7743_v3 = vpop.f32.mrb[55].mxu0 }
 0x43a   : > { %v7343_v38 = vpop.f32.mrb[55].mxu1  ;;  %v5422_v1 = vmul.f32 %v7814_v48, %v11850_v25  ;;  %v7815_v21 = vadd.f32 %v5296_v55, %v3365_v46  ;;  %v11856_v55 = vld [vmem:[#allocation40_spill] sm:$0xff] }
 0x43c   : > { %v5462_v36 = vadd.f32 %v5461_v42, %v5422_v1  ;;  %v5512_v32 = vmul.f32 %v5422_v1, %v5422_v1  ;;  %v5423_v11 = vmul.f32 %v7815_v21, %v11851_v40  ;;  %v6513_v30 = vpack.c.bf16 %v7815_v21, %v7814_v48 }
 0x43e   : > { %v5552_v59 = vadd.f32 %v5551_v44, %v5512_v32  ;;  %v5463_v33 = vadd.f32 %v5462_v36, %v5423_v11  ;;  %v5513_v0 = vmul.f32 %v5423_v11, %v5423_v11  ;;  %6604 = vst [vmem:[%s8681_s6 + $0x78] sm:$0xff] %v6513_v30   ;;  %v5301_v22 = vpop.f32.mrb[56].mxu0  ;;  %v11857_v32 = vld [vmem:[#allocation41_spill] sm:$0xff] }
 0x43f   : > { %v3370_v4 = vpop.f32.mrb[56].mxu1  ;;  %v7746_v61 = vpop.f32.mrb[57].mxu0 }
 0x440   : > { %v7346_v6 = vpop.f32.mrb[57].mxu1  ;;  %v5553_v13 = vadd.f32 %v5552_v59, %v5513_v0  ;;  %v7816_v16 = vadd.f32 %v5301_v22, %v3370_v4  ;;  %v5304_v45 = vpop.f32.mrb[58].mxu0 }
 0x441   : > { %v3373_v35 = vpop.f32.mrb[58].mxu1  ;;  %v7747_v60 = vpop.f32.mrb[59].mxu0 }
 0x442   : > { %v7347_v47 = vpop.f32.mrb[59].mxu1  ;;  %v5424_v10 = vmul.f32 %v7816_v16, %v11852_v29  ;;  %v7817_v49 = vadd.f32 %v5304_v45, %v3373_v35  ;;  %v11858_v45 = vld [vmem:[#allocation42_spill] sm:$0xff] }
 0x444   : > { %v5464_v50 = vadd.f32 %v5463_v33, %v5424_v10  ;;  %v5514_v52 = vmul.f32 %v5424_v10, %v5424_v10  ;;  %v5425_v28 = vmul.f32 %v7817_v49, %v11853_v19  ;;  %v6518_v54 = vpack.c.bf16 %v7817_v49, %v7816_v16 }
 0x446   : > { %v5554_v51 = vadd.f32 %v5553_v13, %v5514_v52  ;;  %v5465_v26 = vadd.f32 %v5464_v50, %v5425_v28  ;;  %v5515_v17 = vmul.f32 %v5425_v28, %v5425_v28  ;;  %6605 = vst [vmem:[%s8681_s6 + $0x80] sm:$0xff] %v6518_v54   ;;  %v5309_v31 = vpop.f32.mrb[60].mxu0  ;;  %v11859_v52 = vld [vmem:[#allocation43_spill] sm:$0xff] }
 0x447   : > { %v3378_v9 = vpop.f32.mrb[60].mxu1  ;;  %v7750_v23 = vpop.f32.mrb[61].mxu0 }
 0x448   : > { %v7350_v53 = vpop.f32.mrb[61].mxu1  ;;  %v5555_v57 = vadd.f32 %v5554_v51, %v5515_v17  ;;  %v7818_v56 = vadd.f32 %v5309_v31, %v3378_v9  ;;  %v5312_v5 = vpop.f32.mrb[62].mxu0 }
 0x449   : > { %v3381_v39 = vpop.f32.mrb[62].mxu1  ;;  %v7751_v12 = vpop.f32.mrb[63].mxu0 }
 0x44a   : > { %v7351_v20 = vpop.f32.mrb[63].mxu1  ;;  %v5426_v63 = vmul.f32 %v7818_v56, %v11854_v34  ;;  %v7819_v41 = vadd.f32 %v5312_v5, %v3381_v39  ;;  %v11860_v5 = vld [vmem:[#allocation45_spill] sm:$0xff] }
 0x44c   : > { %v5466_v18 = vadd.f32 %v5465_v26, %v5426_v63  ;;  %v5516_v27 = vmul.f32 %v5426_v63, %v5426_v63  ;;  %v5427_v62 = vmul.f32 %v7819_v41, %v11855_v14  ;;  %v6523_v58 = vpack.c.bf16 %v7819_v41, %v7818_v56 }
 0x44e   : > { %v5556_v7 = vadd.f32 %v5555_v57, %v5516_v27  ;;  %v5467_v15 = vadd.f32 %v5466_v18, %v5427_v62  ;;  %v5517_v42 = vmul.f32 %v5427_v62, %v5427_v62  ;;  %6606 = vst [vmem:[%s8681_s6 + $0x88] sm:$0xff] %v6523_v58   ;;  %v5317_v2 = vpop.f32.mrb[64].mxu0  ;;  %v11861_v27 = vld [vmem:[#allocation46_spill] sm:$0xff] }
 0x44f   : > { %v3386_v37 = vpop.f32.mrb[64].mxu1  ;;  %v7754_v46 = vpop.f32.mrb[65].mxu0 }
 0x450   : > { %v7354_v43 = vpop.f32.mrb[65].mxu1  ;;  %v5557_v24 = vadd.f32 %v5556_v7, %v5517_v42  ;;  %v7820_v44 = vadd.f32 %v5317_v2, %v3386_v37  ;;  %v5320_v38 = vpop.f32.mrb[66].mxu0 }
 0x451   : > { %v3389_v48 = vpop.f32.mrb[66].mxu1  ;;  %v7755_v21 = vpop.f32.mrb[67].mxu0 }
 0x452   : > { %v7355_v8 = vpop.f32.mrb[67].mxu1  ;;  %v5428_v25 = vmul.f32 %v7820_v44, %v11856_v55  ;;  %v7821_v1 = vadd.f32 %v5320_v38, %v3389_v48  ;;  %v11862_v38 = vld [vmem:[#allocation47_spill] sm:$0xff] }
 0x454   : > { %v5468_v3 = vadd.f32 %v5467_v15, %v5428_v25  ;;  %v5518_v36 = vmul.f32 %v5428_v25, %v5428_v25  ;;  %v5429_v40 = vmul.f32 %v7821_v1, %v11857_v32  ;;  %v6528_v11 = vpack.c.bf16 %v7821_v1, %v7820_v44 }
 0x456   : > { %v5558_v30 = vadd.f32 %v5557_v24, %v5518_v36  ;;  %v5469_v59 = vadd.f32 %v5468_v3, %v5429_v40  ;;  %v5519_v33 = vmul.f32 %v5429_v40, %v5429_v40  ;;  %6607 = vst [vmem:[%s8681_s6 + $0x90] sm:$0xff] %v6528_v11   ;;  %v5325_v6 = vpop.f32.mrb[68].mxu0  ;;  %v11863_v36 = vld [vmem:[#allocation48_spill] sm:$0xff] }
 0x457   : > { %v3394_v0 = vpop.f32.mrb[68].mxu1  ;;  %v7758_v35 = vpop.f32.mrb[69].mxu0 }
 0x458   : > { %v7358_v4 = vpop.f32.mrb[69].mxu1  ;;  %v5559_v22 = vadd.f32 %v5558_v30, %v5519_v33  ;;  %v7822_v13 = vadd.f32 %v5325_v6, %v3394_v0  ;;  %v5328_v47 = vpop.f32.mrb[70].mxu0 }
 0x459   : > { %v3397_v16 = vpop.f32.mrb[70].mxu1  ;;  %v7759_v49 = vpop.f32.mrb[71].mxu0 }
 0x45a   : > { %v7359_v61 = vpop.f32.mrb[71].mxu1  ;;  %v5430_v29 = vmul.f32 %v7822_v13, %v11858_v45  ;;  %v7823_v10 = vadd.f32 %v5328_v47, %v3397_v16  ;;  %v11864_v47 = vld [vmem:[#allocation49_spill] sm:$0xff] }
 0x45c   : > { %v5470_v60 = vadd.f32 %v5469_v59, %v5430_v29  ;;  %v5520_v50 = vmul.f32 %v5430_v29, %v5430_v29  ;;  %v5431_v19 = vmul.f32 %v7823_v10, %v11859_v52  ;;  %v6533_v28 = vpack.c.bf16 %v7823_v10, %v7822_v13 }
 0x45e   : > { %v5560_v54 = vadd.f32 %v5559_v22, %v5520_v50  ;;  %v5471_v51 = vadd.f32 %v5470_v60, %v5431_v19  ;;  %v5521_v26 = vmul.f32 %v5431_v19, %v5431_v19  ;;  %6608 = vst [vmem:[%s8681_s6 + $0x98] sm:$0xff] %v6533_v28   ;;  %v5333_v53 = vpop.f32.mrb[72].mxu0 }
 0x45f   : > { %v3402_v17 = vpop.f32.mrb[72].mxu1  ;;  %v7762_v39 = vpop.f32.mrb[73].mxu0 }
 0x460   : > { %v7362_v9 = vpop.f32.mrb[73].mxu1  ;;  %v5561_v31 = vadd.f32 %v5560_v54, %v5521_v26  ;;  %v7824_v57 = vadd.f32 %v5333_v53, %v3402_v17  ;;  %v5336_v20 = vpop.f32.mrb[74].mxu0 }
 0x461   : > { %v3405_v56 = vpop.f32.mrb[74].mxu1  ;;  %v7763_v41 = vpop.f32.mrb[75].mxu0 }
 0x462   : > { %v7363_v23 = vpop.f32.mrb[75].mxu1  ;;  %v5432_v34 = vmul.f32 %v7824_v57, %v11860_v5  ;;  %v7825_v63 = vadd.f32 %v5336_v20, %v3405_v56 }
 0x464   : > { %v5472_v12 = vadd.f32 %v5471_v51, %v5432_v34  ;;  %v5522_v18 = vmul.f32 %v5432_v34, %v5432_v34  ;;  %v5433_v14 = vmul.f32 %v7825_v63, %v11861_v27  ;;  %v6538_v62 = vpack.c.bf16 %v7825_v63, %v7824_v57 }
 0x466   : > { %v5562_v58 = vadd.f32 %v5561_v31, %v5522_v18  ;;  %v5473_v7 = vadd.f32 %v5472_v12, %v5433_v14  ;;  %v5523_v15 = vmul.f32 %v5433_v14, %v5433_v14  ;;  %6609 = vst [vmem:[%s8681_s6 + $0xa0] sm:$0xff] %v6538_v62   ;;  %v5341_v43 = vpop.f32.mrb[76].mxu0 }
 0x467   : > { %v3410_v42 = vpop.f32.mrb[76].mxu1  ;;  %v7766_v48 = vpop.f32.mrb[77].mxu0 }
 0x468   : > { %v7366_v37 = vpop.f32.mrb[77].mxu1  ;;  %v5563_v2 = vadd.f32 %v5562_v58, %v5523_v15  ;;  %v7826_v24 = vadd.f32 %v5341_v43, %v3410_v42  ;;  %v5344_v8 = vpop.f32.mrb[78].mxu0 }
 0x469   : > { %v3413_v44 = vpop.f32.mrb[78].mxu1  ;;  %v7767_v1 = vpop.f32.mrb[79].mxu0 }
 0x46a   : > { %v7367_v46 = vpop.f32.mrb[79].mxu1  ;;  %v5434_v55 = vmul.f32 %v7826_v24, %v11862_v38  ;;  %v7827_v25 = vadd.f32 %v5344_v8, %v3413_v44 }
 0x46c   : > { %v5474_v21 = vadd.f32 %v5473_v7, %v5434_v55  ;;  %v5524_v3 = vmul.f32 %v5434_v55, %v5434_v55  ;;  %v5435_v32 = vmul.f32 %v7827_v25, %v11863_v36  ;;  %v6543_v40 = vpack.c.bf16 %v7827_v25, %v7826_v24 }
 0x46e   : > { %v5564_v11 = vadd.f32 %v5563_v2, %v5524_v3  ;;  %v5475_v30 = vadd.f32 %v5474_v21, %v5435_v32  ;;  %v5525_v59 = vmul.f32 %v5435_v32, %v5435_v32  ;;  %6610 = vst [vmem:[%s8681_s6 + $0xa8] sm:$0xff] %v6543_v40   ;;  %v5349_v4 = vpop.f32.mrb[80].mxu0 }
 0x46f   : > { %v3418_v33 = vpop.f32.mrb[80].mxu1  ;;  %v7770_v16 = vpop.f32.mrb[81].mxu0 }
 0x470   : > { %v7370_v0 = vpop.f32.mrb[81].mxu1  ;;  %v5565_v6 = vadd.f32 %v5564_v11, %v5525_v59  ;;  %v7828_v22 = vadd.f32 %v5349_v4, %v3418_v33  ;;  %v5352_v61 = vpop.f32.mrb[82].mxu0 }
 0x471   : > { %v3421_v13 = vpop.f32.mrb[82].mxu1  ;;  %v7771_v10 = vpop.f32.mrb[83].mxu0 }
 0x472   : > { %v7371_v35 = vpop.f32.mrb[83].mxu1  ;;  %v5436_v45 = vmul.f32 %v7828_v22, %v11864_v47  ;;  %v6228_v29 = vpack.c.bf16 %v7828_v22, %v7828_v22 }
 0x474   : > { %v5477_v49 = vsel %vm5476_vm7, %v5436_v45, 0.0  ;;  %v5526_v60 = vmul.f32 %v5436_v45, %v5436_v45  ;;  %5784 = vst [vmem:[%s8681_s6 + $0xb0] sm:$0x3] %v6228_v29 }
 0x475   : > { %v5478_v50 = vadd.f32 %v5477_v49, %v5475_v30 }
 0x476   : > { %v5566_v52 = vsel %vm5476_vm7, %v5526_v60, 0.0 }
 0x477   : > { %v5479_v19 = vrot.slane %v5478_v50, 4  ;;  %v5567_v28 = vadd.f32 %v5566_v52, %v5565_v6 }
 0x479   : > { %v5480_v54 = vadd.f32 %v5479_v19, %v5478_v50  ;;  %v5568_v51 = vrot.slane %v5567_v28, 4 }
 0x47b   : > { %v5481_v26 = vrot.slane %v5480_v54, 2  ;;  %v5569_v17 = vadd.f32 %v5568_v51, %v5567_v28 }
 0x47d   : > { %v5482_v9 = vadd.f32 %v5481_v26, %v5480_v54  ;;  %v5570_v53 = vrot.slane %v5569_v17, 2 }
 0x47f   : > { %v5483_v31 = vrot.slane %v5482_v9, 1  ;;  %v5571_v57 = vadd.f32 %v5570_v53, %v5569_v17 }
 0x481   : > { %v5484_v56 = vadd.f32 %v5483_v31, %v5482_v9  ;;  %v5572_v39 = vrot.slane %v5571_v57, 1 }
 0x483   : > { %5485 = vst [vmem:[%s235_s13] sm:$0x1] %v5484_v56  ;;  %v5573_v23 = vadd.f32 %v5572_v39, %v5571_v57 }
 0x485   : > { %5574 = vst [vmem:[%s235_s13 + $0x1] sm:$0x1] %v5573_v23 }
 0x486 PF: > { %s16_s18 = sadd.s32 1, %s8616_s18  }
 0x487   : > { %p13_p4 = scmp.ge.s32.totalorder %s16_s18, 4  }
 0x489   :  { %15 = sbr.rel (!%p13_p4) target bundleno = 1 (0x1), region = 78 }

</bundles_post_ra>
